<compile_context>
chip_gen: v7x
topology: tpu7x:2x2x1
jax: 0.10.0
libtpu: 0.0.40
codegen_flags: <defaults>
</compile_context>

<pallas_src>
import functools

import jax
import jax.numpy as jnp
from jax.experimental import pallas as pl
from jax.experimental.pallas import tpu as pltpu

N_NODES = 2901                      # hardcoded in the PyTorch module
G_TM, G_TN, G_TK = 512, 128, 1024   # graph-matmul tiles (6 M-tiles -> both v7x TCs busy)
VMEM_LIMIT = 48 * 1024 * 1024       # explicit scoped-VMEM budget (fits v7x 64 MiB)


def _round_up(x, m):
    return (x + m - 1) // m * m


def _block_diag(a, b):
    ra, ca = a.shape
    rb, cb = b.shape
    out = jnp.zeros((ra + rb, ca + cb), jnp.float32)
    out = out.at[:ra, :ca].set(a)
    out = out.at[ra:, ca:].set(b)
    return out


# --------------------------------------------------------------------------
# Tiled matmul kernel (MXU): C = A @ B + bias, optional fused ReLU epilogue.
# Operands may be bf16; accumulation is always f32 in VMEM scratch.
# --------------------------------------------------------------------------
def _matmul_kernel(a_ref, b_ref, bias_ref, o_ref, acc_ref, *, relu):
    @pl.when(pl.program_id(2) == 0)
    def _():
        acc_ref[...] = jnp.zeros_like(acc_ref)

    acc_ref[...] += jnp.dot(a_ref[...], b_ref[...],
                            preferred_element_type=jnp.float32)

    @pl.when(pl.program_id(2) == pl.num_programs(2) - 1)
    def _():
        res = acc_ref[...] + bias_ref[...]
        if relu:
            res = jnp.maximum(res, 0.0)
        o_ref[...] = res.astype(o_ref.dtype)


def _matmul_call(a_p, b_p, bias_p, *, relu, tm, tn, tk, out_dtype=jnp.float32):
    """pallas_call on pre-padded operands; returns the padded output."""
    Mp, Kp = a_p.shape
    Kp2, Np = b_p.shape
    assert Kp == Kp2 and Mp % tm == 0 and Np % tn == 0 and Kp % tk == 0
    return pl.pallas_call(
        functools.partial(_matmul_kernel, relu=relu),
        out_shape=jax.ShapeDtypeStruct((Mp, Np), out_dtype),
        grid_spec=pltpu.PrefetchScalarGridSpec(
            num_scalar_prefetch=0,
            grid=(Mp // tm, Np // tn, Kp // tk),
            in_specs=[pl.BlockSpec((tm, tk), lambda i, j, k: (i, k)),
                      pl.BlockSpec((tk, tn), lambda i, j, k: (k, j)),
                      pl.BlockSpec((1, tn), lambda i, j, k: (0, j))],
            out_specs=pl.BlockSpec((tm, tn), lambda i, j, k: (i, j)),
            scratch_shapes=[pltpu.VMEM((tm, tn), jnp.float32)]),
        compiler_params=pltpu.CompilerParams(
            dimension_semantics=("parallel", "parallel", "arbitrary"),
            vmem_limit_bytes=VMEM_LIMIT),
    )(a_p, b_p, bias_p)


def matmul(a, b, bias=None, relu=False, tm=512, tn=128, tk=512,
           out_dtype=jnp.float32):
    """Generic small-matmul wrapper: pads to tile multiples, slices the result.

    Tiles shrink to the (8/128-rounded) full dims when the array is smaller than a
    tile, so small operands are not blown up to 128x128 padded copies on M."""
    M, K = a.shape
    K2, N = b.shape
    assert K == K2
    tm_e = min(tm, _round_up(M, 8))
    tk_e = min(tk, _round_up(K, 128))
    tn_e = min(tn, _round_up(N, 128))
    Mp, Kp, Np = _round_up(M, tm_e), _round_up(K, tk_e), _round_up(N, tn_e)
    a_p = a if (Mp, Kp) == (M, K) else jnp.pad(a, ((0, Mp - M), (0, Kp - K)))
    b_p = b if (Kp, Np) == (K, N) else jnp.pad(b, ((0, Kp - K), (0, Np - N)))
    if bias is None:
        bias_p = jnp.zeros((1, Np), jnp.float32)
    else:
        bias_p = bias.astype(jnp.float32).reshape(1, -1)
        if bias_p.shape[1] != Np:
            bias_p = jnp.pad(bias_p, ((0, 0), (0, Np - bias_p.shape[1])))
    out = _matmul_call(a_p, b_p, bias_p, relu=relu,
                       tm=tm_e, tn=tn_e, tk=tk_e, out_dtype=out_dtype)
    return out[:M, :N]


# --------------------------------------------------------------------------
# LSTM recurrence: single kernel invocation, pl.loop over T, h/c in VMEM scratch.
# PyTorch gate order (i, f, g, o); x-projection is precomputed on the MXU.
# --------------------------------------------------------------------------
def _lstm_seq_kernel(xp_ref, whh_ref, o_ref, h_ref, c_ref):
    H = h_ref.shape[-1]
    T = xp_ref.shape[0]
    h_ref[...] = jnp.zeros_like(h_ref)
    c_ref[...] = jnp.zeros_like(c_ref)

    @pl.loop(0, T)
    def _(t):
        gates = xp_ref[t] + jnp.dot(h_ref[...], whh_ref[...],
                                    preferred_element_type=jnp.float32)
        i = jax.nn.sigmoid(gates[:, 0 * H:1 * H])
        f = jax.nn.sigmoid(gates[:, 1 * H:2 * H])
        g = jnp.tanh(gates[:, 2 * H:3 * H])
        o = jax.nn.sigmoid(gates[:, 3 * H:4 * H])
        c = f * c_ref[...] + i * g
        h = o * jnp.tanh(c)
        c_ref[...] = c
        h_ref[...] = h
        o_ref[t] = h.astype(o_ref.dtype)


def lstm_seq(xproj, whh):
    """xproj: (T, B, 4H) precomputed x-projection (+bias). Returns (T, B, H)."""
    T, B, G4 = xproj.shape
    H = whh.shape[0]
    return pl.pallas_call(
        _lstm_seq_kernel,
        out_shape=jax.ShapeDtypeStruct((T, B, H), jnp.float32),
        grid_spec=pltpu.PrefetchScalarGridSpec(
            num_scalar_prefetch=0,
            grid=(1,),
            in_specs=[pl.BlockSpec((T, B, G4), lambda i: (0, 0, 0)),
                      pl.BlockSpec((H, G4), lambda i: (0, 0))],
            out_specs=pl.BlockSpec((T, B, H), lambda i: (0, 0, 0)),
            scratch_shapes=[pltpu.VMEM((B, H), jnp.float32),
                            pltpu.VMEM((B, H), jnp.float32)]),
        compiler_params=pltpu.CompilerParams(
            dimension_semantics=("arbitrary",)),
    )(xproj, whh)


# --------------------------------------------------------------------------
# MergeLayer kernel: x * w1 + ha * w2 (per-node weights, node dim on lanes).
# --------------------------------------------------------------------------
def _merge_kernel(x_ref, ha_ref, w1_ref, w2_ref, o_ref):
    o_ref[...] = x_ref[...] * w1_ref[...] + ha_ref[...] * w2_ref[...]


def merge_layer(x, ha_enc, w1, w2):
    # x: (1, B, N, 1), ha_enc: (1, B, N, D), w1/w2: (N, 1) -> (1, B, N, D)
    _, B, N, _ = x.shape
    D = ha_enc.shape[-1]
    xb = jnp.broadcast_to(x, (1, B, N, D))
    x2 = jnp.transpose(xb[0], (0, 2, 1)).reshape(B * D, N)
    ha2 = jnp.transpose(ha_enc[0], (0, 2, 1)).reshape(B * D, N)
    out = pl.pallas_call(
        _merge_kernel,
        out_shape=jax.ShapeDtypeStruct((B * D, N), jnp.float32),
    )(x2, ha2, w1.reshape(1, N), w2.reshape(1, N))
    return out.reshape(B, D, N).transpose(0, 2, 1)[None]


# --------------------------------------------------------------------------
# One-time parameter preparation: folds, block-diag channel mixes, padding, bf16.
# --------------------------------------------------------------------------
def prepare_params(p, T, B):
    f32 = jnp.float32
    N = N_NODES
    TB = T * B

    # Graph operator: tiling an identical RHS against [G_1..G_K] equals (sum_k G_k);
    # pre-sum, pre-pad, pre-cast to bf16 once (read 2x per forward instead of 4x f32).
    # TODO(synk): KStepHGCN source not provided; modeled as 2 layers of
    # relu(sum_k G_k @ X @ W1) -> sum_k G_k @ H @ W2, no bias, dropout = identity (eval).
    GP = _round_up(N, G_TK)
    assert GP % G_TM == 0
    G_p = jnp.pad(sum(p['G_list']), ((0, GP - N), (0, GP - N))).astype(jnp.bfloat16)

    # Exact folds: encoder_hidden_fc_layer -> encoder_output_layer column 0
    # (only x[:,:,:,0] feeds the LSTM; no nonlinearity between the layers).
    proj = p['enc_fc_w'] @ p['enc_out_w'][:, 0:1]                       # (enc_feature, 1)
    b_fold = p['enc_fc_b'] @ p['enc_out_w'][:, 0] + p['enc_out_b'][0]   # scalar
    w2e_fold = p['enc_w2'] @ proj                                       # (hidden_fc, 1)

    # Block-diagonal channel-mix weights: the per-(t,b) feature mixes of the enc and
    # ha paths become ONE node-major matmul producing the lane-dense graph RHS.
    eTB = jnp.eye(TB, dtype=f32)
    eB = jnp.eye(B, dtype=f32)
    mix1 = _block_diag(jnp.kron(eTB, p['enc_w1']), jnp.kron(eB, p['ha_w1']))
    mix2 = _block_diag(jnp.kron(eTB, w2e_fold), jnp.kron(eB, p['ha_w2']))
    RW = _round_up(max(mix1.shape[0], mix1.shape[1], mix2.shape[1]), G_TN)
    W_mix1_p = jnp.zeros((RW, RW), f32).at[:mix1.shape[0], :mix1.shape[1]].set(mix1)
    W_mix2_p = jnp.zeros((RW, RW), f32).at[:mix2.shape[0], :mix2.shape[1]].set(mix2)
    bias2_p = jnp.zeros((1, RW), f32).at[:, :TB].set(b_fold)   # folded fc bias (enc cols)

    # LSTM: layer-0 input weight pre-padded to (GP, 128*ceil(4H/128)) so the
    # graph-padded LSTM input multiplies it with zero per-call weight padding.
    lstm = []
    for l, (wih, whh, b) in enumerate(zip(p['lstm_wih_t'], p['lstm_whh_t'], p['lstm_b'])):
        if l == 0:
            In, G4 = wih.shape
            wih_p = jnp.zeros((GP, _round_up(G4, 128)), f32).at[:In, :G4].set(wih)
        else:
            wih_p = wih
        lstm.append((wih_p, whh, b))

    # Decoder: hidden_fc_layer and output_layer fold exactly (no activation between);
    # weight pre-padded once (K to 128, N=2901 to 2944 lane-aligned).
    W_dec = p['fc_w'] @ p['out_w']                       # (rnn_feat, N)
    b_dec = p['fc_b'] @ p['out_w'] + p['out_b']          # (N,)
    Hd = W_dec.shape[0]
    W_dec_p = jnp.zeros((_round_up(Hd, 128), _round_up(N, 128)), f32).at[:Hd, :N].set(W_dec)
    b_dec_p = jnp.pad(b_dec, (0, _round_up(N, 128) - N))

    return dict(G_p=G_p, W_mix1_p=W_mix1_p, W_mix2_p=W_mix2_p, bias2_p=bias2_p,
                lstm=lstm, W_dec_p=W_dec_p, b_dec_p=b_dec_p,
                merge_w1=p['merge_w1'], merge_w2=p['merge_w2'],
                ha_w2=p['ha_w2'])


# --------------------------------------------------------------------------
# Network.forward
# --------------------------------------------------------------------------
def network_forward(prep, sequences_x, ha):
    T, B, N, Cin = sequences_x.shape
    L = ha.shape[0]
    TB = T * B
    GP = prep['G_p'].shape[0]
    RW = prep['W_mix1_p'].shape[0]
    Dh = prep['ha_w2'].shape[1]            # ha_out_dim (static from shape)
    zb = jnp.zeros((1, RW), jnp.float32)

    # node-major layout (N, per-(t,b) channel columns) for both paths, batched.
    x_r = jnp.transpose(sequences_x, (2, 0, 1, 3)).reshape(N, TB * Cin)
    ha_cat = jnp.concatenate([ha[i] for i in range(L)], axis=2)       # (B, N, L)
    ha_r = jnp.transpose(ha_cat, (1, 0, 2)).reshape(N, B * L)
    xr = jnp.concatenate([x_r, ha_r], axis=1)
    a1 = jnp.pad(xr, ((0, GP - N), (0, RW - xr.shape[1])))            # (GP, RW)

    # HGCN layer 1 (enc + ha batched in one RHS): channel mix, graph prop, ReLU.
    rhs1 = _matmul_call(a1, prep['W_mix1_p'], zb, relu=False,
                        tm=G_TM, tn=G_TN, tk=RW, out_dtype=jnp.bfloat16)
    h1 = _matmul_call(prep['G_p'], rhs1, zb, relu=True,
                      tm=G_TM, tn=G_TN, tk=G_TK, out_dtype=jnp.float32)

    # HGCN layer 2 + folded encoder FC stack (enc path keeps only the LSTM column).
    rhs2 = _matmul_call(h1, prep['W_mix2_p'], zb, relu=False,
                        tm=G_TM, tn=G_TN, tk=RW, out_dtype=jnp.bfloat16)
    out2 = _matmul_call(prep['G_p'], rhs2, prep['bias2_p'], relu=False,
                        tm=G_TM, tn=G_TN, tk=G_TK, out_dtype=jnp.float32)

    x0_p = out2[:, :TB].T                                             # (T*B, GP)
    ha_enc = out2[:N, TB:TB + B * Dh].reshape(N, B, Dh).transpose(1, 0, 2)[None]

    # LSTM stack (PyTorch gate order i,f,g,o).  b must be b_ih + b_hh.
    a = x0_p
    h_seq = None
    for wih, whh, b in prep['lstm']:
        H = whh.shape[0]
        xproj = matmul(a, wih, bias=b)[:, :4 * H]
        h_seq = lstm_seq(xproj.reshape(T, B, 4 * H), whh)
        a = h_seq.reshape(TB, H)
    hidden_last = h_seq[-1]                                           # == hidden[-1]

    # decoder (hidden_fc_layer + output_layer folded into one matmul)
    Kd = prep['W_dec_p'].shape[0]
    hpad = jnp.pad(hidden_last, ((0, 0), (0, Kd - hidden_last.shape[1])))
    out_dec = matmul(hpad, prep['W_dec_p'], bias=prep['b_dec_p'])[:, :N]  # (B, N)

    merged = merge_layer(out_dec[None, :, :, None], ha_enc,
                         prep['merge_w1'], prep['merge_w2'])
    # TODO(synk): KStepHGCN score_list semantics unknown (source not provided) -> empty.
    return merged, []


if __name__ == "__main__":
    key = jax.random.PRNGKey(0)
    keys = jax.random.split(key, 20)

    # small config (N is fixed at 2901 by the module)
    T, B = 4, 2
    N = N_NODES
    input_dim = 4
    enc_feature = 16
    hidden_fc = enc_feature // 2
    num_output_dim = 2
    rnn_feat = 16
    num_rnn_layers = 1
    ha_len = 3
    ha_hidden_dim = 8
    ha_out_dim = 1
    n_graphs = 2

    def w(k, shape, scale=0.05):
        return scale * jax.random.normal(k, shape, jnp.float32)

    # deterministic row-normalized hypergraph operators G_k
    G_list = []
    for i in range(n_graphs):
        g = jax.random.uniform(keys[i], (N, N), jnp.float32)
        G_list.append(g / jnp.sum(g, axis=1, keepdims=True))

    H = rnn_feat
    lstm_wih_t, lstm_whh_t, lstm_b = [], [], []
    for l in range(num_rnn_layers):
        in_sz = N if l == 0 else H
        lstm_wih_t.append(w(keys[2 + 2 * l], (in_sz, 4 * H)))
        lstm_whh_t.append(w(keys[3 + 2 * l], (H, 4 * H)))
        lstm_b.append(jnp.zeros((4 * H,), jnp.float32))   # b_ih + b_hh

    raw = dict(
        G_list=G_list,
        enc_w1=w(keys[8], (input_dim, hidden_fc)),
        enc_w2=w(keys[9], (hidden_fc, enc_feature)),
        enc_fc_w=w(keys[10], (enc_feature, hidden_fc)),
        enc_fc_b=jnp.zeros((hidden_fc,), jnp.float32),
        enc_out_w=w(keys[11], (hidden_fc, num_output_dim)),
        enc_out_b=jnp.zeros((num_output_dim,), jnp.float32),
        lstm_wih_t=lstm_wih_t, lstm_whh_t=lstm_whh_t, lstm_b=lstm_b,
        fc_w=w(keys[12], (rnn_feat, 2 * rnn_feat)),
        fc_b=jnp.zeros((2 * rnn_feat,), jnp.float32),
        out_w=w(keys[13], (2 * rnn_feat, N)),
        out_b=jnp.zeros((N,), jnp.float32),
        ha_w1=w(keys[14], (ha_len, ha_hidden_dim)),
        ha_w2=w(keys[15], (ha_hidden_dim, ha_out_dim)),
        merge_w1=jnp.ones((N, 1), jnp.float32),   # init.ones_
        merge_w2=jnp.ones((N, 1), jnp.float32),   # init.ones_
    )

    # one-time prep: G pre-summed/padded/bf16, folded weights, block-diag mixes
    prep = prepare_params(raw, T, B)

    sequences_x = w(keys[16], (T, B, N, input_dim), scale=1.0)
    ha = w(keys[17], (ha_len, B, N, 1), scale=1.0)

    merged, score_list = jax.jit(network_forward)(prep, sequences_x, ha)
    jax.block_until_ready(merged)
    assert merged.shape == (1, B, N, ha_out_dim)
    print("KERNEL_OK")
</pallas_src>

<mosaic_0001>
module attributes {stable_mosaic.version = 11 : i64} {
  func.func @_matmul_kernel(%arg0: i32, %arg1: i32, %arg2: i32, %arg3: memref<512x128xf32, #tpu.memory_space<vmem>>, %arg4: memref<128x128xf32, #tpu.memory_space<vmem>>, %arg5: memref<1x128xf32, #tpu.memory_space<vmem>>, %arg6: memref<512x128xbf16, #tpu.memory_space<vmem>>, %arg7: memref<512x128xf32, #tpu.memory_space<vmem>>) attributes {dimension_semantics = [#tpu.dimension_semantics<parallel>, #tpu.dimension_semantics<parallel>, #tpu.dimension_semantics<arbitrary>], iteration_bounds = array<i64: 6, 1, 1>, scalar_prefetch = 0 : i64, scratch_operands = 1 : i64, tpu.core_type = #tpu.core_type<tc>, window_params = [{transform_indices = @transform_0, window_bounds = array<i64: 512, 128>}, {transform_indices = @transform_1, window_bounds = array<i64: 128, 128>}, {transform_indices = @transform_2, window_bounds = array<i64: 1, 128>}, {transform_indices = @transform_3, window_bounds = array<i64: 512, 128>}]} {
    %c0_i32 = arith.constant 0 : i32
    %0 = arith.cmpi eq, %arg2, %c0_i32 : i32
    %1 = arith.extui %0 : i1 to i32
    %c0_i32_0 = arith.constant 0 : i32
    %2 = arith.cmpi ne, %1, %c0_i32_0 : i32
    scf.if %2 {
      %cst_10 = arith.constant 0.000000e+00 : f32
      %12 = vector.broadcast %cst_10 : f32 to vector<512x128xf32>
      %c0_11 = arith.constant 0 : index
      %c0_12 = arith.constant 0 : index
      %13 = vector.load %arg7[%c0_11, %c0_12] : memref<512x128xf32, #tpu.memory_space<vmem>>, vector<512x128xf32>
      tpu.vector_store %arg7[%c0_11, %c0_12], %12 {strides = array<i32>} : memref<512x128xf32, #tpu.memory_space<vmem>>, vector<512x128xf32>,
    } else {
    }
    %c0 = arith.constant 0 : index
    %c0_1 = arith.constant 0 : index
    %3 = vector.load %arg7[%c0, %c0_1] : memref<512x128xf32, #tpu.memory_space<vmem>>, vector<512x128xf32>
    %c0_2 = arith.constant 0 : index
    %c0_3 = arith.constant 0 : index
    %4 = vector.load %arg3[%c0_2, %c0_3] : memref<512x128xf32, #tpu.memory_space<vmem>>, vector<512x128xf32>
    %c0_4 = arith.constant 0 : index
    %c0_5 = arith.constant 0 : index
    %5 = vector.load %arg4[%c0_4, %c0_5] : memref<128x128xf32, #tpu.memory_space<vmem>>, vector<128x128xf32>
    %cst = arith.constant dense<0.000000e+00> : vector<512x128xf32>
    %6 = tpu.matmul %4, %5, %cst {dimension_numbers = #tpu.dot_dimension_numbers<[1], [0], [0], [1], [0, 0, 1, 1], [], []>} : vector<512x128xf32>, vector<128x128xf32>, vector<512x128xf32> -> vector<512x128xf32>
    %7 = arith.addf %3, %6 : vector<512x128xf32>
    %c0_6 = arith.constant 0 : index
    %c0_7 = arith.constant 0 : index
    %8 = vector.load %arg7[%c0_6, %c0_7] : memref<512x128xf32, #tpu.memory_space<vmem>>, vector<512x128xf32>
    tpu.vector_store %arg7[%c0_6, %c0_7], %7 {strides = array<i32>} : memref<512x128xf32, #tpu.memory_space<vmem>>, vector<512x128xf32>,
    %c0_i32_8 = arith.constant 0 : i32
    %9 = arith.cmpi eq, %arg2, %c0_i32_8 : i32
    %10 = arith.extui %9 : i1 to i32
    %c0_i32_9 = arith.constant 0 : i32
    %11 = arith.cmpi ne, %10, %c0_i32_9 : i32
    scf.if %11 {
      %c0_10 = arith.constant 0 : index
      %c0_11 = arith.constant 0 : index
      %12 = vector.load %arg7[%c0_10, %c0_11] : memref<512x128xf32, #tpu.memory_space<vmem>>, vector<512x128xf32>
      %c0_12 = arith.constant 0 : index
      %c0_13 = arith.constant 0 : index
      %13 = vector.load %arg5[%c0_12, %c0_13] : memref<1x128xf32, #tpu.memory_space<vmem>>, vector<1x128xf32>
      %14 = vector.broadcast %13 : vector<1x128xf32> to vector<512x128xf32>
      %15 = arith.addf %12, %14 : vector<512x128xf32>
      %16 = arith.truncf %15 : vector<512x128xf32> to vector<512x128xbf16>
      %c0_14 = arith.constant 0 : index
      %c0_15 = arith.constant 0 : index
      %17 = vector.load %arg6[%c0_14, %c0_15] : memref<512x128xbf16, #tpu.memory_space<vmem>>, vector<512x128xbf16>
      tpu.vector_store %arg6[%c0_14, %c0_15], %16 {strides = array<i32>} : memref<512x128xbf16, #tpu.memory_space<vmem>>, vector<512x128xbf16>,
    } else {
    }
    return
  }
  func.func @transform_0(%arg0: i32, %arg1: i32, %arg2: i32) -> (i32, i32) {
    %c0_i32 = arith.constant 0 : i32
    return %arg0, %arg2 : i32, i32
  }
  func.func @transform_1(%arg0: i32, %arg1: i32, %arg2: i32) -> (i32, i32) {
    %c0_i32 = arith.constant 0 : i32
    return %arg2, %arg1 : i32, i32
  }
  func.func @transform_2(%arg0: i32, %arg1: i32, %arg2: i32) -> (i32, i32) {
    %c0_i32 = arith.constant 0 : i32
    %c0_i32_0 = arith.constant 0 : i32
    return %c0_i32, %arg1 : i32, i32
  }
  func.func @transform_3(%arg0: i32, %arg1: i32, %arg2: i32) -> (i32, i32) {
    %c0_i32 = arith.constant 0 : i32
    return %arg0, %arg1 : i32, i32
  }
}

module attributes {stable_mosaic.version = 11 : i64} {
  func.func @_matmul_kernel(%arg0: i32, %arg1: i32, %arg2: i32, %arg3: memref<512x1024xbf16, #tpu.memory_space<vmem>>, %arg4: memref<1024x128xbf16, #tpu.memory_space<vmem>>, %arg5: memref<1x128xf32, #tpu.memory_space<vmem>>, %arg6: memref<512x128xf32, #tpu.memory_space<vmem>>, %arg7: memref<512x128xf32, #tpu.memory_space<vmem>>) attributes {dimension_semantics = [#tpu.dimension_semantics<parallel>, #tpu.dimension_semantics<parallel>, #tpu.dimension_semantics<arbitrary>], iteration_bounds = array<i64: 6, 1, 3>, scalar_prefetch = 0 : i64, scratch_operands = 1 : i64, tpu.core_type = #tpu.core_type<tc>, window_params = [{transform_indices = @transform_0, window_bounds = array<i64: 512, 1024>}, {transform_indices = @transform_1, window_bounds = array<i64: 1024, 128>}, {transform_indices = @transform_2, window_bounds = array<i64: 1, 128>}, {transform_indices = @transform_3, window_bounds = array<i64: 512, 128>}]} {
    %c0_i32 = arith.constant 0 : i32
    %0 = arith.cmpi eq, %arg2, %c0_i32 : i32
    %1 = arith.extui %0 : i1 to i32
    %c0_i32_0 = arith.constant 0 : i32
    %2 = arith.cmpi ne, %1, %c0_i32_0 : i32
    scf.if %2 {
      %cst_9 = arith.constant 0.000000e+00 : f32
      %12 = vector.broadcast %cst_9 : f32 to vector<512x128xf32>
      %c0_10 = arith.constant 0 : index
      %c0_11 = arith.constant 0 : index
      %13 = vector.load %arg7[%c0_10, %c0_11] : memref<512x128xf32, #tpu.memory_space<vmem>>, vector<512x128xf32>
      tpu.vector_store %arg7[%c0_10, %c0_11], %12 {strides = array<i32>} : memref<512x128xf32, #tpu.memory_space<vmem>>, vector<512x128xf32>,
    } else {
    }
    %c0 = arith.constant 0 : index
    %c0_1 = arith.constant 0 : index
    %3 = vector.load %arg7[%c0, %c0_1] : memref<512x128xf32, #tpu.memory_space<vmem>>, vector<512x128xf32>
    %c0_2 = arith.constant 0 : index
    %c0_3 = arith.constant 0 : index
    %4 = vector.load %arg3[%c0_2, %c0_3] : memref<512x1024xbf16, #tpu.memory_space<vmem>>, vector<512x1024xbf16>
    %c0_4 = arith.constant 0 : index
    %c0_5 = arith.constant 0 : index
    %5 = vector.load %arg4[%c0_4, %c0_5] : memref<1024x128xbf16, #tpu.memory_space<vmem>>, vector<1024x128xbf16>
    %cst = arith.constant dense<0.000000e+00> : vector<512x128xf32>
    %6 = tpu.matmul %4, %5, %cst {dimension_numbers = #tpu.dot_dimension_numbers<[1], [0], [0], [1], [0, 0, 1, 1], [], []>} : vector<512x1024xbf16>, vector<1024x128xbf16>, vector<512x128xf32> -> vector<512x128xf32>
    %7 = arith.addf %3, %6 : vector<512x128xf32>
    %c0_6 = arith.constant 0 : index
    %c0_7 = arith.constant 0 : index
    %8 = vector.load %arg7[%c0_6, %c0_7] : memref<512x128xf32, #tpu.memory_space<vmem>>, vector<512x128xf32>
    tpu.vector_store %arg7[%c0_6, %c0_7], %7 {strides = array<i32>} : memref<512x128xf32, #tpu.memory_space<vmem>>, vector<512x128xf32>,
    %c2_i32 = arith.constant 2 : i32
    %9 = arith.cmpi eq, %arg2, %c2_i32 : i32
    %10 = arith.extui %9 : i1 to i32
    %c0_i32_8 = arith.constant 0 : i32
    %11 = arith.cmpi ne, %10, %c0_i32_8 : i32
    scf.if %11 {
      %c0_9 = arith.constant 0 : index
      %c0_10 = arith.constant 0 : index
      %12 = vector.load %arg7[%c0_9, %c0_10] : memref<512x128xf32, #tpu.memory_space<vmem>>, vector<512x128xf32>
      %c0_11 = arith.constant 0 : index
      %c0_12 = arith.constant 0 : index
      %13 = vector.load %arg5[%c0_11, %c0_12] : memref<1x128xf32, #tpu.memory_space<vmem>>, vector<1x128xf32>
      %14 = vector.broadcast %13 : vector<1x128xf32> to vector<512x128xf32>
      %15 = arith.addf %12, %14 : vector<512x128xf32>
      %cst_13 = arith.constant 0.000000e+00 : f32
      %16 = vector.broadcast %cst_13 : f32 to vector<512x128xf32>
      %17 = arith.maximumf %15, %16 : vector<512x128xf32>
      %c0_14 = arith.constant 0 : index
      %c0_15 = arith.constant 0 : index
      %18 = vector.load %arg6[%c0_14, %c0_15] : memref<512x128xf32, #tpu.memory_space<vmem>>, vector<512x128xf32>
      tpu.vector_store %arg6[%c0_14, %c0_15], %17 {strides = array<i32>} : memref<512x128xf32, #tpu.memory_space<vmem>>, vector<512x128xf32>,
    } else {
    }
    return
  }
  func.func @transform_0(%arg0: i32, %arg1: i32, %arg2: i32) -> (i32, i32) {
    %c0_i32 = arith.constant 0 : i32
    return %arg0, %arg2 : i32, i32
  }
  func.func @transform_1(%arg0: i32, %arg1: i32, %arg2: i32) -> (i32, i32) {
    %c0_i32 = arith.constant 0 : i32
    return %arg2, %arg1 : i32, i32
  }
  func.func @transform_2(%arg0: i32, %arg1: i32, %arg2: i32) -> (i32, i32) {
    %c0_i32 = arith.constant 0 : i32
    %c0_i32_0 = arith.constant 0 : i32
    return %c0_i32, %arg1 : i32, i32
  }
  func.func @transform_3(%arg0: i32, %arg1: i32, %arg2: i32) -> (i32, i32) {
    %c0_i32 = arith.constant 0 : i32
    return %arg0, %arg1 : i32, i32
  }
}

module attributes {stable_mosaic.version = 11 : i64} {
  func.func @_matmul_kernel(%arg0: i32, %arg1: i32, %arg2: i32, %arg3: memref<512x1024xbf16, #tpu.memory_space<vmem>>, %arg4: memref<1024x128xbf16, #tpu.memory_space<vmem>>, %arg5: memref<1x128xf32, #tpu.memory_space<vmem>>, %arg6: memref<512x128xf32, #tpu.memory_space<vmem>>, %arg7: memref<512x128xf32, #tpu.memory_space<vmem>>) attributes {dimension_semantics = [#tpu.dimension_semantics<parallel>, #tpu.dimension_semantics<parallel>, #tpu.dimension_semantics<arbitrary>], iteration_bounds = array<i64: 6, 1, 3>, scalar_prefetch = 0 : i64, scratch_operands = 1 : i64, tpu.core_type = #tpu.core_type<tc>, window_params = [{transform_indices = @transform_0, window_bounds = array<i64: 512, 1024>}, {transform_indices = @transform_1, window_bounds = array<i64: 1024, 128>}, {transform_indices = @transform_2, window_bounds = array<i64: 1, 128>}, {transform_indices = @transform_3, window_bounds = array<i64: 512, 128>}]} {
    %c0_i32 = arith.constant 0 : i32
    %0 = arith.cmpi eq, %arg2, %c0_i32 : i32
    %1 = arith.extui %0 : i1 to i32
    %c0_i32_0 = arith.constant 0 : i32
    %2 = arith.cmpi ne, %1, %c0_i32_0 : i32
    scf.if %2 {
      %cst_9 = arith.constant 0.000000e+00 : f32
      %12 = vector.broadcast %cst_9 : f32 to vector<512x128xf32>
      %c0_10 = arith.constant 0 : index
      %c0_11 = arith.constant 0 : index
      %13 = vector.load %arg7[%c0_10, %c0_11] : memref<512x128xf32, #tpu.memory_space<vmem>>, vector<512x128xf32>
      tpu.vector_store %arg7[%c0_10, %c0_11], %12 {strides = array<i32>} : memref<512x128xf32, #tpu.memory_space<vmem>>, vector<512x128xf32>,
    } else {
    }
    %c0 = arith.constant 0 : index
    %c0_1 = arith.constant 0 : index
    %3 = vector.load %arg7[%c0, %c0_1] : memref<512x128xf32, #tpu.memory_space<vmem>>, vector<512x128xf32>
    %c0_2 = arith.constant 0 : index
    %c0_3 = arith.constant 0 : index
    %4 = vector.load %arg3[%c0_2, %c0_3] : memref<512x1024xbf16, #tpu.memory_space<vmem>>, vector<512x1024xbf16>
    %c0_4 = arith.constant 0 : index
    %c0_5 = arith.constant 0 : index
    %5 = vector.load %arg4[%c0_4, %c0_5] : memref<1024x128xbf16, #tpu.memory_space<vmem>>, vector<1024x128xbf16>
    %cst = arith.constant dense<0.000000e+00> : vector<512x128xf32>
    %6 = tpu.matmul %4, %5, %cst {dimension_numbers = #tpu.dot_dimension_numbers<[1], [0], [0], [1], [0, 0, 1, 1], [], []>} : vector<512x1024xbf16>, vector<1024x128xbf16>, vector<512x128xf32> -> vector<512x128xf32>
    %7 = arith.addf %3, %6 : vector<512x128xf32>
    %c0_6 = arith.constant 0 : index
    %c0_7 = arith.constant 0 : index
    %8 = vector.load %arg7[%c0_6, %c0_7] : memref<512x128xf32, #tpu.memory_space<vmem>>, vector<512x128xf32>
    tpu.vector_store %arg7[%c0_6, %c0_7], %7 {strides = array<i32>} : memref<512x128xf32, #tpu.memory_space<vmem>>, vector<512x128xf32>,
    %c2_i32 = arith.constant 2 : i32
    %9 = arith.cmpi eq, %arg2, %c2_i32 : i32
    %10 = arith.extui %9 : i1 to i32
    %c0_i32_8 = arith.constant 0 : i32
    %11 = arith.cmpi ne, %10, %c0_i32_8 : i32
    scf.if %11 {
      %c0_9 = arith.constant 0 : index
      %c0_10 = arith.constant 0 : index
      %12 = vector.load %arg7[%c0_9, %c0_10] : memref<512x128xf32, #tpu.memory_space<vmem>>, vector<512x128xf32>
      %c0_11 = arith.constant 0 : index
      %c0_12 = arith.constant 0 : index
      %13 = vector.load %arg5[%c0_11, %c0_12] : memref<1x128xf32, #tpu.memory_space<vmem>>, vector<1x128xf32>
      %14 = vector.broadcast %13 : vector<1x128xf32> to vector<512x128xf32>
      %15 = arith.addf %12, %14 : vector<512x128xf32>
      %c0_13 = arith.constant 0 : index
      %c0_14 = arith.constant 0 : index
      %16 = vector.load %arg6[%c0_13, %c0_14] : memref<512x128xf32, #tpu.memory_space<vmem>>, vector<512x128xf32>
      tpu.vector_store %arg6[%c0_13, %c0_14], %15 {strides = array<i32>} : memref<512x128xf32, #tpu.memory_space<vmem>>, vector<512x128xf32>,
    } else {
    }
    return
  }
  func.func @transform_0(%arg0: i32, %arg1: i32, %arg2: i32) -> (i32, i32) {
    %c0_i32 = arith.constant 0 : i32
    return %arg0, %arg2 : i32, i32
  }
  func.func @transform_1(%arg0: i32, %arg1: i32, %arg2: i32) -> (i32, i32) {
    %c0_i32 = arith.constant 0 : i32
    return %arg2, %arg1 : i32, i32
  }
  func.func @transform_2(%arg0: i32, %arg1: i32, %arg2: i32) -> (i32, i32) {
    %c0_i32 = arith.constant 0 : i32
    %c0_i32_0 = arith.constant 0 : i32
    return %c0_i32, %arg1 : i32, i32
  }
  func.func @transform_3(%arg0: i32, %arg1: i32, %arg2: i32) -> (i32, i32) {
    %c0_i32 = arith.constant 0 : i32
    return %arg0, %arg1 : i32, i32
  }
}

module attributes {stable_mosaic.version = 11 : i64} {
  func.func @_matmul_kernel(%arg0: i32, %arg1: i32, %arg2: i32, %arg3: memref<8x512xf32, #tpu.memory_space<vmem>>, %arg4: memref<512x128xf32, #tpu.memory_space<vmem>>, %arg5: memref<1x128xf32, #tpu.memory_space<vmem>>, %arg6: memref<8x128xf32, #tpu.memory_space<vmem>>, %arg7: memref<8x128xf32, #tpu.memory_space<vmem>>) attributes {dimension_semantics = [#tpu.dimension_semantics<parallel>, #tpu.dimension_semantics<parallel>, #tpu.dimension_semantics<arbitrary>], iteration_bounds = array<i64: 1, 1, 6>, scalar_prefetch = 0 : i64, scratch_operands = 1 : i64, tpu.core_type = #tpu.core_type<tc>, window_params = [{transform_indices = @transform_0, window_bounds = array<i64: 8, 512>}, {transform_indices = @transform_1, window_bounds = array<i64: 512, 128>}, {transform_indices = @transform_2, window_bounds = array<i64: 1, 128>}, {transform_indices = @transform_3, window_bounds = array<i64: 8, 128>}]} {
    %c0_i32 = arith.constant 0 : i32
    %0 = arith.cmpi eq, %arg2, %c0_i32 : i32
    %1 = arith.extui %0 : i1 to i32
    %c0_i32_0 = arith.constant 0 : i32
    %2 = arith.cmpi ne, %1, %c0_i32_0 : i32
    scf.if %2 {
      %cst_9 = arith.constant 0.000000e+00 : f32
      %12 = vector.broadcast %cst_9 : f32 to vector<8x128xf32>
      %c0_10 = arith.constant 0 : index
      %c0_11 = arith.constant 0 : index
      %13 = vector.load %arg7[%c0_10, %c0_11] : memref<8x128xf32, #tpu.memory_space<vmem>>, vector<8x128xf32>
      tpu.vector_store %arg7[%c0_10, %c0_11], %12 {strides = array<i32>} : memref<8x128xf32, #tpu.memory_space<vmem>>, vector<8x128xf32>,
    } else {
    }
    %c0 = arith.constant 0 : index
    %c0_1 = arith.constant 0 : index
    %3 = vector.load %arg7[%c0, %c0_1] : memref<8x128xf32, #tpu.memory_space<vmem>>, vector<8x128xf32>
    %c0_2 = arith.constant 0 : index
    %c0_3 = arith.constant 0 : index
    %4 = vector.load %arg3[%c0_2, %c0_3] : memref<8x512xf32, #tpu.memory_space<vmem>>, vector<8x512xf32>
    %c0_4 = arith.constant 0 : index
    %c0_5 = arith.constant 0 : index
    %5 = vector.load %arg4[%c0_4, %c0_5] : memref<512x128xf32, #tpu.memory_space<vmem>>, vector<512x128xf32>
    %cst = arith.constant dense<0.000000e+00> : vector<8x128xf32>
    %6 = tpu.matmul %4, %5, %cst {dimension_numbers = #tpu.dot_dimension_numbers<[1], [0], [0], [1], [0, 0, 1, 1], [], []>} : vector<8x512xf32>, vector<512x128xf32>, vector<8x128xf32> -> vector<8x128xf32>
    %7 = arith.addf %3, %6 : vector<8x128xf32>
    %c0_6 = arith.constant 0 : index
    %c0_7 = arith.constant 0 : index
    %8 = vector.load %arg7[%c0_6, %c0_7] : memref<8x128xf32, #tpu.memory_space<vmem>>, vector<8x128xf32>
    tpu.vector_store %arg7[%c0_6, %c0_7], %7 {strides = array<i32>} : memref<8x128xf32, #tpu.memory_space<vmem>>, vector<8x128xf32>,
    %c5_i32 = arith.constant 5 : i32
    %9 = arith.cmpi eq, %arg2, %c5_i32 : i32
    %10 = arith.extui %9 : i1 to i32
    %c0_i32_8 = arith.constant 0 : i32
    %11 = arith.cmpi ne, %10, %c0_i32_8 : i32
    scf.if %11 {
      %c0_9 = arith.constant 0 : index
      %c0_10 = arith.constant 0 : index
      %12 = vector.load %arg7[%c0_9, %c0_10] : memref<8x128xf32, #tpu.memory_space<vmem>>, vector<8x128xf32>
      %c0_11 = arith.constant 0 : index
      %c0_12 = arith.constant 0 : index
      %13 = vector.load %arg5[%c0_11, %c0_12] : memref<1x128xf32, #tpu.memory_space<vmem>>, vector<1x128xf32>
      %14 = vector.broadcast %13 : vector<1x128xf32> to vector<8x128xf32>
      %15 = arith.addf %12, %14 : vector<8x128xf32>
      %c0_13 = arith.constant 0 : index
      %c0_14 = arith.constant 0 : index
      %16 = vector.load %arg6[%c0_13, %c0_14] : memref<8x128xf32, #tpu.memory_space<vmem>>, vector<8x128xf32>
      tpu.vector_store %arg6[%c0_13, %c0_14], %15 {strides = array<i32>} : memref<8x128xf32, #tpu.memory_space<vmem>>, vector<8x128xf32>,
    } else {
    }
    return
  }
  func.func @transform_0(%arg0: i32, %arg1: i32, %arg2: i32) -> (i32, i32) {
    %c0_i32 = arith.constant 0 : i32
    return %arg0, %arg2 : i32, i32
  }
  func.func @transform_1(%arg0: i32, %arg1: i32, %arg2: i32) -> (i32, i32) {
    %c0_i32 = arith.constant 0 : i32
    return %arg2, %arg1 : i32, i32
  }
  func.func @transform_2(%arg0: i32, %arg1: i32, %arg2: i32) -> (i32, i32) {
    %c0_i32 = arith.constant 0 : i32
    %c0_i32_0 = arith.constant 0 : i32
    return %c0_i32, %arg1 : i32, i32
  }
  func.func @transform_3(%arg0: i32, %arg1: i32, %arg2: i32) -> (i32, i32) {
    %c0_i32 = arith.constant 0 : i32
    return %arg0, %arg1 : i32, i32
  }
}

module attributes {stable_mosaic.version = 11 : i64} {
  func.func @_lstm_seq_kernel(%arg0: i32, %arg1: memref<4x2x64xf32, #tpu.memory_space<vmem>>, %arg2: memref<16x64xf32, #tpu.memory_space<vmem>>, %arg3: memref<4x2x16xf32, #tpu.memory_space<vmem>>, %arg4: memref<2x16xf32, #tpu.memory_space<vmem>>, %arg5: memref<2x16xf32, #tpu.memory_space<vmem>>) attributes {dimension_semantics = [#tpu.dimension_semantics<arbitrary>], iteration_bounds = array<i64: 1>, scalar_prefetch = 0 : i64, scratch_operands = 2 : i64, tpu.core_type = #tpu.core_type<tc>, window_params = [{pipeline_mode = #tpu.pipeline_mode<synchronous>, transform_indices = @transform_0, window_bounds = array<i64: 4, 2, 64>}, {pipeline_mode = #tpu.pipeline_mode<synchronous>, transform_indices = @transform_1, window_bounds = array<i64: 16, 64>}, {pipeline_mode = #tpu.pipeline_mode<synchronous>, transform_indices = @transform_2, window_bounds = array<i64: 4, 2, 16>}]} {
    %cst = arith.constant 0.000000e+00 : f32
    %0 = vector.broadcast %cst : f32 to vector<2x16xf32>
    %c0 = arith.constant 0 : index
    %c0_0 = arith.constant 0 : index
    %1 = vector.load %arg4[%c0, %c0_0] : memref<2x16xf32, #tpu.memory_space<vmem>>, vector<2x16xf32>
    tpu.vector_store %arg4[%c0, %c0_0], %0 {strides = array<i32>} : memref<2x16xf32, #tpu.memory_space<vmem>>, vector<2x16xf32>,
    %cst_1 = arith.constant 0.000000e+00 : f32
    %2 = vector.broadcast %cst_1 : f32 to vector<2x16xf32>
    %c0_2 = arith.constant 0 : index
    %c0_3 = arith.constant 0 : index
    %3 = vector.load %arg5[%c0_2, %c0_3] : memref<2x16xf32, #tpu.memory_space<vmem>>, vector<2x16xf32>
    tpu.vector_store %arg5[%c0_2, %c0_3], %2 {strides = array<i32>} : memref<2x16xf32, #tpu.memory_space<vmem>>, vector<2x16xf32>,
    %c0_i32 = arith.constant 0 : i32
    %c4_i32 = arith.constant 4 : i32
    %4 = arith.addi %c0_i32, %c4_i32 : i32
    %c1_i32 = arith.constant 1 : i32
    scf.for %arg6 = %c0_i32 to %4 step %c1_i32  : i32 {
      %c1_i32_5 = arith.constant 1 : i32
      %5 = arith.muli %arg6, %c1_i32_5 : i32
      %c0_i32_6 = arith.constant 0 : i32
      %6 = arith.addi %c0_i32_6, %5 : i32
      %7 = arith.index_cast %6 : i32 to index
      %c0_7 = arith.constant 0 : index
      %c0_8 = arith.constant 0 : index
      %8 = vector.load %arg1[%7, %c0_7, %c0_8] : memref<4x2x64xf32, #tpu.memory_space<vmem>>, vector<1x2x64xf32>
      %9 = vector.shape_cast %8 : vector<1x2x64xf32> to vector<2x64xf32>
      %c0_9 = arith.constant 0 : index
      %c0_10 = arith.constant 0 : index
      %10 = vector.load %arg4[%c0_9, %c0_10] : memref<2x16xf32, #tpu.memory_space<vmem>>, vector<2x16xf32>
      %c0_11 = arith.constant 0 : index
      %c0_12 = arith.constant 0 : index
      %11 = vector.load %arg2[%c0_11, %c0_12] : memref<16x64xf32, #tpu.memory_space<vmem>>, vector<16x64xf32>
      %cst_13 = arith.constant dense<0.000000e+00> : vector<2x64xf32>
      %12 = tpu.matmul %10, %11, %cst_13 {dimension_numbers = #tpu.dot_dimension_numbers<[1], [0], [0], [1], [0, 0, 1, 1], [], []>} : vector<2x16xf32>, vector<16x64xf32>, vector<2x64xf32> -> vector<2x64xf32>
      %13 = arith.addf %9, %12 : vector<2x64xf32>
      %14 = vector.extract_strided_slice %13 {offsets = [0, 0], sizes = [2, 16], strides = [1, 1]} : vector<2x64xf32> to vector<2x16xf32>
      %15 = arith.negf %14 : vector<2x16xf32>
      %16 = math.exp %15 : vector<2x16xf32>
      %cst_14 = arith.constant 1.000000e+00 : f32
      %17 = vector.broadcast %cst_14 : f32 to vector<2x16xf32>
      %18 = arith.addf %17, %16 : vector<2x16xf32>
      %19 = arith.divf %17, %18 : vector<2x16xf32>
      %20 = vector.extract_strided_slice %13 {offsets = [0, 16], sizes = [2, 16], strides = [1, 1]} : vector<2x64xf32> to vector<2x16xf32>
      %21 = arith.negf %20 : vector<2x16xf32>
      %22 = math.exp %21 : vector<2x16xf32>
      %cst_15 = arith.constant 1.000000e+00 : f32
      %23 = vector.broadcast %cst_15 : f32 to vector<2x16xf32>
      %24 = arith.addf %23, %22 : vector<2x16xf32>
      %25 = arith.divf %23, %24 : vector<2x16xf32>
      %26 = vector.extract_strided_slice %13 {offsets = [0, 32], sizes = [2, 16], strides = [1, 1]} : vector<2x64xf32> to vector<2x16xf32>
      %27 = math.tanh %26 : vector<2x16xf32>
      %28 = vector.extract_strided_slice %13 {offsets = [0, 48], sizes = [2, 16], strides = [1, 1]} : vector<2x64xf32> to vector<2x16xf32>
      %29 = arith.negf %28 : vector<2x16xf32>
      %30 = math.exp %29 : vector<2x16xf32>
      %cst_16 = arith.constant 1.000000e+00 : f32
      %31 = vector.broadcast %cst_16 : f32 to vector<2x16xf32>
      %32 = arith.addf %31, %30 : vector<2x16xf32>
      %33 = arith.divf %31, %32 : vector<2x16xf32>
      %c0_17 = arith.constant 0 : index
      %c0_18 = arith.constant 0 : index
      %34 = vector.load %arg5[%c0_17, %c0_18] : memref<2x16xf32, #tpu.memory_space<vmem>>, vector<2x16xf32>
      %35 = arith.mulf %25, %34 : vector<2x16xf32>
      %36 = arith.mulf %19, %27 : vector<2x16xf32>
      %37 = arith.addf %35, %36 : vector<2x16xf32>
      %38 = math.tanh %37 : vector<2x16xf32>
      %39 = arith.mulf %33, %38 : vector<2x16xf32>
      %c0_19 = arith.constant 0 : index
      %c0_20 = arith.constant 0 : index
      %40 = vector.load %arg5[%c0_19, %c0_20] : memref<2x16xf32, #tpu.memory_space<vmem>>, vector<2x16xf32>
      tpu.vector_store %arg5[%c0_19, %c0_20], %37 {strides = array<i32>} : memref<2x16xf32, #tpu.memory_space<vmem>>, vector<2x16xf32>,
      %c0_21 = arith.constant 0 : index
      %c0_22 = arith.constant 0 : index
      %41 = vector.load %arg4[%c0_21, %c0_22] : memref<2x16xf32, #tpu.memory_space<vmem>>, vector<2x16xf32>
      tpu.vector_store %arg4[%c0_21, %c0_22], %39 {strides = array<i32>} : memref<2x16xf32, #tpu.memory_space<vmem>>, vector<2x16xf32>,
      %42 = arith.index_cast %6 : i32 to index
      %c0_23 = arith.constant 0 : index
      %c0_24 = arith.constant 0 : index
      %43 = vector.load %arg3[%42, %c0_23, %c0_24] : memref<4x2x16xf32, #tpu.memory_space<vmem>>, vector<1x2x16xf32>
      %44 = vector.shape_cast %43 : vector<1x2x16xf32> to vector<2x16xf32>
      %45 = vector.shape_cast %39 : vector<2x16xf32> to vector<1x2x16xf32>
      tpu.vector_store %arg3[%42, %c0_23, %c0_24], %45 {strides = array<i32>} : memref<4x2x16xf32, #tpu.memory_space<vmem>>, vector<1x2x16xf32>,
    }
    %c4_i32_4 = arith.constant 4 : i32
    return
  }
  func.func @transform_0(%arg0: i32) -> (i32, i32, i32) {
    %c0_i32 = arith.constant 0 : i32
    %c0_i32_0 = arith.constant 0 : i32
    %c0_i32_1 = arith.constant 0 : i32
    %c0_i32_2 = arith.constant 0 : i32
    return %c0_i32, %c0_i32_0, %c0_i32_1 : i32, i32, i32
  }
  func.func @transform_1(%arg0: i32) -> (i32, i32) {
    %c0_i32 = arith.constant 0 : i32
    %c0_i32_0 = arith.constant 0 : i32
    %c0_i32_1 = arith.constant 0 : i32
    return %c0_i32, %c0_i32_0 : i32, i32
  }
  func.func @transform_2(%arg0: i32) -> (i32, i32, i32) {
    %c0_i32 = arith.constant 0 : i32
    %c0_i32_0 = arith.constant 0 : i32
    %c0_i32_1 = arith.constant 0 : i32
    %c0_i32_2 = arith.constant 0 : i32
    return %c0_i32, %c0_i32_0, %c0_i32_1 : i32, i32, i32
  }
}

module attributes {stable_mosaic.version = 11 : i64} {
  func.func @_matmul_kernel(%arg0: i32, %arg1: i32, %arg2: i32, %arg3: memref<8x128xf32, #tpu.memory_space<vmem>>, %arg4: memref<128x128xf32, #tpu.memory_space<vmem>>, %arg5: memref<1x128xf32, #tpu.memory_space<vmem>>, %arg6: memref<8x128xf32, #tpu.memory_space<vmem>>, %arg7: memref<8x128xf32, #tpu.memory_space<vmem>>) attributes {dimension_semantics = [#tpu.dimension_semantics<parallel>, #tpu.dimension_semantics<parallel>, #tpu.dimension_semantics<arbitrary>], iteration_bounds = array<i64: 1, 23, 1>, scalar_prefetch = 0 : i64, scratch_operands = 1 : i64, tpu.core_type = #tpu.core_type<tc>, window_params = [{transform_indices = @transform_0, window_bounds = array<i64: 8, 128>}, {transform_indices = @transform_1, window_bounds = array<i64: 128, 128>}, {transform_indices = @transform_2, window_bounds = array<i64: 1, 128>}, {transform_indices = @transform_3, window_bounds = array<i64: 8, 128>}]} {
    %c0_i32 = arith.constant 0 : i32
    %0 = arith.cmpi eq, %arg2, %c0_i32 : i32
    %1 = arith.extui %0 : i1 to i32
    %c0_i32_0 = arith.constant 0 : i32
    %2 = arith.cmpi ne, %1, %c0_i32_0 : i32
    scf.if %2 {
      %cst_10 = arith.constant 0.000000e+00 : f32
      %12 = vector.broadcast %cst_10 : f32 to vector<8x128xf32>
      %c0_11 = arith.constant 0 : index
      %c0_12 = arith.constant 0 : index
      %13 = vector.load %arg7[%c0_11, %c0_12] : memref<8x128xf32, #tpu.memory_space<vmem>>, vector<8x128xf32>
      tpu.vector_store %arg7[%c0_11, %c0_12], %12 {strides = array<i32>} : memref<8x128xf32, #tpu.memory_space<vmem>>, vector<8x128xf32>,
    } else {
    }
    %c0 = arith.constant 0 : index
    %c0_1 = arith.constant 0 : index
    %3 = vector.load %arg7[%c0, %c0_1] : memref<8x128xf32, #tpu.memory_space<vmem>>, vector<8x128xf32>
    %c0_2 = arith.constant 0 : index
    %c0_3 = arith.constant 0 : index
    %4 = vector.load %arg3[%c0_2, %c0_3] : memref<8x128xf32, #tpu.memory_space<vmem>>, vector<8x128xf32>
    %c0_4 = arith.constant 0 : index
    %c0_5 = arith.constant 0 : index
    %5 = vector.load %arg4[%c0_4, %c0_5] : memref<128x128xf32, #tpu.memory_space<vmem>>, vector<128x128xf32>
    %cst = arith.constant dense<0.000000e+00> : vector<8x128xf32>
    %6 = tpu.matmul %4, %5, %cst {dimension_numbers = #tpu.dot_dimension_numbers<[1], [0], [0], [1], [0, 0, 1, 1], [], []>} : vector<8x128xf32>, vector<128x128xf32>, vector<8x128xf32> -> vector<8x128xf32>
    %7 = arith.addf %3, %6 : vector<8x128xf32>
    %c0_6 = arith.constant 0 : index
    %c0_7 = arith.constant 0 : index
    %8 = vector.load %arg7[%c0_6, %c0_7] : memref<8x128xf32, #tpu.memory_space<vmem>>, vector<8x128xf32>
    tpu.vector_store %arg7[%c0_6, %c0_7], %7 {strides = array<i32>} : memref<8x128xf32, #tpu.memory_space<vmem>>, vector<8x128xf32>,
    %c0_i32_8 = arith.constant 0 : i32
    %9 = arith.cmpi eq, %arg2, %c0_i32_8 : i32
    %10 = arith.extui %9 : i1 to i32
    %c0_i32_9 = arith.constant 0 : i32
    %11 = arith.cmpi ne, %10, %c0_i32_9 : i32
    scf.if %11 {
      %c0_10 = arith.constant 0 : index
      %c0_11 = arith.constant 0 : index
      %12 = vector.load %arg7[%c0_10, %c0_11] : memref<8x128xf32, #tpu.memory_space<vmem>>, vector<8x128xf32>
      %c0_12 = arith.constant 0 : index
      %c0_13 = arith.constant 0 : index
      %13 = vector.load %arg5[%c0_12, %c0_13] : memref<1x128xf32, #tpu.memory_space<vmem>>, vector<1x128xf32>
      %14 = vector.broadcast %13 : vector<1x128xf32> to vector<8x128xf32>
      %15 = arith.addf %12, %14 : vector<8x128xf32>
      %c0_14 = arith.constant 0 : index
      %c0_15 = arith.constant 0 : index
      %16 = vector.load %arg6[%c0_14, %c0_15] : memref<8x128xf32, #tpu.memory_space<vmem>>, vector<8x128xf32>
      tpu.vector_store %arg6[%c0_14, %c0_15], %15 {strides = array<i32>} : memref<8x128xf32, #tpu.memory_space<vmem>>, vector<8x128xf32>,
    } else {
    }
    return
  }
  func.func @transform_0(%arg0: i32, %arg1: i32, %arg2: i32) -> (i32, i32) {
    %c0_i32 = arith.constant 0 : i32
    return %arg0, %arg2 : i32, i32
  }
  func.func @transform_1(%arg0: i32, %arg1: i32, %arg2: i32) -> (i32, i32) {
    %c0_i32 = arith.constant 0 : i32
    return %arg2, %arg1 : i32, i32
  }
  func.func @transform_2(%arg0: i32, %arg1: i32, %arg2: i32) -> (i32, i32) {
    %c0_i32 = arith.constant 0 : i32
    %c0_i32_0 = arith.constant 0 : i32
    return %c0_i32, %arg1 : i32, i32
  }
  func.func @transform_3(%arg0: i32, %arg1: i32, %arg2: i32) -> (i32, i32) {
    %c0_i32 = arith.constant 0 : i32
    return %arg0, %arg1 : i32, i32
  }
}

module attributes {stable_mosaic.version = 11 : i64} {
  func.func @_merge_kernel(%arg0: memref<2x2901xf32, #tpu.memory_space<vmem>>, %arg1: memref<2x2901xf32, #tpu.memory_space<vmem>>, %arg2: memref<1x2901xf32, #tpu.memory_space<vmem>>, %arg3: memref<1x2901xf32, #tpu.memory_space<vmem>>, %arg4: memref<2x2901xf32, #tpu.memory_space<vmem>>) attributes {dimension_semantics = [], scalar_prefetch = 0 : i64, scratch_operands = 0 : i64, tpu.core_type = #tpu.core_type<tc>} {
    %c0 = arith.constant 0 : index
    %c0_0 = arith.constant 0 : index
    %0 = vector.load %arg0[%c0, %c0_0] : memref<2x2901xf32, #tpu.memory_space<vmem>>, vector<2x2901xf32>
    %c0_1 = arith.constant 0 : index
    %c0_2 = arith.constant 0 : index
    %1 = vector.load %arg2[%c0_1, %c0_2] : memref<1x2901xf32, #tpu.memory_space<vmem>>, vector<1x2901xf32>
    %2 = vector.broadcast %1 : vector<1x2901xf32> to vector<2x2901xf32>
    %3 = arith.mulf %0, %2 : vector<2x2901xf32>
    %c0_3 = arith.constant 0 : index
    %c0_4 = arith.constant 0 : index
    %4 = vector.load %arg1[%c0_3, %c0_4] : memref<2x2901xf32, #tpu.memory_space<vmem>>, vector<2x2901xf32>
    %c0_5 = arith.constant 0 : index
    %c0_6 = arith.constant 0 : index
    %5 = vector.load %arg3[%c0_5, %c0_6] : memref<1x2901xf32, #tpu.memory_space<vmem>>, vector<1x2901xf32>
    %6 = vector.broadcast %5 : vector<1x2901xf32> to vector<2x2901xf32>
    %7 = arith.mulf %4, %6 : vector<2x2901xf32>
    %8 = arith.addf %3, %7 : vector<2x2901xf32>
    %c0_7 = arith.constant 0 : index
    %c0_8 = arith.constant 0 : index
    %9 = vector.load %arg4[%c0_7, %c0_8] : memref<2x2901xf32, #tpu.memory_space<vmem>>, vector<2x2901xf32>
    tpu.vector_store %arg4[%c0_7, %c0_8], %8 {strides = array<i32>} : memref<2x2901xf32, #tpu.memory_space<vmem>>, vector<2x2901xf32>,
    return
  }
}

</mosaic_0001>

<bundles_post_ra>
// kernel: network_forward.8
= control target key start
LH: loop header
LB: loop body
LE: loop exit
PB: predicated region body
PF: predicated region fallthrough
CT: control target
= control target key end

     0   :  { %s2210_s12 = smov 0   ;;  %s2212_s13 = smov 0   ;;  %s2464_s0 = inlined_call_operand.vmem [shape: f32[3072,128], index: 0, kind: input, shape index: {}]   ;;  %s2465_s1 = inlined_call_operand.vmem [shape: f32[128,128], index: 1, kind: input, shape index: {}]   ;;  %s2466_s2 = inlined_call_operand.vmem [shape: f32[1,128], index: 2, kind: input, shape index: {}]   ;;  %s2467_s3 = inlined_call_operand.vmem [shape: bf16[3072,128], index: 3, kind: output, shape index: {}]  }
   0x1   :  { %s2214_s14 = smov 0  }
   0x2 LB: > { %s32_s15 = sadd.s32 1, %s2184_s13  ;;  %p1559_p0 = scmp.ge.s32.totalorder %s2188_s14, 1  ;;  %s2188_s14 = sphi %s2214_s14, %s13_s14   ;;  %s2184_s13 = sphi %s2212_s13, %s2469_s13   ;;  %s2180_s12 = sphi %s2210_s12, %s2468_s12  }
   0x3   : > { %p34_p1 = scmp.ge.s32.totalorder %s32_s15, 6  ;;  %p188_p2 = scmp.lt.s32.totalorder %s2188_s14, 7 }
   0x5   : > { %s2471_s15 = smov (%p34_p1, %s32_s15), 0  ;;  %p189_p3 = pnand %p1559_p0, %p188_p2 }
   0x6   : > { %v455_v0 = vld [vmem:[%s2465_s1] sm:$0xff] (!%p189_p3)  ;;  %v456_v1 = vld [vmem:[%s2465_s1 + $0x8] sm:$0xff] (!%p189_p3)  ;;  %v457_v2 = vld [vmem:[%s2465_s1 + $0x10] sm:$0xff] (!%p189_p3)  ;;  %s1560_s22 = sshll.u32 (!%p189_p3), %s2180_s12, 6 }
   0x7   : > { %192 = sbr.rel (%p189_p3) target bundleno = 320 (0x140), region = 32  ;;  %v2094_v3 = vpack.c.bf16 (!%p189_p3), %v456_v1, %v455_v0  ;;  %v458_v4 = vld [vmem:[%s2465_s1 + $0x18] sm:$0xff] (!%p189_p3)  ;;  %p230_p4 = scmp.lt.s32.totalorder (!%p189_p3), %s1560_s22, 383  ;;  %v459_v6 = vld [vmem:[%s2465_s1 + $0x20] sm:$0xff] (!%p189_p3)  ;;  %v460_v7 = vld [vmem:[%s2465_s1 + $0x28] sm:$0xff] (!%p189_p3) }
   0x8   : > { %v2098_v5 = vpack.c.bf16 (!%p189_p3), %v458_v4, %v457_v2  ;;  %v2102_v8 = vpack.c.bf16 (!%p189_p3), %v460_v7, %v459_v6  ;;  %v461_v9 = vld [vmem:[%s2465_s1 + $0x30] sm:$0xff] (!%p189_p3)  ;;  %v462_v10 = vld [vmem:[%s2465_s1 + $0x38] sm:$0xff] (!%p189_p3)  ;;  %v463_v14 = vld [vmem:[%s2465_s1 + $0x40] sm:$0xff] (!%p189_p3) }
   0x9   : > { %2095 = vmatprep.subr.bf16.mxu0 (!%p189_p3), %v2094_v3  ;;  %2126 = vmatprep.subr.bf16.mxu1 (!%p189_p3), %v2094_v3  ;;  %v2106_v13 = vpack.c.bf16 (!%p189_p3), %v462_v10, %v461_v9  ;;  %v464_v15 = vld [vmem:[%s2465_s1 + $0x48] sm:$0xff] (!%p189_p3)  ;;  %v465_v17 = vld [vmem:[%s2465_s1 + $0x50] sm:$0xff] (!%p189_p3)  ;;  %v466_v18 = vld [vmem:[%s2465_s1 + $0x58] sm:$0xff] (!%p189_p3) }
   0xa   : > { %2097 = vmatpush3.bf16.msra.mxu0 (!%p189_p3), %v2094_v3  ;;  %2134 = vmatpush3.bf16.msra.mxu1 (!%p189_p3), %v2094_v3  ;;  %v2110_v16 = vpack.c.bf16 (!%p189_p3), %v464_v15, %v463_v14  ;;  %v2114_v19 = vpack.c.bf16 (!%p189_p3), %v466_v18, %v465_v17  ;;  %v467_v20 = vld [vmem:[%s2465_s1 + $0x60] sm:$0xff] (!%p189_p3)  ;;  %v468_v21 = vld [vmem:[%s2465_s1 + $0x68] sm:$0xff] (!%p189_p3)  ;;  %v469_v23 = vld [vmem:[%s2465_s1 + $0x70] sm:$0xff] (!%p189_p3) }
   0xb   : > { %2099 = vmatprep.subr.bf16.mxu0 (!%p189_p3), %v2098_v5  ;;  %2127 = vmatprep.subr.bf16.mxu1 (!%p189_p3), %v2098_v5  ;;  %v2118_v22 = vpack.c.bf16 (!%p189_p3), %v468_v21, %v467_v20  ;;  %v470_v24 = vld [vmem:[%s2465_s1 + $0x78] sm:$0xff] (!%p189_p3) }
   0xc   : > { %v2122_v25 = vpack.c.bf16 (!%p189_p3), %v470_v24, %v469_v23  ;;  %v2351_v24 = vld [vmem:[%s2466_s2] ss:$0 sm:$0xff] (!%p189_p3) }
   0xe   : > { %s2473_s22 = smov (!%p230_p4, %s1560_s22), 383  ;;  %2101 = vmatpush3.bf16.msra.mxu0 %v2098_v5  ;;  %2135 = vmatpush3.bf16.msra.mxu1 %v2098_v5 }
   0xf   : > { %s1561_s29 = sshll.u32 %s2473_s22, 3  ;;  %2103 = vmatprep.subr.bf16.mxu0 %v2102_v8  ;;  %2128 = vmatprep.subr.bf16.mxu1 %v2102_v8  ;;  %s1563_s5 = sshll.u32 %s2473_s22, 2 }
  0x10   : > { %s2258_s9 = scalar_lea.vmem %s2464_s0, %s1561_s29  ;;  %s2361_s8 = scalar_lea.vmem %s2467_s3, %s1563_s5 }
  0x11   : > { %v391_v11 = vld [vmem:[%s2258_s9] sm:$0xff]  ;;  %v392_v26 = vld [vmem:[%s2258_s9 + $0x8] sm:$0xff]  ;;  %v393_v28 = vld [vmem:[%s2258_s9 + $0x10] sm:$0xff] }
  0x12   : > { %v423_v12 = vld [vmem:[%s2258_s9 + $0x100] sm:$0xff]  ;;  %1998 = vmatprep.mubr.f32.mxu0 %v391_v11  ;;  %2105 = vmatpush3.bf16.msra.mxu0 %v2102_v8  ;;  %v424_v27 = vld [vmem:[%s2258_s9 + $0x108] sm:$0xff]  ;;  %v425_v29 = vld [vmem:[%s2258_s9 + $0x110] sm:$0xff] }
  0x13   : > { %2046 = vmatprep.mubr.f32.mxu1 %v423_v12  ;;  %2136 = vmatpush3.bf16.msra.mxu1 %v2102_v8  ;;  %v394_v30 = vld [vmem:[%s2258_s9 + $0x18] sm:$0xff]  ;;  %v395_v32 = vld [vmem:[%s2258_s9 + $0x20] sm:$0xff]  ;;  %v396_v34 = vld [vmem:[%s2258_s9 + $0x28] sm:$0xff] }
  0x14   : > { %2107 = vmatprep.subr.bf16.mxu0 %v2106_v13  ;;  %2129 = vmatprep.subr.bf16.mxu1 %v2106_v13  ;;  %v426_v31 = vld [vmem:[%s2258_s9 + $0x118] sm:$0xff]  ;;  %v427_v33 = vld [vmem:[%s2258_s9 + $0x120] sm:$0xff]  ;;  %v428_v35 = vld [vmem:[%s2258_s9 + $0x128] sm:$0xff] }
  0x15   : > { %v397_v36 = vld [vmem:[%s2258_s9 + $0x30] sm:$0xff]  ;;  %v398_v38 = vld [vmem:[%s2258_s9 + $0x38] sm:$0xff]  ;;  %v399_v40 = vld [vmem:[%s2258_s9 + $0x40] sm:$0xff] }
  0x16   : > { %2109 = vmatpush3.bf16.msra.mxu0 %v2106_v13  ;;  %v429_v37 = vld [vmem:[%s2258_s9 + $0x130] sm:$0xff]  ;;  %v430_v39 = vld [vmem:[%s2258_s9 + $0x138] sm:$0xff]  ;;  %v431_v41 = vld [vmem:[%s2258_s9 + $0x140] sm:$0xff] }
  0x17   : > { %2137 = vmatpush3.bf16.msra.mxu1 %v2106_v13  ;;  %2111 = vmatprep.subr.bf16.mxu0 %v2110_v16  ;;  %v400_v42 = vld [vmem:[%s2258_s9 + $0x48] sm:$0xff]  ;;  %v401_v44 = vld [vmem:[%s2258_s9 + $0x50] sm:$0xff]  ;;  %v402_v46 = vld [vmem:[%s2258_s9 + $0x58] sm:$0xff] }
  0x18   : > { %2130 = vmatprep.subr.bf16.mxu1 %v2110_v16  ;;  %v432_v43 = vld [vmem:[%s2258_s9 + $0x148] sm:$0xff]  ;;  %v433_v45 = vld [vmem:[%s2258_s9 + $0x150] sm:$0xff]  ;;  %v434_v47 = vld [vmem:[%s2258_s9 + $0x158] sm:$0xff] }
  0x19   : > { %v403_v48 = vld [vmem:[%s2258_s9 + $0x60] sm:$0xff]  ;;  %v404_v50 = vld [vmem:[%s2258_s9 + $0x68] sm:$0xff]  ;;  %v405_v52 = vld [vmem:[%s2258_s9 + $0x70] sm:$0xff] }
  0x1a   : > { %2113 = vmatpush3.bf16.msra.mxu0 %v2110_v16  ;;  %v435_v49 = vld [vmem:[%s2258_s9 + $0x160] sm:$0xff]  ;;  %v436_v51 = vld [vmem:[%s2258_s9 + $0x168] sm:$0xff]  ;;  %v437_v53 = vld [vmem:[%s2258_s9 + $0x170] sm:$0xff] }
  0x1b   : > { %2138 = vmatpush3.bf16.msra.mxu1 %v2110_v16  ;;  %2115 = vmatprep.subr.bf16.mxu0 %v2114_v19  ;;  %v406_v54 = vld [vmem:[%s2258_s9 + $0x78] sm:$0xff]  ;;  %v407_v56 = vld [vmem:[%s2258_s9 + $0x80] sm:$0xff]  ;;  %v408_v58 = vld [vmem:[%s2258_s9 + $0x88] sm:$0xff] }
  0x1c   : > { %2131 = vmatprep.subr.bf16.mxu1 %v2114_v19  ;;  %v438_v55 = vld [vmem:[%s2258_s9 + $0x178] sm:$0xff]  ;;  %v439_v57 = vld [vmem:[%s2258_s9 + $0x180] sm:$0xff]  ;;  %v440_v59 = vld [vmem:[%s2258_s9 + $0x188] sm:$0xff] }
  0x1d   : > { %v409_v60 = vld [vmem:[%s2258_s9 + $0x90] sm:$0xff]  ;;  %v410_v62 = vld [vmem:[%s2258_s9 + $0x98] sm:$0xff]  ;;  %v411_v0 = vld [vmem:[%s2258_s9 + $0xa0] sm:$0xff] }
  0x1e   : > { %2117 = vmatpush3.bf16.msra.mxu0 %v2114_v19  ;;  %v441_v61 = vld [vmem:[%s2258_s9 + $0x190] sm:$0xff]  ;;  %v442_v63 = vld [vmem:[%s2258_s9 + $0x198] sm:$0xff]  ;;  %v443_v1 = vld [vmem:[%s2258_s9 + $0x1a0] sm:$0xff] }
  0x1f   : > { %2139 = vmatpush3.bf16.msra.mxu1 %v2114_v19  ;;  %2119 = vmatprep.subr.bf16.mxu0 %v2118_v22  ;;  %v412_v2 = vld [vmem:[%s2258_s9 + $0xa8] sm:$0xff]  ;;  %v413_v4 = vld [vmem:[%s2258_s9 + $0xb0] sm:$0xff]  ;;  %v414_v6 = vld [vmem:[%s2258_s9 + $0xb8] sm:$0xff] }
  0x20   : > { %2132 = vmatprep.subr.bf16.mxu1 %v2118_v22  ;;  %v444_v3 = vld [vmem:[%s2258_s9 + $0x1a8] sm:$0xff]  ;;  %v445_v5 = vld [vmem:[%s2258_s9 + $0x1b0] sm:$0xff]  ;;  %v446_v7 = vld [vmem:[%s2258_s9 + $0x1b8] sm:$0xff] }
  0x21   : > { %v415_v8 = vld [vmem:[%s2258_s9 + $0xc0] sm:$0xff]  ;;  %v416_v10 = vld [vmem:[%s2258_s9 + $0xc8] sm:$0xff]  ;;  %v417_v12 = vld [vmem:[%s2258_s9 + $0xd0] sm:$0xff] }
  0x22   : > { %2121 = vmatpush3.bf16.msra.mxu0 %v2118_v22  ;;  %v447_v9 = vld [vmem:[%s2258_s9 + $0x1c0] sm:$0xff]  ;;  %v448_v11 = vld [vmem:[%s2258_s9 + $0x1c8] sm:$0xff]  ;;  %v449_v13 = vld [vmem:[%s2258_s9 + $0x1d0] sm:$0xff] }
  0x23   : > { %2140 = vmatpush3.bf16.msra.mxu1 %v2118_v22  ;;  %2123 = vmatprep.subr.bf16.mxu0 %v2122_v25  ;;  %v418_v14 = vld [vmem:[%s2258_s9 + $0xd8] sm:$0xff]  ;;  %v419_v16 = vld [vmem:[%s2258_s9 + $0xe0] sm:$0xff]  ;;  %v420_v18 = vld [vmem:[%s2258_s9 + $0xe8] sm:$0xff] }
  0x24   : > { %2133 = vmatprep.subr.bf16.mxu1 %v2122_v25  ;;  %v450_v15 = vld [vmem:[%s2258_s9 + $0x1d8] sm:$0xff]  ;;  %v451_v17 = vld [vmem:[%s2258_s9 + $0x1e0] sm:$0xff]  ;;  %v452_v19 = vld [vmem:[%s2258_s9 + $0x1e8] sm:$0xff] }
  0x25   : > { %v421_v20 = vld [vmem:[%s2258_s9 + $0xf0] sm:$0xff]  ;;  %v422_v22 = vld [vmem:[%s2258_s9 + $0xf8] sm:$0xff] }
  0x26   : > { %2125 = vmatpush3.bf16.msra.mxu0 %v2122_v25  ;;  %v453_v21 = vld [vmem:[%s2258_s9 + $0x1f0] sm:$0xff]  ;;  %v454_v23 = vld [vmem:[%s2258_s9 + $0x1f8] sm:$0xff] }
  0x27   : > { %2141 = vmatpush3.bf16.msra.mxu1 %v2122_v25 }
  0x29   : > { %1999 = vmatmul.mubr.f32.vlgmr.msra.gmra.mrb[0].mxu0 %v392_v26 }
  0x2a   : > { %2047 = vmatmul.mubr.f32.vlgmr.msra.gmra.mrb[0].mxu1 %v424_v27  ;;  %2001 = vmatprep.mubr.f32.mxu0 %v393_v28 }
  0x2b   : > { %2049 = vmatprep.mubr.f32.mxu1 %v425_v29 }
  0x2d   : > { %2002 = vmatmul.mubr.f32.gmra.mrb[2].mxu0 %v394_v30 }
  0x2e   : > { %2050 = vmatmul.mubr.f32.gmra.mrb[2].mxu1 %v426_v31  ;;  %2004 = vmatprep.mubr.f32.mxu0 %v395_v32 }
  0x2f   : > { %2052 = vmatprep.mubr.f32.mxu1 %v427_v33 }
  0x31   : > { %2005 = vmatmul.mubr.f32.gmra.mrb[4].mxu0 %v396_v34 }
  0x32   : > { %2053 = vmatmul.mubr.f32.gmra.mrb[4].mxu1 %v428_v35  ;;  %2007 = vmatprep.mubr.f32.mxu0 %v397_v36 }
  0x33   : > { %2055 = vmatprep.mubr.f32.mxu1 %v429_v37 }
  0x35   : > { %2008 = vmatmul.mubr.f32.gmra.mrb[6].mxu0 %v398_v38 }
  0x36   : > { %2056 = vmatmul.mubr.f32.gmra.mrb[6].mxu1 %v430_v39  ;;  %2010 = vmatprep.mubr.f32.mxu0 %v399_v40 }
  0x37   : > { %2058 = vmatprep.mubr.f32.mxu1 %v431_v41 }
  0x39   : > { %2011 = vmatmul.mubr.f32.gmra.mrb[8].mxu0 %v400_v42 }
  0x3a   : > { %2059 = vmatmul.mubr.f32.gmra.mrb[8].mxu1 %v432_v43  ;;  %2013 = vmatprep.mubr.f32.mxu0 %v401_v44 }
  0x3b   : > { %2061 = vmatprep.mubr.f32.mxu1 %v433_v45 }
  0x3d   : > { %2014 = vmatmul.mubr.f32.gmra.mrb[10].mxu0 %v402_v46 }
  0x3e   : > { %2062 = vmatmul.mubr.f32.gmra.mrb[10].mxu1 %v434_v47  ;;  %2016 = vmatprep.mubr.f32.mxu0 %v403_v48 }
  0x3f   : > { %2064 = vmatprep.mubr.f32.mxu1 %v435_v49 }
  0x41   : > { %2017 = vmatmul.mubr.f32.gmra.mrb[12].mxu0 %v404_v50 }
  0x42   : > { %2065 = vmatmul.mubr.f32.gmra.mrb[12].mxu1 %v436_v51  ;;  %2019 = vmatprep.mubr.f32.mxu0 %v405_v52 }
  0x43   : > { %2067 = vmatprep.mubr.f32.mxu1 %v437_v53 }
  0x45   : > { %2020 = vmatmul.mubr.f32.gmra.mrb[14].mxu0 %v406_v54 }
  0x46   : > { %2068 = vmatmul.mubr.f32.gmra.mrb[14].mxu1 %v438_v55  ;;  %2022 = vmatprep.mubr.f32.mxu0 %v407_v56 }
  0x47   : > { %2070 = vmatprep.mubr.f32.mxu1 %v439_v57 }
  0x49   : > { %2023 = vmatmul.mubr.f32.gmra.mrb[16].mxu0 %v408_v58 }
  0x4a   : > { %2071 = vmatmul.mubr.f32.gmra.mrb[16].mxu1 %v440_v59  ;;  %2025 = vmatprep.mubr.f32.mxu0 %v409_v60 }
  0x4b   : > { %2073 = vmatprep.mubr.f32.mxu1 %v441_v61 }
  0x4d   : > { %2026 = vmatmul.mubr.f32.gmra.mrb[18].mxu0 %v410_v62 }
  0x4e   : > { %2074 = vmatmul.mubr.f32.gmra.mrb[18].mxu1 %v442_v63  ;;  %2028 = vmatprep.mubr.f32.mxu0 %v411_v0 }
  0x4f   : > { %2076 = vmatprep.mubr.f32.mxu1 %v443_v1 }
  0x51   : > { %2029 = vmatmul.mubr.f32.gmra.mrb[20].mxu0 %v412_v2 }
  0x52   : > { %2077 = vmatmul.mubr.f32.gmra.mrb[20].mxu1 %v444_v3  ;;  %2031 = vmatprep.mubr.f32.mxu0 %v413_v4 }
  0x53   : > { %2079 = vmatprep.mubr.f32.mxu1 %v445_v5 }
  0x55   : > { %2032 = vmatmul.mubr.f32.gmra.mrb[22].mxu0 %v414_v6 }
  0x56   : > { %2080 = vmatmul.mubr.f32.gmra.mrb[22].mxu1 %v446_v7  ;;  %2034 = vmatprep.mubr.f32.mxu0 %v415_v8 }
  0x57   : > { %2082 = vmatprep.mubr.f32.mxu1 %v447_v9 }
  0x59   : > { %2035 = vmatmul.mubr.f32.gmra.mrb[24].mxu0 %v416_v10 }
  0x5a   : > { %2083 = vmatmul.mubr.f32.gmra.mrb[24].mxu1 %v448_v11  ;;  %2037 = vmatprep.mubr.f32.mxu0 %v417_v12 }
  0x5b   : > { %2085 = vmatprep.mubr.f32.mxu1 %v449_v13 }
  0x5d   : > { %2038 = vmatmul.mubr.f32.gmra.mrb[26].mxu0 %v418_v14 }
  0x5e   : > { %2086 = vmatmul.mubr.f32.gmra.mrb[26].mxu1 %v450_v15  ;;  %2040 = vmatprep.mubr.f32.mxu0 %v419_v16 }
  0x5f   : > { %2088 = vmatprep.mubr.f32.mxu1 %v451_v17 }
  0x61   : > { %2041 = vmatmul.mubr.f32.gmra.mrb[28].mxu0 %v420_v18 }
  0x62   : > { %2089 = vmatmul.mubr.f32.gmra.mrb[28].mxu1 %v452_v19  ;;  %2043 = vmatprep.mubr.f32.mxu0 %v421_v20 }
  0x63   : > { %2091 = vmatprep.mubr.f32.mxu1 %v453_v21 }
  0x65   : > { %2044 = vmatmul.mubr.f32.gmra.mrb[30].mxu0 %v422_v22 }
  0x66   : > { %2092 = vmatmul.mubr.f32.gmra.mrb[30].mxu1 %v454_v23 }
  0xfc   : > { %v2000_v25 = vpop.f32.mrb[0].mxu0 }
  0xfd   : > { %v2048_v26 = vpop.f32.mrb[0].mxu1  ;;  %v1059_v27 = vadd.f32 %v2000_v25, %v2351_v24  ;;  %v537_v29 = vpop.f32.mrb[1].mxu0 }
  0xfe   : > { %v1091_v28 = vadd.f32 %v2048_v26, %v2351_v24  ;;  %v697_v30 = vpop.f32.mrb[1].mxu1  ;;  %v1058_v31 = vadd.f32 %v2351_v24, %v537_v29 }
  0xff   : > { %v1090_v32 = vadd.f32 %v2351_v24, %v697_v30 }
 0x100   : > { %v1698_v33 = vpack.c.bf16 %v1059_v27, %v1058_v31  ;;  %v2003_v35 = vpop.f32.mrb[2].mxu0 }
 0x101   : > { %v1778_v34 = vpack.c.bf16 %v1091_v28, %v1090_v32  ;;  %v2051_v36 = vpop.f32.mrb[2].mxu1  ;;  %v1061_v37 = vadd.f32 %v2003_v35, %v2351_v24  ;;  %v547_v39 = vpop.f32.mrb[3].mxu0 }
 0x102   : > { %v1093_v38 = vadd.f32 %v2051_v36, %v2351_v24  ;;  %v707_v40 = vpop.f32.mrb[3].mxu1  ;;  %1699 = vst [vmem:[%s2361_s8] sm:$0xff] %v1698_v33   ;;  %v1060_v41 = vadd.f32 %v2351_v24, %v547_v39 }
 0x103   : > { %1870 = vst [vmem:[%s2361_s8 + $0x80] sm:$0xff] %v1778_v34   ;;  %v1092_v42 = vadd.f32 %v2351_v24, %v707_v40 }
 0x104   : > { %v1703_v43 = vpack.c.bf16 %v1061_v37, %v1060_v41  ;;  %v2006_v45 = vpop.f32.mrb[4].mxu0 }
 0x105   : > { %v1783_v44 = vpack.c.bf16 %v1093_v38, %v1092_v42  ;;  %v2054_v46 = vpop.f32.mrb[4].mxu1  ;;  %v1063_v47 = vadd.f32 %v2006_v45, %v2351_v24  ;;  %v557_v49 = vpop.f32.mrb[5].mxu0 }
 0x106   : > { %v1095_v48 = vadd.f32 %v2054_v46, %v2351_v24  ;;  %v717_v50 = vpop.f32.mrb[5].mxu1  ;;  %1855 = vst [vmem:[%s2361_s8 + $0x8] sm:$0xff] %v1703_v43   ;;  %v1062_v51 = vadd.f32 %v2351_v24, %v557_v49 }
 0x107   : > { %1871 = vst [vmem:[%s2361_s8 + $0x88] sm:$0xff] %v1783_v44   ;;  %v1094_v52 = vadd.f32 %v2351_v24, %v717_v50 }
 0x108   : > { %v1708_v53 = vpack.c.bf16 %v1063_v47, %v1062_v51  ;;  %v2009_v55 = vpop.f32.mrb[6].mxu0 }
 0x109   : > { %v1788_v54 = vpack.c.bf16 %v1095_v48, %v1094_v52  ;;  %v2057_v56 = vpop.f32.mrb[6].mxu1  ;;  %v1065_v57 = vadd.f32 %v2009_v55, %v2351_v24  ;;  %v567_v59 = vpop.f32.mrb[7].mxu0 }
 0x10a   : > { %v1097_v58 = vadd.f32 %v2057_v56, %v2351_v24  ;;  %v727_v60 = vpop.f32.mrb[7].mxu1  ;;  %1856 = vst [vmem:[%s2361_s8 + $0x10] sm:$0xff] %v1708_v53   ;;  %v1064_v61 = vadd.f32 %v2351_v24, %v567_v59 }
 0x10b   : > { %1872 = vst [vmem:[%s2361_s8 + $0x90] sm:$0xff] %v1788_v54   ;;  %v1096_v62 = vadd.f32 %v2351_v24, %v727_v60 }
 0x10c   : > { %v1713_v63 = vpack.c.bf16 %v1065_v57, %v1064_v61  ;;  %v2012_v1 = vpop.f32.mrb[8].mxu0 }
 0x10d   : > { %v1793_v0 = vpack.c.bf16 %v1097_v58, %v1096_v62  ;;  %v2060_v2 = vpop.f32.mrb[8].mxu1  ;;  %v1067_v3 = vadd.f32 %v2012_v1, %v2351_v24  ;;  %v577_v5 = vpop.f32.mrb[9].mxu0 }
 0x10e   : > { %v1099_v4 = vadd.f32 %v2060_v2, %v2351_v24  ;;  %v737_v6 = vpop.f32.mrb[9].mxu1  ;;  %1857 = vst [vmem:[%s2361_s8 + $0x18] sm:$0xff] %v1713_v63   ;;  %v1066_v7 = vadd.f32 %v2351_v24, %v577_v5 }
 0x10f   : > { %1873 = vst [vmem:[%s2361_s8 + $0x98] sm:$0xff] %v1793_v0   ;;  %v1098_v8 = vadd.f32 %v2351_v24, %v737_v6 }
 0x110   : > { %v1718_v9 = vpack.c.bf16 %v1067_v3, %v1066_v7  ;;  %v2015_v11 = vpop.f32.mrb[10].mxu0 }
 0x111   : > { %v1798_v10 = vpack.c.bf16 %v1099_v4, %v1098_v8  ;;  %v2063_v12 = vpop.f32.mrb[10].mxu1  ;;  %v1069_v13 = vadd.f32 %v2015_v11, %v2351_v24  ;;  %v587_v15 = vpop.f32.mrb[11].mxu0 }
 0x112   : > { %v1101_v14 = vadd.f32 %v2063_v12, %v2351_v24  ;;  %v747_v16 = vpop.f32.mrb[11].mxu1  ;;  %1858 = vst [vmem:[%s2361_s8 + $0x20] sm:$0xff] %v1718_v9   ;;  %v1068_v17 = vadd.f32 %v2351_v24, %v587_v15 }
 0x113   : > { %1874 = vst [vmem:[%s2361_s8 + $0xa0] sm:$0xff] %v1798_v10   ;;  %v1100_v18 = vadd.f32 %v2351_v24, %v747_v16 }
 0x114   : > { %v1723_v19 = vpack.c.bf16 %v1069_v13, %v1068_v17  ;;  %v2018_v21 = vpop.f32.mrb[12].mxu0 }
 0x115   : > { %v1803_v20 = vpack.c.bf16 %v1101_v14, %v1100_v18  ;;  %v2066_v22 = vpop.f32.mrb[12].mxu1  ;;  %v1071_v23 = vadd.f32 %v2018_v21, %v2351_v24  ;;  %v597_v26 = vpop.f32.mrb[13].mxu0 }
 0x116   : > { %v1103_v25 = vadd.f32 %v2066_v22, %v2351_v24  ;;  %v757_v27 = vpop.f32.mrb[13].mxu1  ;;  %1859 = vst [vmem:[%s2361_s8 + $0x28] sm:$0xff] %v1723_v19   ;;  %v1070_v28 = vadd.f32 %v2351_v24, %v597_v26 }
 0x117   : > { %1875 = vst [vmem:[%s2361_s8 + $0xa8] sm:$0xff] %v1803_v20   ;;  %v1102_v29 = vadd.f32 %v2351_v24, %v757_v27 }
 0x118   : > { %v1728_v30 = vpack.c.bf16 %v1071_v23, %v1070_v28  ;;  %v2021_v32 = vpop.f32.mrb[14].mxu0 }
 0x119   : > { %v1808_v31 = vpack.c.bf16 %v1103_v25, %v1102_v29  ;;  %v2069_v33 = vpop.f32.mrb[14].mxu1  ;;  %v1073_v34 = vadd.f32 %v2021_v32, %v2351_v24  ;;  %v607_v36 = vpop.f32.mrb[15].mxu0 }
 0x11a   : > { %v1105_v35 = vadd.f32 %v2069_v33, %v2351_v24  ;;  %v767_v37 = vpop.f32.mrb[15].mxu1  ;;  %1860 = vst [vmem:[%s2361_s8 + $0x30] sm:$0xff] %v1728_v30   ;;  %v1072_v38 = vadd.f32 %v2351_v24, %v607_v36 }
 0x11b   : > { %1876 = vst [vmem:[%s2361_s8 + $0xb0] sm:$0xff] %v1808_v31   ;;  %v1104_v39 = vadd.f32 %v2351_v24, %v767_v37 }
 0x11c   : > { %v1733_v40 = vpack.c.bf16 %v1073_v34, %v1072_v38  ;;  %v2024_v42 = vpop.f32.mrb[16].mxu0 }
 0x11d   : > { %v1813_v41 = vpack.c.bf16 %v1105_v35, %v1104_v39  ;;  %v2072_v43 = vpop.f32.mrb[16].mxu1  ;;  %v1075_v44 = vadd.f32 %v2024_v42, %v2351_v24  ;;  %v617_v46 = vpop.f32.mrb[17].mxu0 }
 0x11e   : > { %v1107_v45 = vadd.f32 %v2072_v43, %v2351_v24  ;;  %v777_v47 = vpop.f32.mrb[17].mxu1  ;;  %1861 = vst [vmem:[%s2361_s8 + $0x38] sm:$0xff] %v1733_v40   ;;  %v1074_v48 = vadd.f32 %v2351_v24, %v617_v46 }
 0x11f   : > { %1877 = vst [vmem:[%s2361_s8 + $0xb8] sm:$0xff] %v1813_v41   ;;  %v1106_v49 = vadd.f32 %v2351_v24, %v777_v47 }
 0x120   : > { %v1738_v50 = vpack.c.bf16 %v1075_v44, %v1074_v48  ;;  %v2027_v52 = vpop.f32.mrb[18].mxu0 }
 0x121   : > { %v1818_v51 = vpack.c.bf16 %v1107_v45, %v1106_v49  ;;  %v2075_v53 = vpop.f32.mrb[18].mxu1  ;;  %v1077_v54 = vadd.f32 %v2027_v52, %v2351_v24  ;;  %v627_v56 = vpop.f32.mrb[19].mxu0 }
 0x122   : > { %v1109_v55 = vadd.f32 %v2075_v53, %v2351_v24  ;;  %v787_v57 = vpop.f32.mrb[19].mxu1  ;;  %1862 = vst [vmem:[%s2361_s8 + $0x40] sm:$0xff] %v1738_v50   ;;  %v1076_v58 = vadd.f32 %v2351_v24, %v627_v56 }
 0x123   : > { %1878 = vst [vmem:[%s2361_s8 + $0xc0] sm:$0xff] %v1818_v51   ;;  %v1108_v59 = vadd.f32 %v2351_v24, %v787_v57 }
 0x124   : > { %v1743_v60 = vpack.c.bf16 %v1077_v54, %v1076_v58  ;;  %v2030_v62 = vpop.f32.mrb[20].mxu0 }
 0x125   : > { %v1823_v61 = vpack.c.bf16 %v1109_v55, %v1108_v59  ;;  %v2078_v63 = vpop.f32.mrb[20].mxu1  ;;  %v1079_v0 = vadd.f32 %v2030_v62, %v2351_v24  ;;  %v637_v2 = vpop.f32.mrb[21].mxu0 }
 0x126   : > { %v1111_v1 = vadd.f32 %v2078_v63, %v2351_v24  ;;  %v797_v3 = vpop.f32.mrb[21].mxu1  ;;  %1863 = vst [vmem:[%s2361_s8 + $0x48] sm:$0xff] %v1743_v60   ;;  %v1078_v4 = vadd.f32 %v2351_v24, %v637_v2 }
 0x127   : > { %1879 = vst [vmem:[%s2361_s8 + $0xc8] sm:$0xff] %v1823_v61   ;;  %v1110_v5 = vadd.f32 %v2351_v24, %v797_v3 }
 0x128   : > { %v1748_v6 = vpack.c.bf16 %v1079_v0, %v1078_v4  ;;  %v2033_v8 = vpop.f32.mrb[22].mxu0 }
 0x129   : > { %v1828_v7 = vpack.c.bf16 %v1111_v1, %v1110_v5  ;;  %v2081_v9 = vpop.f32.mrb[22].mxu1  ;;  %v1081_v10 = vadd.f32 %v2033_v8, %v2351_v24  ;;  %v647_v12 = vpop.f32.mrb[23].mxu0 }
 0x12a   : > { %v1113_v11 = vadd.f32 %v2081_v9, %v2351_v24  ;;  %v807_v13 = vpop.f32.mrb[23].mxu1  ;;  %1864 = vst [vmem:[%s2361_s8 + $0x50] sm:$0xff] %v1748_v6   ;;  %v1080_v14 = vadd.f32 %v2351_v24, %v647_v12 }
 0x12b   : > { %1880 = vst [vmem:[%s2361_s8 + $0xd0] sm:$0xff] %v1828_v7   ;;  %v1112_v15 = vadd.f32 %v2351_v24, %v807_v13 }
 0x12c   : > { %v1753_v16 = vpack.c.bf16 %v1081_v10, %v1080_v14  ;;  %v2036_v18 = vpop.f32.mrb[24].mxu0 }
 0x12d   : > { %v1833_v17 = vpack.c.bf16 %v1113_v11, %v1112_v15  ;;  %v2084_v19 = vpop.f32.mrb[24].mxu1  ;;  %v1083_v20 = vadd.f32 %v2036_v18, %v2351_v24  ;;  %v657_v22 = vpop.f32.mrb[25].mxu0 }
 0x12e   : > { %v1115_v21 = vadd.f32 %v2084_v19, %v2351_v24  ;;  %v817_v23 = vpop.f32.mrb[25].mxu1  ;;  %1865 = vst [vmem:[%s2361_s8 + $0x58] sm:$0xff] %v1753_v16   ;;  %v1082_v25 = vadd.f32 %v2351_v24, %v657_v22 }
 0x12f   : > { %1881 = vst [vmem:[%s2361_s8 + $0xd8] sm:$0xff] %v1833_v17   ;;  %v1114_v26 = vadd.f32 %v2351_v24, %v817_v23 }
 0x130   : > { %v1758_v27 = vpack.c.bf16 %v1083_v20, %v1082_v25  ;;  %v2039_v29 = vpop.f32.mrb[26].mxu0 }
 0x131   : > { %v1838_v28 = vpack.c.bf16 %v1115_v21, %v1114_v26  ;;  %v2087_v30 = vpop.f32.mrb[26].mxu1  ;;  %v1085_v31 = vadd.f32 %v2039_v29, %v2351_v24  ;;  %v667_v33 = vpop.f32.mrb[27].mxu0 }
 0x132   : > { %v1117_v32 = vadd.f32 %v2087_v30, %v2351_v24  ;;  %v827_v34 = vpop.f32.mrb[27].mxu1  ;;  %1866 = vst [vmem:[%s2361_s8 + $0x60] sm:$0xff] %v1758_v27   ;;  %v1084_v35 = vadd.f32 %v2351_v24, %v667_v33 }
 0x133   : > { %1882 = vst [vmem:[%s2361_s8 + $0xe0] sm:$0xff] %v1838_v28   ;;  %v1116_v36 = vadd.f32 %v2351_v24, %v827_v34 }
 0x134   : > { %v1763_v37 = vpack.c.bf16 %v1085_v31, %v1084_v35  ;;  %v2042_v39 = vpop.f32.mrb[28].mxu0 }
 0x135   : > { %v1843_v38 = vpack.c.bf16 %v1117_v32, %v1116_v36  ;;  %v2090_v40 = vpop.f32.mrb[28].mxu1  ;;  %v1087_v41 = vadd.f32 %v2042_v39, %v2351_v24  ;;  %v677_v43 = vpop.f32.mrb[29].mxu0 }
 0x136   : > { %v1119_v42 = vadd.f32 %v2090_v40, %v2351_v24  ;;  %v837_v44 = vpop.f32.mrb[29].mxu1  ;;  %1867 = vst [vmem:[%s2361_s8 + $0x68] sm:$0xff] %v1763_v37   ;;  %v1086_v45 = vadd.f32 %v2351_v24, %v677_v43 }
 0x137   : > { %1883 = vst [vmem:[%s2361_s8 + $0xe8] sm:$0xff] %v1843_v38   ;;  %v1118_v46 = vadd.f32 %v2351_v24, %v837_v44 }
 0x138   : > { %v1768_v47 = vpack.c.bf16 %v1087_v41, %v1086_v45  ;;  %v2045_v49 = vpop.f32.mrb[30].mxu0 }
 0x139   : > { %v1848_v48 = vpack.c.bf16 %v1119_v42, %v1118_v46  ;;  %v2093_v50 = vpop.f32.mrb[30].mxu1  ;;  %v1089_v51 = vadd.f32 %v2045_v49, %v2351_v24  ;;  %v687_v53 = vpop.f32.mrb[31].mxu0 }
 0x13a   : > { %v1121_v52 = vadd.f32 %v2093_v50, %v2351_v24  ;;  %v847_v54 = vpop.f32.mrb[31].mxu1  ;;  %1868 = vst [vmem:[%s2361_s8 + $0x70] sm:$0xff] %v1768_v47   ;;  %v1088_v55 = vadd.f32 %v2351_v24, %v687_v53 }
 0x13b   : > { %1884 = vst [vmem:[%s2361_s8 + $0xf0] sm:$0xff] %v1848_v48   ;;  %v1120_v56 = vadd.f32 %v2351_v24, %v847_v54 }
 0x13c   : > { %v1773_v57 = vpack.c.bf16 %v1089_v51, %v1088_v55 }
 0x13d   : > { %v1853_v58 = vpack.c.bf16 %v1121_v52, %v1120_v56 }
 0x13e   : > { %1869 = vst [vmem:[%s2361_s8 + $0x78] sm:$0xff] %v1773_v57  }
 0x13f   : > { %1885 = vst [vmem:[%s2361_s8 + $0xf8] sm:$0xff] %v1853_v58  }
 0x140 PF: > { %s13_s14 = sadd.s32 1, %s2188_s14   ;;  %s2468_s12 = smov %s2184_s13 }
 0x141   : > { %p10_p5 = scmp.ge.s32.totalorder %s13_s14, 8   ;;  %s2469_s13 = smov %s2471_s15 }
 0x143   :  { %12 = sbr.rel (!%p10_p5) target bundleno = 2 (0x2), region = 76 }

// kernel: network_forward.12
= control target key start
LH: loop header
LB: loop body
LE: loop exit
PB: predicated region body
PF: predicated region fallthrough
CT: control target
= control target key end

     0   :  { %s813_s12 = smov 0   ;;  %s815_s13 = smov 0   ;;  %s930_s0 = inlined_call_operand.vmem [shape: f32[8,3072], index: 0, kind: input, shape index: {}]   ;;  %s931_s1 = inlined_call_operand.vmem [shape: f32[3072,128], index: 1, kind: input, shape index: {}]   ;;  %s932_s2 = inlined_call_operand.vmem [shape: f32[1,128], index: 2, kind: input, shape index: {}]   ;;  %s933_s3 = inlined_call_operand.vmem [shape: f32[8,128], index: 3, kind: output, shape index: {}]  }
   0x1   :  { %s817_s14 = smov 0  }
   0x2 LB: > { %s25_s15 = sadd.s32 1, %s786_s13  ;;  %p598_p0 = scmp.ge.s32.totalorder %s790_s14, 1  ;;  %s790_s14 = sphi %s817_s14, %s13_s14   ;;  %s786_s13 = sphi %s815_s13, %s935_s13   ;;  %s782_s12 = sphi %s813_s12, %s934_s12  }
   0x3   : > { %p26_p1 = scmp.ge.s32.totalorder %s25_s15, 6  ;;  %p189_p2 = scmp.lt.s32.totalorder %s790_s14, 7 }
   0x5   : > { %s937_s15 = smov (%p26_p1, %s25_s15), 0  ;;  %p190_p3 = pnand %p598_p0, %p189_p2 }
   0x6   : > { %s599_s16 = sshll.u32 (!%p190_p3), %s782_s12, 2  ;;  %s601_s17 = sshll.u32 (!%p190_p3), %s782_s12, 6 }
   0x7   : > { %193 = sbr.rel (%p190_p3) target bundleno = 291 (0x123), region = 32  ;;  %p233_p4 = scmp.lt.s32.totalorder (!%p190_p3), %s599_s16, 23 }
   0x8   : > { %p241_p5 = scmp.lt.s32.totalorder (!%p190_p3), %s601_s17, 383  ;;  %p603_p6 = scmp.ne.s32.totalorder (!%p190_p3), %s782_s12, 0 }
   0xe   : > { %s939_s16 = smov (!%p233_p4, %s599_s16), 23  ;;  %s941_s17 = smov (!%p241_p5, %s601_s17), 383 }
   0xf   : > { %s600_s18 = sshll.u32 %s939_s16, 3  ;;  %s602_s22 = sshll.u32 %s941_s17, 3  ;;  %v792_v0 = vmov (!%p603_p6), 0.0  }
  0x10   : > { %s838_s21 = scalar_lea.vmem %s930_s0, %s600_s18  ;;  %s843_s25 = scalar_lea.vmem %s931_s1, %s602_s22  ;;  %263 = vst [vmem:[#allocation2] sm:$0xff] (!%p603_p6), %v792_v0 }
  0x11   : > { %262 = sbr.rel (%p603_p6) target bundleno = 24 (0x18), region = 36 }
  0x18 PF: > { %v285_v1 = vld [vmem:[%s843_s25 + $0x80] sm:$0xff]  ;;  %v286_v2 = vld [vmem:[%s843_s25 + $0x88] sm:$0xff]  ;;  %v287_v12 = vld [vmem:[%s843_s25 + $0x90] sm:$0xff]  ;;  %p604_p7 = scmp.ne.s32.totalorder %s782_s12, 5 }
  0x19   : > { %v317_v3 = vld [vmem:[%s843_s25 + $0x180] sm:$0xff]  ;;  %v679_v4 = vpack.c.bf16 %v286_v2, %v285_v1  ;;  %v318_v5 = vld [vmem:[%s843_s25 + $0x188] sm:$0xff]  ;;  %v288_v14 = vld [vmem:[%s843_s25 + $0x98] sm:$0xff] }
  0x1a   : > { %v269_v6 = vld [vmem:[%s843_s25] sm:$0xff]  ;;  %v270_v7 = vld [vmem:[%s843_s25 + $0x8] sm:$0xff]  ;;  %v711_v8 = vpack.c.bf16 %v318_v5, %v317_v3  ;;  %v319_v15 = vld [vmem:[%s843_s25 + $0x190] sm:$0xff]  ;;  %v683_v17 = vpack.c.bf16 %v288_v14, %v287_v12 }
  0x1b   : > { %v681_v9 = vpack.c.bf16 %v270_v7, %v269_v6  ;;  %v301_v10 = vld [vmem:[%s843_s25 + $0x100] sm:$0xff]  ;;  %v302_v11 = vld [vmem:[%s843_s25 + $0x108] sm:$0xff]  ;;  %680 = vmatprep.subr.bf16.mxu0 %v679_v4  ;;  %v320_v16 = vld [vmem:[%s843_s25 + $0x198] sm:$0xff] }
  0x1c   : > { %v713_v13 = vpack.c.bf16 %v302_v11, %v301_v10  ;;  %712 = vmatprep.subr.bf16.mxu1 %v711_v8  ;;  %v715_v18 = vpack.c.bf16 %v320_v16, %v319_v15  ;;  %v271_v19 = vld [vmem:[%s843_s25 + $0x10] sm:$0xff]  ;;  %v272_v20 = vld [vmem:[%s843_s25 + $0x18] sm:$0xff]  ;;  %v289_v24 = vld [vmem:[%s843_s25 + $0xa0] sm:$0xff] }
  0x1d   : > { %682 = vmatpush3.bf16.msra.mxu0 %v681_v9  ;;  %v303_v21 = vld [vmem:[%s843_s25 + $0x110] sm:$0xff]  ;;  %v685_v22 = vpack.c.bf16 %v272_v20, %v271_v19  ;;  %v304_v23 = vld [vmem:[%s843_s25 + $0x118] sm:$0xff]  ;;  %v290_v25 = vld [vmem:[%s843_s25 + $0xa8] sm:$0xff] }
  0x1e   : > { %714 = vmatpush3.bf16.msra.mxu1 %v713_v13  ;;  %684 = vmatprep.subr.bf16.mxu0 %v683_v17  ;;  %v717_v26 = vpack.c.bf16 %v304_v23, %v303_v21  ;;  %v687_v27 = vpack.c.bf16 %v290_v25, %v289_v24  ;;  %v321_v28 = vld [vmem:[%s843_s25 + $0x1a0] sm:$0xff]  ;;  %v322_v29 = vld [vmem:[%s843_s25 + $0x1a8] sm:$0xff]  ;;  %v291_v36 = vld [vmem:[%s843_s25 + $0xb0] sm:$0xff] }
  0x1f   : > { %716 = vmatprep.subr.bf16.mxu1 %v715_v18  ;;  %v273_v30 = vld [vmem:[%s843_s25 + $0x20] sm:$0xff]  ;;  %v719_v31 = vpack.c.bf16 %v322_v29, %v321_v28  ;;  %v274_v32 = vld [vmem:[%s843_s25 + $0x28] sm:$0xff]  ;;  %v292_v37 = vld [vmem:[%s843_s25 + $0xb8] sm:$0xff] }
  0x20   : > { %v305_v33 = vld [vmem:[%s843_s25 + $0x120] sm:$0xff]  ;;  %v306_v34 = vld [vmem:[%s843_s25 + $0x128] sm:$0xff]  ;;  %v689_v35 = vpack.c.bf16 %v274_v32, %v273_v30  ;;  %v323_v38 = vld [vmem:[%s843_s25 + $0x1b0] sm:$0xff]  ;;  %v691_v40 = vpack.c.bf16 %v292_v37, %v291_v36 }
  0x21   : > { %686 = vmatpush3.bf16.msra.mxu0 %v685_v22  ;;  %v721_v39 = vpack.c.bf16 %v306_v34, %v305_v33  ;;  %v324_v41 = vld [vmem:[%s843_s25 + $0x1b8] sm:$0xff]  ;;  %v275_v42 = vld [vmem:[%s843_s25 + $0x30] sm:$0xff]  ;;  %v293_v47 = vld [vmem:[%s843_s25 + $0xc0] sm:$0xff] }
  0x22   : > { %718 = vmatpush3.bf16.msra.mxu1 %v717_v26  ;;  %688 = vmatprep.subr.bf16.mxu0 %v687_v27  ;;  %v276_v43 = vld [vmem:[%s843_s25 + $0x38] sm:$0xff]  ;;  %v723_v44 = vpack.c.bf16 %v324_v41, %v323_v38  ;;  %v307_v45 = vld [vmem:[%s843_s25 + $0x130] sm:$0xff]  ;;  %v294_v48 = vld [vmem:[%s843_s25 + $0xc8] sm:$0xff] }
  0x23   : > { %720 = vmatprep.subr.bf16.mxu1 %v719_v31  ;;  %v308_v46 = vld [vmem:[%s843_s25 + $0x138] sm:$0xff]  ;;  %v325_v49 = vld [vmem:[%s843_s25 + $0x1c0] sm:$0xff]  ;;  %v326_v50 = vld [vmem:[%s843_s25 + $0x1c8] sm:$0xff]  ;;  %v693_v51 = vpack.c.bf16 %v276_v43, %v275_v42  ;;  %v695_v53 = vpack.c.bf16 %v294_v48, %v293_v47 }
  0x24   : > { %v725_v52 = vpack.c.bf16 %v308_v46, %v307_v45  ;;  %v277_v54 = vld [vmem:[%s843_s25 + $0x40] sm:$0xff]  ;;  %v278_v55 = vld [vmem:[%s843_s25 + $0x48] sm:$0xff]  ;;  %v727_v57 = vpack.c.bf16 %v326_v50, %v325_v49  ;;  %v295_v59 = vld [vmem:[%s843_s25 + $0xd0] sm:$0xff] }
  0x25   : > { %690 = vmatpush3.bf16.msra.mxu0 %v689_v35  ;;  %v309_v56 = vld [vmem:[%s843_s25 + $0x140] sm:$0xff]  ;;  %v310_v58 = vld [vmem:[%s843_s25 + $0x148] sm:$0xff]  ;;  %v296_v60 = vld [vmem:[%s843_s25 + $0xd8] sm:$0xff]  ;;  %v697_v63 = vpack.c.bf16 %v278_v55, %v277_v54 }
  0x26   : > { %722 = vmatpush3.bf16.msra.mxu1 %v721_v39  ;;  %692 = vmatprep.subr.bf16.mxu0 %v691_v40  ;;  %v327_v61 = vld [vmem:[%s843_s25 + $0x1d0] sm:$0xff]  ;;  %v328_v62 = vld [vmem:[%s843_s25 + $0x1d8] sm:$0xff]  ;;  %v729_v0 = vpack.c.bf16 %v310_v58, %v309_v56  ;;  %v699_v1 = vpack.c.bf16 %v296_v60, %v295_v59  ;;  %v297_v7 = vld [vmem:[%s843_s25 + $0xe0] sm:$0xff] }
  0x27   : > { %724 = vmatprep.subr.bf16.mxu1 %v723_v44  ;;  %v279_v2 = vld [vmem:[%s843_s25 + $0x50] sm:$0xff]  ;;  %v280_v3 = vld [vmem:[%s843_s25 + $0x58] sm:$0xff]  ;;  %v731_v5 = vpack.c.bf16 %v328_v62, %v327_v61  ;;  %v298_v8 = vld [vmem:[%s843_s25 + $0xe8] sm:$0xff] }
  0x28   : > { %v311_v4 = vld [vmem:[%s843_s25 + $0x150] sm:$0xff]  ;;  %v312_v6 = vld [vmem:[%s843_s25 + $0x158] sm:$0xff]  ;;  %v329_v9 = vld [vmem:[%s843_s25 + $0x1e0] sm:$0xff]  ;;  %v701_v11 = vpack.c.bf16 %v280_v3, %v279_v2  ;;  %v703_v15 = vpack.c.bf16 %v298_v8, %v297_v7 }
  0x29   : > { %694 = vmatpush3.bf16.msra.mxu0 %v693_v51  ;;  %v330_v10 = vld [vmem:[%s843_s25 + $0x1e8] sm:$0xff]  ;;  %v281_v12 = vld [vmem:[%s843_s25 + $0x60] sm:$0xff]  ;;  %v733_v14 = vpack.c.bf16 %v312_v6, %v311_v4  ;;  %v268_v18 = vld [vmem:[%s838_s21 + $0x18] sm:$0xff] }
  0x2a   : > { %726 = vmatpush3.bf16.msra.mxu1 %v725_v52  ;;  %696 = vmatprep.subr.bf16.mxu0 %v695_v53  ;;  %v282_v13 = vld [vmem:[%s843_s25 + $0x68] sm:$0xff]  ;;  %v313_v16 = vld [vmem:[%s843_s25 + $0x160] sm:$0xff]  ;;  %v735_v19 = vpack.c.bf16 %v330_v10, %v329_v9  ;;  %v299_v21 = vld [vmem:[%s843_s25 + $0xf0] sm:$0xff] }
  0x2b   : > { %728 = vmatprep.subr.bf16.mxu1 %v727_v57  ;;  %v266_v17 = vld [vmem:[%s838_s21 + $0x8] sm:$0xff]  ;;  %v300_v22 = vld [vmem:[%s843_s25 + $0xf8] sm:$0xff]  ;;  %v331_v23 = vld [vmem:[%s843_s25 + $0x1f0] sm:$0xff]  ;;  %467 = vmatprep.mubr.f32.mxu1 %v268_v18  ;;  %v705_v25 = vpack.c.bf16 %v282_v13, %v281_v12 }
  0x2c   : > { %v314_v20 = vld [vmem:[%s843_s25 + $0x168] sm:$0xff]  ;;  %397 = vmatprep.mubr.f32.mxu0 %v266_v17  ;;  %v332_v24 = vld [vmem:[%s843_s25 + $0x1f8] sm:$0xff]  ;;  %v707_v27 = vpack.c.bf16 %v300_v22, %v299_v21  ;;  %v283_v28 = vld [vmem:[%s843_s25 + $0x70] sm:$0xff] }
  0x2d   : > { %698 = vmatpush3.bf16.msra.mxu0 %v697_v63  ;;  %v737_v26 = vpack.c.bf16 %v314_v20, %v313_v16  ;;  %v284_v29 = vld [vmem:[%s843_s25 + $0x78] sm:$0xff]  ;;  %v739_v30 = vpack.c.bf16 %v332_v24, %v331_v23  ;;  %v315_v31 = vld [vmem:[%s843_s25 + $0x170] sm:$0xff]  ;;  %v265_v35 = vld [vmem:[%s838_s21] sm:$0xff] }
  0x2e   : > { %730 = vmatpush3.bf16.msra.mxu1 %v729_v0  ;;  %700 = vmatprep.subr.bf16.mxu0 %v699_v1  ;;  %v316_v32 = vld [vmem:[%s843_s25 + $0x178] sm:$0xff]  ;;  %v709_v33 = vpack.c.bf16 %v284_v29, %v283_v28  ;;  %v267_v36 = vld [vmem:[%s838_s21 + $0x10] sm:$0xff]  ;;  %v264_v43 = vld [vmem:[#allocation2] sm:$0xff] }
  0x2f   : > { %732 = vmatprep.subr.bf16.mxu1 %v731_v5  ;;  %v741_v34 = vpack.c.bf16 %v316_v32, %v315_v31  ;;  %v605_v47 = vld [vmem:[%s932_s2] ss:$0 sm:$0xff] (!%p604_p7) }
  0x31   : > { %702 = vmatpush3.bf16.msra.mxu0 %v701_v11 }
  0x32   : > { %734 = vmatpush3.bf16.msra.mxu1 %v733_v14  ;;  %704 = vmatprep.subr.bf16.mxu0 %v703_v15 }
  0x33   : > { %736 = vmatprep.subr.bf16.mxu1 %v735_v19 }
  0x35   : > { %706 = vmatpush3.bf16.msra.mxu0 %v705_v25 }
  0x36   : > { %738 = vmatpush3.bf16.msra.mxu1 %v737_v26  ;;  %708 = vmatprep.subr.bf16.mxu0 %v707_v27 }
  0x37   : > { %740 = vmatprep.subr.bf16.mxu1 %v739_v30 }
  0x39   : > { %710 = vmatpush3.bf16.msra.mxu0 %v709_v33 }
  0x3a   : > { %742 = vmatpush3.bf16.msra.mxu1 %v741_v34 }
  0x3c   : > { %398 = vmatmul.mubr.f32.vlgmr.msra.gmra.mrb[0].mxu0 %v265_v35 }
  0x3d   : > { %468 = vmatmul.mubr.f32.vlgmr.msra.gmra.mrb[0].mxu1 %v267_v36 }
 0x10f   : > { %v641_v37 = vpop.f32.mrb[0].mxu0 }
 0x110   : > { %v676_v38 = vpop.f32.mrb[0].mxu1  ;;  %v642_v39 = vpop.f32.mrb[1].mxu0 }
 0x111   : > { %v643_v40 = vadd.f32 %v642_v39, %v641_v37  ;;  %v677_v41 = vpop.f32.mrb[1].mxu1 }
 0x112   : > { %v678_v42 = vadd.f32 %v677_v41, %v676_v38  ;;  %478 = sbr.rel (%p604_p7) target bundleno = 291 (0x123), region = 40 }
 0x114   : > { %v470_v44 = vadd.f32 %v678_v42, %v643_v40 }
 0x116   : > { %v473_v45 = vadd.f32 %v470_v44, %v264_v43 }
 0x118   : > { %474 = vst [vmem:[#allocation2] sm:$0xff] %v473_v45 }
 0x11f   : > { %v479_v46 = vld [vmem:[#allocation2] sm:$0xff] }
 0x120   : > { %v487_v48 = vadd.f32 %v605_v47, %v479_v46 }
 0x122   : > { %488 = vst [vmem:[%s933_s3] sm:$0xff] %v487_v48 }
 0x123 PF: > { %s13_s14 = sadd.s32 1, %s790_s14   ;;  %s934_s12 = smov %s786_s13 }
 0x124   : > { %p10_p8 = scmp.ge.s32.totalorder %s13_s14, 8   ;;  %s935_s13 = smov %s937_s15 }
 0x126   :  { %12 = sbr.rel (!%p10_p8) target bundleno = 2 (0x2), region = 76 }

// kernel: network_forward.11
= control target key start
LH: loop header
LB: loop body
LE: loop exit
PB: predicated region body
PF: predicated region fallthrough
CT: control target
= control target key end

     0   :  { %8 = vsyncpa [#allocation4], 0  ;;  %s5616_s0 = inlined_call_operand.hbm [shape: bf16[3072,3072], index: 0, kind: input, shape index: {}]   ;;  %s5617_s1 = inlined_call_operand.vmem [shape: bf16[3072,128], index: 1, kind: input, shape index: {}]   ;;  %s5618_s2 = inlined_call_operand.vmem [shape: f32[1,128], index: 2, kind: input, shape index: {}]   ;;  %s5619_s3 = inlined_call_operand.vmem [shape: f32[3072,128], index: 3, kind: output, shape index: {}]  }
   0x1   :  { %10 = vsyncpa [#allocation4 + $0x1], 0  ;;  %s4669_s12 = smov 0   ;;  %s4671_s13 = smov 0  }
   0x2   :  { %s4673_s14 = smov 0   ;;  %s4675_s15 = smov 0  }
   0x3   :  { %s4677_s16 = smov 0   ;;  %s4679_s17 = smov 0  }
   0x4   :  { %s4681_s18 = smov 0   ;;  %s4683_s19 = smov 0  }
   0x5 LB: > { %s4063_s20 = sadd.s32 4294967295, %s4641_s19   ;;  %s28_s21 = sadd.s32 1, %s4633_s17  ;;  %s4641_s19 = sphi %s4683_s19, %s16_s19   ;;  %s4637_s18 = sphi %s4681_s18, %s5677_s18   ;;  %s4633_s17 = sphi %s4679_s17, %s5676_s17   ;;  %s4629_s16 = sphi %s4677_s16, %s5675_s16   ;;  %s4625_s15 = sphi %s4675_s15, %s5674_s15   ;;  %s4621_s14 = sphi %s4673_s14, %s5673_s14   ;;  %s4617_s13 = sphi %s4671_s13, %s5672_s13   ;;  %s4613_s12 = sphi %s4669_s12, %s5671_s12  }
   0x6   : > { %p29_p0 = scmp.ge.s32.totalorder %s28_s21, 3  ;;  %s35_s22 = sadd.s32 1, %s4637_s18 }
   0x7   : > { %s44_s23 = sadd.s32 1, %s4621_s14  ;;  %p51_p1 = scmp.ne.s32.totalorder %s4621_s14, %s4617_s13 }
   0x8   : > { %s5679_s21 = smov (%p29_p0, %s28_s21), 0  ;;  %s5681_s22 = smov (!%p29_p0, %s35_s22), %s4637_s18 }
   0x9   : > { %s40_s24 = ssub.s32 %s4633_s17, %s5679_s21  ;;  %p52_p2 = scmp.eq.s32.totalorder %s4641_s19, 0 }
   0xa   : > { %p37_p3 = scmp.ge.s32.totalorder %s5681_s22, 6  ;;  %p57_p4 = scmp.ne.s32.totalorder %s4617_s13, %s4613_s12 }
   0xb   : > { %p4720_p5 = por %p52_p2, %p51_p1  ;;  %p58_p6 = scmp.eq.s32.totalorder %s4063_s20, 0 }
   0xc   : > { %s5683_s22 = smov (%p37_p3, %s5681_s22), 0  ;;  %p4411_p8 = scmp.lt.s32.totalorder %s4641_s19, 18 }
   0xd   : > { %p4726_p7 = por %p58_p6, %p57_p4  ;;  %s39_s27 = ssub.s32 %s4637_s18, %s5683_s22 }
   0xe   : > { %s41_s28 = sor.u32 %s40_s24, %s39_s27  ;;  %s169_s29 = sand.u32 1, %s4621_s14  }
   0xf   : > { %p42_p9 = scmp.eq.s32.totalorder %s41_s28, 0  ;;  %s4068_s30 = sshll.u32 %s169_s29, 11 }
  0x10   : > { %s4070_s4 = sshll.u32 %s4633_s17, 3  ;;  %s4404_s6 = smul.u32 1536, %s4637_s18 }
  0x11   : > { %s4736_s5 = scalar_select %p42_p9, %s4621_s14, %s44_s23  }
  0x12   : > { %s173_s7 = scalar_lea.vmem [#allocation3], %s4068_s30  ;;  %p4741_p10 = pnand %p4411_p8, %p4720_p5 }
  0x13   : > { %s183_s8 = sshll.u32 %s173_s7, 4  ;;  %s180_s10 = sadd.s32 %s4404_s6, %s4070_s4  ;;  %s4745_s8 = int_to_ptr.vmem [resolvable:$true] %s183_s8 }
  0x14   : > { %s4072_s11 = sshll.u32 %s180_s10, 6  ;;  %s4752_s23 = scalar_lea.sflag [#allocation4], %s169_s29 }
  0x15   : > { %s4750_s24 = scalar_lea.hbm %s5616_s0, %s4072_s11  ;;  %p4547_p12 = pneg %p4741_p10 }
  0x16   : > { %s4545_s25 = scalar_lea.hbm %s4750_s24, 32768  ;;  %s4550_s30 = scalar_lea.hbm %s5616_s0, 589824 }
  0x17   : > { %p4546_p11 = scmp.ne.s32.totalorder %s4750_s24, %s4545_s25  ;;  %p4551_p1 = scmp.lt.u32.totalorder %s4750_s24, %s5616_s0 }
  0x18   : > { %p4552_p2 = scmp.lt.u32.totalorder %s4550_s30, %s4545_s25  ;;  %p4554_p4 = scmp.lt.u32.totalorder %s4545_s25, %s4750_s24 }
  0x19   : > { %p4548_p13 = pnand %p4547_p12, %p4546_p11 }
  0x1a   : > { %p4553_p3 = por %p4552_p2, %p4551_p1 }
  0x1b   : > { %p4549_p0 = pneg %p4548_p13 }
  0x1c   : > { %p4555_p5 = por %p4554_p4, %p4553_p3 }
  0x1e   : > { %p4556_p6 = pnand %p4555_p5, %p4549_p0 }
  0x20   : > { %4559 = shalt.err (!%p4556_p6)
}
  0x21   : > { %s4560_s29 = scalar_lea.vmem %s4745_s8, 32768  ;;  %s4643_s7 = smov [#allocation3]  }
  0x22   : > { %p4561_p8 = scmp.ne.s32.totalorder %s4745_s8, %s4560_s29  ;;  %s4565_s10 = sshll.u32 %s4643_s7, 4  ;;  %s4566_s10 = int_to_ptr.vmem [resolvable:$false] %s4565_s10 }
  0x23   : > { %s4567_s11 = scalar_lea.vmem %s4566_s10, 65536  ;;  %p4568_p13 = scmp.lt.s32.totalorder %s4745_s8, %s4566_s10 }
  0x24   : > { %p4563_p9 = pnand %p4561_p8, %p4547_p12  ;;  %p4569_p1 = scmp.lt.s32.totalorder %s4567_s11, %s4560_s29 }
  0x26   : > { %p4564_p11 = pneg %p4563_p9  ;;  %p4570_p2 = por %p4569_p1, %p4568_p13 }
  0x28   : > { %p4571_p3 = pnand %p4570_p2, %p4564_p11 }
  0x2a   : > { %4574 = shalt.err (!%p4571_p3)
}
  0x2b   : > { %s4644_s12 = smov 1536   ;;  %s4645_s20 = smov 512  }
  0x2c   : > { %s4646_s25 = smov 32   ;;  %p4073_p12 = scmp.ge.s32.totalorder %s4641_s19, 1 }
  0x2d   : > { %4410 = dma.hbm_to_vmem [thread:$0]  (!%p4741_p10), %s4750_s24, 32768, %s4745_s8, %s4752_s23, %s4644_s12, %s4645_s20, %s4646_s25  }
  0x2e   : > { %p203_p0 = scmp.lt.s32.totalorder %s4641_s19, 19 }
  0x30   : > { %p204_p4 = pnand %p4073_p12, %p203_p0 }
  0x32   : > { %207 = sbr.rel (%p204_p4) target bundleno = 902 (0x386), region = 32 }
  0x39   : > { %s209_s27 = sand.u32 1, %s4617_s13  }
  0x3a   : > { %s4074_s28 = sshll.u32 %s209_s27, 11  ;;  %s210_s30 = scalar_lea.sflag [#allocation4], %s209_s27 }
  0x3b   : > { %s4783_s4 = scalar_lea.vmem [#allocation3], %s4074_s28 }
  0x3c   : > { %4608 = dma.done.wait (%p4726_p7), %s210_s30, 32768  }
  0x3d   : > { %4610 = vsyncadd (%p4726_p7), %s210_s30, 4294934528  ;;  %s4075_s9 = sshll.u32 %s4625_s15, 7  ;;  %s4077_s8 = sshll.u32 %s4629_s16, 6 }
  0x3e   : > { %p253_p10 = scmp.lt.s32.totalorder %s4075_s9, 383  ;;  %p265_p5 = scmp.lt.s32.totalorder %s4077_s8, 383 }
  0x3f   : > { %p4079_p7 = scmp.ne.s32.totalorder %s4625_s15, 0 }
  0x40   : > { %s5685_s9 = smov (!%p253_p10, %s4075_s9), 383  ;;  %s5687_s8 = smov (!%p265_p5, %s4077_s8), 383 }
  0x41   : > { %s4076_s24 = sshll.u32 %s5685_s9, 2  ;;  %s4078_s7 = sshll.u32 %s5687_s8, 3  ;;  %v4647_v0 = vmov (!%p4079_p7), 0.0  }
  0x42   : > { %s4794_s29 = scalar_lea.vmem %s5617_s1, %s4076_s24  ;;  %s4799_s26 = scalar_lea.vmem %s5619_s3, %s4078_s7  ;;  %278 = vst [vmem:[#allocation2] sm:$0xff] (!%p4079_p7), %v4647_v0  ;;  %279 = vst [vmem:[#allocation2 + $0x8] sm:$0xff] (!%p4079_p7), %v4647_v0 }
  0x43   : > { %277 = sbr.rel (%p4079_p7) target bundleno = 98 (0x62), region = 40  ;;  %280 = vst [vmem:[#allocation2 + $0x10] sm:$0xff] (!%p4079_p7), %v4647_v0  ;;  %281 = vst [vmem:[#allocation2 + $0x18] sm:$0xff] (!%p4079_p7), %v4647_v0 }
  0x44   : > { %282 = vst [vmem:[#allocation2 + $0x20] sm:$0xff] (!%p4079_p7), %v4647_v0  ;;  %283 = vst [vmem:[#allocation2 + $0x28] sm:$0xff] (!%p4079_p7), %v4647_v0 }
  0x45   : > { %284 = vst [vmem:[#allocation2 + $0x30] sm:$0xff] (!%p4079_p7), %v4647_v0  ;;  %285 = vst [vmem:[#allocation2 + $0x38] sm:$0xff] (!%p4079_p7), %v4647_v0 }
  0x46   : > { %286 = vst [vmem:[#allocation2 + $0x40] sm:$0xff] (!%p4079_p7), %v4647_v0  ;;  %287 = vst [vmem:[#allocation2 + $0x48] sm:$0xff] (!%p4079_p7), %v4647_v0 }
  0x47   : > { %288 = vst [vmem:[#allocation2 + $0x50] sm:$0xff] (!%p4079_p7), %v4647_v0  ;;  %289 = vst [vmem:[#allocation2 + $0x58] sm:$0xff] (!%p4079_p7), %v4647_v0 }
  0x48   : > { %290 = vst [vmem:[#allocation2 + $0x60] sm:$0xff] (!%p4079_p7), %v4647_v0  ;;  %291 = vst [vmem:[#allocation2 + $0x68] sm:$0xff] (!%p4079_p7), %v4647_v0 }
  0x49   : > { %292 = vst [vmem:[#allocation2 + $0x70] sm:$0xff] (!%p4079_p7), %v4647_v0  ;;  %293 = vst [vmem:[#allocation2 + $0x78] sm:$0xff] (!%p4079_p7), %v4647_v0 }
  0x4a   : > { %294 = vst [vmem:[#allocation2 + $0x80] sm:$0xff] %v4647_v0  ;;  %295 = vst [vmem:[#allocation2 + $0x88] sm:$0xff] %v4647_v0 }
  0x4b   : > { %296 = vst [vmem:[#allocation2 + $0x90] sm:$0xff] %v4647_v0  ;;  %297 = vst [vmem:[#allocation2 + $0x98] sm:$0xff] %v4647_v0 }
  0x4c   : > { %298 = vst [vmem:[#allocation2 + $0xa0] sm:$0xff] %v4647_v0  ;;  %299 = vst [vmem:[#allocation2 + $0xa8] sm:$0xff] %v4647_v0 }
  0x4d   : > { %300 = vst [vmem:[#allocation2 + $0xb0] sm:$0xff] %v4647_v0  ;;  %301 = vst [vmem:[#allocation2 + $0xb8] sm:$0xff] %v4647_v0 }
  0x4e   : > { %302 = vst [vmem:[#allocation2 + $0xc0] sm:$0xff] %v4647_v0  ;;  %303 = vst [vmem:[#allocation2 + $0xc8] sm:$0xff] %v4647_v0 }
  0x4f   : > { %304 = vst [vmem:[#allocation2 + $0xd0] sm:$0xff] %v4647_v0  ;;  %305 = vst [vmem:[#allocation2 + $0xd8] sm:$0xff] %v4647_v0 }
  0x50   : > { %306 = vst [vmem:[#allocation2 + $0xe0] sm:$0xff] %v4647_v0  ;;  %307 = vst [vmem:[#allocation2 + $0xe8] sm:$0xff] %v4647_v0 }
  0x51   : > { %308 = vst [vmem:[#allocation2 + $0xf0] sm:$0xff] %v4647_v0  ;;  %309 = vst [vmem:[#allocation2 + $0xf8] sm:$0xff] %v4647_v0 }
  0x52   : > { %310 = vst [vmem:[#allocation2 + $0x100] sm:$0xff] %v4647_v0  ;;  %311 = vst [vmem:[#allocation2 + $0x108] sm:$0xff] %v4647_v0 }
  0x53   : > { %312 = vst [vmem:[#allocation2 + $0x110] sm:$0xff] %v4647_v0  ;;  %313 = vst [vmem:[#allocation2 + $0x118] sm:$0xff] %v4647_v0 }
  0x54   : > { %314 = vst [vmem:[#allocation2 + $0x120] sm:$0xff] %v4647_v0  ;;  %315 = vst [vmem:[#allocation2 + $0x128] sm:$0xff] %v4647_v0 }
  0x55   : > { %316 = vst [vmem:[#allocation2 + $0x130] sm:$0xff] %v4647_v0  ;;  %317 = vst [vmem:[#allocation2 + $0x138] sm:$0xff] %v4647_v0 }
  0x56   : > { %318 = vst [vmem:[#allocation2 + $0x140] sm:$0xff] %v4647_v0  ;;  %319 = vst [vmem:[#allocation2 + $0x148] sm:$0xff] %v4647_v0 }
  0x57   : > { %320 = vst [vmem:[#allocation2 + $0x150] sm:$0xff] %v4647_v0  ;;  %321 = vst [vmem:[#allocation2 + $0x158] sm:$0xff] %v4647_v0 }
  0x58   : > { %322 = vst [vmem:[#allocation2 + $0x160] sm:$0xff] %v4647_v0  ;;  %323 = vst [vmem:[#allocation2 + $0x168] sm:$0xff] %v4647_v0 }
  0x59   : > { %324 = vst [vmem:[#allocation2 + $0x170] sm:$0xff] %v4647_v0  ;;  %325 = vst [vmem:[#allocation2 + $0x178] sm:$0xff] %v4647_v0 }
  0x5a   : > { %326 = vst [vmem:[#allocation2 + $0x180] sm:$0xff] %v4647_v0  ;;  %327 = vst [vmem:[#allocation2 + $0x188] sm:$0xff] %v4647_v0 }
  0x5b   : > { %328 = vst [vmem:[#allocation2 + $0x190] sm:$0xff] %v4647_v0  ;;  %329 = vst [vmem:[#allocation2 + $0x198] sm:$0xff] %v4647_v0 }
  0x5c   : > { %330 = vst [vmem:[#allocation2 + $0x1a0] sm:$0xff] %v4647_v0  ;;  %331 = vst [vmem:[#allocation2 + $0x1a8] sm:$0xff] %v4647_v0 }
  0x5d   : > { %332 = vst [vmem:[#allocation2 + $0x1b0] sm:$0xff] %v4647_v0  ;;  %333 = vst [vmem:[#allocation2 + $0x1b8] sm:$0xff] %v4647_v0 }
  0x5e   : > { %334 = vst [vmem:[#allocation2 + $0x1c0] sm:$0xff] %v4647_v0  ;;  %335 = vst [vmem:[#allocation2 + $0x1c8] sm:$0xff] %v4647_v0 }
  0x5f   : > { %336 = vst [vmem:[#allocation2 + $0x1d0] sm:$0xff] %v4647_v0  ;;  %337 = vst [vmem:[#allocation2 + $0x1d8] sm:$0xff] %v4647_v0 }
  0x60   : > { %338 = vst [vmem:[#allocation2 + $0x1e0] sm:$0xff] %v4647_v0  ;;  %339 = vst [vmem:[#allocation2 + $0x1e8] sm:$0xff] %v4647_v0 }
  0x61   : > { %340 = vst [vmem:[#allocation2 + $0x1f0] sm:$0xff] %v4647_v0  ;;  %341 = vst [vmem:[#allocation2 + $0x1f8] sm:$0xff] %v4647_v0 }
  0x62 PF: > { %v4481_v1 = vld [vmem:[%s4794_s29] sm:$0xff]   ;;  %v4648_v2 = vmov 0   ;;  %v4483_v4 = vld [vmem:[%s4794_s29 + $0x8] sm:$0xff]   ;;  %v4485_v6 = vld [vmem:[%s4794_s29 + $0x10] sm:$0xff]   ;;  %p4400_p6 = scmp.ne.s32.totalorder %s4625_s15, 2 }
  0x63   : > { %2454 = vmatprep.subr.bf16.mxu0 %v4648_v2  ;;  %2743 = vmatprep.subr.bf16.mxu1 %v4648_v2  ;;  %v4482_v3 = vld [vmem:[%s4794_s29 + $0x80] sm:$0xff]   ;;  %v4484_v5 = vld [vmem:[%s4794_s29 + $0x88] sm:$0xff]   ;;  %v4486_v7 = vld [vmem:[%s4794_s29 + $0x90] sm:$0xff]  }
  0x64   : > { %2455 = vmatpush1.bf16.msra.mxu0 %v4481_v1  ;;  %2744 = vmatpush1.bf16.msra.mxu1 %v4482_v3  ;;  %v4487_v8 = vld [vmem:[%s4794_s29 + $0x18] sm:$0xff]   ;;  %v4489_v10 = vld [vmem:[%s4794_s29 + $0x20] sm:$0xff]   ;;  %v4491_v12 = vld [vmem:[%s4794_s29 + $0x28] sm:$0xff]  }
  0x65   : > { %2456 = vmatprep.subr.bf16.mxu0 %v4648_v2  ;;  %2745 = vmatprep.subr.bf16.mxu1 %v4648_v2  ;;  %v4488_v9 = vld [vmem:[%s4794_s29 + $0x98] sm:$0xff]   ;;  %v4490_v11 = vld [vmem:[%s4794_s29 + $0xa0] sm:$0xff]   ;;  %v4492_v13 = vld [vmem:[%s4794_s29 + $0xa8] sm:$0xff]  }
  0x66   : > { %v4493_v14 = vld [vmem:[%s4794_s29 + $0x30] sm:$0xff]   ;;  %v4495_v16 = vld [vmem:[%s4794_s29 + $0x38] sm:$0xff]   ;;  %v4497_v18 = vld [vmem:[%s4794_s29 + $0x40] sm:$0xff]  }
  0x67   : > { %v4494_v15 = vld [vmem:[%s4794_s29 + $0xb0] sm:$0xff]   ;;  %v4496_v17 = vld [vmem:[%s4794_s29 + $0xb8] sm:$0xff]   ;;  %v4498_v19 = vld [vmem:[%s4794_s29 + $0xc0] sm:$0xff]  }
  0x68   : > { %2457 = vmatpush1.bf16.msra.mxu0 %v4483_v4  ;;  %2746 = vmatpush1.bf16.msra.mxu1 %v4484_v5  ;;  %v4903_v20 = vld [vmem:[%s4783_s4] sm:$0xff]  ;;  %v4909_v22 = vld [vmem:[%s4783_s4 + $0x8] sm:$0xff]  ;;  %v4501_v28 = vld [vmem:[%s4794_s29 + $0x50] sm:$0xff]  }
  0x69   : > { %2458 = vmatprep.subr.bf16.mxu0 %v4648_v2  ;;  %2747 = vmatprep.subr.bf16.mxu1 %v4648_v2  ;;  %v4906_v21 = vld [vmem:[%s4783_s4 + $0x20] sm:$0xff]  ;;  %v4914_v24 = vld [vmem:[%s4783_s4 + $0x28] sm:$0xff]  ;;  %v4502_v29 = vld [vmem:[%s4794_s29 + $0xd0] sm:$0xff]  }
  0x6a   : > { %v4081_v23 = vcombine.high %v4903_v20, %v4906_v21  ;;  %v4499_v25 = vld [vmem:[%s4794_s29 + $0x48] sm:$0xff]   ;;  %v4083_v26 = vcombine.high %v4909_v22, %v4914_v24  ;;  %v4503_v30 = vld [vmem:[%s4794_s29 + $0x58] sm:$0xff]   ;;  %v4505_v32 = vld [vmem:[%s4794_s29 + $0x60] sm:$0xff]   ;;  %v4080_v43 = vcombine.low %v4903_v20, %v4906_v21  ;;  %v4082_v45 = vcombine.low %v4909_v22, %v4914_v24 }
  0x6b   : > { %v4500_v27 = vld [vmem:[%s4794_s29 + $0xc8] sm:$0xff]   ;;  %v4504_v31 = vld [vmem:[%s4794_s29 + $0xd8] sm:$0xff]   ;;  %v4506_v33 = vld [vmem:[%s4794_s29 + $0xe0] sm:$0xff]  }
  0x6c   : > { %2459 = vmatpush1.bf16.msra.mxu0 %v4485_v6  ;;  %2748 = vmatpush1.bf16.msra.mxu1 %v4486_v7  ;;  %v4507_v34 = vld [vmem:[%s4794_s29 + $0x68] sm:$0xff]   ;;  %v4509_v36 = vld [vmem:[%s4794_s29 + $0x70] sm:$0xff]   ;;  %v4511_v38 = vld [vmem:[%s4794_s29 + $0x78] sm:$0xff]  }
  0x6d   : > { %2460 = vmatprep.subr.bf16.mxu0 %v4648_v2  ;;  %2749 = vmatprep.subr.bf16.mxu1 %v4648_v2  ;;  %v4508_v35 = vld [vmem:[%s4794_s29 + $0xe8] sm:$0xff]   ;;  %v4510_v37 = vld [vmem:[%s4794_s29 + $0xf0] sm:$0xff]   ;;  %v4512_v39 = vld [vmem:[%s4794_s29 + $0xf8] sm:$0xff]  }
  0x6e   : > { %2486 = vmatprep.mubr.bf16.mxu0 %v4081_v23  ;;  %2775 = vmatprep.mubr.bf16.mxu1 %v4083_v26  ;;  %v414_v40 = vld [vmem:[%s4783_s4 + $0x40] sm:$0xff]  ;;  %v415_v42 = vld [vmem:[%s4783_s4 + $0x48] sm:$0xff]  ;;  %v4517_v60 = vld [vmem:[%s4794_s29 + $0x110] sm:$0xff]  }
  0x6f   : > { %v418_v41 = vld [vmem:[%s4783_s4 + $0x60] sm:$0xff]  ;;  %v419_v44 = vld [vmem:[%s4783_s4 + $0x68] sm:$0xff]  ;;  %v4518_v61 = vld [vmem:[%s4794_s29 + $0x190] sm:$0xff]  }
  0x70   : > { %2461 = vmatpush1.bf16.msra.mxu0 %v4487_v8  ;;  %2750 = vmatpush1.bf16.msra.mxu1 %v4488_v9  ;;  %v4513_v46 = vld [vmem:[%s4794_s29 + $0x100] sm:$0xff]   ;;  %v4089_v48 = vcombine.high %v414_v40, %v418_v41  ;;  %v4091_v49 = vcombine.high %v415_v42, %v419_v44  ;;  %v4515_v52 = vld [vmem:[%s4794_s29 + $0x108] sm:$0xff]   ;;  %v4088_v56 = vcombine.low %v414_v40, %v418_v41  ;;  %v4519_v3 = vld [vmem:[%s4794_s29 + $0x118] sm:$0xff]  }
  0x71   : > { %2462 = vmatprep.subr.bf16.mxu0 %v4648_v2  ;;  %2751 = vmatprep.subr.bf16.mxu1 %v4648_v2  ;;  %v4514_v47 = vld [vmem:[%s4794_s29 + $0x180] sm:$0xff]   ;;  %v4516_v53 = vld [vmem:[%s4794_s29 + $0x188] sm:$0xff]   ;;  %v4090_v57 = vcombine.low %v415_v42, %v419_v44  ;;  %v4520_v4 = vld [vmem:[%s4794_s29 + $0x198] sm:$0xff]  }
  0x72   : > { %v422_v50 = vld [vmem:[%s4783_s4 + $0x80] sm:$0xff]  ;;  %v423_v54 = vld [vmem:[%s4783_s4 + $0x88] sm:$0xff]  ;;  %v4525_v21 = vld [vmem:[%s4794_s29 + $0x130] sm:$0xff]  }
  0x73   : > { %v426_v51 = vld [vmem:[%s4783_s4 + $0xa0] sm:$0xff]  ;;  %v427_v55 = vld [vmem:[%s4783_s4 + $0xa8] sm:$0xff]  ;;  %v4526_v22 = vld [vmem:[%s4794_s29 + $0x1b0] sm:$0xff]  }
  0x74   : > { %2463 = vmatpush1.bf16.msra.mxu0 %v4489_v10  ;;  %2752 = vmatpush1.bf16.msra.mxu1 %v4490_v11  ;;  %v4097_v58 = vcombine.high %v422_v50, %v426_v51  ;;  %v4099_v59 = vcombine.high %v423_v54, %v427_v55  ;;  %v430_v62 = vld [vmem:[%s4783_s4 + $0xc0] sm:$0xff]  ;;  %v431_v0 = vld [vmem:[%s4783_s4 + $0xc8] sm:$0xff]  ;;  %v4096_v5 = vcombine.low %v422_v50, %v426_v51 }
  0x75   : > { %2464 = vmatprep.subr.bf16.mxu0 %v4648_v2  ;;  %2753 = vmatprep.subr.bf16.mxu1 %v4648_v2  ;;  %v434_v63 = vld [vmem:[%s4783_s4 + $0xe0] sm:$0xff]  ;;  %v435_v1 = vld [vmem:[%s4783_s4 + $0xe8] sm:$0xff]  ;;  %v4098_v7 = vcombine.low %v423_v54, %v427_v55  ;;  %v4535_v55 = vld [vmem:[%s4794_s29 + $0x158] sm:$0xff]  }
  0x76   : > { %v4521_v6 = vld [vmem:[%s4794_s29 + $0x120] sm:$0xff]   ;;  %v4105_v8 = vcombine.high %v430_v62, %v434_v63  ;;  %v4107_v10 = vcombine.high %v431_v0, %v435_v1  ;;  %v447_v26 = vld [vmem:[%s4783_s4 + $0x148] sm:$0xff] }
  0x77   : > { %v4522_v9 = vld [vmem:[%s4794_s29 + $0x1a0] sm:$0xff]   ;;  %v4532_v40 = vld [vmem:[%s4794_s29 + $0x1c8] sm:$0xff]  }
  0x78   : > { %2465 = vmatpush1.bf16.msra.mxu0 %v4491_v12  ;;  %2754 = vmatpush1.bf16.msra.mxu1 %v4492_v13  ;;  %v438_v11 = vld [vmem:[%s4783_s4 + $0x100] sm:$0xff]  ;;  %v439_v13 = vld [vmem:[%s4783_s4 + $0x108] sm:$0xff] }
  0x79   : > { %2466 = vmatprep.subr.bf16.mxu0 %v4648_v2  ;;  %2755 = vmatprep.subr.bf16.mxu1 %v4648_v2  ;;  %v442_v12 = vld [vmem:[%s4783_s4 + $0x120] sm:$0xff]  ;;  %v467_v50 = vld [vmem:[%s4783_s4 + $0x1e8] sm:$0xff] }
  0x7a   : > { %v446_v23 = vld [vmem:[%s4783_s4 + $0x140] sm:$0xff] }
  0x7b   : > { %v450_v24 = vld [vmem:[%s4783_s4 + $0x160] sm:$0xff] }
  0x7c   : > { %2467 = vmatpush1.bf16.msra.mxu0 %v4493_v14  ;;  %2756 = vmatpush1.bf16.msra.mxu1 %v4494_v15  ;;  %v443_v14 = vld [vmem:[%s4783_s4 + $0x128] sm:$0xff]  ;;  %v4120_v41 = vcombine.low %v446_v23, %v450_v24 }
  0x7d   : > { %2468 = vmatprep.subr.bf16.mxu0 %v4648_v2  ;;  %2757 = vmatprep.subr.bf16.mxu1 %v4648_v2  ;;  %v4523_v15 = vld [vmem:[%s4794_s29 + $0x128] sm:$0xff]   ;;  %v4115_v20 = vcombine.high %v439_v13, %v443_v14 }
  0x80   : > { %2469 = vmatpush1.bf16.msra.mxu0 %v4495_v16  ;;  %2758 = vmatpush1.bf16.msra.mxu1 %v4496_v17  ;;  %v4524_v16 = vld [vmem:[%s4794_s29 + $0x1a8] sm:$0xff]   ;;  %v4104_v17 = vcombine.low %v430_v62, %v434_v63 }
  0x81   : > { %2470 = vmatprep.subr.bf16.mxu0 %v4648_v2  ;;  %2759 = vmatprep.subr.bf16.mxu1 %v4648_v2 }
  0x84   : > { %2471 = vmatpush1.bf16.msra.mxu0 %v4497_v18  ;;  %2760 = vmatpush1.bf16.msra.mxu1 %v4498_v19  ;;  %v4106_v18 = vcombine.low %v431_v0, %v435_v1  ;;  %v4113_v19 = vcombine.high %v438_v11, %v442_v12  ;;  %v478_v1 = vld [vmem:[%s4783_s4 + $0x240] sm:$0xff] }
  0x85   : > { %2472 = vmatprep.subr.bf16.mxu0 %v4648_v2  ;;  %2761 = vmatprep.subr.bf16.mxu1 %v4648_v2 }
  0x88   : > { %2473 = vmatpush1.bf16.msra.mxu0 %v4499_v25  ;;  %2762 = vmatpush1.bf16.msra.mxu1 %v4500_v27  ;;  %v4527_v25 = vld [vmem:[%s4794_s29 + $0x138] sm:$0xff]   ;;  %v451_v27 = vld [vmem:[%s4783_s4 + $0x168] sm:$0xff] }
  0x89   : > { %2474 = vmatprep.subr.bf16.mxu0 %v4648_v2  ;;  %2763 = vmatprep.subr.bf16.mxu1 %v4648_v2  ;;  %v4122_v42 = vcombine.low %v447_v26, %v451_v27 }
  0x8c   : > { %2475 = vmatpush1.bf16.msra.mxu0 %v4501_v28  ;;  %2764 = vmatpush1.bf16.msra.mxu1 %v4502_v29  ;;  %v4528_v28 = vld [vmem:[%s4794_s29 + $0x1b8] sm:$0xff]   ;;  %v4112_v29 = vcombine.low %v438_v11, %v442_v12  ;;  %v4538_v11 = vld [vmem:[%s4794_s29 + $0x1e0] sm:$0xff]  }
  0x8d   : > { %2476 = vmatprep.subr.bf16.mxu0 %v4648_v2  ;;  %2765 = vmatprep.subr.bf16.mxu1 %v4648_v2  ;;  %v486_v12 = vld [vmem:[%s4783_s4 + $0x280] sm:$0xff] }
  0x90   : > { %2477 = vmatpush1.bf16.msra.mxu0 %v4503_v30  ;;  %2766 = vmatpush1.bf16.msra.mxu1 %v4504_v31  ;;  %v4114_v30 = vcombine.low %v439_v13, %v443_v14  ;;  %v4121_v31 = vcombine.high %v446_v23, %v450_v24  ;;  %v490_v13 = vld [vmem:[%s4783_s4 + $0x2a0] sm:$0xff]  ;;  %v487_v14 = vld [vmem:[%s4783_s4 + $0x288] sm:$0xff] }
  0x91   : > { %2478 = vmatprep.subr.bf16.mxu0 %v4648_v2  ;;  %2767 = vmatprep.subr.bf16.mxu1 %v4648_v2  ;;  %v499_v23 = vld [vmem:[%s4783_s4 + $0x2e8] sm:$0xff]  ;;  %v4160_v24 = vcombine.low %v486_v12, %v490_v13 }
  0x94   : > { %2479 = vmatpush1.bf16.msra.mxu0 %v4505_v32  ;;  %2768 = vmatpush1.bf16.msra.mxu1 %v4506_v33  ;;  %v4123_v32 = vcombine.high %v447_v26, %v451_v27  ;;  %v4529_v33 = vld [vmem:[%s4794_s29 + $0x140] sm:$0xff]  }
  0x95   : > { %2480 = vmatprep.subr.bf16.mxu0 %v4648_v2  ;;  %2769 = vmatprep.subr.bf16.mxu1 %v4648_v2 }
  0x98   : > { %2481 = vmatpush1.bf16.msra.mxu0 %v4507_v34  ;;  %2770 = vmatpush1.bf16.msra.mxu1 %v4508_v35  ;;  %v4530_v34 = vld [vmem:[%s4794_s29 + $0x1c0] sm:$0xff]  }
  0x99   : > { %2482 = vmatprep.subr.bf16.mxu0 %v4648_v2  ;;  %2771 = vmatprep.subr.bf16.mxu1 %v4648_v2  ;;  %v454_v35 = vld [vmem:[%s4783_s4 + $0x180] sm:$0xff] }
  0x9c   : > { %2483 = vmatpush1.bf16.msra.mxu0 %v4509_v36  ;;  %2772 = vmatpush1.bf16.msra.mxu1 %v4510_v37  ;;  %v458_v36 = vld [vmem:[%s4783_s4 + $0x1a0] sm:$0xff]  ;;  %v4531_v37 = vld [vmem:[%s4794_s29 + $0x148] sm:$0xff]  }
  0x9d   : > { %2484 = vmatprep.subr.bf16.mxu0 %v4648_v2  ;;  %2773 = vmatprep.subr.bf16.mxu1 %v4648_v2  ;;  %v4128_v51 = vcombine.low %v454_v35, %v458_v36 }
  0xa0   : > { %2485 = vmatpush1.bf16.msra.mxu0 %v4511_v38  ;;  %2774 = vmatpush1.bf16.msra.mxu1 %v4512_v39  ;;  %v455_v38 = vld [vmem:[%s4783_s4 + $0x188] sm:$0xff] }
  0xa1   : > { %3032 = vmatprep.subr.bf16.mxu0 %v4648_v2  ;;  %3321 = vmatprep.subr.bf16.mxu1 %v4648_v2  ;;  %v459_v39 = vld [vmem:[%s4783_s4 + $0x1a8] sm:$0xff] }
  0xa2   : > { %v4131_v44 = vcombine.high %v455_v38, %v459_v39 }
  0xa3   : > { %2487 = vmatmul.mubr.bf16.vlgmr.msra.gmra.mrb[0].mxu0 %v4080_v43  ;;  %2776 = vmatmul.mubr.bf16.vlgmr.msra.gmra.mrb[0].mxu1 %v4082_v45  ;;  %v4129_v43 = vcombine.high %v454_v35, %v458_v36  ;;  %v4533_v45 = vld [vmem:[%s4794_s29 + $0x150] sm:$0xff]   ;;  %v4540_v36 = vld [vmem:[%s4794_s29 + $0x1e8] sm:$0xff]  }
  0xa4   : > { %3033 = vmatpush1.bf16.msra.mxu0 %v4513_v46  ;;  %3322 = vmatpush1.bf16.msra.mxu1 %v4514_v47  ;;  %v4534_v46 = vld [vmem:[%s4794_s29 + $0x1d0] sm:$0xff]   ;;  %v462_v47 = vld [vmem:[%s4783_s4 + $0x1c0] sm:$0xff] }
  0xa5   : > { %2494 = vmatprep.mubr.bf16.mxu0 %v4089_v48  ;;  %2783 = vmatprep.mubr.bf16.mxu1 %v4091_v49  ;;  %v466_v48 = vld [vmem:[%s4783_s4 + $0x1e0] sm:$0xff]  ;;  %v463_v49 = vld [vmem:[%s4783_s4 + $0x1c8] sm:$0xff] }
  0xa6   : > { %3034 = vmatprep.subr.bf16.mxu0 %v4648_v2  ;;  %3323 = vmatprep.subr.bf16.mxu1 %v4648_v2  ;;  %v4139_v54 = vcombine.high %v463_v49, %v467_v50  ;;  %v4138_v62 = vcombine.low %v463_v49, %v467_v50  ;;  %v519_v49 = vld [vmem:[%s4783_s4 + $0x388] sm:$0xff] }
  0xa7   : > { %v523_v50 = vld [vmem:[%s4783_s4 + $0x3a8] sm:$0xff] }
  0xa8   : > { %3035 = vmatpush1.bf16.msra.mxu0 %v4515_v52  ;;  %3324 = vmatpush1.bf16.msra.mxu1 %v4516_v53  ;;  %v4130_v52 = vcombine.low %v455_v38, %v459_v39  ;;  %v4137_v53 = vcombine.high %v462_v47, %v466_v48  ;;  %v510_v38 = vld [vmem:[%s4783_s4 + $0x340] sm:$0xff] }
  0xa9   : > { %3036 = vmatprep.subr.bf16.mxu0 %v4648_v2  ;;  %3325 = vmatprep.subr.bf16.mxu1 %v4648_v2  ;;  %v514_v39 = vld [vmem:[%s4783_s4 + $0x360] sm:$0xff] }
  0xab   : > { %2495 = vmatmul.mubr.bf16.gmra.mrb[4].mxu0 %v4088_v56  ;;  %2784 = vmatmul.mubr.bf16.gmra.mrb[4].mxu1 %v4090_v57  ;;  %v4536_v56 = vld [vmem:[%s4794_s29 + $0x1d8] sm:$0xff]   ;;  %v470_v57 = vld [vmem:[%s4783_s4 + $0x200] sm:$0xff] }
  0xac   : > { %2502 = vmatprep.mubr.bf16.mxu0 %v4097_v58  ;;  %2791 = vmatprep.mubr.bf16.mxu1 %v4099_v59  ;;  %v474_v58 = vld [vmem:[%s4783_s4 + $0x220] sm:$0xff]  ;;  %v471_v59 = vld [vmem:[%s4783_s4 + $0x208] sm:$0xff] }
  0xad   : > { %3037 = vmatpush1.bf16.msra.mxu0 %v4517_v60  ;;  %3326 = vmatpush1.bf16.msra.mxu1 %v4518_v61  ;;  %v475_v60 = vld [vmem:[%s4783_s4 + $0x228] sm:$0xff]  ;;  %v4136_v61 = vcombine.low %v462_v47, %v466_v48  ;;  %v4145_v63 = vcombine.high %v470_v57, %v474_v58  ;;  %v518_v47 = vld [vmem:[%s4783_s4 + $0x380] sm:$0xff] }
  0xae   : > { %3038 = vmatprep.subr.bf16.mxu0 %v4648_v2  ;;  %3327 = vmatprep.subr.bf16.mxu1 %v4648_v2  ;;  %v4147_v0 = vcombine.high %v471_v59, %v475_v60  ;;  %v522_v48 = vld [vmem:[%s4783_s4 + $0x3a0] sm:$0xff] }
  0xb1   : > { %3039 = vmatpush1.bf16.msra.mxu0 %v4519_v3  ;;  %3328 = vmatpush1.bf16.msra.mxu1 %v4520_v4  ;;  %v482_v3 = vld [vmem:[%s4783_s4 + $0x260] sm:$0xff]  ;;  %v479_v4 = vld [vmem:[%s4783_s4 + $0x248] sm:$0xff] }
  0xb2   : > { %3040 = vmatprep.subr.bf16.mxu0 %v4648_v2  ;;  %3329 = vmatprep.subr.bf16.mxu1 %v4648_v2 }
  0xb3   : > { %2503 = vmatmul.mubr.bf16.gmra.mrb[8].mxu0 %v4096_v5  ;;  %2792 = vmatmul.mubr.bf16.gmra.mrb[8].mxu1 %v4098_v7  ;;  %v483_v5 = vld [vmem:[%s4783_s4 + $0x268] sm:$0xff]  ;;  %v4146_v7 = vcombine.low %v471_v59, %v475_v60  ;;  %v4192_v60 = vcombine.low %v518_v47, %v522_v48 }
  0xb4   : > { %2510 = vmatprep.mubr.bf16.mxu0 %v4105_v8  ;;  %2799 = vmatprep.mubr.bf16.mxu1 %v4107_v10  ;;  %v4153_v8 = vcombine.high %v478_v1, %v482_v3  ;;  %v4537_v10 = vld [vmem:[%s4794_s29 + $0x160] sm:$0xff]   ;;  %v531_v59 = vld [vmem:[%s4783_s4 + $0x3e8] sm:$0xff] }
  0xb5   : > { %3041 = vmatpush1.bf16.msra.mxu0 %v4521_v6  ;;  %3330 = vmatpush1.bf16.msra.mxu1 %v4522_v9  ;;  %v4144_v6 = vcombine.low %v470_v57, %v474_v58  ;;  %v4155_v9 = vcombine.high %v479_v4, %v483_v5  ;;  %v530_v57 = vld [vmem:[%s4783_s4 + $0x3e0] sm:$0xff]  ;;  %v527_v58 = vld [vmem:[%s4783_s4 + $0x3c8] sm:$0xff] }
  0xb6   : > { %3042 = vmatprep.subr.bf16.mxu0 %v4648_v2  ;;  %3331 = vmatprep.subr.bf16.mxu1 %v4648_v2 }
  0xb9   : > { %3043 = vmatpush1.bf16.msra.mxu0 %v4523_v15  ;;  %3332 = vmatpush1.bf16.msra.mxu1 %v4524_v16  ;;  %v491_v15 = vld [vmem:[%s4783_s4 + $0x2a8] sm:$0xff]  ;;  %v4152_v16 = vcombine.low %v478_v1, %v482_v3  ;;  %v538_v1 = vld [vmem:[%s4783_s4 + $0x420] sm:$0xff] }
  0xba   : > { %3044 = vmatprep.subr.bf16.mxu0 %v4648_v2  ;;  %3333 = vmatprep.subr.bf16.mxu1 %v4648_v2  ;;  %v535_v3 = vld [vmem:[%s4783_s4 + $0x408] sm:$0xff] }
  0xbb   : > { %2511 = vmatmul.mubr.bf16.gmra.mrb[12].mxu0 %v4104_v17  ;;  %2800 = vmatmul.mubr.bf16.gmra.mrb[12].mxu1 %v4106_v18  ;;  %v4154_v17 = vcombine.low %v479_v4, %v483_v5  ;;  %v4161_v18 = vcombine.high %v486_v12, %v490_v13  ;;  %v539_v4 = vld [vmem:[%s4783_s4 + $0x428] sm:$0xff] }
  0xbc   : > { %2518 = vmatprep.mubr.bf16.mxu0 %v4113_v19  ;;  %2807 = vmatprep.mubr.bf16.mxu1 %v4115_v20  ;;  %v4163_v19 = vcombine.high %v487_v14, %v491_v15  ;;  %v494_v20 = vld [vmem:[%s4783_s4 + $0x2c0] sm:$0xff]  ;;  %v543_v12 = vld [vmem:[%s4783_s4 + $0x448] sm:$0xff] }
  0xbd   : > { %3045 = vmatpush1.bf16.msra.mxu0 %v4525_v21  ;;  %3334 = vmatpush1.bf16.msra.mxu1 %v4526_v22  ;;  %v498_v21 = vld [vmem:[%s4783_s4 + $0x2e0] sm:$0xff]  ;;  %v495_v22 = vld [vmem:[%s4783_s4 + $0x2c8] sm:$0xff] }
  0xbe   : > { %3046 = vmatprep.subr.bf16.mxu0 %v4648_v2  ;;  %3335 = vmatprep.subr.bf16.mxu1 %v4648_v2  ;;  %v4169_v26 = vcombine.high %v494_v20, %v498_v21  ;;  %v4171_v27 = vcombine.high %v495_v22, %v499_v23  ;;  %v547_v13 = vld [vmem:[%s4783_s4 + $0x468] sm:$0xff] }
  0xc1   : > { %3047 = vmatpush1.bf16.msra.mxu0 %v4527_v25  ;;  %3336 = vmatpush1.bf16.msra.mxu1 %v4528_v28  ;;  %v4162_v25 = vcombine.low %v487_v14, %v491_v15  ;;  %v4539_v28 = vld [vmem:[%s4794_s29 + $0x168] sm:$0xff]   ;;  %v4210_v15 = vcombine.low %v535_v3, %v539_v4 }
  0xc2   : > { %3048 = vmatprep.subr.bf16.mxu0 %v4648_v2  ;;  %3337 = vmatprep.subr.bf16.mxu1 %v4648_v2 }
  0xc3   : > { %2519 = vmatmul.mubr.bf16.gmra.mrb[16].mxu0 %v4112_v29  ;;  %2808 = vmatmul.mubr.bf16.gmra.mrb[16].mxu1 %v4114_v30  ;;  %v502_v29 = vld [vmem:[%s4783_s4 + $0x300] sm:$0xff] }
  0xc4   : > { %2526 = vmatprep.mubr.bf16.mxu0 %v4121_v31  ;;  %2815 = vmatprep.mubr.bf16.mxu1 %v4123_v32  ;;  %v506_v30 = vld [vmem:[%s4783_s4 + $0x320] sm:$0xff]  ;;  %v503_v31 = vld [vmem:[%s4783_s4 + $0x308] sm:$0xff] }
  0xc5   : > { %3049 = vmatpush1.bf16.msra.mxu0 %v4529_v33  ;;  %3338 = vmatpush1.bf16.msra.mxu1 %v4530_v34  ;;  %v507_v32 = vld [vmem:[%s4783_s4 + $0x328] sm:$0xff]  ;;  %v4168_v33 = vcombine.low %v494_v20, %v498_v21  ;;  %v4170_v34 = vcombine.low %v495_v22, %v499_v23  ;;  %v4177_v35 = vcombine.high %v502_v29, %v506_v30 }
  0xc6   : > { %3050 = vmatprep.subr.bf16.mxu0 %v4648_v2  ;;  %3339 = vmatprep.subr.bf16.mxu1 %v4648_v2  ;;  %v551_v20 = vld [vmem:[%s4783_s4 + $0x488] sm:$0xff]  ;;  %v4218_v23 = vcombine.low %v543_v12, %v547_v13 }
  0xc7   : > { %v555_v21 = vld [vmem:[%s4783_s4 + $0x4a8] sm:$0xff] }
  0xc9   : > { %3051 = vmatpush1.bf16.msra.mxu0 %v4531_v37  ;;  %3340 = vmatpush1.bf16.msra.mxu1 %v4532_v40  ;;  %v4179_v37 = vcombine.high %v503_v31, %v507_v32  ;;  %v511_v40 = vld [vmem:[%s4783_s4 + $0x348] sm:$0xff] }
  0xca   : > { %3052 = vmatprep.subr.bf16.mxu0 %v4648_v2  ;;  %3341 = vmatprep.subr.bf16.mxu1 %v4648_v2 }
  0xcb   : > { %2527 = vmatmul.mubr.bf16.gmra.mrb[20].mxu0 %v4120_v41  ;;  %2816 = vmatmul.mubr.bf16.gmra.mrb[20].mxu1 %v4122_v42  ;;  %v515_v41 = vld [vmem:[%s4783_s4 + $0x368] sm:$0xff]  ;;  %v4176_v42 = vcombine.low %v502_v29, %v506_v30 }
  0xcc   : > { %2534 = vmatprep.mubr.bf16.mxu0 %v4129_v43  ;;  %2823 = vmatprep.mubr.bf16.mxu1 %v4131_v44  ;;  %v4178_v43 = vcombine.low %v503_v31, %v507_v32  ;;  %v4185_v44 = vcombine.high %v510_v38, %v514_v39  ;;  %v563_v29 = vld [vmem:[%s4783_s4 + $0x4e8] sm:$0xff]  ;;  %v4226_v31 = vcombine.low %v551_v20, %v555_v21 }
  0xcd   : > { %3053 = vmatpush1.bf16.msra.mxu0 %v4533_v45  ;;  %3342 = vmatpush1.bf16.msra.mxu1 %v4534_v46  ;;  %v4187_v45 = vcombine.high %v511_v40, %v515_v41  ;;  %v4541_v46 = vld [vmem:[%s4794_s29 + $0x170] sm:$0xff]  }
  0xce   : > { %3054 = vmatprep.subr.bf16.mxu0 %v4648_v2  ;;  %3343 = vmatprep.subr.bf16.mxu1 %v4648_v2 }
  0xd1   : > { %3055 = vmatpush1.bf16.msra.mxu0 %v4535_v55  ;;  %3344 = vmatpush1.bf16.msra.mxu1 %v4536_v56  ;;  %v4195_v55 = vcombine.high %v519_v49, %v523_v50  ;;  %v526_v56 = vld [vmem:[%s4783_s4 + $0x3c0] sm:$0xff] }
  0xd2   : > { %3056 = vmatprep.subr.bf16.mxu0 %v4648_v2  ;;  %3345 = vmatprep.subr.bf16.mxu1 %v4648_v2  ;;  %v4200_v5 = vcombine.low %v526_v56, %v530_v57 }
  0xd3   : > { %2535 = vmatmul.mubr.bf16.gmra.mrb[24].mxu0 %v4128_v51  ;;  %2824 = vmatmul.mubr.bf16.gmra.mrb[24].mxu1 %v4130_v52  ;;  %v4184_v51 = vcombine.low %v510_v38, %v514_v39  ;;  %v4186_v52 = vcombine.low %v511_v40, %v515_v41 }
  0xd4   : > { %2542 = vmatprep.mubr.bf16.mxu0 %v4137_v53  ;;  %2831 = vmatprep.mubr.bf16.mxu1 %v4139_v54  ;;  %v4193_v53 = vcombine.high %v518_v47, %v522_v48  ;;  %v4542_v54 = vld [vmem:[%s4794_s29 + $0x1f0] sm:$0xff]  }
  0xd5   : > { %3057 = vmatpush1.bf16.msra.mxu0 %v4537_v10  ;;  %3346 = vmatpush1.bf16.msra.mxu1 %v4538_v11  ;;  %v542_v10 = vld [vmem:[%s4783_s4 + $0x440] sm:$0xff] }
  0xd6   : > { %3058 = vmatprep.subr.bf16.mxu0 %v4648_v2  ;;  %3347 = vmatprep.subr.bf16.mxu1 %v4648_v2  ;;  %v546_v11 = vld [vmem:[%s4783_s4 + $0x460] sm:$0xff] }
  0xd7   : > { %v4216_v22 = vcombine.low %v542_v10, %v546_v11 }
  0xd9   : > { %3059 = vmatpush1.bf16.msra.mxu0 %v4539_v28  ;;  %3348 = vmatpush1.bf16.msra.mxu1 %v4540_v36  ;;  %v559_v28 = vld [vmem:[%s4783_s4 + $0x4c8] sm:$0xff] }
  0xda   : > { %3060 = vmatprep.subr.bf16.mxu0 %v4648_v2  ;;  %3349 = vmatprep.subr.bf16.mxu1 %v4648_v2  ;;  %v567_v36 = vld [vmem:[%s4783_s4 + $0x508] sm:$0xff]  ;;  %v4234_v39 = vcombine.low %v559_v28, %v563_v29 }
  0xdb   : > { %2543 = vmatmul.mubr.bf16.gmra.mrb[28].mxu0 %v4136_v61  ;;  %2832 = vmatmul.mubr.bf16.gmra.mrb[28].mxu1 %v4138_v62  ;;  %v4194_v61 = vcombine.low %v519_v49, %v523_v50  ;;  %v4201_v62 = vcombine.high %v526_v56, %v530_v57  ;;  %v582_v50 = vld [vmem:[%s4783_s4 + $0x580] sm:$0xff] }
  0xdc   : > { %2550 = vmatprep.mubr.bf16.mxu0 %v4145_v63  ;;  %2839 = vmatprep.mubr.bf16.mxu1 %v4147_v0  ;;  %v4203_v63 = vcombine.high %v527_v58, %v531_v59  ;;  %v534_v0 = vld [vmem:[%s4783_s4 + $0x400] sm:$0xff] }
  0xdd   : > { %3061 = vmatpush1.bf16.msra.mxu0 %v4541_v46  ;;  %3350 = vmatpush1.bf16.msra.mxu1 %v4542_v54  ;;  %v4208_v14 = vcombine.low %v534_v0, %v538_v1 }
  0xde   : > { %3062 = vmatprep.subr.bf16.mxu0 %v4648_v2  ;;  %3351 = vmatprep.subr.bf16.mxu1 %v4648_v2  ;;  %v4543_v2 = vld [vmem:[%s4794_s29 + $0x178] sm:$0xff]  }
  0xe1   : > { %3063 = vmatpush1.bf16.msra.mxu0 %v4543_v2 }
  0xe3   : > { %2551 = vmatmul.mubr.bf16.gmra.mrb[32].mxu0 %v4144_v6  ;;  %2840 = vmatmul.mubr.bf16.gmra.mrb[32].mxu1 %v4146_v7  ;;  %v4202_v6 = vcombine.low %v527_v58, %v531_v59  ;;  %v4209_v7 = vcombine.high %v534_v0, %v538_v1  ;;  %v590_v58 = vld [vmem:[%s4783_s4 + $0x5c0] sm:$0xff] }
  0xe4   : > { %2558 = vmatprep.mubr.bf16.mxu0 %v4153_v8  ;;  %2847 = vmatprep.mubr.bf16.mxu1 %v4155_v9  ;;  %v4544_v8 = vld [vmem:[%s4794_s29 + $0x1f8] sm:$0xff]   ;;  %v4211_v9 = vcombine.high %v535_v3, %v539_v4  ;;  %v594_v59 = vld [vmem:[%s4783_s4 + $0x5e0] sm:$0xff]  ;;  %v599_v4 = vld [vmem:[%s4783_s4 + $0x608] sm:$0xff] }
  0xe5   : > { %3352 = vmatpush1.bf16.msra.mxu1 %v4544_v8  ;;  %v4265_v2 = vcombine.high %v590_v58, %v594_v59  ;;  %v598_v1 = vld [vmem:[%s4783_s4 + $0x600] sm:$0xff] }
  0xe6   : > { %v602_v3 = vld [vmem:[%s4783_s4 + $0x620] sm:$0xff] }
  0xe7   : > { %v4273_v8 = vcombine.high %v598_v1, %v602_v3 }
  0xeb   : > { %2559 = vmatmul.mubr.bf16.gmra.mrb[36].mxu0 %v4152_v16  ;;  %2848 = vmatmul.mubr.bf16.gmra.mrb[36].mxu1 %v4154_v17  ;;  %v4217_v16 = vcombine.high %v542_v10, %v546_v11  ;;  %v4219_v17 = vcombine.high %v543_v12, %v547_v13  ;;  %v606_v10 = vld [vmem:[%s4783_s4 + $0x640] sm:$0xff]  ;;  %v607_v12 = vld [vmem:[%s4783_s4 + $0x648] sm:$0xff] }
  0xec   : > { %2566 = vmatprep.mubr.bf16.mxu0 %v4161_v18  ;;  %2855 = vmatprep.mubr.bf16.mxu1 %v4163_v19  ;;  %v550_v18 = vld [vmem:[%s4783_s4 + $0x480] sm:$0xff]  ;;  %v611_v13 = vld [vmem:[%s4783_s4 + $0x668] sm:$0xff] }
  0xed   : > { %v554_v19 = vld [vmem:[%s4783_s4 + $0x4a0] sm:$0xff] }
  0xee   : > { %v4224_v30 = vcombine.low %v550_v18, %v554_v19  ;;  %v610_v11 = vld [vmem:[%s4783_s4 + $0x660] sm:$0xff] }
  0xf3   : > { %2567 = vmatmul.mubr.bf16.gmra.mrb[40].mxu0 %v4160_v24  ;;  %2856 = vmatmul.mubr.bf16.gmra.mrb[40].mxu1 %v4162_v25  ;;  %v4225_v24 = vcombine.high %v550_v18, %v554_v19  ;;  %v4227_v25 = vcombine.high %v551_v20, %v555_v21  ;;  %v614_v18 = vld [vmem:[%s4783_s4 + $0x680] sm:$0xff]  ;;  %v615_v20 = vld [vmem:[%s4783_s4 + $0x688] sm:$0xff] }
  0xf4   : > { %2574 = vmatprep.mubr.bf16.mxu0 %v4169_v26  ;;  %2863 = vmatprep.mubr.bf16.mxu1 %v4171_v27  ;;  %v558_v26 = vld [vmem:[%s4783_s4 + $0x4c0] sm:$0xff]  ;;  %v619_v21 = vld [vmem:[%s4783_s4 + $0x6a8] sm:$0xff] }
  0xf5   : > { %v562_v27 = vld [vmem:[%s4783_s4 + $0x4e0] sm:$0xff] }
  0xf6   : > { %v4233_v32 = vcombine.high %v558_v26, %v562_v27  ;;  %v4232_v38 = vcombine.low %v558_v26, %v562_v27  ;;  %v618_v19 = vld [vmem:[%s4783_s4 + $0x6a0] sm:$0xff] }
  0xf7   : > { %v622_v26 = vld [vmem:[%s4783_s4 + $0x6c0] sm:$0xff] }
  0xf8   : > { %v626_v27 = vld [vmem:[%s4783_s4 + $0x6e0] sm:$0xff] }
  0xfb   : > { %2575 = vmatmul.mubr.bf16.gmra.mrb[44].mxu0 %v4168_v33  ;;  %2864 = vmatmul.mubr.bf16.gmra.mrb[44].mxu1 %v4170_v34  ;;  %v4235_v33 = vcombine.high %v559_v28, %v563_v29  ;;  %v566_v34 = vld [vmem:[%s4783_s4 + $0x500] sm:$0xff]  ;;  %v623_v28 = vld [vmem:[%s4783_s4 + $0x6c8] sm:$0xff] }
  0xfc   : > { %2582 = vmatprep.mubr.bf16.mxu0 %v4177_v35  ;;  %2871 = vmatprep.mubr.bf16.mxu1 %v4179_v37  ;;  %v570_v35 = vld [vmem:[%s4783_s4 + $0x520] sm:$0xff]  ;;  %v571_v37 = vld [vmem:[%s4783_s4 + $0x528] sm:$0xff] }
  0xfd   : > { %v4241_v40 = vcombine.high %v566_v34, %v570_v35  ;;  %v4243_v41 = vcombine.high %v567_v36, %v571_v37  ;;  %v4240_v46 = vcombine.low %v566_v34, %v570_v35  ;;  %v4242_v47 = vcombine.low %v567_v36, %v571_v37  ;;  %v627_v29 = vld [vmem:[%s4783_s4 + $0x6e8] sm:$0xff]  ;;  %v630_v34 = vld [vmem:[%s4783_s4 + $0x700] sm:$0xff] }
  0xfe   : > { %v634_v35 = vld [vmem:[%s4783_s4 + $0x720] sm:$0xff]  ;;  %v631_v37 = vld [vmem:[%s4783_s4 + $0x708] sm:$0xff] }
 0x103   : > { %2583 = vmatmul.mubr.bf16.gmra.mrb[48].mxu0 %v4176_v42  ;;  %2872 = vmatmul.mubr.bf16.gmra.mrb[48].mxu1 %v4178_v43  ;;  %v574_v42 = vld [vmem:[%s4783_s4 + $0x540] sm:$0xff] }
 0x104   : > { %2590 = vmatprep.mubr.bf16.mxu0 %v4185_v44  ;;  %2879 = vmatprep.mubr.bf16.mxu1 %v4187_v45  ;;  %v578_v43 = vld [vmem:[%s4783_s4 + $0x560] sm:$0xff]  ;;  %v575_v44 = vld [vmem:[%s4783_s4 + $0x548] sm:$0xff] }
 0x105   : > { %v579_v45 = vld [vmem:[%s4783_s4 + $0x568] sm:$0xff]  ;;  %v4249_v48 = vcombine.high %v574_v42, %v578_v43  ;;  %v4248_v54 = vcombine.low %v574_v42, %v578_v43 }
 0x106   : > { %v4251_v49 = vcombine.high %v575_v44, %v579_v45 }
 0x10b   : > { %2591 = vmatmul.mubr.bf16.gmra.mrb[52].mxu0 %v4184_v51  ;;  %2880 = vmatmul.mubr.bf16.gmra.mrb[52].mxu1 %v4186_v52  ;;  %v586_v51 = vld [vmem:[%s4783_s4 + $0x5a0] sm:$0xff]  ;;  %v583_v52 = vld [vmem:[%s4783_s4 + $0x588] sm:$0xff] }
 0x10c   : > { %2598 = vmatprep.mubr.bf16.mxu0 %v4193_v53  ;;  %2887 = vmatprep.mubr.bf16.mxu1 %v4195_v55  ;;  %v587_v53 = vld [vmem:[%s4783_s4 + $0x5a8] sm:$0xff]  ;;  %v4250_v55 = vcombine.low %v575_v44, %v579_v45  ;;  %v4257_v56 = vcombine.high %v582_v50, %v586_v51  ;;  %v4298_v45 = vcombine.low %v623_v28, %v627_v29 }
 0x10d   : > { %v4259_v57 = vcombine.high %v583_v52, %v587_v53 }
 0x113   : > { %2599 = vmatmul.mubr.bf16.gmra.mrb[56].mxu0 %v4192_v60  ;;  %2888 = vmatmul.mubr.bf16.gmra.mrb[56].mxu1 %v4194_v61  ;;  %v591_v60 = vld [vmem:[%s4783_s4 + $0x5c8] sm:$0xff] }
 0x114   : > { %2606 = vmatprep.mubr.bf16.mxu0 %v4201_v62  ;;  %2895 = vmatprep.mubr.bf16.mxu1 %v4203_v63  ;;  %v595_v61 = vld [vmem:[%s4783_s4 + $0x5e8] sm:$0xff]  ;;  %v4256_v62 = vcombine.low %v582_v50, %v586_v51  ;;  %v4258_v63 = vcombine.low %v583_v52, %v587_v53  ;;  %v638_v52 = vld [vmem:[%s4783_s4 + $0x740] sm:$0xff] }
 0x115   : > { %v4267_v0 = vcombine.high %v591_v60, %v595_v61  ;;  %v642_v53 = vld [vmem:[%s4783_s4 + $0x760] sm:$0xff] }
 0x11b   : > { %2607 = vmatmul.mubr.bf16.gmra.mrb[60].mxu0 %v4200_v5  ;;  %2896 = vmatmul.mubr.bf16.gmra.mrb[60].mxu1 %v4202_v6  ;;  %v603_v5 = vld [vmem:[%s4783_s4 + $0x628] sm:$0xff]  ;;  %v4264_v6 = vcombine.low %v590_v58, %v594_v59  ;;  %v4304_v59 = vcombine.low %v630_v34, %v634_v35 }
 0x11c   : > { %2614 = vmatprep.mubr.bf16.mxu0 %v4209_v7  ;;  %2903 = vmatprep.mubr.bf16.mxu1 %v4211_v9  ;;  %v4266_v7 = vcombine.low %v591_v60, %v595_v61  ;;  %v4275_v9 = vcombine.high %v599_v4, %v603_v5 }
 0x123   : > { %2615 = vmatmul.mubr.bf16.gmra.mrb[64].mxu0 %v4208_v14  ;;  %2904 = vmatmul.mubr.bf16.gmra.mrb[64].mxu1 %v4210_v15  ;;  %v4272_v14 = vcombine.low %v598_v1, %v602_v3  ;;  %v4274_v15 = vcombine.low %v599_v4, %v603_v5 }
 0x124   : > { %2622 = vmatprep.mubr.bf16.mxu0 %v4217_v16  ;;  %2911 = vmatprep.mubr.bf16.mxu1 %v4219_v17  ;;  %v4281_v16 = vcombine.high %v606_v10, %v610_v11  ;;  %v4283_v17 = vcombine.high %v607_v12, %v611_v13 }
 0x12b   : > { %2623 = vmatmul.mubr.bf16.gmra.mrb[68].mxu0 %v4216_v22  ;;  %2912 = vmatmul.mubr.bf16.gmra.mrb[68].mxu1 %v4218_v23  ;;  %v4280_v22 = vcombine.low %v606_v10, %v610_v11  ;;  %v4282_v23 = vcombine.low %v607_v12, %v611_v13  ;;  %v651_v10 = vld [vmem:[%s4783_s4 + $0x7a8] sm:$0xff]  ;;  %v4312_v13 = vcombine.low %v638_v52, %v642_v53 }
 0x12c   : > { %2630 = vmatprep.mubr.bf16.mxu0 %v4225_v24  ;;  %2919 = vmatprep.mubr.bf16.mxu1 %v4227_v25  ;;  %v4289_v24 = vcombine.high %v614_v18, %v618_v19  ;;  %v4291_v25 = vcombine.high %v615_v20, %v619_v21 }
 0x133   : > { %2631 = vmatmul.mubr.bf16.gmra.mrb[72].mxu0 %v4224_v30  ;;  %2920 = vmatmul.mubr.bf16.gmra.mrb[72].mxu1 %v4226_v31  ;;  %v4288_v30 = vcombine.low %v614_v18, %v618_v19  ;;  %v4290_v31 = vcombine.low %v615_v20, %v619_v21 }
 0x134   : > { %2638 = vmatprep.mubr.bf16.mxu0 %v4233_v32  ;;  %2927 = vmatprep.mubr.bf16.mxu1 %v4235_v33  ;;  %v4297_v32 = vcombine.high %v622_v26, %v626_v27  ;;  %v4299_v33 = vcombine.high %v623_v28, %v627_v29  ;;  %v659_v28 = vld [vmem:[%s4783_s4 + $0x7e8] sm:$0xff] }
 0x13b   : > { %2639 = vmatmul.mubr.bf16.gmra.mrb[76].mxu0 %v4232_v38  ;;  %2928 = vmatmul.mubr.bf16.gmra.mrb[76].mxu1 %v4234_v39  ;;  %v635_v38 = vld [vmem:[%s4783_s4 + $0x728] sm:$0xff] }
 0x13c   : > { %2646 = vmatprep.mubr.bf16.mxu0 %v4241_v40  ;;  %2935 = vmatprep.mubr.bf16.mxu1 %v4243_v41  ;;  %v4296_v41 = vcombine.low %v622_v26, %v626_v27  ;;  %v655_v27 = vld [vmem:[%s4783_s4 + $0x7c8] sm:$0xff] }
 0x143   : > { %2647 = vmatmul.mubr.bf16.gmra.mrb[80].mxu0 %v4240_v46  ;;  %2936 = vmatmul.mubr.bf16.gmra.mrb[80].mxu1 %v4242_v47  ;;  %v4305_v46 = vcombine.high %v630_v34, %v634_v35 }
 0x144   : > { %2654 = vmatprep.mubr.bf16.mxu0 %v4249_v48  ;;  %2943 = vmatprep.mubr.bf16.mxu1 %v4251_v49  ;;  %v4307_v49 = vcombine.high %v631_v37, %v635_v38 }
 0x14b   : > { %2655 = vmatmul.mubr.bf16.gmra.mrb[84].mxu0 %v4248_v54  ;;  %2944 = vmatmul.mubr.bf16.gmra.mrb[84].mxu1 %v4250_v55  ;;  %v639_v55 = vld [vmem:[%s4783_s4 + $0x748] sm:$0xff] }
 0x14c   : > { %2662 = vmatprep.mubr.bf16.mxu0 %v4257_v56  ;;  %2951 = vmatprep.mubr.bf16.mxu1 %v4259_v57  ;;  %v643_v56 = vld [vmem:[%s4783_s4 + $0x768] sm:$0xff] }
 0x14d   : > { %v4315_v3 = vcombine.high %v639_v55, %v643_v56 }
 0x153   : > { %2663 = vmatmul.mubr.bf16.gmra.mrb[88].mxu0 %v4256_v62  ;;  %2952 = vmatmul.mubr.bf16.gmra.mrb[88].mxu1 %v4258_v63  ;;  %v4306_v63 = vcombine.low %v631_v37, %v635_v38 }
 0x154   : > { %2670 = vmatprep.mubr.bf16.mxu0 %v4265_v2  ;;  %2959 = vmatprep.mubr.bf16.mxu1 %v4267_v0  ;;  %v4313_v2 = vcombine.high %v638_v52, %v642_v53 }
 0x15b   : > { %2671 = vmatmul.mubr.bf16.gmra.mrb[92].mxu0 %v4264_v6  ;;  %2960 = vmatmul.mubr.bf16.gmra.mrb[92].mxu1 %v4266_v7  ;;  %v646_v6 = vld [vmem:[%s4783_s4 + $0x780] sm:$0xff] }
 0x15c   : > { %2678 = vmatprep.mubr.bf16.mxu0 %v4273_v8  ;;  %2967 = vmatprep.mubr.bf16.mxu1 %v4275_v9  ;;  %v650_v7 = vld [vmem:[%s4783_s4 + $0x7a0] sm:$0xff]  ;;  %v647_v9 = vld [vmem:[%s4783_s4 + $0x788] sm:$0xff] }
 0x15d   : > { %v4321_v18 = vcombine.high %v646_v6, %v650_v7  ;;  %v4323_v21 = vcombine.high %v647_v9, %v651_v10  ;;  %v4322_v35 = vcombine.low %v647_v9, %v651_v10 }
 0x163   : > { %2679 = vmatmul.mubr.bf16.gmra.mrb[96].mxu0 %v4272_v14  ;;  %2968 = vmatmul.mubr.bf16.gmra.mrb[96].mxu1 %v4274_v15 }
 0x164   : > { %2686 = vmatprep.mubr.bf16.mxu0 %v4281_v16  ;;  %2975 = vmatprep.mubr.bf16.mxu1 %v4283_v17  ;;  %v4314_v17 = vcombine.low %v639_v55, %v643_v56  ;;  %v4330_v55 = vcombine.low %v655_v27, %v659_v28 }
 0x16b   : > { %2687 = vmatmul.mubr.bf16.gmra.mrb[100].mxu0 %v4280_v22  ;;  %2976 = vmatmul.mubr.bf16.gmra.mrb[100].mxu1 %v4282_v23 }
 0x16c   : > { %2694 = vmatprep.mubr.bf16.mxu0 %v4289_v24  ;;  %2983 = vmatprep.mubr.bf16.mxu1 %v4291_v25  ;;  %v654_v24 = vld [vmem:[%s4783_s4 + $0x7c0] sm:$0xff] }
 0x16d   : > { %v658_v25 = vld [vmem:[%s4783_s4 + $0x7e0] sm:$0xff] }
 0x173   : > { %2695 = vmatmul.mubr.bf16.gmra.mrb[104].mxu0 %v4288_v30  ;;  %2984 = vmatmul.mubr.bf16.gmra.mrb[104].mxu1 %v4290_v31  ;;  %v4320_v31 = vcombine.low %v646_v6, %v650_v7 }
 0x174   : > { %2702 = vmatprep.mubr.bf16.mxu0 %v4297_v32  ;;  %2991 = vmatprep.mubr.bf16.mxu1 %v4299_v33 }
 0x176   : > { %v2488_v36 = vpop.f32.mrb[0].mxu0  ;;  %v2777_v39 = vpop.f32.mrb[0].mxu1 }
 0x177   : > { %v2490_v40 = vpop.f32.mrb[1].mxu0  ;;  %v5126_v42 = vadd.f32 %v2777_v39, %v2488_v36  ;;  %v2779_v43 = vpop.f32.mrb[1].mxu1  ;;  %v4329_v36 = vcombine.high %v654_v24, %v658_v25  ;;  %v4331_v39 = vcombine.high %v655_v27, %v659_v28 }
 0x178   : > { %v2491_v44 = vpop.f32.mrb[2].mxu0  ;;  %v2780_v47 = vpop.f32.mrb[2].mxu1  ;;  %v408_v43 = vld [vmem:[%s4783_s4 + $0x10] sm:$0xff] }
 0x179   : > { %v2493_v48 = vpop.f32.mrb[3].mxu0  ;;  %v5128_v50 = vadd.f32 %v2780_v47, %v2491_v44  ;;  %v2782_v51 = vpop.f32.mrb[3].mxu1  ;;  %v412_v44 = vld [vmem:[%s4783_s4 + $0x30] sm:$0xff]  ;;  %v413_v47 = vld [vmem:[%s4783_s4 + $0x38] sm:$0xff] }
 0x17a   : > { %v4328_v51 = vcombine.low %v654_v24, %v658_v25  ;;  %v4085_v56 = vcombine.high %v408_v43, %v412_v44  ;;  %v4084_v7 = vcombine.low %v408_v43, %v412_v44  ;;  %v429_v24 = vld [vmem:[%s4783_s4 + $0xb8] sm:$0xff] }
 0x17b   : > { %2703 = vmatmul.mubr.bf16.gmra.mrb[108].mxu0 %v4296_v41  ;;  %2992 = vmatmul.mubr.bf16.gmra.mrb[108].mxu1 %v4298_v45  ;;  %v433_v44 = vld [vmem:[%s4783_s4 + $0xd8] sm:$0xff] }
 0x17c   : > { %2710 = vmatprep.mubr.bf16.mxu0 %v4305_v46  ;;  %2999 = vmatprep.mubr.bf16.mxu1 %v4307_v49  ;;  %v409_v46 = vld [vmem:[%s4783_s4 + $0x18] sm:$0xff] }
 0x17e   : > { %v2496_v54 = vpop.f32.mrb[4].mxu0  ;;  %v2785_v57 = vpop.f32.mrb[4].mxu1 }
 0x17f   : > { %v2498_v58 = vpop.f32.mrb[5].mxu0  ;;  %v5134_v60 = vadd.f32 %v2785_v57, %v2496_v54  ;;  %v2787_v61 = vpop.f32.mrb[5].mxu1 }
 0x180   : > { %v2499_v62 = vpop.f32.mrb[6].mxu0  ;;  %v2788_v0 = vpop.f32.mrb[6].mxu1 }
 0x181   : > { %v2501_v1 = vpop.f32.mrb[7].mxu0  ;;  %v5136_v4 = vadd.f32 %v2788_v0, %v2499_v62  ;;  %v2790_v5 = vpop.f32.mrb[7].mxu1 }
 0x182   : > { %v417_v1 = vld [vmem:[%s4783_s4 + $0x58] sm:$0xff] }
 0x183   : > { %2711 = vmatmul.mubr.bf16.gmra.mrb[112].mxu0 %v4304_v59  ;;  %3000 = vmatmul.mubr.bf16.gmra.mrb[112].mxu1 %v4306_v63  ;;  %v4087_v59 = vcombine.high %v409_v46, %v413_v47  ;;  %v416_v63 = vld [vmem:[%s4783_s4 + $0x50] sm:$0xff] }
 0x184   : > { %2718 = vmatprep.mubr.bf16.mxu0 %v4313_v2  ;;  %3007 = vmatprep.mubr.bf16.mxu1 %v4315_v3  ;;  %v420_v2 = vld [vmem:[%s4783_s4 + $0x70] sm:$0xff]  ;;  %v421_v3 = vld [vmem:[%s4783_s4 + $0x78] sm:$0xff] }
 0x185   : > { %v4092_v27 = vcombine.low %v416_v63, %v420_v2 }
 0x186   : > { %v2504_v8 = vpop.f32.mrb[8].mxu0  ;;  %v2793_v11 = vpop.f32.mrb[8].mxu1 }
 0x187   : > { %v2506_v12 = vpop.f32.mrb[9].mxu0  ;;  %v5142_v14 = vadd.f32 %v2793_v11, %v2504_v8  ;;  %v2795_v15 = vpop.f32.mrb[9].mxu1  ;;  %v4086_v11 = vcombine.low %v409_v46, %v413_v47 }
 0x188   : > { %v2507_v16 = vpop.f32.mrb[10].mxu0  ;;  %v2796_v19 = vpop.f32.mrb[10].mxu1  ;;  %v4093_v12 = vcombine.high %v416_v63, %v420_v2  ;;  %v440_v63 = vld [vmem:[%s4783_s4 + $0x110] sm:$0xff] }
 0x189   : > { %v2509_v20 = vpop.f32.mrb[11].mxu0  ;;  %v5144_v22 = vadd.f32 %v2796_v19, %v2507_v16  ;;  %v2798_v23 = vpop.f32.mrb[11].mxu1  ;;  %v4095_v16 = vcombine.high %v417_v1, %v421_v3  ;;  %v424_v19 = vld [vmem:[%s4783_s4 + $0x90] sm:$0xff] }
 0x18a   : > { %v428_v20 = vld [vmem:[%s4783_s4 + $0xb0] sm:$0xff]  ;;  %v425_v23 = vld [vmem:[%s4783_s4 + $0x98] sm:$0xff] }
 0x18b   : > { %2719 = vmatmul.mubr.bf16.gmra.mrb[116].mxu0 %v4312_v13  ;;  %3008 = vmatmul.mubr.bf16.gmra.mrb[116].mxu1 %v4314_v17  ;;  %v444_v2 = vld [vmem:[%s4783_s4 + $0x130] sm:$0xff] }
 0x18c   : > { %2726 = vmatprep.mubr.bf16.mxu0 %v4321_v18  ;;  %3015 = vmatprep.mubr.bf16.mxu1 %v4323_v21 }
 0x18e   : > { %v2512_v26 = vpop.f32.mrb[12].mxu0  ;;  %v2801_v29 = vpop.f32.mrb[12].mxu1 }
 0x18f   : > { %v2514_v30 = vpop.f32.mrb[13].mxu0  ;;  %v5150_v32 = vadd.f32 %v2801_v29, %v2512_v26  ;;  %v2803_v33 = vpop.f32.mrb[13].mxu1 }
 0x190   : > { %v2515_v34 = vpop.f32.mrb[14].mxu0  ;;  %v2804_v37 = vpop.f32.mrb[14].mxu1  ;;  %v4101_v33 = vcombine.high %v424_v19, %v428_v20 }
 0x191   : > { %v2517_v38 = vpop.f32.mrb[15].mxu0  ;;  %v5152_v40 = vadd.f32 %v2804_v37, %v2515_v34  ;;  %v2806_v41 = vpop.f32.mrb[15].mxu1 }
 0x192   : > { %v436_v41 = vld [vmem:[%s4783_s4 + $0xf0] sm:$0xff] }
 0x193   : > { %2727 = vmatmul.mubr.bf16.gmra.mrb[120].mxu0 %v4320_v31  ;;  %3016 = vmatmul.mubr.bf16.gmra.mrb[120].mxu1 %v4322_v35  ;;  %v4094_v31 = vcombine.low %v417_v1, %v421_v3  ;;  %v441_v1 = vld [vmem:[%s4783_s4 + $0x118] sm:$0xff] }
 0x194   : > { %2734 = vmatprep.mubr.bf16.mxu0 %v4329_v36  ;;  %3023 = vmatprep.mubr.bf16.mxu1 %v4331_v39  ;;  %v4103_v36 = vcombine.high %v425_v23, %v429_v24  ;;  %v432_v39 = vld [vmem:[%s4783_s4 + $0xd0] sm:$0xff]  ;;  %v445_v3 = vld [vmem:[%s4783_s4 + $0x138] sm:$0xff] }
 0x196   : > { %v2520_v45 = vpop.f32.mrb[16].mxu0  ;;  %v2809_v48 = vpop.f32.mrb[16].mxu1 }
 0x197   : > { %v2522_v49 = vpop.f32.mrb[17].mxu0  ;;  %v5158_v52 = vadd.f32 %v2809_v48, %v2520_v45  ;;  %v2811_v53 = vpop.f32.mrb[17].mxu1  ;;  %v437_v45 = vld [vmem:[%s4783_s4 + $0xf8] sm:$0xff]  ;;  %v4100_v48 = vcombine.low %v424_v19, %v428_v20 }
 0x198   : > { %v2523_v54 = vpop.f32.mrb[18].mxu0  ;;  %v2812_v57 = vpop.f32.mrb[18].mxu1 }
 0x199   : > { %v2525_v58 = vpop.f32.mrb[19].mxu0  ;;  %v5160_v61 = vadd.f32 %v2812_v57, %v2523_v54  ;;  %v2814_v62 = vpop.f32.mrb[19].mxu1  ;;  %v4102_v54 = vcombine.low %v425_v23, %v429_v24  ;;  %v452_v23 = vld [vmem:[%s4783_s4 + $0x170] sm:$0xff] }
 0x19a   : > { %v4111_v58 = vcombine.high %v433_v44, %v437_v45 }
 0x19b   : > { %2735 = vmatmul.mubr.bf16.gmra.mrb[124].mxu0 %v4328_v51  ;;  %3024 = vmatmul.mubr.bf16.gmra.mrb[124].mxu1 %v4330_v55  ;;  %v4109_v55 = vcombine.high %v432_v39, %v436_v41 }
 0x19c   : > { %3064 = vmatprep.mubr.bf16.mxu0 %v4085_v56  ;;  %3353 = vmatprep.mubr.bf16.mxu1 %v4087_v59 }
 0x19e   : > { %v2528_v0 = vpop.f32.mrb[20].mxu0  ;;  %v2817_v5 = vpop.f32.mrb[20].mxu1 }
 0x19f   : > { %v2530_v6 = vpop.f32.mrb[21].mxu0  ;;  %v5166_v8 = vadd.f32 %v2817_v5, %v2528_v0  ;;  %v2819_v9 = vpop.f32.mrb[21].mxu1 }
 0x1a0   : > { %v2531_v10 = vpop.f32.mrb[22].mxu0  ;;  %v2820_v13 = vpop.f32.mrb[22].mxu1 }
 0x1a1   : > { %v2533_v15 = vpop.f32.mrb[23].mxu0  ;;  %v5168_v17 = vadd.f32 %v2820_v13, %v2531_v10  ;;  %v2822_v18 = vpop.f32.mrb[23].mxu1  ;;  %v4117_v13 = vcombine.high %v440_v63, %v444_v2 }
 0x1a2   : > { %v4119_v18 = vcombine.high %v441_v1, %v445_v3 }
 0x1a3   : > { %3065 = vmatmul.mubr.bf16.vlgmr.msra.gmra.mrb[128].mxu0 %v4084_v7  ;;  %3354 = vmatmul.mubr.bf16.vlgmr.msra.gmra.mrb[128].mxu1 %v4086_v11  ;;  %v4108_v7 = vcombine.low %v432_v39, %v436_v41 }
 0x1a4   : > { %3072 = vmatprep.mubr.bf16.mxu0 %v4093_v12  ;;  %3361 = vmatprep.mubr.bf16.mxu1 %v4095_v16  ;;  %v4110_v12 = vcombine.low %v433_v44, %v437_v45  ;;  %v456_v45 = vld [vmem:[%s4783_s4 + $0x190] sm:$0xff] }
 0x1a6   : > { %v2536_v21 = vpop.f32.mrb[24].mxu0  ;;  %v2825_v25 = vpop.f32.mrb[24].mxu1 }
 0x1a7   : > { %v2538_v26 = vpop.f32.mrb[25].mxu0  ;;  %v5174_v28 = vadd.f32 %v2825_v25, %v2536_v21  ;;  %v2827_v29 = vpop.f32.mrb[25].mxu1  ;;  %v448_v21 = vld [vmem:[%s4783_s4 + $0x150] sm:$0xff]  ;;  %v449_v25 = vld [vmem:[%s4783_s4 + $0x158] sm:$0xff] }
 0x1a8   : > { %v2539_v30 = vpop.f32.mrb[26].mxu0  ;;  %v2828_v34 = vpop.f32.mrb[26].mxu1  ;;  %v453_v26 = vld [vmem:[%s4783_s4 + $0x178] sm:$0xff] }
 0x1a9   : > { %v2541_v35 = vpop.f32.mrb[27].mxu0  ;;  %v5176_v37 = vadd.f32 %v2828_v34, %v2539_v30  ;;  %v2830_v38 = vpop.f32.mrb[27].mxu1  ;;  %v4116_v30 = vcombine.low %v440_v63, %v444_v2  ;;  %v4127_v41 = vcombine.high %v449_v25, %v453_v26 }
 0x1aa   : > { %v4118_v35 = vcombine.low %v441_v1, %v445_v3 }
 0x1ab   : > { %3073 = vmatmul.mubr.bf16.gmra.mrb[132].mxu0 %v4092_v27  ;;  %3362 = vmatmul.mubr.bf16.gmra.mrb[132].mxu1 %v4094_v31 }
 0x1ac   : > { %3080 = vmatprep.mubr.bf16.mxu0 %v4101_v33  ;;  %3369 = vmatprep.mubr.bf16.mxu1 %v4103_v36  ;;  %v4125_v36 = vcombine.high %v448_v21, %v452_v23 }
 0x1ae   : > { %v2544_v43 = vpop.f32.mrb[28].mxu0  ;;  %v2833_v46 = vpop.f32.mrb[28].mxu1 }
 0x1af   : > { %v2546_v47 = vpop.f32.mrb[29].mxu0  ;;  %v5182_v49 = vadd.f32 %v2833_v46, %v2544_v43  ;;  %v2835_v51 = vpop.f32.mrb[29].mxu1  ;;  %v460_v46 = vld [vmem:[%s4783_s4 + $0x1b0] sm:$0xff] }
 0x1b0   : > { %v2547_v53 = vpop.f32.mrb[30].mxu0  ;;  %v2836_v56 = vpop.f32.mrb[30].mxu1  ;;  %v461_v51 = vld [vmem:[%s4783_s4 + $0x1b8] sm:$0xff]  ;;  %v4133_v63 = vcombine.high %v456_v45, %v460_v46 }
 0x1b1   : > { %v2549_v57 = vpop.f32.mrb[31].mxu0  ;;  %v5184_v59 = vadd.f32 %v2836_v56, %v2547_v53  ;;  %v2838_v62 = vpop.f32.mrb[31].mxu1 }
 0x1b2   : > { %v4126_v62 = vcombine.low %v449_v25, %v453_v26 }
 0x1b3   : > { %3081 = vmatmul.mubr.bf16.gmra.mrb[136].mxu0 %v4100_v48  ;;  %3370 = vmatmul.mubr.bf16.gmra.mrb[136].mxu1 %v4102_v54  ;;  %v457_v48 = vld [vmem:[%s4783_s4 + $0x198] sm:$0xff] }
 0x1b4   : > { %3088 = vmatprep.mubr.bf16.mxu0 %v4109_v55  ;;  %3377 = vmatprep.mubr.bf16.mxu1 %v4111_v58  ;;  %v4124_v55 = vcombine.low %v448_v21, %v452_v23  ;;  %v4135_v1 = vcombine.high %v457_v48, %v461_v51  ;;  %v4134_v23 = vcombine.low %v457_v48, %v461_v51 }
 0x1b6   : > { %v2552_v0 = vpop.f32.mrb[32].mxu0  ;;  %v2841_v5 = vpop.f32.mrb[32].mxu1 }
 0x1b7   : > { %v2554_v6 = vpop.f32.mrb[33].mxu0  ;;  %v5190_v9 = vadd.f32 %v2841_v5, %v2552_v0  ;;  %v2843_v10 = vpop.f32.mrb[33].mxu1 }
 0x1b8   : > { %v2555_v11 = vpop.f32.mrb[34].mxu0  ;;  %v2844_v15 = vpop.f32.mrb[34].mxu1  ;;  %v464_v6 = vld [vmem:[%s4783_s4 + $0x1d0] sm:$0xff] }
 0x1b9   : > { %v2557_v16 = vpop.f32.mrb[35].mxu0  ;;  %v5192_v19 = vadd.f32 %v2844_v15, %v2555_v11  ;;  %v2846_v20 = vpop.f32.mrb[35].mxu1  ;;  %v465_v11 = vld [vmem:[%s4783_s4 + $0x1d8] sm:$0xff] }
 0x1ba   : > { %v4132_v16 = vcombine.low %v456_v45, %v460_v46 }
 0x1bb   : > { %3089 = vmatmul.mubr.bf16.gmra.mrb[140].mxu0 %v4108_v7  ;;  %3378 = vmatmul.mubr.bf16.gmra.mrb[140].mxu1 %v4110_v12  ;;  %v468_v7 = vld [vmem:[%s4783_s4 + $0x1f0] sm:$0xff]  ;;  %v469_v12 = vld [vmem:[%s4783_s4 + $0x1f8] sm:$0xff] }
 0x1bc   : > { %3096 = vmatprep.mubr.bf16.mxu0 %v4117_v13  ;;  %3385 = vmatprep.mubr.bf16.mxu1 %v4119_v18  ;;  %v4142_v48 = vcombine.low %v465_v11, %v469_v12 }
 0x1be   : > { %v2560_v24 = vpop.f32.mrb[36].mxu0  ;;  %v2849_v27 = vpop.f32.mrb[36].mxu1 }
 0x1bf   : > { %v2562_v29 = vpop.f32.mrb[37].mxu0  ;;  %v5198_v31 = vadd.f32 %v2849_v27, %v2560_v24  ;;  %v2851_v33 = vpop.f32.mrb[37].mxu1  ;;  %v4141_v24 = vcombine.high %v464_v6, %v468_v7  ;;  %v4143_v27 = vcombine.high %v465_v11, %v469_v12 }
 0x1c0   : > { %v2563_v34 = vpop.f32.mrb[38].mxu0  ;;  %v2852_v38 = vpop.f32.mrb[38].mxu1  ;;  %v472_v33 = vld [vmem:[%s4783_s4 + $0x210] sm:$0xff] }
 0x1c1   : > { %v2565_v39 = vpop.f32.mrb[39].mxu0  ;;  %v5200_v43 = vadd.f32 %v2852_v38, %v2563_v34  ;;  %v2854_v44 = vpop.f32.mrb[39].mxu1  ;;  %v476_v34 = vld [vmem:[%s4783_s4 + $0x230] sm:$0xff]  ;;  %v477_v38 = vld [vmem:[%s4783_s4 + $0x238] sm:$0xff] }
 0x1c2   : > { %v4140_v44 = vcombine.low %v464_v6, %v468_v7  ;;  %v4149_v51 = vcombine.high %v472_v33, %v476_v34  ;;  %v4148_v7 = vcombine.low %v472_v33, %v476_v34  ;;  %v493_v33 = vld [vmem:[%s4783_s4 + $0x2b8] sm:$0xff] }
 0x1c3   : > { %3097 = vmatmul.mubr.bf16.gmra.mrb[144].mxu0 %v4116_v30  ;;  %3386 = vmatmul.mubr.bf16.gmra.mrb[144].mxu1 %v4118_v35 }
 0x1c4   : > { %3104 = vmatprep.mubr.bf16.mxu0 %v4125_v36  ;;  %3393 = vmatprep.mubr.bf16.mxu1 %v4127_v41  ;;  %v473_v36 = vld [vmem:[%s4783_s4 + $0x218] sm:$0xff] }
 0x1c6   : > { %v2568_v47 = vpop.f32.mrb[40].mxu0  ;;  %v2857_v53 = vpop.f32.mrb[40].mxu1 }
 0x1c7   : > { %v2570_v54 = vpop.f32.mrb[41].mxu0  ;;  %v5206_v56 = vadd.f32 %v2857_v53, %v2568_v47  ;;  %v2859_v57 = vpop.f32.mrb[41].mxu1 }
 0x1c8   : > { %v2571_v58 = vpop.f32.mrb[42].mxu0  ;;  %v2860_v2 = vpop.f32.mrb[42].mxu1 }
 0x1c9   : > { %v2573_v0 = vpop.f32.mrb[43].mxu0  ;;  %v5208_v3 = vadd.f32 %v2860_v2, %v2571_v58  ;;  %v2862_v5 = vpop.f32.mrb[43].mxu1 }
 0x1ca   : > { %v481_v0 = vld [vmem:[%s4783_s4 + $0x258] sm:$0xff] }
 0x1cb   : > { %3105 = vmatmul.mubr.bf16.gmra.mrb[148].mxu0 %v4124_v55  ;;  %3394 = vmatmul.mubr.bf16.gmra.mrb[148].mxu1 %v4126_v62  ;;  %v4151_v55 = vcombine.high %v473_v36, %v477_v38  ;;  %v480_v62 = vld [vmem:[%s4783_s4 + $0x250] sm:$0xff] }
 0x1cc   : > { %3112 = vmatprep.mubr.bf16.mxu0 %v4133_v63  ;;  %3401 = vmatprep.mubr.bf16.mxu1 %v4135_v1  ;;  %v484_v63 = vld [vmem:[%s4783_s4 + $0x270] sm:$0xff]  ;;  %v485_v1 = vld [vmem:[%s4783_s4 + $0x278] sm:$0xff] }
 0x1ce   : > { %v2576_v10 = vpop.f32.mrb[44].mxu0  ;;  %v2865_v13 = vpop.f32.mrb[44].mxu1 }
 0x1cf   : > { %v2578_v15 = vpop.f32.mrb[45].mxu0  ;;  %v5214_v18 = vadd.f32 %v2865_v13, %v2576_v10  ;;  %v2867_v20 = vpop.f32.mrb[45].mxu1  ;;  %v4150_v13 = vcombine.low %v473_v36, %v477_v38  ;;  %v4156_v36 = vcombine.low %v480_v62, %v484_v63 }
 0x1d0   : > { %v2579_v21 = vpop.f32.mrb[46].mxu0  ;;  %v2868_v25 = vpop.f32.mrb[46].mxu1  ;;  %v4157_v15 = vcombine.high %v480_v62, %v484_v63  ;;  %v497_v63 = vld [vmem:[%s4783_s4 + $0x2d8] sm:$0xff] }
 0x1d1   : > { %v2581_v26 = vpop.f32.mrb[47].mxu0  ;;  %v5216_v29 = vadd.f32 %v2868_v25, %v2579_v21  ;;  %v2870_v30 = vpop.f32.mrb[47].mxu1  ;;  %v4159_v21 = vcombine.high %v481_v0, %v485_v1  ;;  %v488_v25 = vld [vmem:[%s4783_s4 + $0x290] sm:$0xff] }
 0x1d2   : > { %v492_v26 = vld [vmem:[%s4783_s4 + $0x2b0] sm:$0xff]  ;;  %v489_v30 = vld [vmem:[%s4783_s4 + $0x298] sm:$0xff] }
 0x1d3   : > { %3113 = vmatmul.mubr.bf16.gmra.mrb[152].mxu0 %v4132_v16  ;;  %3402 = vmatmul.mubr.bf16.gmra.mrb[152].mxu1 %v4134_v23 }
 0x1d4   : > { %3120 = vmatprep.mubr.bf16.mxu0 %v4141_v24  ;;  %3409 = vmatprep.mubr.bf16.mxu1 %v4143_v27 }
 0x1d6   : > { %v2584_v35 = vpop.f32.mrb[48].mxu0  ;;  %v2873_v39 = vpop.f32.mrb[48].mxu1 }
 0x1d7   : > { %v2586_v41 = vpop.f32.mrb[49].mxu0  ;;  %v5222_v45 = vadd.f32 %v2873_v39, %v2584_v35  ;;  %v2875_v46 = vpop.f32.mrb[49].mxu1 }
 0x1d8   : > { %v2587_v47 = vpop.f32.mrb[50].mxu0  ;;  %v2876_v53 = vpop.f32.mrb[50].mxu1  ;;  %v4165_v46 = vcombine.high %v488_v25, %v492_v26 }
 0x1d9   : > { %v2589_v54 = vpop.f32.mrb[51].mxu0  ;;  %v5224_v57 = vadd.f32 %v2876_v53, %v2587_v47  ;;  %v2878_v58 = vpop.f32.mrb[51].mxu1 }
 0x1da   : > { %v500_v58 = vld [vmem:[%s4783_s4 + $0x2f0] sm:$0xff] }
 0x1db   : > { %3121 = vmatmul.mubr.bf16.gmra.mrb[156].mxu0 %v4140_v44  ;;  %3410 = vmatmul.mubr.bf16.gmra.mrb[156].mxu1 %v4142_v48  ;;  %v4158_v44 = vcombine.low %v481_v0, %v485_v1  ;;  %v4164_v0 = vcombine.low %v488_v25, %v492_v26  ;;  %v504_v25 = vld [vmem:[%s4783_s4 + $0x310] sm:$0xff] }
 0x1dc   : > { %3128 = vmatprep.mubr.bf16.mxu0 %v4149_v51  ;;  %3417 = vmatprep.mubr.bf16.mxu1 %v4151_v55  ;;  %v4167_v51 = vcombine.high %v489_v30, %v493_v33  ;;  %v496_v55 = vld [vmem:[%s4783_s4 + $0x2d0] sm:$0xff] }
 0x1dd   : > { %v508_v26 = vld [vmem:[%s4783_s4 + $0x330] sm:$0xff] }
 0x1de   : > { %v2592_v2 = vpop.f32.mrb[52].mxu0  ;;  %v2881_v5 = vpop.f32.mrb[52].mxu1 }
 0x1df   : > { %v2594_v6 = vpop.f32.mrb[53].mxu0  ;;  %v5230_v10 = vadd.f32 %v2881_v5, %v2592_v2  ;;  %v2883_v11 = vpop.f32.mrb[53].mxu1  ;;  %v501_v2 = vld [vmem:[%s4783_s4 + $0x2f8] sm:$0xff] }
 0x1e0   : > { %v2595_v12 = vpop.f32.mrb[54].mxu0  ;;  %v2884_v16 = vpop.f32.mrb[54].mxu1 }
 0x1e1   : > { %v2597_v20 = vpop.f32.mrb[55].mxu0  ;;  %v5232_v23 = vadd.f32 %v2884_v16, %v2595_v12  ;;  %v2886_v24 = vpop.f32.mrb[55].mxu1  ;;  %v4166_v12 = vcombine.low %v489_v30, %v493_v33  ;;  %v4172_v30 = vcombine.low %v496_v55, %v500_v58 }
 0x1e2   : > { %v4175_v20 = vcombine.high %v497_v63, %v501_v2 }
 0x1e3   : > { %3129 = vmatmul.mubr.bf16.gmra.mrb[160].mxu0 %v4148_v7  ;;  %3418 = vmatmul.mubr.bf16.gmra.mrb[160].mxu1 %v4150_v13  ;;  %v4173_v13 = vcombine.high %v496_v55, %v500_v58  ;;  %v512_v55 = vld [vmem:[%s4783_s4 + $0x350] sm:$0xff] }
 0x1e4   : > { %3136 = vmatprep.mubr.bf16.mxu0 %v4157_v15  ;;  %3425 = vmatprep.mubr.bf16.mxu1 %v4159_v21  ;;  %v516_v58 = vld [vmem:[%s4783_s4 + $0x370] sm:$0xff] }
 0x1e6   : > { %v2600_v27 = vpop.f32.mrb[56].mxu0  ;;  %v2889_v34 = vpop.f32.mrb[56].mxu1 }
 0x1e7   : > { %v2602_v35 = vpop.f32.mrb[57].mxu0  ;;  %v5238_v38 = vadd.f32 %v2889_v34, %v2600_v27  ;;  %v2891_v39 = vpop.f32.mrb[57].mxu1  ;;  %v505_v34 = vld [vmem:[%s4783_s4 + $0x318] sm:$0xff] }
 0x1e8   : > { %v2603_v41 = vpop.f32.mrb[58].mxu0  ;;  %v2892_v47 = vpop.f32.mrb[58].mxu1  ;;  %v509_v35 = vld [vmem:[%s4783_s4 + $0x338] sm:$0xff] }
 0x1e9   : > { %v2605_v48 = vpop.f32.mrb[59].mxu0  ;;  %v5240_v53 = vadd.f32 %v2892_v47, %v2603_v41  ;;  %v2894_v54 = vpop.f32.mrb[59].mxu1  ;;  %v4181_v47 = vcombine.high %v504_v25, %v508_v26 }
 0x1ea   : > { %v4183_v54 = vcombine.high %v505_v34, %v509_v35 }
 0x1eb   : > { %3137 = vmatmul.mubr.bf16.gmra.mrb[164].mxu0 %v4156_v36  ;;  %3426 = vmatmul.mubr.bf16.gmra.mrb[164].mxu1 %v4158_v44 }
 0x1ec   : > { %3144 = vmatprep.mubr.bf16.mxu0 %v4165_v46  ;;  %3433 = vmatprep.mubr.bf16.mxu1 %v4167_v51  ;;  %v4174_v46 = vcombine.low %v497_v63, %v501_v2  ;;  %v4180_v63 = vcombine.low %v504_v25, %v508_v26  ;;  %v520_v25 = vld [vmem:[%s4783_s4 + $0x390] sm:$0xff] }
 0x1ed   : > { %v524_v26 = vld [vmem:[%s4783_s4 + $0x3b0] sm:$0xff] }
 0x1ee   : > { %v2608_v62 = vpop.f32.mrb[60].mxu0  ;;  %v2897_v5 = vpop.f32.mrb[60].mxu1 }
 0x1ef   : > { %v2610_v6 = vpop.f32.mrb[61].mxu0  ;;  %v5246_v1 = vadd.f32 %v2897_v5, %v2608_v62  ;;  %v2899_v7 = vpop.f32.mrb[61].mxu1 }
 0x1f0   : > { %v2611_v11 = vpop.f32.mrb[62].mxu0  ;;  %v2900_v15 = vpop.f32.mrb[62].mxu1  ;;  %v517_v7 = vld [vmem:[%s4783_s4 + $0x378] sm:$0xff] }
 0x1f1   : > { %v2613_v16 = vpop.f32.mrb[63].mxu0  ;;  %v5248_v21 = vadd.f32 %v2900_v15, %v2611_v11  ;;  %v2902_v24 = vpop.f32.mrb[63].mxu1 }
 0x1f2   : > { %v4182_v16 = vcombine.low %v505_v34, %v509_v35  ;;  %v4188_v34 = vcombine.low %v512_v55, %v516_v58 }
 0x1f3   : > { %3145 = vmatmul.mubr.bf16.gmra.mrb[168].mxu0 %v4164_v0  ;;  %3434 = vmatmul.mubr.bf16.gmra.mrb[168].mxu1 %v4166_v12  ;;  %v513_v0 = vld [vmem:[%s4783_s4 + $0x358] sm:$0xff] }
 0x1f4   : > { %3152 = vmatprep.mubr.bf16.mxu0 %v4173_v13  ;;  %3441 = vmatprep.mubr.bf16.mxu1 %v4175_v20  ;;  %v4189_v20 = vcombine.high %v512_v55, %v516_v58  ;;  %v528_v55 = vld [vmem:[%s4783_s4 + $0x3d0] sm:$0xff] }
 0x1f5   : > { %v532_v58 = vld [vmem:[%s4783_s4 + $0x3f0] sm:$0xff] }
 0x1f6   : > { %v2616_v27 = vpop.f32.mrb[64].mxu0  ;;  %v2905_v36 = vpop.f32.mrb[64].mxu1 }
 0x1f7   : > { %v2618_v39 = vpop.f32.mrb[65].mxu0  ;;  %v5254_v33 = vadd.f32 %v2905_v36, %v2616_v27  ;;  %v2907_v41 = vpop.f32.mrb[65].mxu1  ;;  %v4191_v36 = vcombine.high %v513_v0, %v517_v7 }
 0x1f8   : > { %v2619_v44 = vpop.f32.mrb[66].mxu0  ;;  %v2908_v48 = vpop.f32.mrb[66].mxu1 }
 0x1f9   : > { %v2621_v51 = vpop.f32.mrb[67].mxu0  ;;  %v5256_v62 = vadd.f32 %v2908_v48, %v2619_v44  ;;  %v2910_v5 = vpop.f32.mrb[67].mxu1  ;;  %v521_v44 = vld [vmem:[%s4783_s4 + $0x398] sm:$0xff] }
 0x1fa   : > { %v4190_v5 = vcombine.low %v513_v0, %v517_v7  ;;  %v4196_v0 = vcombine.low %v520_v25, %v524_v26 }
 0x1fb   : > { %3153 = vmatmul.mubr.bf16.gmra.mrb[172].mxu0 %v4172_v30  ;;  %3442 = vmatmul.mubr.bf16.gmra.mrb[172].mxu1 %v4174_v46  ;;  %v525_v46 = vld [vmem:[%s4783_s4 + $0x3b8] sm:$0xff] }
 0x1fc   : > { %3160 = vmatprep.mubr.bf16.mxu0 %v4181_v47  ;;  %3449 = vmatprep.mubr.bf16.mxu1 %v4183_v54 }
 0x1fe   : > { %v2624_v6 = vpop.f32.mrb[68].mxu0  ;;  %v2913_v11 = vpop.f32.mrb[68].mxu1 }
 0x1ff   : > { %v2626_v12 = vpop.f32.mrb[69].mxu0  ;;  %v5262_v2 = vadd.f32 %v2913_v11, %v2624_v6  ;;  %v2915_v13 = vpop.f32.mrb[69].mxu1  ;;  %v4197_v6 = vcombine.high %v520_v25, %v524_v26  ;;  %v536_v25 = vld [vmem:[%s4783_s4 + $0x410] sm:$0xff] }
 0x200   : > { %v2627_v15 = vpop.f32.mrb[70].mxu0  ;;  %v2916_v24 = vpop.f32.mrb[70].mxu1  ;;  %v540_v26 = vld [vmem:[%s4783_s4 + $0x430] sm:$0xff] }
 0x201   : > { %v2629_v27 = vpop.f32.mrb[71].mxu0  ;;  %v5264_v39 = vadd.f32 %v2916_v24, %v2627_v15  ;;  %v2918_v30 = vpop.f32.mrb[71].mxu1  ;;  %v533_v24 = vld [vmem:[%s4783_s4 + $0x3f8] sm:$0xff] }
 0x203   : > { %3161 = vmatmul.mubr.bf16.gmra.mrb[176].mxu0 %v4180_v63  ;;  %3450 = vmatmul.mubr.bf16.gmra.mrb[176].mxu1 %v4182_v16  ;;  %v4199_v63 = vcombine.high %v521_v44, %v525_v46 }
 0x204   : > { %3168 = vmatprep.mubr.bf16.mxu0 %v4189_v20  ;;  %3457 = vmatprep.mubr.bf16.mxu1 %v4191_v36  ;;  %v529_v20 = vld [vmem:[%s4783_s4 + $0x3d8] sm:$0xff] }
 0x206   : > { %v2632_v41 = vpop.f32.mrb[72].mxu0  ;;  %v2921_v47 = vpop.f32.mrb[72].mxu1 }
 0x207   : > { %v2634_v48 = vpop.f32.mrb[73].mxu0  ;;  %v5270_v35 = vadd.f32 %v2921_v47, %v2632_v41  ;;  %v2923_v51 = vpop.f32.mrb[73].mxu1  ;;  %v4198_v47 = vcombine.low %v521_v44, %v525_v46  ;;  %v4204_v44 = vcombine.low %v528_v55, %v532_v58 }
 0x208   : > { %v2635_v54 = vpop.f32.mrb[74].mxu0  ;;  %v2924_v11 = vpop.f32.mrb[74].mxu1  ;;  %v4205_v48 = vcombine.high %v528_v55, %v532_v58  ;;  %v544_v55 = vld [vmem:[%s4783_s4 + $0x450] sm:$0xff] }
 0x209   : > { %v2637_v12 = vpop.f32.mrb[75].mxu0  ;;  %v5272_v13 = vadd.f32 %v2924_v11, %v2635_v54  ;;  %v2926_v15 = vpop.f32.mrb[75].mxu1  ;;  %v4207_v54 = vcombine.high %v529_v20, %v533_v24  ;;  %v548_v58 = vld [vmem:[%s4783_s4 + $0x470] sm:$0xff] }
 0x20a   : > { %v537_v12 = vld [vmem:[%s4783_s4 + $0x418] sm:$0xff] }
 0x20b   : > { %3169 = vmatmul.mubr.bf16.gmra.mrb[180].mxu0 %v4188_v34  ;;  %3458 = vmatmul.mubr.bf16.gmra.mrb[180].mxu1 %v4190_v5 }
 0x20c   : > { %3176 = vmatprep.mubr.bf16.mxu0 %v4197_v6  ;;  %3465 = vmatprep.mubr.bf16.mxu1 %v4199_v63  ;;  %v541_v63 = vld [vmem:[%s4783_s4 + $0x438] sm:$0xff] }
 0x20e   : > { %v2640_v16 = vpop.f32.mrb[76].mxu0  ;;  %v2929_v27 = vpop.f32.mrb[76].mxu1 }
 0x20f   : > { %v2642_v36 = vpop.f32.mrb[77].mxu0  ;;  %v5278_v7 = vadd.f32 %v2929_v27, %v2640_v16  ;;  %v2931_v30 = vpop.f32.mrb[77].mxu1 }
 0x210   : > { %v2643_v41 = vpop.f32.mrb[78].mxu0  ;;  %v2932_v34 = vpop.f32.mrb[78].mxu1  ;;  %v4213_v30 = vcombine.high %v536_v25, %v540_v26 }
 0x211   : > { %v2645_v51 = vpop.f32.mrb[79].mxu0  ;;  %v5280_v5 = vadd.f32 %v2932_v34, %v2643_v41  ;;  %v2934_v6 = vpop.f32.mrb[79].mxu1 }
 0x212   : > { %v545_v6 = vld [vmem:[%s4783_s4 + $0x458] sm:$0xff] }
 0x213   : > { %3177 = vmatmul.mubr.bf16.gmra.mrb[184].mxu0 %v4196_v0  ;;  %3466 = vmatmul.mubr.bf16.gmra.mrb[184].mxu1 %v4198_v47  ;;  %v4206_v0 = vcombine.low %v529_v20, %v533_v24  ;;  %v4212_v20 = vcombine.low %v536_v25, %v540_v26  ;;  %v552_v25 = vld [vmem:[%s4783_s4 + $0x490] sm:$0xff] }
 0x214   : > { %3184 = vmatprep.mubr.bf16.mxu0 %v4205_v48  ;;  %3473 = vmatprep.mubr.bf16.mxu1 %v4207_v54  ;;  %v4215_v48 = vcombine.high %v537_v12, %v541_v63  ;;  %v556_v26 = vld [vmem:[%s4783_s4 + $0x4b0] sm:$0xff] }
 0x216   : > { %v2648_v11 = vpop.f32.mrb[80].mxu0  ;;  %v2937_v15 = vpop.f32.mrb[80].mxu1 }
 0x217   : > { %v2650_v16 = vpop.f32.mrb[81].mxu0  ;;  %v5286_v46 = vadd.f32 %v2937_v15, %v2648_v11  ;;  %v2939_v27 = vpop.f32.mrb[81].mxu1  ;;  %v549_v11 = vld [vmem:[%s4783_s4 + $0x478] sm:$0xff] }
 0x218   : > { %v2651_v36 = vpop.f32.mrb[82].mxu0  ;;  %v2940_v41 = vpop.f32.mrb[82].mxu1 }
 0x219   : > { %5623 = vst [vmem:[#allocation6_spill] sm:$0xff] %v5286_v46  ;;  %v2653_v47 = vpop.f32.mrb[83].mxu0  ;;  %v5288_v34 = vadd.f32 %v2940_v41, %v2651_v36  ;;  %v2942_v51 = vpop.f32.mrb[83].mxu1 }
 0x21a   : > { %v4223_v47 = vcombine.high %v545_v6, %v549_v11 }
 0x21b   : > { %5624 = vst [vmem:[#allocation7_spill] sm:$0xff] %v5288_v34  ;;  %3185 = vmatmul.mubr.bf16.gmra.mrb[188].mxu0 %v4204_v44  ;;  %3474 = vmatmul.mubr.bf16.gmra.mrb[188].mxu1 %v4206_v0  ;;  %v4214_v44 = vcombine.low %v537_v12, %v541_v63  ;;  %v4221_v0 = vcombine.high %v544_v55, %v548_v58  ;;  %v342_v34 = vld [vmem:[#allocation2] sm:$0xff] }
 0x21c   : > { %3192 = vmatprep.mubr.bf16.mxu0 %v4213_v30  ;;  %3481 = vmatprep.mubr.bf16.mxu1 %v4215_v48  ;;  %v4220_v12 = vcombine.low %v544_v55, %v548_v58  ;;  %v560_v55 = vld [vmem:[%s4783_s4 + $0x4d0] sm:$0xff] }
 0x21d   : > { %v564_v58 = vld [vmem:[%s4783_s4 + $0x4f0] sm:$0xff] }
 0x21e   : > { %v2656_v54 = vpop.f32.mrb[84].mxu0  ;;  %v2945_v15 = vpop.f32.mrb[84].mxu1 }
 0x21f   : > { %v2658_v16 = vpop.f32.mrb[85].mxu0  ;;  %v5294_v24 = vadd.f32 %v2945_v15, %v2656_v54  ;;  %v2947_v27 = vpop.f32.mrb[85].mxu1  ;;  %v553_v15 = vld [vmem:[%s4783_s4 + $0x498] sm:$0xff] }
 0x220   : > { %v2659_v36 = vpop.f32.mrb[86].mxu0  ;;  %v2948_v30 = vpop.f32.mrb[86].mxu1  ;;  %v557_v16 = vld [vmem:[%s4783_s4 + $0x4b8] sm:$0xff] }
 0x221   : > { %5625 = vst [vmem:[#allocation8_spill] sm:$0xff] %v5294_v24  ;;  %v2661_v41 = vpop.f32.mrb[87].mxu0  ;;  %v5296_v48 = vadd.f32 %v2948_v30, %v2659_v36  ;;  %v2950_v51 = vpop.f32.mrb[87].mxu1 }
 0x223   : > { %5626 = vst [vmem:[#allocation9_spill] sm:$0xff] %v5296_v48  ;;  %3193 = vmatmul.mubr.bf16.gmra.mrb[192].mxu0 %v4212_v20  ;;  %3482 = vmatmul.mubr.bf16.gmra.mrb[192].mxu1 %v4214_v44  ;;  %v4222_v20 = vcombine.low %v545_v6, %v549_v11  ;;  %v4229_v44 = vcombine.high %v552_v25, %v556_v26 }
 0x224   : > { %3200 = vmatprep.mubr.bf16.mxu0 %v4221_v0  ;;  %3489 = vmatprep.mubr.bf16.mxu1 %v4223_v47  ;;  %v4231_v47 = vcombine.high %v553_v15, %v557_v16  ;;  %v4228_v6 = vcombine.low %v552_v25, %v556_v26  ;;  %v568_v25 = vld [vmem:[%s4783_s4 + $0x510] sm:$0xff] }
 0x225   : > { %v572_v26 = vld [vmem:[%s4783_s4 + $0x530] sm:$0xff] }
 0x226   : > { %v2664_v54 = vpop.f32.mrb[88].mxu0  ;;  %v2953_v27 = vpop.f32.mrb[88].mxu1 }
 0x227   : > { %v2666_v24 = vpop.f32.mrb[89].mxu0  ;;  %v5302_v63 = vadd.f32 %v2953_v27, %v2664_v54  ;;  %v2955_v41 = vpop.f32.mrb[89].mxu1  ;;  %v561_v54 = vld [vmem:[%s4783_s4 + $0x4d8] sm:$0xff] }
 0x228   : > { %v2667_v36 = vpop.f32.mrb[90].mxu0  ;;  %v2956_v0 = vpop.f32.mrb[90].mxu1  ;;  %v565_v27 = vld [vmem:[%s4783_s4 + $0x4f8] sm:$0xff] }
 0x229   : > { %5627 = vst [vmem:[#allocation10_spill] sm:$0xff] %v5302_v63  ;;  %v2669_v30 = vpop.f32.mrb[91].mxu0  ;;  %v5304_v51 = vadd.f32 %v2956_v0, %v2667_v36  ;;  %v2958_v48 = vpop.f32.mrb[91].mxu1  ;;  %v4239_v0 = vcombine.high %v561_v54, %v565_v27 }
 0x22a   : > { %v4230_v48 = vcombine.low %v553_v15, %v557_v16  ;;  %v4236_v15 = vcombine.low %v560_v55, %v564_v58 }
 0x22b   : > { %5628 = vst [vmem:[#allocation11_spill] sm:$0xff] %v5304_v51  ;;  %3201 = vmatmul.mubr.bf16.gmra.mrb[196].mxu0 %v4220_v12  ;;  %3490 = vmatmul.mubr.bf16.gmra.mrb[196].mxu1 %v4222_v20  ;;  %v4237_v12 = vcombine.high %v560_v55, %v564_v58  ;;  %v576_v55 = vld [vmem:[%s4783_s4 + $0x550] sm:$0xff] }
 0x22c   : > { %3208 = vmatprep.mubr.bf16.mxu0 %v4229_v44  ;;  %3497 = vmatprep.mubr.bf16.mxu1 %v4231_v47  ;;  %v580_v58 = vld [vmem:[%s4783_s4 + $0x570] sm:$0xff] }
 0x22e   : > { %v2672_v24 = vpop.f32.mrb[92].mxu0  ;;  %v2961_v41 = vpop.f32.mrb[92].mxu1 }
 0x22f   : > { %v2674_v63 = vpop.f32.mrb[93].mxu0  ;;  %v5310_v11 = vadd.f32 %v2961_v41, %v2672_v24  ;;  %v2963_v30 = vpop.f32.mrb[93].mxu1  ;;  %v569_v24 = vld [vmem:[%s4783_s4 + $0x518] sm:$0xff] }
 0x230   : > { %v2675_v36 = vpop.f32.mrb[94].mxu0  ;;  %v2964_v20 = vpop.f32.mrb[94].mxu1  ;;  %v573_v41 = vld [vmem:[%s4783_s4 + $0x538] sm:$0xff] }
 0x231   : > { %5629 = vst [vmem:[#allocation12_spill] sm:$0xff] %v5310_v11  ;;  %v2677_v44 = vpop.f32.mrb[95].mxu0  ;;  %v5312_v47 = vadd.f32 %v2964_v20, %v2675_v36  ;;  %v2966_v51 = vpop.f32.mrb[95].mxu1  ;;  %v4247_v20 = vcombine.high %v569_v24, %v573_v41 }
 0x232   : > { %v4238_v51 = vcombine.low %v561_v54, %v565_v27  ;;  %v4244_v54 = vcombine.low %v568_v25, %v572_v26 }
 0x233   : > { %5630 = vst [vmem:[#allocation13_spill] sm:$0xff] %v5312_v47  ;;  %3209 = vmatmul.mubr.bf16.gmra.mrb[200].mxu0 %v4228_v6  ;;  %3498 = vmatmul.mubr.bf16.gmra.mrb[200].mxu1 %v4230_v48  ;;  %v4245_v6 = vcombine.high %v568_v25, %v572_v26  ;;  %v584_v25 = vld [vmem:[%s4783_s4 + $0x590] sm:$0xff] }
 0x234   : > { %3216 = vmatprep.mubr.bf16.mxu0 %v4237_v12  ;;  %3505 = vmatprep.mubr.bf16.mxu1 %v4239_v0  ;;  %v588_v26 = vld [vmem:[%s4783_s4 + $0x5b0] sm:$0xff] }
 0x236   : > { %v2680_v63 = vpop.f32.mrb[96].mxu0  ;;  %v2969_v30 = vpop.f32.mrb[96].mxu1 }
 0x237   : > { %v2682_v11 = vpop.f32.mrb[97].mxu0  ;;  %v5318_v16 = vadd.f32 %v2969_v30, %v2680_v63  ;;  %v2971_v44 = vpop.f32.mrb[97].mxu1  ;;  %v577_v63 = vld [vmem:[%s4783_s4 + $0x558] sm:$0xff] }
 0x238   : > { %v2683_v36 = vpop.f32.mrb[98].mxu0  ;;  %v2972_v48 = vpop.f32.mrb[98].mxu1  ;;  %v581_v30 = vld [vmem:[%s4783_s4 + $0x578] sm:$0xff] }
 0x239   : > { %5631 = vst [vmem:[#allocation14_spill] sm:$0xff] %v5318_v16  ;;  %v2685_v12 = vpop.f32.mrb[99].mxu0  ;;  %v5320_v0 = vadd.f32 %v2972_v48, %v2683_v36  ;;  %v2974_v47 = vpop.f32.mrb[99].mxu1  ;;  %v4255_v48 = vcombine.high %v577_v63, %v581_v30 }
 0x23a   : > { %v4246_v47 = vcombine.low %v569_v24, %v573_v41  ;;  %v4252_v24 = vcombine.low %v576_v55, %v580_v58 }
 0x23b   : > { %5632 = vst [vmem:[#allocation15_spill] sm:$0xff] %v5320_v0  ;;  %3217 = vmatmul.mubr.bf16.gmra.mrb[204].mxu0 %v4236_v15  ;;  %3506 = vmatmul.mubr.bf16.gmra.mrb[204].mxu1 %v4238_v51  ;;  %v4253_v15 = vcombine.high %v576_v55, %v580_v58  ;;  %v592_v55 = vld [vmem:[%s4783_s4 + $0x5d0] sm:$0xff] }
 0x23c   : > { %3224 = vmatprep.mubr.bf16.mxu0 %v4245_v6  ;;  %3513 = vmatprep.mubr.bf16.mxu1 %v4247_v20  ;;  %v596_v58 = vld [vmem:[%s4783_s4 + $0x5f0] sm:$0xff] }
 0x23e   : > { %v2688_v11 = vpop.f32.mrb[100].mxu0  ;;  %v2977_v44 = vpop.f32.mrb[100].mxu1 }
 0x23f   : > { %v2690_v16 = vpop.f32.mrb[101].mxu0  ;;  %v5326_v27 = vadd.f32 %v2977_v44, %v2688_v11  ;;  %v2979_v12 = vpop.f32.mrb[101].mxu1  ;;  %v585_v11 = vld [vmem:[%s4783_s4 + $0x598] sm:$0xff] }
 0x240   : > { %v2691_v36 = vpop.f32.mrb[102].mxu0  ;;  %v2980_v51 = vpop.f32.mrb[102].mxu1  ;;  %v589_v44 = vld [vmem:[%s4783_s4 + $0x5b8] sm:$0xff] }
 0x241   : > { %5633 = vst [vmem:[#allocation16_spill] sm:$0xff] %v5326_v27  ;;  %v2693_v6 = vpop.f32.mrb[103].mxu0  ;;  %v5328_v20 = vadd.f32 %v2980_v51, %v2691_v36  ;;  %v2982_v0 = vpop.f32.mrb[103].mxu1  ;;  %v4263_v51 = vcombine.high %v585_v11, %v589_v44 }
 0x242   : > { %v4254_v0 = vcombine.low %v577_v63, %v581_v30  ;;  %v4260_v63 = vcombine.low %v584_v25, %v588_v26 }
 0x243   : > { %5634 = vst [vmem:[#allocation17_spill] sm:$0xff] %v5328_v20  ;;  %3225 = vmatmul.mubr.bf16.gmra.mrb[208].mxu0 %v4244_v54  ;;  %3514 = vmatmul.mubr.bf16.gmra.mrb[208].mxu1 %v4246_v47  ;;  %v4261_v54 = vcombine.high %v584_v25, %v588_v26  ;;  %v600_v25 = vld [vmem:[%s4783_s4 + $0x610] sm:$0xff] }
 0x244   : > { %3232 = vmatprep.mubr.bf16.mxu0 %v4253_v15  ;;  %3521 = vmatprep.mubr.bf16.mxu1 %v4255_v48  ;;  %v604_v26 = vld [vmem:[%s4783_s4 + $0x630] sm:$0xff] }
 0x246   : > { %v2696_v16 = vpop.f32.mrb[104].mxu0  ;;  %v2985_v12 = vpop.f32.mrb[104].mxu1 }
 0x247   : > { %v2698_v27 = vpop.f32.mrb[105].mxu0  ;;  %v5334_v41 = vadd.f32 %v2985_v12, %v2696_v16  ;;  %v2987_v6 = vpop.f32.mrb[105].mxu1  ;;  %v593_v16 = vld [vmem:[%s4783_s4 + $0x5d8] sm:$0xff] }
 0x248   : > { %v2699_v36 = vpop.f32.mrb[106].mxu0  ;;  %v2988_v47 = vpop.f32.mrb[106].mxu1  ;;  %v597_v12 = vld [vmem:[%s4783_s4 + $0x5f8] sm:$0xff] }
 0x249   : > { %5635 = vst [vmem:[#allocation18_spill] sm:$0xff] %v5334_v41  ;;  %v2701_v15 = vpop.f32.mrb[107].mxu0  ;;  %v5336_v48 = vadd.f32 %v2988_v47, %v2699_v36  ;;  %v2990_v20 = vpop.f32.mrb[107].mxu1  ;;  %v4271_v47 = vcombine.high %v593_v16, %v597_v12 }
 0x24a   : > { %v4262_v20 = vcombine.low %v585_v11, %v589_v44  ;;  %v4268_v11 = vcombine.low %v592_v55, %v596_v58 }
 0x24b   : > { %5636 = vst [vmem:[#allocation19_spill] sm:$0xff] %v5336_v48  ;;  %3233 = vmatmul.mubr.bf16.gmra.mrb[212].mxu0 %v4252_v24  ;;  %3522 = vmatmul.mubr.bf16.gmra.mrb[212].mxu1 %v4254_v0  ;;  %v4269_v24 = vcombine.high %v592_v55, %v596_v58  ;;  %v608_v55 = vld [vmem:[%s4783_s4 + $0x650] sm:$0xff] }
 0x24c   : > { %3240 = vmatprep.mubr.bf16.mxu0 %v4261_v54  ;;  %3529 = vmatprep.mubr.bf16.mxu1 %v4263_v51  ;;  %v612_v58 = vld [vmem:[%s4783_s4 + $0x670] sm:$0xff] }
 0x24e   : > { %v2704_v27 = vpop.f32.mrb[108].mxu0  ;;  %v2993_v6 = vpop.f32.mrb[108].mxu1 }
 0x24f   : > { %v2706_v41 = vpop.f32.mrb[109].mxu0  ;;  %v5342_v30 = vadd.f32 %v2993_v6, %v2704_v27  ;;  %v2995_v15 = vpop.f32.mrb[109].mxu1  ;;  %v601_v27 = vld [vmem:[%s4783_s4 + $0x618] sm:$0xff] }
 0x250   : > { %v2707_v36 = vpop.f32.mrb[110].mxu0  ;;  %v2996_v0 = vpop.f32.mrb[110].mxu1  ;;  %v605_v6 = vld [vmem:[%s4783_s4 + $0x638] sm:$0xff] }
 0x251   : > { %5637 = vst [vmem:[#allocation20_spill] sm:$0xff] %v5342_v30  ;;  %v2709_v54 = vpop.f32.mrb[111].mxu0  ;;  %v5344_v51 = vadd.f32 %v2996_v0, %v2707_v36  ;;  %v2998_v48 = vpop.f32.mrb[111].mxu1  ;;  %v4279_v0 = vcombine.high %v601_v27, %v605_v6 }
 0x252   : > { %v4270_v48 = vcombine.low %v593_v16, %v597_v12  ;;  %v4276_v16 = vcombine.low %v600_v25, %v604_v26 }
 0x253   : > { %5638 = vst [vmem:[#allocation21_spill] sm:$0xff] %v5344_v51  ;;  %3241 = vmatmul.mubr.bf16.gmra.mrb[216].mxu0 %v4260_v63  ;;  %3530 = vmatmul.mubr.bf16.gmra.mrb[216].mxu1 %v4262_v20  ;;  %v4277_v63 = vcombine.high %v600_v25, %v604_v26  ;;  %v616_v25 = vld [vmem:[%s4783_s4 + $0x690] sm:$0xff] }
 0x254   : > { %3248 = vmatprep.mubr.bf16.mxu0 %v4269_v24  ;;  %3537 = vmatprep.mubr.bf16.mxu1 %v4271_v47  ;;  %v620_v26 = vld [vmem:[%s4783_s4 + $0x6b0] sm:$0xff] }
 0x256   : > { %v2712_v41 = vpop.f32.mrb[112].mxu0  ;;  %v3001_v15 = vpop.f32.mrb[112].mxu1 }
 0x257   : > { %v2714_v30 = vpop.f32.mrb[113].mxu0  ;;  %v5350_v44 = vadd.f32 %v3001_v15, %v2712_v41  ;;  %v3003_v54 = vpop.f32.mrb[113].mxu1  ;;  %v609_v41 = vld [vmem:[%s4783_s4 + $0x658] sm:$0xff] }
 0x258   : > { %v2715_v36 = vpop.f32.mrb[114].mxu0  ;;  %v3004_v20 = vpop.f32.mrb[114].mxu1  ;;  %v613_v15 = vld [vmem:[%s4783_s4 + $0x678] sm:$0xff] }
 0x259   : > { %5639 = vst [vmem:[#allocation22_spill] sm:$0xff] %v5350_v44  ;;  %v2717_v24 = vpop.f32.mrb[115].mxu0  ;;  %v5352_v47 = vadd.f32 %v3004_v20, %v2715_v36  ;;  %v3006_v51 = vpop.f32.mrb[115].mxu1  ;;  %v4287_v20 = vcombine.high %v609_v41, %v613_v15 }
 0x25a   : > { %v4278_v51 = vcombine.low %v601_v27, %v605_v6  ;;  %v4284_v27 = vcombine.low %v608_v55, %v612_v58 }
 0x25b   : > { %5640 = vst [vmem:[#allocation23_spill] sm:$0xff] %v5352_v47  ;;  %3249 = vmatmul.mubr.bf16.gmra.mrb[220].mxu0 %v4268_v11  ;;  %3538 = vmatmul.mubr.bf16.gmra.mrb[220].mxu1 %v4270_v48  ;;  %v4285_v11 = vcombine.high %v608_v55, %v612_v58  ;;  %v624_v55 = vld [vmem:[%s4783_s4 + $0x6d0] sm:$0xff] }
 0x25c   : > { %3256 = vmatprep.mubr.bf16.mxu0 %v4277_v63  ;;  %3545 = vmatprep.mubr.bf16.mxu1 %v4279_v0  ;;  %v628_v58 = vld [vmem:[%s4783_s4 + $0x6f0] sm:$0xff] }
 0x25e   : > { %v2720_v30 = vpop.f32.mrb[116].mxu0  ;;  %v3009_v54 = vpop.f32.mrb[116].mxu1 }
 0x25f   : > { %v2722_v44 = vpop.f32.mrb[117].mxu0  ;;  %v5358_v12 = vadd.f32 %v3009_v54, %v2720_v30  ;;  %v3011_v24 = vpop.f32.mrb[117].mxu1  ;;  %v617_v30 = vld [vmem:[%s4783_s4 + $0x698] sm:$0xff] }
 0x260   : > { %v2723_v36 = vpop.f32.mrb[118].mxu0  ;;  %v3012_v48 = vpop.f32.mrb[118].mxu1  ;;  %v621_v54 = vld [vmem:[%s4783_s4 + $0x6b8] sm:$0xff] }
 0x261   : > { %5641 = vst [vmem:[#allocation24_spill] sm:$0xff] %v5358_v12  ;;  %v2725_v63 = vpop.f32.mrb[119].mxu0  ;;  %v5360_v0 = vadd.f32 %v3012_v48, %v2723_v36  ;;  %v3014_v47 = vpop.f32.mrb[119].mxu1  ;;  %v4295_v48 = vcombine.high %v617_v30, %v621_v54 }
 0x262   : > { %v4286_v47 = vcombine.low %v609_v41, %v613_v15  ;;  %v4292_v41 = vcombine.low %v616_v25, %v620_v26 }
 0x263   : > { %5642 = vst [vmem:[#allocation25_spill] sm:$0xff] %v5360_v0  ;;  %3257 = vmatmul.mubr.bf16.gmra.mrb[224].mxu0 %v4276_v16  ;;  %3546 = vmatmul.mubr.bf16.gmra.mrb[224].mxu1 %v4278_v51  ;;  %v4293_v16 = vcombine.high %v616_v25, %v620_v26  ;;  %v632_v25 = vld [vmem:[%s4783_s4 + $0x710] sm:$0xff] }
 0x264   : > { %3264 = vmatprep.mubr.bf16.mxu0 %v4285_v11  ;;  %3553 = vmatprep.mubr.bf16.mxu1 %v4287_v20  ;;  %v636_v26 = vld [vmem:[%s4783_s4 + $0x730] sm:$0xff] }
 0x266   : > { %v2728_v44 = vpop.f32.mrb[120].mxu0  ;;  %v3017_v24 = vpop.f32.mrb[120].mxu1 }
 0x267   : > { %v2730_v12 = vpop.f32.mrb[121].mxu0  ;;  %v5366_v6 = vadd.f32 %v3017_v24, %v2728_v44  ;;  %v3019_v63 = vpop.f32.mrb[121].mxu1  ;;  %v625_v44 = vld [vmem:[%s4783_s4 + $0x6d8] sm:$0xff] }
 0x268   : > { %v2731_v36 = vpop.f32.mrb[122].mxu0  ;;  %v3020_v51 = vpop.f32.mrb[122].mxu1  ;;  %v629_v24 = vld [vmem:[%s4783_s4 + $0x6f8] sm:$0xff] }
 0x269   : > { %5643 = vst [vmem:[#allocation26_spill] sm:$0xff] %v5366_v6  ;;  %v2733_v11 = vpop.f32.mrb[123].mxu0  ;;  %v5368_v20 = vadd.f32 %v3020_v51, %v2731_v36  ;;  %v3022_v0 = vpop.f32.mrb[123].mxu1  ;;  %v4303_v51 = vcombine.high %v625_v44, %v629_v24 }
 0x26a   : > { %v4294_v0 = vcombine.low %v617_v30, %v621_v54  ;;  %v4300_v54 = vcombine.low %v624_v55, %v628_v58 }
 0x26b   : > { %5644 = vst [vmem:[#allocation27_spill] sm:$0xff] %v5368_v20  ;;  %3265 = vmatmul.mubr.bf16.gmra.mrb[228].mxu0 %v4284_v27  ;;  %3554 = vmatmul.mubr.bf16.gmra.mrb[228].mxu1 %v4286_v47  ;;  %v4301_v27 = vcombine.high %v624_v55, %v628_v58  ;;  %v640_v58 = vld [vmem:[%s4783_s4 + $0x750] sm:$0xff] }
 0x26c   : > { %3272 = vmatprep.mubr.bf16.mxu0 %v4293_v16  ;;  %3561 = vmatprep.mubr.bf16.mxu1 %v4295_v48 }
 0x26e   : > { %v2736_v12 = vpop.f32.mrb[124].mxu0  ;;  %v3025_v63 = vpop.f32.mrb[124].mxu1 }
 0x26f   : > { %v2738_v6 = vpop.f32.mrb[125].mxu0  ;;  %v5374_v15 = vadd.f32 %v3025_v63, %v2736_v12  ;;  %v3027_v11 = vpop.f32.mrb[125].mxu1  ;;  %v633_v12 = vld [vmem:[%s4783_s4 + $0x718] sm:$0xff] }
 0x270   : > { %v2739_v36 = vpop.f32.mrb[126].mxu0  ;;  %v3028_v47 = vpop.f32.mrb[126].mxu1  ;;  %v637_v63 = vld [vmem:[%s4783_s4 + $0x738] sm:$0xff] }
 0x271   : > { %5645 = vst [vmem:[#allocation28_spill] sm:$0xff] %v5374_v15  ;;  %v2741_v16 = vpop.f32.mrb[127].mxu0  ;;  %v5376_v48 = vadd.f32 %v3028_v47, %v2739_v36  ;;  %v3030_v20 = vpop.f32.mrb[127].mxu1  ;;  %v4302_v36 = vcombine.low %v625_v44, %v629_v24  ;;  %v4309_v47 = vcombine.high %v632_v25, %v636_v26  ;;  %v644_v44 = vld [vmem:[%s4783_s4 + $0x770] sm:$0xff] }
 0x273   : > { %5646 = vst [vmem:[#allocation29_spill] sm:$0xff] %v5376_v48  ;;  %3273 = vmatmul.mubr.bf16.gmra.mrb[232].mxu0 %v4292_v41  ;;  %3562 = vmatmul.mubr.bf16.gmra.mrb[232].mxu1 %v4294_v0  ;;  %v343_v48 = vld [vmem:[#allocation2 + $0x8] sm:$0xff] }
 0x274   : > { %3280 = vmatprep.mubr.bf16.mxu0 %v4301_v27  ;;  %3569 = vmatprep.mubr.bf16.mxu1 %v4303_v51  ;;  %v4311_v51 = vcombine.high %v633_v12, %v637_v63 }
 0x276   : > { %v3066_v6 = vpop.f32.mrb[128].mxu0  ;;  %v3355_v15 = vpop.f32.mrb[128].mxu1 }
 0x277   : > { %v3067_v11 = vadd.f32 %v3066_v6, %v5126_v42  ;;  %v3068_v30 = vpop.f32.mrb[129].mxu0  ;;  %v3357_v16 = vpop.f32.mrb[129].mxu1 }
 0x278   : > { %v3069_v46 = vpop.f32.mrb[130].mxu0  ;;  %v3358_v0 = vpop.f32.mrb[130].mxu1 }
 0x279   : > { %v3356_v20 = vadd.f32 %v3355_v15, %v3067_v11  ;;  %v3070_v41 = vadd.f32 %v3069_v46, %v5128_v50  ;;  %v3071_v27 = vpop.f32.mrb[131].mxu0  ;;  %v3360_v42 = vpop.f32.mrb[131].mxu1  ;;  %v641_v15 = vld [vmem:[%s4783_s4 + $0x758] sm:$0xff] }
 0x27a   : > { %v645_v50 = vld [vmem:[%s4783_s4 + $0x778] sm:$0xff]  ;;  %v4308_v27 = vcombine.low %v632_v25, %v636_v26  ;;  %v344_v42 = vld [vmem:[#allocation2 + $0x10] sm:$0xff] }
 0x27b   : > { %v3610_v6 = vadd.f32 %v3356_v20, %v342_v34  ;;  %v3359_v30 = vadd.f32 %v3358_v0, %v3070_v41  ;;  %3281 = vmatmul.mubr.bf16.gmra.mrb[236].mxu0 %v4300_v54  ;;  %3570 = vmatmul.mubr.bf16.gmra.mrb[236].mxu1 %v4302_v36  ;;  %v4310_v54 = vcombine.low %v633_v12, %v637_v63  ;;  %v648_v26 = vld [vmem:[%s4783_s4 + $0x790] sm:$0xff] }
 0x27c   : > { %3288 = vmatprep.mubr.bf16.mxu0 %v4309_v47  ;;  %3577 = vmatprep.mubr.bf16.mxu1 %v4311_v51  ;;  %v4317_v36 = vcombine.high %v640_v58, %v644_v44  ;;  %v4319_v51 = vcombine.high %v641_v15, %v645_v50  ;;  %v652_v12 = vld [vmem:[%s4783_s4 + $0x7b0] sm:$0xff] }
 0x27d   : > { %3674 = vst [vmem:[#allocation2] sm:$0xff] %v3610_v6  ;;  %v3611_v55 = vadd.f32 %v3359_v30, %v343_v48  ;;  %v345_v6 = vld [vmem:[#allocation2 + $0x18] sm:$0xff] }
 0x27e   : > { %v3074_v24 = vpop.f32.mrb[132].mxu0  ;;  %v3363_v11 = vpop.f32.mrb[132].mxu1 }
 0x27f   : > { %3675 = vst [vmem:[#allocation2 + $0x8] sm:$0xff] %v3611_v55  ;;  %v3075_v46 = vadd.f32 %v3074_v24, %v5134_v60  ;;  %v3076_v16 = vpop.f32.mrb[133].mxu0  ;;  %v3365_v34 = vpop.f32.mrb[133].mxu1  ;;  %v649_v24 = vld [vmem:[%s4783_s4 + $0x798] sm:$0xff] }
 0x280   : > { %v3077_v20 = vpop.f32.mrb[134].mxu0  ;;  %v3366_v41 = vpop.f32.mrb[134].mxu1  ;;  %v4316_v34 = vcombine.low %v640_v58, %v644_v44  ;;  %v656_v44 = vld [vmem:[%s4783_s4 + $0x7d0] sm:$0xff] }
 0x281   : > { %v3364_v47 = vadd.f32 %v3363_v11, %v3075_v46  ;;  %v3078_v48 = vadd.f32 %v3077_v20, %v5136_v4  ;;  %v3079_v0 = vpop.f32.mrb[135].mxu0  ;;  %v3368_v60 = vpop.f32.mrb[135].mxu1  ;;  %v653_v4 = vld [vmem:[%s4783_s4 + $0x7b8] sm:$0xff]  ;;  %v346_v20 = vld [vmem:[#allocation2 + $0x20] sm:$0xff] }
 0x283   : > { %v3612_v30 = vadd.f32 %v3364_v47, %v344_v42  ;;  %v3367_v55 = vadd.f32 %v3366_v41, %v3078_v48  ;;  %3289 = vmatmul.mubr.bf16.gmra.mrb[240].mxu0 %v4308_v27  ;;  %3578 = vmatmul.mubr.bf16.gmra.mrb[240].mxu1 %v4310_v54  ;;  %v4318_v27 = vcombine.low %v641_v15, %v645_v50  ;;  %v660_v15 = vld [vmem:[%s4783_s4 + $0x7f0] sm:$0xff] }
 0x284   : > { %3296 = vmatprep.mubr.bf16.mxu0 %v4317_v36  ;;  %3585 = vmatprep.mubr.bf16.mxu1 %v4319_v51  ;;  %v4325_v54 = vcombine.high %v648_v26, %v652_v12  ;;  %v4327_v51 = vcombine.high %v649_v24, %v653_v4 }
 0x285   : > { %3676 = vst [vmem:[#allocation2 + $0x10] sm:$0xff] %v3612_v30  ;;  %v3613_v25 = vadd.f32 %v3367_v55, %v345_v6  ;;  %v347_v6 = vld [vmem:[#allocation2 + $0x28] sm:$0xff]  ;;  %v657_v55 = vld [vmem:[%s4783_s4 + $0x7d8] sm:$0xff] }
 0x286   : > { %v3082_v63 = vpop.f32.mrb[136].mxu0  ;;  %v3371_v11 = vpop.f32.mrb[136].mxu1 }
 0x287   : > { %3677 = vst [vmem:[#allocation2 + $0x18] sm:$0xff] %v3613_v25  ;;  %v3083_v46 = vadd.f32 %v3082_v63, %v5142_v14  ;;  %v3084_v16 = vpop.f32.mrb[137].mxu0  ;;  %v3373_v42 = vpop.f32.mrb[137].mxu1 }
 0x288   : > { %v3085_v47 = vpop.f32.mrb[138].mxu0  ;;  %v3374_v41 = vpop.f32.mrb[138].mxu1  ;;  %v348_v16 = vld [vmem:[#allocation2 + $0x30] sm:$0xff] }
 0x289   : > { %v3372_v36 = vadd.f32 %v3371_v11, %v3083_v46  ;;  %v3086_v48 = vadd.f32 %v3085_v47, %v5144_v22  ;;  %v3087_v0 = vpop.f32.mrb[139].mxu0  ;;  %v3376_v14 = vpop.f32.mrb[139].mxu1  ;;  %v661_v22 = vld [vmem:[%s4783_s4 + $0x7f8] sm:$0xff]  ;;  %v4324_v11 = vcombine.low %v648_v26, %v652_v12  ;;  %v4333_v47 = vcombine.high %v656_v44, %v660_v15 }
 0x28a   : > { %v349_v0 = vld [vmem:[#allocation2 + $0x38] sm:$0xff] }
 0x28b   : > { %v3614_v60 = vadd.f32 %v3372_v36, %v346_v20  ;;  %v3375_v30 = vadd.f32 %v3374_v41, %v3086_v48  ;;  %3297 = vmatmul.mubr.bf16.gmra.mrb[244].mxu0 %v4316_v34  ;;  %3586 = vmatmul.mubr.bf16.gmra.mrb[244].mxu1 %v4318_v27  ;;  %v4326_v34 = vcombine.low %v649_v24, %v653_v4 }
 0x28c   : > { %3304 = vmatprep.mubr.bf16.mxu0 %v4325_v54  ;;  %3593 = vmatprep.mubr.bf16.mxu1 %v4327_v51  ;;  %v4335_v41 = vcombine.high %v657_v55, %v661_v22 }
 0x28d   : > { %3678 = vst [vmem:[#allocation2 + $0x20] sm:$0xff] %v3614_v60  ;;  %v3615_v58 = vadd.f32 %v3375_v30, %v347_v6  ;;  %v350_v60 = vld [vmem:[#allocation2 + $0x40] sm:$0xff] }
 0x28e   : > { %v3090_v50 = vpop.f32.mrb[140].mxu0  ;;  %v3379_v63 = vpop.f32.mrb[140].mxu1 }
 0x28f   : > { %3679 = vst [vmem:[#allocation2 + $0x28] sm:$0xff] %v3615_v58  ;;  %v3091_v25 = vadd.f32 %v3090_v50, %v5150_v32  ;;  %v3092_v46 = vpop.f32.mrb[141].mxu0  ;;  %v3381_v20 = vpop.f32.mrb[141].mxu1  ;;  %v4334_v50 = vcombine.low %v657_v55, %v661_v22  ;;  %v352_v55 = vld [vmem:[#allocation2 + $0x50] sm:$0xff] }
 0x290   : > { %v3093_v42 = vpop.f32.mrb[142].mxu0  ;;  %v3382_v36 = vpop.f32.mrb[142].mxu1 }
 0x291   : > { %v3380_v27 = vadd.f32 %v3379_v63, %v3091_v25  ;;  %v3094_v54 = vadd.f32 %v3093_v42, %v5152_v40  ;;  %v3095_v48 = vpop.f32.mrb[143].mxu0  ;;  %v3384_v51 = vpop.f32.mrb[143].mxu1  ;;  %v4332_v40 = vcombine.low %v656_v44, %v660_v15 }
 0x293   : > { %v3616_v6 = vadd.f32 %v3380_v27, %v348_v16  ;;  %v3383_v14 = vadd.f32 %v3382_v36, %v3094_v54  ;;  %3305 = vmatmul.mubr.bf16.gmra.mrb[248].mxu0 %v4324_v11  ;;  %3594 = vmatmul.mubr.bf16.gmra.mrb[248].mxu1 %v4326_v34  ;;  %v351_v16 = vld [vmem:[#allocation2 + $0x48] sm:$0xff] }
 0x294   : > { %3312 = vmatprep.mubr.bf16.mxu0 %v4333_v47  ;;  %3601 = vmatprep.mubr.bf16.mxu1 %v4335_v41 }
 0x295   : > { %3680 = vst [vmem:[#allocation2 + $0x30] sm:$0xff] %v3616_v6  ;;  %v3617_v32 = vadd.f32 %v3383_v14, %v349_v0  ;;  %v353_v0 = vld [vmem:[#allocation2 + $0x58] sm:$0xff] }
 0x296   : > { %v3098_v26 = vpop.f32.mrb[144].mxu0  ;;  %v3387_v24 = vpop.f32.mrb[144].mxu1 }
 0x297   : > { %3681 = vst [vmem:[#allocation2 + $0x38] sm:$0xff] %v3617_v32  ;;  %v3099_v12 = vadd.f32 %v3098_v26, %v5158_v52  ;;  %v3100_v4 = vpop.f32.mrb[145].mxu0  ;;  %v3389_v30 = vpop.f32.mrb[145].mxu1 }
 0x298   : > { %v3101_v58 = vpop.f32.mrb[146].mxu0  ;;  %v3390_v46 = vpop.f32.mrb[146].mxu1  ;;  %v354_v4 = vld [vmem:[#allocation2 + $0x60] sm:$0xff] }
 0x299   : > { %v3388_v25 = vadd.f32 %v3387_v24, %v3099_v12  ;;  %v3102_v63 = vadd.f32 %v3101_v58, %v5160_v61  ;;  %v3103_v11 = vpop.f32.mrb[147].mxu0  ;;  %v3392_v20 = vpop.f32.mrb[147].mxu1 }
 0x29b   : > { %v3618_v42 = vadd.f32 %v3388_v25, %v350_v60  ;;  %v3391_v34 = vadd.f32 %v3390_v46, %v3102_v63  ;;  %3313 = vmatmul.mubr.bf16.gmra.mrb[252].mxu0 %v4332_v40  ;;  %3602 = vmatmul.mubr.bf16.gmra.mrb[252].mxu1 %v4334_v50  ;;  %v355_v25 = vld [vmem:[#allocation2 + $0x68] sm:$0xff] }
 0x29d   : > { %3682 = vst [vmem:[#allocation2 + $0x40] sm:$0xff] %v3618_v42  ;;  %v3619_v52 = vadd.f32 %v3391_v34, %v351_v16 }
 0x29e   : > { %v3106_v47 = vpop.f32.mrb[148].mxu0  ;;  %v3395_v15 = vpop.f32.mrb[148].mxu1 }
 0x29f   : > { %3683 = vst [vmem:[#allocation2 + $0x48] sm:$0xff] %v3619_v52  ;;  %v3107_v44 = vadd.f32 %v3106_v47, %v5166_v8  ;;  %v3108_v27 = vpop.f32.mrb[149].mxu0  ;;  %v3397_v22 = vpop.f32.mrb[149].mxu1  ;;  %v356_v52 = vld [vmem:[#allocation2 + $0x70] sm:$0xff] }
 0x2a0   : > { %v3109_v54 = vpop.f32.mrb[150].mxu0  ;;  %v3398_v48 = vpop.f32.mrb[150].mxu1  ;;  %v357_v22 = vld [vmem:[#allocation2 + $0x78] sm:$0xff] }
 0x2a1   : > { %v3396_v61 = vadd.f32 %v3395_v15, %v3107_v44  ;;  %v3110_v36 = vadd.f32 %v3109_v54, %v5168_v17  ;;  %v3111_v41 = vpop.f32.mrb[151].mxu0  ;;  %v3400_v51 = vpop.f32.mrb[151].mxu1 }
 0x2a3   : > { %v3620_v6 = vadd.f32 %v3396_v61, %v352_v55  ;;  %v3399_v14 = vadd.f32 %v3398_v48, %v3110_v36 }
 0x2a5   : > { %3684 = vst [vmem:[#allocation2 + $0x50] sm:$0xff] %v3620_v6  ;;  %v3621_v32 = vadd.f32 %v3399_v14, %v353_v0  ;;  %v358_v6 = vld [vmem:[#allocation2 + $0x80] sm:$0xff] }
 0x2a6   : > { %v3114_v26 = vpop.f32.mrb[152].mxu0  ;;  %v3403_v12 = vpop.f32.mrb[152].mxu1 }
 0x2a7   : > { %3685 = vst [vmem:[#allocation2 + $0x58] sm:$0xff] %v3621_v32  ;;  %v3115_v8 = vadd.f32 %v3114_v26, %v5174_v28  ;;  %v3116_v24 = vpop.f32.mrb[153].mxu0  ;;  %v3405_v40 = vpop.f32.mrb[153].mxu1 }
 0x2a8   : > { %v3117_v60 = vpop.f32.mrb[154].mxu0  ;;  %v3406_v58 = vpop.f32.mrb[154].mxu1  ;;  %v359_v24 = vld [vmem:[#allocation2 + $0x88] sm:$0xff] }
 0x2a9   : > { %v3404_v30 = vadd.f32 %v3403_v12, %v3115_v8  ;;  %v3118_v17 = vadd.f32 %v3117_v60, %v5176_v37  ;;  %v3119_v50 = vpop.f32.mrb[155].mxu0  ;;  %v3408_v63 = vpop.f32.mrb[155].mxu1 }
 0x2ab   : > { %v3622_v46 = vadd.f32 %v3404_v30, %v354_v4  ;;  %v3407_v11 = vadd.f32 %v3406_v58, %v3118_v17 }
 0x2ad   : > { %3686 = vst [vmem:[#allocation2 + $0x60] sm:$0xff] %v3622_v46  ;;  %v3623_v16 = vadd.f32 %v3407_v11, %v355_v25  ;;  %v360_v25 = vld [vmem:[#allocation2 + $0x90] sm:$0xff] }
 0x2ae   : > { %v3122_v20 = vpop.f32.mrb[156].mxu0  ;;  %v3411_v42 = vpop.f32.mrb[156].mxu1 }
 0x2af   : > { %3687 = vst [vmem:[#allocation2 + $0x68] sm:$0xff] %v3623_v16  ;;  %v3123_v28 = vadd.f32 %v3122_v20, %v5182_v49  ;;  %v3124_v34 = vpop.f32.mrb[157].mxu0  ;;  %v3413_v47 = vpop.f32.mrb[157].mxu1 }
 0x2b0   : > { %v3125_v44 = vpop.f32.mrb[158].mxu0  ;;  %v3414_v27 = vpop.f32.mrb[158].mxu1 }
 0x2b1   : > { %v3412_v15 = vadd.f32 %v3411_v42, %v3123_v28  ;;  %v3126_v37 = vadd.f32 %v3125_v44, %v5184_v59  ;;  %v3127_v55 = vpop.f32.mrb[159].mxu0  ;;  %v3416_v54 = vpop.f32.mrb[159].mxu1  ;;  %v361_v28 = vld [vmem:[#allocation2 + $0x98] sm:$0xff] }
 0x2b3   : > { %v3624_v61 = vadd.f32 %v3412_v15, %v356_v52  ;;  %v3415_v36 = vadd.f32 %v3414_v27, %v3126_v37  ;;  %v362_v27 = vld [vmem:[#allocation2 + $0xa0] sm:$0xff] }
 0x2b5   : > { %3688 = vst [vmem:[#allocation2 + $0x70] sm:$0xff] %v3624_v61  ;;  %v3625_v48 = vadd.f32 %v3415_v36, %v357_v22 }
 0x2b6   : > { %v3130_v41 = vpop.f32.mrb[160].mxu0  ;;  %v3419_v0 = vpop.f32.mrb[160].mxu1 }
 0x2b7   : > { %3689 = vst [vmem:[#allocation2 + $0x78] sm:$0xff] %v3625_v48  ;;  %v3131_v49 = vadd.f32 %v3130_v41, %v5190_v9  ;;  %v3132_v51 = vpop.f32.mrb[161].mxu0  ;;  %v3421_v14 = vpop.f32.mrb[161].mxu1  ;;  %v363_v48 = vld [vmem:[#allocation2 + $0xa8] sm:$0xff] }
 0x2b8   : > { %v3133_v32 = vpop.f32.mrb[162].mxu0  ;;  %v3422_v8 = vpop.f32.mrb[162].mxu1 }
 0x2b9   : > { %v3420_v26 = vadd.f32 %v3419_v0, %v3131_v49  ;;  %v3134_v59 = vadd.f32 %v3133_v32, %v5192_v19  ;;  %v3135_v12 = vpop.f32.mrb[163].mxu0  ;;  %v3424_v4 = vpop.f32.mrb[163].mxu1 }
 0x2bb   : > { %v3626_v40 = vadd.f32 %v3420_v26, %v358_v6  ;;  %v3423_v60 = vadd.f32 %v3422_v8, %v3134_v59  ;;  %v364_v26 = vld [vmem:[#allocation2 + $0xb0] sm:$0xff] }
 0x2bd   : > { %3690 = vst [vmem:[#allocation2 + $0x80] sm:$0xff] %v3626_v40  ;;  %v3627_v30 = vadd.f32 %v3423_v60, %v359_v24  ;;  %v365_v40 = vld [vmem:[#allocation2 + $0xb8] sm:$0xff] }
 0x2be   : > { %v3138_v17 = vpop.f32.mrb[164].mxu0  ;;  %v3427_v58 = vpop.f32.mrb[164].mxu1 }
 0x2bf   : > { %3691 = vst [vmem:[#allocation2 + $0x88] sm:$0xff] %v3627_v30  ;;  %v3139_v9 = vadd.f32 %v3138_v17, %v5198_v31  ;;  %v3140_v50 = vpop.f32.mrb[165].mxu0  ;;  %v3429_v63 = vpop.f32.mrb[165].mxu1 }
 0x2c0   : > { %v3141_v46 = vpop.f32.mrb[166].mxu0  ;;  %v3430_v16 = vpop.f32.mrb[166].mxu1  ;;  %v366_v63 = vld [vmem:[#allocation2 + $0xc0] sm:$0xff] }
 0x2c1   : > { %v3428_v11 = vadd.f32 %v3427_v58, %v3139_v9  ;;  %v3142_v19 = vadd.f32 %v3141_v46, %v5200_v43  ;;  %v3143_v20 = vpop.f32.mrb[167].mxu0  ;;  %v3432_v42 = vpop.f32.mrb[167].mxu1 }
 0x2c3   : > { %v3628_v34 = vadd.f32 %v3428_v11, %v360_v25  ;;  %v3431_v52 = vadd.f32 %v3430_v16, %v3142_v19 }
 0x2c5   : > { %3692 = vst [vmem:[#allocation2 + $0x90] sm:$0xff] %v3628_v34  ;;  %v3629_v47 = vadd.f32 %v3431_v52, %v361_v28  ;;  %v367_v28 = vld [vmem:[#allocation2 + $0xc8] sm:$0xff] }
 0x2c6   : > { %v3146_v44 = vpop.f32.mrb[168].mxu0  ;;  %v3435_v15 = vpop.f32.mrb[168].mxu1 }
 0x2c7   : > { %3693 = vst [vmem:[#allocation2 + $0x98] sm:$0xff] %v3629_v47  ;;  %v3147_v31 = vadd.f32 %v3146_v44, %v5206_v56  ;;  %v3148_v37 = vpop.f32.mrb[169].mxu0  ;;  %v3437_v55 = vpop.f32.mrb[169].mxu1 }
 0x2c8   : > { %v3149_v22 = vpop.f32.mrb[170].mxu0  ;;  %v3438_v61 = vpop.f32.mrb[170].mxu1  ;;  %v368_v37 = vld [vmem:[#allocation2 + $0xd0] sm:$0xff] }
 0x2c9   : > { %v3436_v54 = vadd.f32 %v3435_v15, %v3147_v31  ;;  %v3150_v43 = vadd.f32 %v3149_v22, %v5208_v3  ;;  %v3151_v36 = vpop.f32.mrb[171].mxu0  ;;  %v3440_v41 = vpop.f32.mrb[171].mxu1 }
 0x2cb   : > { %v3630_v49 = vadd.f32 %v3436_v54, %v362_v27  ;;  %v3439_v0 = vadd.f32 %v3438_v61, %v3150_v43  ;;  %v369_v61 = vld [vmem:[#allocation2 + $0xd8] sm:$0xff] }
 0x2cd   : > { %3694 = vst [vmem:[#allocation2 + $0xa0] sm:$0xff] %v3630_v49  ;;  %v3631_v51 = vadd.f32 %v3439_v0, %v363_v48 }
 0x2ce   : > { %v3154_v6 = vpop.f32.mrb[172].mxu0  ;;  %v3443_v14 = vpop.f32.mrb[172].mxu1 }
 0x2cf   : > { %3695 = vst [vmem:[#allocation2 + $0xa8] sm:$0xff] %v3631_v51  ;;  %v3155_v56 = vadd.f32 %v3154_v6, %v5214_v18  ;;  %v3156_v32 = vpop.f32.mrb[173].mxu0  ;;  %v3445_v59 = vpop.f32.mrb[173].mxu1 }
 0x2d0   : > { %v3157_v8 = vpop.f32.mrb[174].mxu0  ;;  %v3446_v24 = vpop.f32.mrb[174].mxu1 }
 0x2d1   : > { %v3444_v12 = vadd.f32 %v3443_v14, %v3155_v56  ;;  %v3158_v3 = vadd.f32 %v3157_v8, %v5216_v29  ;;  %v3159_v4 = vpop.f32.mrb[175].mxu0  ;;  %v3448_v60 = vpop.f32.mrb[175].mxu1  ;;  %v370_v56 = vld [vmem:[#allocation2 + $0xe0] sm:$0xff] }
 0x2d3   : > { %v3632_v30 = vadd.f32 %v3444_v12, %v364_v26  ;;  %v3447_v17 = vadd.f32 %v3446_v24, %v3158_v3  ;;  %v371_v12 = vld [vmem:[#allocation2 + $0xe8] sm:$0xff] }
 0x2d5   : > { %3696 = vst [vmem:[#allocation2 + $0xb0] sm:$0xff] %v3632_v30  ;;  %v3633_v9 = vadd.f32 %v3447_v17, %v365_v40 }
 0x2d6   : > { %v3162_v58 = vpop.f32.mrb[176].mxu0  ;;  %v3451_v50 = vpop.f32.mrb[176].mxu1 }
 0x2d7   : > { %3697 = vst [vmem:[#allocation2 + $0xb8] sm:$0xff] %v3633_v9  ;;  %v3163_v18 = vadd.f32 %v3162_v58, %v5222_v45  ;;  %v3164_v25 = vpop.f32.mrb[177].mxu0  ;;  %v3453_v46 = vpop.f32.mrb[177].mxu1  ;;  %v372_v9 = vld [vmem:[#allocation2 + $0xf0] sm:$0xff] }
 0x2d8   : > { %v3165_v11 = vpop.f32.mrb[178].mxu0  ;;  %v3454_v16 = vpop.f32.mrb[178].mxu1  ;;  %v373_v46 = vld [vmem:[#allocation2 + $0xf8] sm:$0xff] }
 0x2d9   : > { %v3452_v19 = vadd.f32 %v3451_v50, %v3163_v18  ;;  %v3166_v29 = vadd.f32 %v3165_v11, %v5224_v57  ;;  %v3167_v20 = vpop.f32.mrb[179].mxu0  ;;  %v3456_v42 = vpop.f32.mrb[179].mxu1 }
 0x2db   : > { %v3634_v34 = vadd.f32 %v3452_v19, %v366_v63  ;;  %v3455_v52 = vadd.f32 %v3454_v16, %v3166_v29 }
 0x2dd   : > { %3698 = vst [vmem:[#allocation2 + $0xc0] sm:$0xff] %v3634_v34  ;;  %v3635_v47 = vadd.f32 %v3455_v52, %v367_v28  ;;  %v374_v34 = vld [vmem:[#allocation2 + $0x100] sm:$0xff] }
 0x2de   : > { %v3170_v44 = vpop.f32.mrb[180].mxu0  ;;  %v3459_v31 = vpop.f32.mrb[180].mxu1 }
 0x2df   : > { %3699 = vst [vmem:[#allocation2 + $0xc8] sm:$0xff] %v3635_v47  ;;  %v3171_v45 = vadd.f32 %v3170_v44, %v5230_v10  ;;  %v3172_v15 = vpop.f32.mrb[181].mxu0  ;;  %v3461_v27 = vpop.f32.mrb[181].mxu1 }
 0x2e0   : > { %v3173_v55 = vpop.f32.mrb[182].mxu0  ;;  %v3462_v54 = vpop.f32.mrb[182].mxu1  ;;  %v375_v15 = vld [vmem:[#allocation2 + $0x108] sm:$0xff] }
 0x2e1   : > { %v3460_v22 = vadd.f32 %v3459_v31, %v3171_v45  ;;  %v3174_v57 = vadd.f32 %v3173_v55, %v5232_v23  ;;  %v3175_v43 = vpop.f32.mrb[183].mxu0  ;;  %v3464_v36 = vpop.f32.mrb[183].mxu1 }
 0x2e3   : > { %v3636_v48 = vadd.f32 %v3460_v22, %v368_v37  ;;  %v3463_v41 = vadd.f32 %v3462_v54, %v3174_v57 }
 0x2e5   : > { %3700 = vst [vmem:[#allocation2 + $0xd0] sm:$0xff] %v3636_v48  ;;  %v3637_v49 = vadd.f32 %v3463_v41, %v369_v61  ;;  %v376_v61 = vld [vmem:[#allocation2 + $0x110] sm:$0xff] }
 0x2e6   : > { %v3178_v0 = vpop.f32.mrb[184].mxu0  ;;  %v3467_v51 = vpop.f32.mrb[184].mxu1 }
 0x2e7   : > { %3701 = vst [vmem:[#allocation2 + $0xd8] sm:$0xff] %v3637_v49  ;;  %v3179_v10 = vadd.f32 %v3178_v0, %v5238_v38  ;;  %v3180_v6 = vpop.f32.mrb[185].mxu0  ;;  %v3469_v14 = vpop.f32.mrb[185].mxu1 }
 0x2e8   : > { %v3181_v32 = vpop.f32.mrb[186].mxu0  ;;  %v3470_v59 = vpop.f32.mrb[186].mxu1 }
 0x2e9   : > { %v3468_v26 = vadd.f32 %v3467_v51, %v3179_v10  ;;  %v3182_v23 = vadd.f32 %v3181_v32, %v5240_v53  ;;  %v3183_v8 = vpop.f32.mrb[187].mxu0  ;;  %v3472_v3 = vpop.f32.mrb[187].mxu1  ;;  %v377_v10 = vld [vmem:[#allocation2 + $0x118] sm:$0xff] }
 0x2eb   : > { %v3638_v24 = vadd.f32 %v3468_v26, %v370_v56  ;;  %v3471_v4 = vadd.f32 %v3470_v59, %v3182_v23  ;;  %v378_v59 = vld [vmem:[#allocation2 + $0x120] sm:$0xff] }
 0x2ed   : > { %3702 = vst [vmem:[#allocation2 + $0xe0] sm:$0xff] %v3638_v24  ;;  %v3639_v40 = vadd.f32 %v3471_v4, %v371_v12 }
 0x2ee   : > { %v3186_v60 = vpop.f32.mrb[188].mxu0  ;;  %v3475_v30 = vpop.f32.mrb[188].mxu1 }
 0x2ef   : > { %3703 = vst [vmem:[#allocation2 + $0xe8] sm:$0xff] %v3639_v40  ;;  %v3187_v38 = vadd.f32 %v3186_v60, %v5246_v1  ;;  %v3188_v17 = vpop.f32.mrb[189].mxu0  ;;  %v3477_v58 = vpop.f32.mrb[189].mxu1  ;;  %v379_v40 = vld [vmem:[#allocation2 + $0x128] sm:$0xff] }
 0x2f0   : > { %v3189_v18 = vpop.f32.mrb[190].mxu0  ;;  %v3478_v25 = vpop.f32.mrb[190].mxu1 }
 0x2f1   : > { %v3476_v50 = vadd.f32 %v3475_v30, %v3187_v38  ;;  %v3190_v53 = vadd.f32 %v3189_v18, %v5248_v21  ;;  %v3191_v63 = vpop.f32.mrb[191].mxu0  ;;  %v3480_v11 = vpop.f32.mrb[191].mxu1 }
 0x2f3   : > { %v3640_v19 = vadd.f32 %v3476_v50, %v372_v9  ;;  %v3479_v29 = vadd.f32 %v3478_v25, %v3190_v53  ;;  %v380_v50 = vld [vmem:[#allocation2 + $0x130] sm:$0xff] }
 0x2f5   : > { %3704 = vst [vmem:[#allocation2 + $0xf0] sm:$0xff] %v3640_v19  ;;  %v3641_v16 = vadd.f32 %v3479_v29, %v373_v46  ;;  %v381_v19 = vld [vmem:[#allocation2 + $0x138] sm:$0xff] }
 0x2f6   : > { %v3194_v20 = vpop.f32.mrb[192].mxu0  ;;  %v3483_v28 = vpop.f32.mrb[192].mxu1 }
 0x2f7   : > { %3705 = vst [vmem:[#allocation2 + $0xf8] sm:$0xff] %v3641_v16  ;;  %v3195_v1 = vadd.f32 %v3194_v20, %v5254_v33  ;;  %v3196_v42 = vpop.f32.mrb[193].mxu0  ;;  %v3485_v52 = vpop.f32.mrb[193].mxu1 }
 0x2f8   : > { %v3197_v47 = vpop.f32.mrb[194].mxu0  ;;  %v3486_v45 = vpop.f32.mrb[194].mxu1  ;;  %v5647_v42 = vld [vmem:[#allocation6_spill] sm:$0xff] }
 0x2f9   : > { %v3484_v44 = vadd.f32 %v3483_v28, %v3195_v1  ;;  %v3198_v21 = vadd.f32 %v3197_v47, %v5256_v62  ;;  %v3199_v31 = vpop.f32.mrb[195].mxu0  ;;  %v3488_v37 = vpop.f32.mrb[195].mxu1  ;;  %v382_v47 = vld [vmem:[#allocation2 + $0x140] sm:$0xff] }
 0x2fa   : > { %v5648_v31 = vld [vmem:[#allocation7_spill] sm:$0xff] }
 0x2fb   : > { %v3642_v27 = vadd.f32 %v3484_v44, %v374_v34  ;;  %v3487_v55 = vadd.f32 %v3486_v45, %v3198_v21 }
 0x2fd   : > { %3706 = vst [vmem:[#allocation2 + $0x100] sm:$0xff] %v3642_v27  ;;  %v3643_v22 = vadd.f32 %v3487_v55, %v375_v15  ;;  %v383_v27 = vld [vmem:[#allocation2 + $0x148] sm:$0xff] }
 0x2fe   : > { %v3202_v57 = vpop.f32.mrb[196].mxu0  ;;  %v3491_v54 = vpop.f32.mrb[196].mxu1 }
 0x2ff   : > { %3707 = vst [vmem:[#allocation2 + $0x108] sm:$0xff] %v3643_v22  ;;  %v3203_v33 = vadd.f32 %v3202_v57, %v5262_v2  ;;  %v3204_v43 = vpop.f32.mrb[197].mxu0  ;;  %v3493_v36 = vpop.f32.mrb[197].mxu1 }
 0x300   : > { %v3205_v48 = vpop.f32.mrb[198].mxu0  ;;  %v3494_v49 = vpop.f32.mrb[198].mxu1  ;;  %v5649_v43 = vld [vmem:[#allocation8_spill] sm:$0xff] }
 0x301   : > { %v3492_v41 = vadd.f32 %v3491_v54, %v3203_v33  ;;  %v3206_v62 = vadd.f32 %v3205_v48, %v5264_v39  ;;  %v3207_v0 = vpop.f32.mrb[199].mxu0  ;;  %v3496_v51 = vpop.f32.mrb[199].mxu1 }
 0x303   : > { %v3644_v6 = vadd.f32 %v3492_v41, %v376_v61  ;;  %v3495_v56 = vadd.f32 %v3494_v49, %v3206_v62  ;;  %v384_v41 = vld [vmem:[#allocation2 + $0x150] sm:$0xff] }
 0x305   : > { %3708 = vst [vmem:[#allocation2 + $0x110] sm:$0xff] %v3644_v6  ;;  %v3645_v14 = vadd.f32 %v3495_v56, %v377_v10  ;;  %v5650_v10 = vld [vmem:[#allocation9_spill] sm:$0xff] }
 0x306   : > { %v3210_v32 = vpop.f32.mrb[200].mxu0  ;;  %v3499_v26 = vpop.f32.mrb[200].mxu1 }
 0x307   : > { %3709 = vst [vmem:[#allocation2 + $0x118] sm:$0xff] %v3645_v14  ;;  %v3211_v2 = vadd.f32 %v3210_v32, %v5270_v35  ;;  %v3212_v23 = vpop.f32.mrb[201].mxu0  ;;  %v3501_v8 = vpop.f32.mrb[201].mxu1  ;;  %v385_v14 = vld [vmem:[#allocation2 + $0x158] sm:$0xff] }
 0x308   : > { %v3213_v12 = vpop.f32.mrb[202].mxu0  ;;  %v3502_v24 = vpop.f32.mrb[202].mxu1  ;;  %v5651_v8 = vld [vmem:[#allocation10_spill] sm:$0xff] }
 0x309   : > { %v3500_v3 = vadd.f32 %v3499_v26, %v3211_v2  ;;  %v3214_v39 = vadd.f32 %v3213_v12, %v5272_v13  ;;  %v3215_v4 = vpop.f32.mrb[203].mxu0  ;;  %v3504_v60 = vpop.f32.mrb[203].mxu1 }
 0x30b   : > { %v3646_v38 = vadd.f32 %v3500_v3, %v378_v59  ;;  %v3503_v30 = vadd.f32 %v3502_v24, %v3214_v39  ;;  %v386_v24 = vld [vmem:[#allocation2 + $0x160] sm:$0xff] }
 0x30d   : > { %3710 = vst [vmem:[#allocation2 + $0x120] sm:$0xff] %v3646_v38  ;;  %v3647_v17 = vadd.f32 %v3503_v30, %v379_v40  ;;  %v5652_v38 = vld [vmem:[#allocation11_spill] sm:$0xff] }
 0x30e   : > { %v3218_v9 = vpop.f32.mrb[204].mxu0  ;;  %v3507_v58 = vpop.f32.mrb[204].mxu1 }
 0x30f   : > { %3711 = vst [vmem:[#allocation2 + $0x128] sm:$0xff] %v3647_v17  ;;  %v3219_v35 = vadd.f32 %v3218_v9, %v5278_v7  ;;  %v3220_v18 = vpop.f32.mrb[205].mxu0  ;;  %v3509_v53 = vpop.f32.mrb[205].mxu1 }
 0x310   : > { %v3221_v25 = vpop.f32.mrb[206].mxu0  ;;  %v3510_v46 = vpop.f32.mrb[206].mxu1 }
 0x311   : > { %v3508_v63 = vadd.f32 %v3507_v58, %v3219_v35  ;;  %v3222_v13 = vadd.f32 %v3221_v25, %v5280_v5  ;;  %v3223_v11 = vpop.f32.mrb[207].mxu0  ;;  %v3512_v29 = vpop.f32.mrb[207].mxu1  ;;  %v387_v35 = vld [vmem:[#allocation2 + $0x168] sm:$0xff] }
 0x313   : > { %v3648_v16 = vadd.f32 %v3508_v63, %v380_v50  ;;  %v3511_v20 = vadd.f32 %v3510_v46, %v3222_v13  ;;  %v5653_v63 = vld [vmem:[#allocation12_spill] sm:$0xff] }
 0x315   : > { %3712 = vst [vmem:[#allocation2 + $0x130] sm:$0xff] %v3648_v16  ;;  %v3649_v1 = vadd.f32 %v3511_v20, %v381_v19  ;;  %v388_v19 = vld [vmem:[#allocation2 + $0x170] sm:$0xff] }
 0x316   : > { %v3226_v28 = vpop.f32.mrb[208].mxu0  ;;  %v3515_v34 = vpop.f32.mrb[208].mxu1 }
 0x317   : > { %3713 = vst [vmem:[#allocation2 + $0x138] sm:$0xff] %v3649_v1  ;;  %v3227_v7 = vadd.f32 %v3226_v28, %v5647_v42  ;;  %v3228_v52 = vpop.f32.mrb[209].mxu0  ;;  %v3517_v44 = vpop.f32.mrb[209].mxu1  ;;  %v5654_v1 = vld [vmem:[#allocation13_spill] sm:$0xff] }
 0x318   : > { %v3229_v21 = vpop.f32.mrb[210].mxu0  ;;  %v3518_v15 = vpop.f32.mrb[210].mxu1 }
 0x319   : > { %v3516_v45 = vadd.f32 %v3515_v34, %v3227_v7  ;;  %v3230_v5 = vadd.f32 %v3229_v21, %v5648_v31  ;;  %v3231_v37 = vpop.f32.mrb[211].mxu0  ;;  %v3520_v55 = vpop.f32.mrb[211].mxu1  ;;  %v389_v34 = vld [vmem:[#allocation2 + $0x178] sm:$0xff]  ;;  %v5655_v31 = vld [vmem:[#allocation14_spill] sm:$0xff] }
 0x31b   : > { %v3650_v22 = vadd.f32 %v3516_v45, %v382_v47  ;;  %v3519_v57 = vadd.f32 %v3518_v15, %v3230_v5 }
 0x31d   : > { %3714 = vst [vmem:[#allocation2 + $0x140] sm:$0xff] %v3650_v22  ;;  %v3651_v33 = vadd.f32 %v3519_v57, %v383_v27  ;;  %v390_v27 = vld [vmem:[#allocation2 + $0x180] sm:$0xff] }
 0x31e   : > { %v3234_v54 = vpop.f32.mrb[212].mxu0  ;;  %v3523_v36 = vpop.f32.mrb[212].mxu1 }
 0x31f   : > { %3715 = vst [vmem:[#allocation2 + $0x148] sm:$0xff] %v3651_v33  ;;  %v3235_v61 = vadd.f32 %v3234_v54, %v5649_v43  ;;  %v3236_v48 = vpop.f32.mrb[213].mxu0  ;;  %v3525_v62 = vpop.f32.mrb[213].mxu1  ;;  %v5656_v33 = vld [vmem:[#allocation15_spill] sm:$0xff] }
 0x320   : > { %v3237_v49 = vpop.f32.mrb[214].mxu0  ;;  %v3526_v6 = vpop.f32.mrb[214].mxu1 }
 0x321   : > { %v3524_v0 = vadd.f32 %v3523_v36, %v3235_v61  ;;  %v3238_v51 = vadd.f32 %v3237_v49, %v5650_v10  ;;  %v3239_v56 = vpop.f32.mrb[215].mxu0  ;;  %v3528_v32 = vpop.f32.mrb[215].mxu1  ;;  %v391_v36 = vld [vmem:[#allocation2 + $0x188] sm:$0xff]  ;;  %v5657_v10 = vld [vmem:[#allocation16_spill] sm:$0xff] }
 0x323   : > { %v3652_v2 = vadd.f32 %v3524_v0, %v384_v41  ;;  %v3527_v26 = vadd.f32 %v3526_v6, %v3238_v51 }
 0x325   : > { %3716 = vst [vmem:[#allocation2 + $0x150] sm:$0xff] %v3652_v2  ;;  %v3653_v23 = vadd.f32 %v3527_v26, %v385_v14  ;;  %v392_v14 = vld [vmem:[#allocation2 + $0x190] sm:$0xff] }
 0x326   : > { %v3242_v59 = vpop.f32.mrb[216].mxu0  ;;  %v3531_v3 = vpop.f32.mrb[216].mxu1 }
 0x327   : > { %3717 = vst [vmem:[#allocation2 + $0x158] sm:$0xff] %v3653_v23  ;;  %v3243_v12 = vadd.f32 %v3242_v59, %v5651_v8  ;;  %v3244_v39 = vpop.f32.mrb[217].mxu0  ;;  %v3533_v4 = vpop.f32.mrb[217].mxu1  ;;  %v5658_v23 = vld [vmem:[#allocation17_spill] sm:$0xff] }
 0x328   : > { %v3245_v40 = vpop.f32.mrb[218].mxu0  ;;  %v3534_v17 = vpop.f32.mrb[218].mxu1 }
 0x329   : > { %v3532_v60 = vadd.f32 %v3531_v3, %v3243_v12  ;;  %v3246_v30 = vadd.f32 %v3245_v40, %v5652_v38  ;;  %v3247_v9 = vpop.f32.mrb[219].mxu0  ;;  %v3536_v58 = vpop.f32.mrb[219].mxu1  ;;  %v393_v3 = vld [vmem:[#allocation2 + $0x198] sm:$0xff]  ;;  %v5659_v38 = vld [vmem:[#allocation18_spill] sm:$0xff] }
 0x32b   : > { %v3654_v18 = vadd.f32 %v3532_v60, %v386_v24  ;;  %v3535_v50 = vadd.f32 %v3534_v17, %v3246_v30 }
 0x32d   : > { %3718 = vst [vmem:[#allocation2 + $0x160] sm:$0xff] %v3654_v18  ;;  %v3655_v53 = vadd.f32 %v3535_v50, %v387_v35  ;;  %v394_v35 = vld [vmem:[#allocation2 + $0x1a0] sm:$0xff] }
 0x32e   : > { %v3250_v25 = vpop.f32.mrb[220].mxu0  ;;  %v3539_v46 = vpop.f32.mrb[220].mxu1 }
 0x32f   : > { %3719 = vst [vmem:[#allocation2 + $0x168] sm:$0xff] %v3655_v53  ;;  %v3251_v13 = vadd.f32 %v3250_v25, %v5653_v63  ;;  %v3252_v11 = vpop.f32.mrb[221].mxu0  ;;  %v3541_v29 = vpop.f32.mrb[221].mxu1  ;;  %v5660_v53 = vld [vmem:[#allocation19_spill] sm:$0xff] }
 0x330   : > { %v3253_v16 = vpop.f32.mrb[222].mxu0  ;;  %v3542_v42 = vpop.f32.mrb[222].mxu1 }
 0x331   : > { %v3540_v20 = vadd.f32 %v3539_v46, %v3251_v13  ;;  %v3254_v28 = vadd.f32 %v3253_v16, %v5654_v1  ;;  %v3255_v7 = vpop.f32.mrb[223].mxu0  ;;  %v3544_v52 = vpop.f32.mrb[223].mxu1  ;;  %v395_v46 = vld [vmem:[#allocation2 + $0x1a8] sm:$0xff]  ;;  %v5661_v1 = vld [vmem:[#allocation20_spill] sm:$0xff] }
 0x333   : > { %v3656_v47 = vadd.f32 %v3540_v20, %v388_v19  ;;  %v3543_v44 = vadd.f32 %v3542_v42, %v3254_v28 }
 0x335   : > { %3720 = vst [vmem:[#allocation2 + $0x170] sm:$0xff] %v3656_v47  ;;  %v3657_v21 = vadd.f32 %v3543_v44, %v389_v34  ;;  %v396_v34 = vld [vmem:[#allocation2 + $0x1b0] sm:$0xff] }
 0x336   : > { %v3258_v45 = vpop.f32.mrb[224].mxu0  ;;  %v3547_v15 = vpop.f32.mrb[224].mxu1 }
 0x337   : > { %3721 = vst [vmem:[#allocation2 + $0x178] sm:$0xff] %v3657_v21  ;;  %v3259_v5 = vadd.f32 %v3258_v45, %v5655_v31  ;;  %v3260_v37 = vpop.f32.mrb[225].mxu0  ;;  %v3549_v55 = vpop.f32.mrb[225].mxu1  ;;  %v5662_v21 = vld [vmem:[#allocation21_spill] sm:$0xff] }
 0x338   : > { %v3261_v22 = vpop.f32.mrb[226].mxu0  ;;  %v3550_v43 = vpop.f32.mrb[226].mxu1 }
 0x339   : > { %v3548_v57 = vadd.f32 %v3547_v15, %v3259_v5  ;;  %v3262_v54 = vadd.f32 %v3261_v22, %v5656_v33  ;;  %v3263_v61 = vpop.f32.mrb[227].mxu0  ;;  %v3552_v48 = vpop.f32.mrb[227].mxu1  ;;  %v397_v15 = vld [vmem:[#allocation2 + $0x1b8] sm:$0xff]  ;;  %v5663_v33 = vld [vmem:[#allocation22_spill] sm:$0xff] }
 0x33b   : > { %v3658_v41 = vadd.f32 %v3548_v57, %v390_v27  ;;  %v3551_v62 = vadd.f32 %v3550_v43, %v3262_v54 }
 0x33d   : > { %3722 = vst [vmem:[#allocation2 + $0x180] sm:$0xff] %v3658_v41  ;;  %v3659_v49 = vadd.f32 %v3551_v62, %v391_v36  ;;  %v398_v36 = vld [vmem:[#allocation2 + $0x1c0] sm:$0xff] }
 0x33e   : > { %v3266_v0 = vpop.f32.mrb[228].mxu0  ;;  %v3555_v6 = vpop.f32.mrb[228].mxu1 }
 0x33f   : > { %3723 = vst [vmem:[#allocation2 + $0x188] sm:$0xff] %v3659_v49  ;;  %v3267_v51 = vadd.f32 %v3266_v0, %v5657_v10  ;;  %v3268_v56 = vpop.f32.mrb[229].mxu0  ;;  %v3557_v32 = vpop.f32.mrb[229].mxu1  ;;  %v5664_v49 = vld [vmem:[#allocation23_spill] sm:$0xff] }
 0x340   : > { %v3269_v2 = vpop.f32.mrb[230].mxu0  ;;  %v3558_v8 = vpop.f32.mrb[230].mxu1 }
 0x341   : > { %v3556_v26 = vadd.f32 %v3555_v6, %v3267_v51  ;;  %v3270_v59 = vadd.f32 %v3269_v2, %v5658_v23  ;;  %v3271_v12 = vpop.f32.mrb[231].mxu0  ;;  %v3560_v39 = vpop.f32.mrb[231].mxu1  ;;  %v399_v6 = vld [vmem:[#allocation2 + $0x1c8] sm:$0xff]  ;;  %v5665_v23 = vld [vmem:[#allocation24_spill] sm:$0xff] }
 0x343   : > { %v3660_v24 = vadd.f32 %v3556_v26, %v392_v14  ;;  %v3559_v4 = vadd.f32 %v3558_v8, %v3270_v59 }
 0x345   : > { %3724 = vst [vmem:[#allocation2 + $0x190] sm:$0xff] %v3660_v24  ;;  %v3661_v40 = vadd.f32 %v3559_v4, %v393_v3  ;;  %v400_v3 = vld [vmem:[#allocation2 + $0x1d0] sm:$0xff] }
 0x346   : > { %v3274_v60 = vpop.f32.mrb[232].mxu0  ;;  %v3563_v17 = vpop.f32.mrb[232].mxu1 }
 0x347   : > { %3725 = vst [vmem:[#allocation2 + $0x198] sm:$0xff] %v3661_v40  ;;  %v3275_v30 = vadd.f32 %v3274_v60, %v5659_v38  ;;  %v3276_v9 = vpop.f32.mrb[233].mxu0  ;;  %v3565_v58 = vpop.f32.mrb[233].mxu1  ;;  %v5666_v40 = vld [vmem:[#allocation25_spill] sm:$0xff] }
 0x348   : > { %v3277_v18 = vpop.f32.mrb[234].mxu0  ;;  %v3566_v63 = vpop.f32.mrb[234].mxu1 }
 0x349   : > { %v3564_v50 = vadd.f32 %v3563_v17, %v3275_v30  ;;  %v3278_v25 = vadd.f32 %v3277_v18, %v5660_v53  ;;  %v3279_v13 = vpop.f32.mrb[235].mxu0  ;;  %v3568_v11 = vpop.f32.mrb[235].mxu1  ;;  %v401_v17 = vld [vmem:[#allocation2 + $0x1d8] sm:$0xff]  ;;  %v5667_v53 = vld [vmem:[#allocation26_spill] sm:$0xff] }
 0x34b   : > { %v3662_v19 = vadd.f32 %v3564_v50, %v394_v35  ;;  %v3567_v29 = vadd.f32 %v3566_v63, %v3278_v25 }
 0x34d   : > { %3726 = vst [vmem:[#allocation2 + $0x1a0] sm:$0xff] %v3662_v19  ;;  %v3663_v16 = vadd.f32 %v3567_v29, %v395_v46  ;;  %v402_v46 = vld [vmem:[#allocation2 + $0x1e0] sm:$0xff] }
 0x34e   : > { %v3282_v20 = vpop.f32.mrb[236].mxu0  ;;  %v3571_v42 = vpop.f32.mrb[236].mxu1 }
 0x34f   : > { %3727 = vst [vmem:[#allocation2 + $0x1a8] sm:$0xff] %v3663_v16  ;;  %v3283_v28 = vadd.f32 %v3282_v20, %v5661_v1  ;;  %v3284_v7 = vpop.f32.mrb[237].mxu0  ;;  %v3573_v52 = vpop.f32.mrb[237].mxu1  ;;  %v5668_v16 = vld [vmem:[#allocation27_spill] sm:$0xff] }
 0x350   : > { %v3285_v47 = vpop.f32.mrb[238].mxu0  ;;  %v3574_v31 = vpop.f32.mrb[238].mxu1 }
 0x351   : > { %v3572_v44 = vadd.f32 %v3571_v42, %v3283_v28  ;;  %v3286_v45 = vadd.f32 %v3285_v47, %v5662_v21  ;;  %v3287_v5 = vpop.f32.mrb[239].mxu0  ;;  %v3576_v37 = vpop.f32.mrb[239].mxu1  ;;  %v403_v42 = vld [vmem:[#allocation2 + $0x1e8] sm:$0xff]  ;;  %v5669_v21 = vld [vmem:[#allocation28_spill] sm:$0xff] }
 0x353   : > { %v3664_v27 = vadd.f32 %v3572_v44, %v396_v34  ;;  %v3575_v55 = vadd.f32 %v3574_v31, %v3286_v45 }
 0x355   : > { %3728 = vst [vmem:[#allocation2 + $0x1b0] sm:$0xff] %v3664_v27  ;;  %v3665_v22 = vadd.f32 %v3575_v55, %v397_v15  ;;  %v404_v15 = vld [vmem:[#allocation2 + $0x1f0] sm:$0xff] }
 0x356   : > { %v3290_v57 = vpop.f32.mrb[240].mxu0  ;;  %v3579_v43 = vpop.f32.mrb[240].mxu1 }
 0x357   : > { %3729 = vst [vmem:[#allocation2 + $0x1b8] sm:$0xff] %v3665_v22  ;;  %v3291_v54 = vadd.f32 %v3290_v57, %v5663_v33  ;;  %v3292_v61 = vpop.f32.mrb[241].mxu0  ;;  %v3581_v48 = vpop.f32.mrb[241].mxu1  ;;  %v5670_v22 = vld [vmem:[#allocation29_spill] sm:$0xff] }
 0x358   : > { %v3293_v41 = vpop.f32.mrb[242].mxu0  ;;  %v3582_v10 = vpop.f32.mrb[242].mxu1 }
 0x359   : > { %v3580_v62 = vadd.f32 %v3579_v43, %v3291_v54  ;;  %v3294_v0 = vadd.f32 %v3293_v41, %v5664_v49  ;;  %v3295_v51 = vpop.f32.mrb[243].mxu0  ;;  %v3584_v56 = vpop.f32.mrb[243].mxu1  ;;  %v405_v43 = vld [vmem:[#allocation2 + $0x1f8] sm:$0xff]  ;;  %v5462_v49 = vld [vmem:[%s5618_s2] ss:$0 sm:$0xff] (!%p4400_p6) }
 0x35a   : > { %v3745_v56 = vld [vmem:[#allocation2 + $0x18] sm:$0xff] (!%p4400_p6) }
 0x35b   : > { %v3666_v14 = vadd.f32 %v3580_v62, %v398_v36  ;;  %v3583_v32 = vadd.f32 %v3582_v10, %v3294_v0  ;;  %v3742_v62 = vld [vmem:[#allocation2] sm:$0xff] (!%p4400_p6)  ;;  %v3743_v0 = vld [vmem:[#allocation2 + $0x8] sm:$0xff] (!%p4400_p6) }
 0x35c   : > { %v3813_v10 = vadd.f32 (!%p4400_p6), %v5462_v49, %v3742_v62  ;;  %v3814_v51 = vadd.f32 (!%p4400_p6), %v5462_v49, %v3743_v0  ;;  %v3774_v0 = vld [vmem:[#allocation2 + $0x100] sm:$0xff] (!%p4400_p6) }
 0x35d   : > { %3730 = vst [vmem:[#allocation2 + $0x1c0] sm:$0xff] %v3666_v14  ;;  %v3667_v2 = vadd.f32 %v3583_v32, %v399_v6  ;;  %v3744_v6 = vld [vmem:[#allocation2 + $0x10] sm:$0xff] (!%p4400_p6)  ;;  %v3746_v14 = vld [vmem:[#allocation2 + $0x20] sm:$0xff] (!%p4400_p6) }
 0x35e   : > { %v3298_v26 = vpop.f32.mrb[244].mxu0  ;;  %v3587_v8 = vpop.f32.mrb[244].mxu1  ;;  %v3815_v32 = vadd.f32 (!%p4400_p6), %v5462_v49, %v3744_v6  ;;  %3877 = vst [vmem:[%s4799_s26] sm:$0xff] (!%p4400_p6), %v3813_v10  ;;  %3878 = vst [vmem:[%s4799_s26 + $0x8] sm:$0xff] (!%p4400_p6), %v3814_v51  ;;  %v3775_v10 = vld [vmem:[#allocation2 + $0x108] sm:$0xff] (!%p4400_p6)  ;;  %v3776_v51 = vld [vmem:[#allocation2 + $0x110] sm:$0xff] (!%p4400_p6)  ;;  %v3845_v6 = vadd.f32 (!%p4400_p6), %v5462_v49, %v3774_v0 }
 0x35f   : > { %3731 = vst [vmem:[#allocation2 + $0x1c8] sm:$0xff] %v3667_v2  ;;  %v3299_v59 = vadd.f32 %v3298_v26, %v5665_v23  ;;  %v3300_v12 = vpop.f32.mrb[245].mxu0  ;;  %v3589_v39 = vpop.f32.mrb[245].mxu1  ;;  %v3816_v2 = vadd.f32 (!%p4400_p6), %v5462_v49, %v3745_v56  ;;  %v3817_v26 = vadd.f32 (!%p4400_p6), %v5462_v49, %v3746_v14  ;;  %v3747_v23 = vld [vmem:[#allocation2 + $0x28] sm:$0xff] (!%p4400_p6)  ;;  %v3846_v56 = vadd.f32 (!%p4400_p6), %v5462_v49, %v3775_v10 }
 0x360   : > { %v3301_v24 = vpop.f32.mrb[246].mxu0  ;;  %v3590_v38 = vpop.f32.mrb[246].mxu1  ;;  %v3818_v12 = vadd.f32 (!%p4400_p6), %v5462_v49, %v3747_v23  ;;  %3879 = vst [vmem:[%s4799_s26 + $0x10] sm:$0xff] (!%p4400_p6), %v3815_v32  ;;  %v3847_v14 = vadd.f32 (!%p4400_p6), %v5462_v49, %v3776_v51  ;;  %v3777_v32 = vld [vmem:[#allocation2 + $0x118] sm:$0xff] (!%p4400_p6)  ;;  %3909 = vst [vmem:[%s4799_s26 + $0x100] sm:$0xff] (!%p4400_p6), %v3845_v6 }
 0x361   : > { %v3588_v4 = vadd.f32 %v3587_v8, %v3299_v59  ;;  %v3302_v60 = vadd.f32 %v3301_v24, %v5666_v40  ;;  %v3303_v30 = vpop.f32.mrb[247].mxu0  ;;  %v3592_v9 = vpop.f32.mrb[247].mxu1  ;;  %v3748_v59 = vld [vmem:[#allocation2 + $0x30] sm:$0xff] (!%p4400_p6)  ;;  %v3749_v8 = vld [vmem:[#allocation2 + $0x38] sm:$0xff] (!%p4400_p6)  ;;  %v3750_v24 = vld [vmem:[#allocation2 + $0x40] sm:$0xff] (!%p4400_p6)  ;;  %3880 = vst [vmem:[%s4799_s26 + $0x18] sm:$0xff] (!%p4400_p6), %v3816_v2  ;;  %v3848_v23 = vadd.f32 (!%p4400_p6), %v5462_v49, %v3777_v32 }
 0x362   : > { %v3820_v39 = vadd.f32 (!%p4400_p6), %v5462_v49, %v3749_v8  ;;  %v3752_v40 = vld [vmem:[#allocation2 + $0x50] sm:$0xff] (!%p4400_p6)  ;;  %3881 = vst [vmem:[%s4799_s26 + $0x20] sm:$0xff] (!%p4400_p6), %v3817_v26  ;;  %v3754_v9 = vld [vmem:[#allocation2 + $0x60] sm:$0xff] (!%p4400_p6)  ;;  %3882 = vst [vmem:[%s4799_s26 + $0x28] sm:$0xff] (!%p4400_p6), %v3818_v12 }
 0x363   : > { %v3668_v35 = vadd.f32 %v3588_v4, %v400_v3  ;;  %v3591_v58 = vadd.f32 %v3590_v38, %v3302_v60  ;;  %v3819_v3 = vadd.f32 (!%p4400_p6), %v5462_v49, %v3748_v59  ;;  %v3751_v4 = vld [vmem:[#allocation2 + $0x48] sm:$0xff] (!%p4400_p6)  ;;  %v3821_v60 = vadd.f32 (!%p4400_p6), %v5462_v49, %v3750_v24  ;;  %v3778_v2 = vld [vmem:[#allocation2 + $0x120] sm:$0xff] (!%p4400_p6)  ;;  %v3780_v12 = vld [vmem:[#allocation2 + $0x130] sm:$0xff] (!%p4400_p6)  ;;  %3910 = vst [vmem:[%s4799_s26 + $0x108] sm:$0xff] (!%p4400_p6), %v3846_v56 }
 0x364   : > { %v3822_v38 = vadd.f32 (!%p4400_p6), %v5462_v49, %v3751_v4  ;;  %v3823_v30 = vadd.f32 (!%p4400_p6), %v5462_v49, %v3752_v40  ;;  %3884 = vst [vmem:[%s4799_s26 + $0x38] sm:$0xff] (!%p4400_p6), %v3820_v39  ;;  %v3779_v26 = vld [vmem:[#allocation2 + $0x128] sm:$0xff] (!%p4400_p6)  ;;  %v3849_v59 = vadd.f32 (!%p4400_p6), %v5462_v49, %v3778_v2  ;;  %v3782_v39 = vld [vmem:[#allocation2 + $0x140] sm:$0xff] (!%p4400_p6)  ;;  %3911 = vst [vmem:[%s4799_s26 + $0x110] sm:$0xff] (!%p4400_p6), %v3847_v14 }
 0x365   : > { %3732 = vst [vmem:[#allocation2 + $0x1d0] sm:$0xff] %v3668_v35  ;;  %v3669_v18 = vadd.f32 %v3591_v58, %v401_v17  ;;  %v3753_v17 = vld [vmem:[#allocation2 + $0x58] sm:$0xff] (!%p4400_p6)  ;;  %v3755_v35 = vld [vmem:[#allocation2 + $0x68] sm:$0xff] (!%p4400_p6)  ;;  %3883 = vst [vmem:[%s4799_s26 + $0x30] sm:$0xff] (!%p4400_p6), %v3819_v3  ;;  %v3850_v8 = vadd.f32 (!%p4400_p6), %v5462_v49, %v3779_v26  ;;  %v3851_v24 = vadd.f32 (!%p4400_p6), %v5462_v49, %v3780_v12 }
 0x366   : > { %v3306_v50 = vpop.f32.mrb[248].mxu0  ;;  %v3595_v63 = vpop.f32.mrb[248].mxu1  ;;  %v3824_v58 = vadd.f32 (!%p4400_p6), %v5462_v49, %v3753_v17  ;;  %3885 = vst [vmem:[%s4799_s26 + $0x40] sm:$0xff] (!%p4400_p6), %v3821_v60  ;;  %3886 = vst [vmem:[%s4799_s26 + $0x48] sm:$0xff] (!%p4400_p6), %v3822_v38  ;;  %v3781_v3 = vld [vmem:[#allocation2 + $0x138] sm:$0xff] (!%p4400_p6)  ;;  %v3853_v40 = vadd.f32 (!%p4400_p6), %v5462_v49, %v3782_v39  ;;  %v3783_v60 = vld [vmem:[#allocation2 + $0x148] sm:$0xff] (!%p4400_p6) }
 0x367   : > { %3733 = vst [vmem:[#allocation2 + $0x1d8] sm:$0xff] %v3669_v18  ;;  %v3307_v25 = vadd.f32 %v3306_v50, %v5667_v53  ;;  %v3308_v13 = vpop.f32.mrb[249].mxu0  ;;  %v3597_v11 = vpop.f32.mrb[249].mxu1  ;;  %v3825_v18 = vadd.f32 (!%p4400_p6), %v5462_v49, %v3754_v9  ;;  %v3826_v50 = vadd.f32 (!%p4400_p6), %v5462_v49, %v3755_v35  ;;  %v3756_v53 = vld [vmem:[#allocation2 + $0x70] sm:$0xff] (!%p4400_p6)  ;;  %3887 = vst [vmem:[%s4799_s26 + $0x50] sm:$0xff] (!%p4400_p6), %v3823_v30  ;;  %v3785_v30 = vld [vmem:[#allocation2 + $0x158] sm:$0xff] (!%p4400_p6) }
 0x368   : > { %v3309_v19 = vpop.f32.mrb[250].mxu0  ;;  %v3598_v1 = vpop.f32.mrb[250].mxu1  ;;  %v3827_v13 = vadd.f32 (!%p4400_p6), %v5462_v49, %v3756_v53  ;;  %3888 = vst [vmem:[%s4799_s26 + $0x58] sm:$0xff] (!%p4400_p6), %v3824_v58  ;;  %v3852_v4 = vadd.f32 (!%p4400_p6), %v5462_v49, %v3781_v3  ;;  %v3784_v38 = vld [vmem:[#allocation2 + $0x150] sm:$0xff] (!%p4400_p6)  ;;  %3912 = vst [vmem:[%s4799_s26 + $0x118] sm:$0xff] (!%p4400_p6), %v3848_v23  ;;  %v3854_v17 = vadd.f32 (!%p4400_p6), %v5462_v49, %v3783_v60  ;;  %v3786_v58 = vld [vmem:[#allocation2 + $0x160] sm:$0xff] (!%p4400_p6) }
 0x369   : > { %v3596_v29 = vadd.f32 %v3595_v63, %v3307_v25  ;;  %v3310_v20 = vadd.f32 %v3309_v19, %v5668_v16  ;;  %v3311_v28 = vpop.f32.mrb[251].mxu0  ;;  %v3600_v7 = vpop.f32.mrb[251].mxu1  ;;  %v3757_v25 = vld [vmem:[#allocation2 + $0x78] sm:$0xff] (!%p4400_p6)  ;;  %v3758_v63 = vld [vmem:[#allocation2 + $0x80] sm:$0xff] (!%p4400_p6)  ;;  %v3759_v19 = vld [vmem:[#allocation2 + $0x88] sm:$0xff] (!%p4400_p6)  ;;  %3889 = vst [vmem:[%s4799_s26 + $0x60] sm:$0xff] (!%p4400_p6), %v3825_v18  ;;  %v3855_v9 = vadd.f32 (!%p4400_p6), %v5462_v49, %v3784_v38  ;;  %v3856_v35 = vadd.f32 (!%p4400_p6), %v5462_v49, %v3785_v30 }
 0x36a   : > { %v3829_v11 = vadd.f32 (!%p4400_p6), %v5462_v49, %v3758_v63  ;;  %v3761_v16 = vld [vmem:[#allocation2 + $0x98] sm:$0xff] (!%p4400_p6)  ;;  %3890 = vst [vmem:[%s4799_s26 + $0x68] sm:$0xff] (!%p4400_p6), %v3826_v50  ;;  %v3763_v7 = vld [vmem:[#allocation2 + $0xa8] sm:$0xff] (!%p4400_p6)  ;;  %3891 = vst [vmem:[%s4799_s26 + $0x70] sm:$0xff] (!%p4400_p6), %v3827_v13  ;;  %v3857_v53 = vadd.f32 (!%p4400_p6), %v5462_v49, %v3786_v58 }
 0x36b   : > { %v3670_v34 = vadd.f32 %v3596_v29, %v402_v46  ;;  %v3599_v52 = vadd.f32 %v3598_v1, %v3310_v20  ;;  %v3828_v46 = vadd.f32 (!%p4400_p6), %v5462_v49, %v3757_v25  ;;  %v3760_v29 = vld [vmem:[#allocation2 + $0x90] sm:$0xff] (!%p4400_p6)  ;;  %v3830_v20 = vadd.f32 (!%p4400_p6), %v5462_v49, %v3759_v19  ;;  %3913 = vst [vmem:[%s4799_s26 + $0x120] sm:$0xff] (!%p4400_p6), %v3849_v59  ;;  %v3787_v18 = vld [vmem:[#allocation2 + $0x168] sm:$0xff] (!%p4400_p6)  ;;  %v3789_v13 = vld [vmem:[#allocation2 + $0x178] sm:$0xff] (!%p4400_p6) }
 0x36c   : > { %v3831_v1 = vadd.f32 (!%p4400_p6), %v5462_v49, %v3760_v29  ;;  %v3832_v28 = vadd.f32 (!%p4400_p6), %v5462_v49, %v3761_v16  ;;  %3893 = vst [vmem:[%s4799_s26 + $0x80] sm:$0xff] (!%p4400_p6), %v3829_v11  ;;  %3914 = vst [vmem:[%s4799_s26 + $0x128] sm:$0xff] (!%p4400_p6), %v3850_v8  ;;  %v3788_v50 = vld [vmem:[#allocation2 + $0x170] sm:$0xff] (!%p4400_p6)  ;;  %v3858_v25 = vadd.f32 (!%p4400_p6), %v5462_v49, %v3787_v18  ;;  %v3791_v11 = vld [vmem:[#allocation2 + $0x188] sm:$0xff] (!%p4400_p6) }
 0x36d   : > { %3734 = vst [vmem:[#allocation2 + $0x1e0] sm:$0xff] %v3670_v34  ;;  %v3671_v47 = vadd.f32 %v3599_v52, %v403_v42  ;;  %v3762_v42 = vld [vmem:[#allocation2 + $0xa0] sm:$0xff] (!%p4400_p6)  ;;  %v3764_v34 = vld [vmem:[#allocation2 + $0xb0] sm:$0xff] (!%p4400_p6)  ;;  %3892 = vst [vmem:[%s4799_s26 + $0x78] sm:$0xff] (!%p4400_p6), %v3828_v46  ;;  %v3859_v63 = vadd.f32 (!%p4400_p6), %v5462_v49, %v3788_v50  ;;  %v3860_v19 = vadd.f32 (!%p4400_p6), %v5462_v49, %v3789_v13 }
 0x36e   : > { %v3314_v44 = vpop.f32.mrb[252].mxu0  ;;  %v3603_v31 = vpop.f32.mrb[252].mxu1  ;;  %v3833_v52 = vadd.f32 (!%p4400_p6), %v5462_v49, %v3762_v42  ;;  %3894 = vst [vmem:[%s4799_s26 + $0x88] sm:$0xff] (!%p4400_p6), %v3830_v20  ;;  %3895 = vst [vmem:[%s4799_s26 + $0x90] sm:$0xff] (!%p4400_p6), %v3831_v1  ;;  %v3790_v46 = vld [vmem:[#allocation2 + $0x180] sm:$0xff] (!%p4400_p6)  ;;  %v3862_v16 = vadd.f32 (!%p4400_p6), %v5462_v49, %v3791_v11  ;;  %v3792_v20 = vld [vmem:[#allocation2 + $0x190] sm:$0xff] (!%p4400_p6) }
 0x36f   : > { %3735 = vst [vmem:[#allocation2 + $0x1e8] sm:$0xff] %v3671_v47  ;;  %v3315_v45 = vadd.f32 %v3314_v44, %v5669_v21  ;;  %v3316_v5 = vpop.f32.mrb[253].mxu0  ;;  %v3605_v37 = vpop.f32.mrb[253].mxu1  ;;  %v3834_v47 = vadd.f32 (!%p4400_p6), %v5462_v49, %v3763_v7  ;;  %v3835_v44 = vadd.f32 (!%p4400_p6), %v5462_v49, %v3764_v34  ;;  %v3765_v21 = vld [vmem:[#allocation2 + $0xb8] sm:$0xff] (!%p4400_p6)  ;;  %3896 = vst [vmem:[%s4799_s26 + $0x98] sm:$0xff] (!%p4400_p6), %v3832_v28  ;;  %v3794_v28 = vld [vmem:[#allocation2 + $0x1a0] sm:$0xff] (!%p4400_p6) }
 0x370   : > { %v3317_v27 = vpop.f32.mrb[254].mxu0  ;;  %v3606_v33 = vpop.f32.mrb[254].mxu1  ;;  %v3836_v5 = vadd.f32 (!%p4400_p6), %v5462_v49, %v3765_v21  ;;  %3897 = vst [vmem:[%s4799_s26 + $0xa0] sm:$0xff] (!%p4400_p6), %v3833_v52  ;;  %3915 = vst [vmem:[%s4799_s26 + $0x130] sm:$0xff] (!%p4400_p6), %v3851_v24  ;;  %v3861_v29 = vadd.f32 (!%p4400_p6), %v5462_v49, %v3790_v46  ;;  %v3793_v1 = vld [vmem:[#allocation2 + $0x198] sm:$0xff] (!%p4400_p6)  ;;  %v3863_v42 = vadd.f32 (!%p4400_p6), %v5462_v49, %v3792_v20  ;;  %v3795_v52 = vld [vmem:[#allocation2 + $0x1a8] sm:$0xff] (!%p4400_p6) }
 0x371   : > { %v3604_v55 = vadd.f32 %v3603_v31, %v3315_v45  ;;  %v3318_v57 = vadd.f32 %v3317_v27, %v5670_v22  ;;  %v3319_v54 = vpop.f32.mrb[255].mxu0  ;;  %v3608_v61 = vpop.f32.mrb[255].mxu1  ;;  %3741 = sbr.rel (%p4400_p6) target bundleno = 902 (0x386), region = 44  ;;  %v3766_v45 = vld [vmem:[#allocation2 + $0xc0] sm:$0xff] (!%p4400_p6)  ;;  %v3767_v31 = vld [vmem:[#allocation2 + $0xc8] sm:$0xff] (!%p4400_p6)  ;;  %v3768_v27 = vld [vmem:[#allocation2 + $0xd0] sm:$0xff] (!%p4400_p6)  ;;  %v3864_v7 = vadd.f32 (!%p4400_p6), %v5462_v49, %v3793_v1  ;;  %v3865_v34 = vadd.f32 (!%p4400_p6), %v5462_v49, %v3794_v28 }
 0x372   : > { %v3838_v37 = vadd.f32 (!%p4400_p6), %v5462_v49, %v3767_v31  ;;  %v3770_v22 = vld [vmem:[#allocation2 + $0xe0] sm:$0xff] (!%p4400_p6)  ;;  %3898 = vst [vmem:[%s4799_s26 + $0xa8] sm:$0xff] (!%p4400_p6), %v3834_v47  ;;  %3899 = vst [vmem:[%s4799_s26 + $0xb0] sm:$0xff] (!%p4400_p6), %v3835_v44  ;;  %v3772_v61 = vld [vmem:[#allocation2 + $0xf0] sm:$0xff] (!%p4400_p6)  ;;  %v3866_v21 = vadd.f32 (!%p4400_p6), %v5462_v49, %v3795_v52 }
 0x373   : > { %v3672_v36 = vadd.f32 %v3604_v55, %v404_v15  ;;  %v3607_v48 = vadd.f32 %v3606_v33, %v3318_v57  ;;  %v3837_v15 = vadd.f32 (!%p4400_p6), %v5462_v49, %v3766_v45  ;;  %v3769_v55 = vld [vmem:[#allocation2 + $0xd8] sm:$0xff] (!%p4400_p6)  ;;  %v3839_v57 = vadd.f32 (!%p4400_p6), %v5462_v49, %v3768_v27  ;;  %3900 = vst [vmem:[%s4799_s26 + $0xb8] sm:$0xff] (!%p4400_p6), %v3836_v5  ;;  %v3796_v47 = vld [vmem:[#allocation2 + $0x1b0] sm:$0xff] (!%p4400_p6)  ;;  %v3798_v5 = vld [vmem:[#allocation2 + $0x1c0] sm:$0xff] (!%p4400_p6) }
 0x374   : > { %v3840_v33 = vadd.f32 (!%p4400_p6), %v5462_v49, %v3769_v55  ;;  %v3841_v54 = vadd.f32 (!%p4400_p6), %v5462_v49, %v3770_v22  ;;  %3902 = vst [vmem:[%s4799_s26 + $0xc8] sm:$0xff] (!%p4400_p6), %v3838_v37  ;;  %3916 = vst [vmem:[%s4799_s26 + $0x138] sm:$0xff] (!%p4400_p6), %v3852_v4  ;;  %v3797_v44 = vld [vmem:[#allocation2 + $0x1b8] sm:$0xff] (!%p4400_p6)  ;;  %v3867_v45 = vadd.f32 (!%p4400_p6), %v5462_v49, %v3796_v47  ;;  %v3800_v37 = vld [vmem:[#allocation2 + $0x1d0] sm:$0xff] (!%p4400_p6) }
 0x375   : > { %3736 = vst [vmem:[#allocation2 + $0x1f0] sm:$0xff] %v3672_v36  ;;  %v3673_v41 = vadd.f32 %v3607_v48, %v405_v43  ;;  %v3771_v43 = vld [vmem:[#allocation2 + $0xe8] sm:$0xff] (!%p4400_p6)  ;;  %v3773_v36 = vld [vmem:[#allocation2 + $0xf8] sm:$0xff] (!%p4400_p6)  ;;  %3901 = vst [vmem:[%s4799_s26 + $0xc0] sm:$0xff] (!%p4400_p6), %v3837_v15  ;;  %v3868_v31 = vadd.f32 (!%p4400_p6), %v5462_v49, %v3797_v44  ;;  %v3869_v27 = vadd.f32 (!%p4400_p6), %v5462_v49, %v3798_v5 }
 0x376   : > { %v3842_v48 = vadd.f32 (!%p4400_p6), %v5462_v49, %v3771_v43  ;;  %v3844_v62 = vadd.f32 (!%p4400_p6), %v5462_v49, %v3773_v36  ;;  %3903 = vst [vmem:[%s4799_s26 + $0xd0] sm:$0xff] (!%p4400_p6), %v3839_v57  ;;  %3904 = vst [vmem:[%s4799_s26 + $0xd8] sm:$0xff] (!%p4400_p6), %v3840_v33  ;;  %v3799_v15 = vld [vmem:[#allocation2 + $0x1c8] sm:$0xff] (!%p4400_p6)  ;;  %v3871_v22 = vadd.f32 (!%p4400_p6), %v5462_v49, %v3800_v37  ;;  %v3801_v57 = vld [vmem:[#allocation2 + $0x1d8] sm:$0xff] (!%p4400_p6) }
 0x377   : > { %3737 = vst [vmem:[#allocation2 + $0x1f8] sm:$0xff] %v3673_v41  ;;  %v3843_v41 = vadd.f32 (!%p4400_p6), %v5462_v49, %v3772_v61  ;;  %3905 = vst [vmem:[%s4799_s26 + $0xe0] sm:$0xff] (!%p4400_p6), %v3841_v54  ;;  %v3870_v55 = vadd.f32 (!%p4400_p6), %v5462_v49, %v3799_v15  ;;  %v3802_v33 = vld [vmem:[#allocation2 + $0x1e0] sm:$0xff] (!%p4400_p6)  ;;  %v3803_v54 = vld [vmem:[#allocation2 + $0x1e8] sm:$0xff] (!%p4400_p6)  ;;  %v3872_v43 = vadd.f32 (!%p4400_p6), %v5462_v49, %v3801_v57 }
 0x378   : > { %3906 = vst [vmem:[%s4799_s26 + $0xe8] sm:$0xff] %v3842_v48  ;;  %3908 = vst [vmem:[%s4799_s26 + $0xf8] sm:$0xff] %v3844_v62  ;;  %v3873_v61 = vadd.f32 %v5462_v49, %v3802_v33  ;;  %v3874_v36 = vadd.f32 %v5462_v49, %v3803_v54 }
 0x379   : > { %3907 = vst [vmem:[%s4799_s26 + $0xf0] sm:$0xff] %v3843_v41  ;;  %3917 = vst [vmem:[%s4799_s26 + $0x140] sm:$0xff] %v3853_v40 }
 0x37a   : > { %3918 = vst [vmem:[%s4799_s26 + $0x148] sm:$0xff] %v3854_v17  ;;  %3919 = vst [vmem:[%s4799_s26 + $0x150] sm:$0xff] %v3855_v9 }
 0x37b   : > { %3920 = vst [vmem:[%s4799_s26 + $0x158] sm:$0xff] %v3856_v35  ;;  %3921 = vst [vmem:[%s4799_s26 + $0x160] sm:$0xff] %v3857_v53 }
 0x37c   : > { %3922 = vst [vmem:[%s4799_s26 + $0x168] sm:$0xff] %v3858_v25  ;;  %3923 = vst [vmem:[%s4799_s26 + $0x170] sm:$0xff] %v3859_v63  ;;  %v3804_v48 = vld [vmem:[#allocation2 + $0x1f0] sm:$0xff] }
 0x37d   : > { %3924 = vst [vmem:[%s4799_s26 + $0x178] sm:$0xff] %v3860_v19  ;;  %3925 = vst [vmem:[%s4799_s26 + $0x180] sm:$0xff] %v3861_v29  ;;  %v3875_v62 = vadd.f32 %v5462_v49, %v3804_v48 }
 0x37e   : > { %3926 = vst [vmem:[%s4799_s26 + $0x188] sm:$0xff] %v3862_v16  ;;  %3927 = vst [vmem:[%s4799_s26 + $0x190] sm:$0xff] %v3863_v42  ;;  %v3805_v41 = vld [vmem:[#allocation2 + $0x1f8] sm:$0xff] }
 0x37f   : > { %3928 = vst [vmem:[%s4799_s26 + $0x198] sm:$0xff] %v3864_v7  ;;  %3929 = vst [vmem:[%s4799_s26 + $0x1a0] sm:$0xff] %v3865_v34  ;;  %v3876_v0 = vadd.f32 %v5462_v49, %v3805_v41 }
 0x380   : > { %3930 = vst [vmem:[%s4799_s26 + $0x1a8] sm:$0xff] %v3866_v21  ;;  %3931 = vst [vmem:[%s4799_s26 + $0x1b0] sm:$0xff] %v3867_v45 }
 0x381   : > { %3932 = vst [vmem:[%s4799_s26 + $0x1b8] sm:$0xff] %v3868_v31  ;;  %3933 = vst [vmem:[%s4799_s26 + $0x1c0] sm:$0xff] %v3869_v27 }
 0x382   : > { %3934 = vst [vmem:[%s4799_s26 + $0x1c8] sm:$0xff] %v3870_v55  ;;  %3935 = vst [vmem:[%s4799_s26 + $0x1d0] sm:$0xff] %v3871_v22 }
 0x383   : > { %3936 = vst [vmem:[%s4799_s26 + $0x1d8] sm:$0xff] %v3872_v43  ;;  %3937 = vst [vmem:[%s4799_s26 + $0x1e0] sm:$0xff] %v3873_v61 }
 0x384   : > { %3938 = vst [vmem:[%s4799_s26 + $0x1e8] sm:$0xff] %v3874_v36  ;;  %3939 = vst [vmem:[%s4799_s26 + $0x1f0] sm:$0xff] %v3875_v62 }
 0x385   : > { %3940 = vst [vmem:[%s4799_s26 + $0x1f8] sm:$0xff] %v3876_v0 }
 0x386 PF: > { %s16_s19 = sadd.s32 1, %s4641_s19   ;;  %s5671_s12 = smov %s4617_s13 }
 0x387   : > { %p13_p8 = scmp.ge.s32.totalorder %s16_s19, 20   ;;  %s5672_s13 = smov %s4621_s14 }
 0x388   : > { %s5673_s14 = smov %s4736_s5  ;;  %s5674_s15 = smov %s4633_s17 }
 0x389   : > { %s5675_s16 = smov %s4637_s18  ;;  %s5676_s17 = smov %s5679_s21 }
 0x38a   : > { %s5677_s18 = smov %s5683_s22  ;;  %15 = sbr.rel (!%p13_p8) target bundleno = 5 (0x5), region = 86 }
 0x391   :  { %3969 = vsyncpa [#allocation4], 1 }
 0x392   :  { %3971 = vsyncpa [#allocation4 + $0x1], 1 }

// kernel: network_forward.13
= control target key start
LH: loop header
LB: loop body
LE: loop exit
PB: predicated region body
PF: predicated region fallthrough
CT: control target
= control target key end

     0   :  { %vm11_vm0 = vcmask 123904   ;;  %v204_v0 = vmov 0.0   ;;  %s230_s9 = smov 0   ;;  %s258_s0 = inlined_call_operand.vmem [shape: f32[4,2,64], index: 0, kind: input, shape index: {}]   ;;  %s259_s1 = inlined_call_operand.vmem [shape: f32[16,64], index: 1, kind: input, shape index: {}]   ;;  %s260_s2 = inlined_call_operand.vmem [shape: f32[4,2,16], index: 2, kind: output, shape index: {}]  }
   0x1   :  { %12 = vst.msk [vmem:[#allocation2] sm:$0x3] %vm11_vm0, %v204_v0  ;;  %13 = vst.msk [vmem:[#allocation3] sm:$0x3] %vm11_vm0, %v204_v0 }
   0x2 LB: > { %v24_v1 = vld [vmem:[%s259_s1] sm:$0xff]  ;;  %v25_v2 = vld [vmem:[%s259_s1 + $0x8] sm:$0xff]  ;;  %v205_v3 = vmov 0.0|0.0   ;;  %vm206_vm1 = vmmov 0   ;;  %v207_v5 = vmov 0.0   ;;  %vm26_vm2 = vcmask 130048   ;;  %s202_s9 = sphi %s230_s9, %s19_s9  }
   0x3   : > { %168 = vmatprep.subr.bf16.mxu0 %v205_v3  ;;  %v169_v4 = vpack.c.bf16 %v25_v2, %v24_v1  ;;  %165 = vmatprep.mubr.msk.f32.mxu0 %vm206_vm1, %v207_v5  ;;  %s155_s14 = sshll.u32 %s202_s9, 1  ;;  %s208_s18 = smov 96  }
   0x4   : > { %s21_s17 = scalar_lea.vmem %s258_s0, %s155_s14  ;;  %s209_s19 = smov 16  }
   0x5   : > { %170 = vmatpush3.bf16.msra.mxu0 %v169_v4  ;;  %v22_v7 = vld [vmem:[%s21_s17] sm:$0x3]  ;;  %s210_s20 = smov 112   ;;  %s211_s21 = smov 32  }
   0x6   : > { %s212_s22 = smov 80   ;;  %s140_s25 = scalar_lea.vmem %s260_s2, %s155_s14 }
   0x7   : > { %s19_s9 = sadd.s32 1, %s202_s9  }
   0x8   : > { %v23_v6 = vld [vmem:[#allocation2] sm:$0x3]  ;;  %v108_v12 = vld [vmem:[#allocation3] sm:$0x3]  ;;  %p16_p0 = scmp.ge.s32.totalorder %s19_s9, 4  }
   0x9   : > { %166 = vmatmul.mubr.msk.f32.vlgmr.msra.gmra.mrb[0].mxu0 %vm26_vm2, %v23_v6 }
  0xdc   : > { %v96_v8 = vpop.f32.mrb[0].mxu0 }
  0xdd   : > { %v100_v9 = vadd.f32 %v96_v8, %v22_v7  ;;  %v167_v10 = vpop.f32.mrb[1].mxu0 }
  0xdf   : > { %188 = vtanh.f32 %v100_v9  ;;  %v157_v13 = vmul.f32 -1.442695, %v100_v9 }
  0xe1   : > { %190 = vpow2.f32 %v157_v13 }
  0xe9   : > { %v189_v11 = vpop.eup %188 }
  0xea   : > { %115 = vrot.lane.b32.xlu0 %v189_v11, %s208_s18 }
  0xeb   : > { %v191_v14 = vpop.eup %190 }
  0xec   : > { %v104_v15 = vadd.f32 1.0, %v191_v14 }
  0xee   : > { %110 = vrot.lane.b32.xlu0 %v108_v12, %s209_s19  ;;  %192 = vrcp.f32 %v104_v15 }
  0xf8   : > { %v193_v16 = vpop.eup %192 }
 0x15c   : > { %v116_v17 = vpop.permute.xlu0 %115 }
 0x15d   : > { %v118_v18 = vmul.f32 %v193_v16, %v116_v17 }
 0x15f   : > { %120 = vrot.lane.b32.xlu1 %v118_v18, %s209_s19 }
 0x160   : > { %v111_v19 = vpop.permute.xlu0 %110 }
 0x161   : > { %v113_v20 = vmul.f32 %v193_v16, %v111_v19 }
 0x1d1   : > { %v121_v21 = vpop.permute.xlu1 %120 }
 0x1d2   : > { %v123_v22 = vadd.f32 %v121_v21, %v113_v20 }
 0x1d4   : > { %194 = vtanh.f32 %v123_v22  ;;  %131 = vrot.lane.b32.xlu0 %v123_v22, %s210_s20 }
 0x1de   : > { %v195_v23 = vpop.eup %194 }
 0x1df   : > { %126 = vrot.lane.b32.xlu1 %v195_v23, %s211_s21 }
 0x246   : > { %v132_v24 = vpop.permute.xlu0 %131 }
 0x247   : > { %134 = vst.msk [vmem:[#allocation3] sm:$0x3] %vm11_vm0, %v132_v24 }
 0x251   : > { %v127_v25 = vpop.permute.xlu1 %126 }
 0x252   : > { %v129_v26 = vmul.f32 %v193_v16, %v127_v25 }
 0x254   : > { %136 = vrot.lane.b32.xlu1 %v129_v26, %s212_s22 }
 0x2c1   :  { %18 = sbr.rel (!%p16_p0) target bundleno = 2 (0x2), region = 37 }
 0x2c6   : > { %v137_v27 = vpop.permute.xlu1 %136 }
 0x2c7   : > { %139 = vst.msk [vmem:[#allocation2] sm:$0x3] %vm11_vm0, %v137_v27  ;;  %141 = vst.msk [vmem:[%s140_s25] sm:$0x3] %vm11_vm0, %v137_v27 }

// kernel: network_forward.14
= control target key start
LH: loop header
LB: loop body
LE: loop exit
PB: predicated region body
PF: predicated region fallthrough
CT: control target
= control target key end

     0   :  { %s759_s12 = smov 0   ;;  %s761_s13 = smov 0   ;;  %s867_s0 = inlined_call_operand.vmem [shape: f32[8,128], index: 0, kind: input, shape index: {}]   ;;  %s868_s1 = inlined_call_operand.vmem [shape: f32[128,2944], index: 1, kind: input, shape index: {}]   ;;  %s869_s2 = inlined_call_operand.vmem [shape: f32[1,2944], index: 2, kind: input, shape index: {}]   ;;  %s870_s3 = inlined_call_operand.vmem [shape: f32[8,2944], index: 3, kind: output, shape index: {}]  }
   0x1   :  { %s763_s14 = smov 0   ;;  %s765_s15 = smov 0  }
   0x2   :  { %s767_s16 = smov 0  }
   0x3 LB: > { %s28_s17 = sadd.s32 1, %s730_s15  ;;  %p76_p1 = scmp.ne.s32.totalorder %s722_s13, %s718_s12  ;;  %s734_s16 = sphi %s767_s16, %s13_s16   ;;  %s730_s15 = sphi %s765_s15, %s874_s15   ;;  %s726_s14 = sphi %s763_s14, %s873_s14   ;;  %s722_s13 = sphi %s761_s13, %s872_s13   ;;  %s718_s12 = sphi %s759_s12, %s871_s12  }
   0x4   : > { %p30_p0 = scmp.ge.s32.totalorder %s28_s17, 23  ;;  %p77_p2 = scmp.eq.s32.totalorder %s734_s16, 0 }
   0x5   : > { %s69_s19 = sadd.s32 1, %s722_s13  ;;  %p568_p5 = scmp.ge.s32.totalorder %s734_s16, 23 }
   0x6   : > { %s876_s17 = smov (%p30_p0, %s28_s17), 0  ;;  %p78_p3 = por %p77_p2, %p76_p1 }
   0x7   : > { %s65_s18 = ssub.s32 %s730_s15, %s876_s17  ;;  %166 = sbr.rel (%p568_p5) target bundleno = 26 (0x1a), region = 20 }
   0x8   : > { %p67_p4 = scmp.eq.s32.totalorder %s65_s18, 0 }
   0xa   : > { %s794_s20 = scalar_select %p67_p4, %s722_s13, %s69_s19  }
   0xe   : > { %169 = sbr.rel (!%p78_p3) target bundleno = 26 (0x1a), region = 24  ;;  %s171_s21 = sand.u32 (%p78_p3), 1, %s722_s13  }
   0xf   : > { %s570_s22 = sshll.u32 (%p78_p3), %s730_s15, 3  ;;  %s569_s23 = sshll.u32 (%p78_p3), %s171_s21, 7 }
  0x10   : > { %s802_s26 = scalar_lea.vmem (%p78_p3), %s868_s1, %s570_s22  ;;  %s173_s27 = scalar_lea.vmem (%p78_p3), [#allocation3], %s569_s23 }
  0x11   : > { %v236_v0 = vld [vmem:[%s802_s26] sm:$0xff] (%p78_p3)  ;;  %v238_v1 = vld [vmem:[%s802_s26 + $0xb8] sm:$0xff] (%p78_p3)  ;;  %v240_v2 = vld [vmem:[%s802_s26 + $0x170] sm:$0xff] (%p78_p3) }
  0x12   : > { %237 = vst [vmem:[%s173_s27] sm:$0xff] (%p78_p3), %v236_v0  ;;  %239 = vst [vmem:[%s173_s27 + $0x8] sm:$0xff] (%p78_p3), %v238_v1  ;;  %v242_v3 = vld [vmem:[%s802_s26 + $0x228] sm:$0xff] (%p78_p3)  ;;  %v244_v4 = vld [vmem:[%s802_s26 + $0x2e0] sm:$0xff] (%p78_p3) }
  0x13   : > { %241 = vst [vmem:[%s173_s27 + $0x10] sm:$0xff] (%p78_p3), %v240_v2  ;;  %v246_v5 = vld [vmem:[%s802_s26 + $0x398] sm:$0xff] (%p78_p3)  ;;  %243 = vst [vmem:[%s173_s27 + $0x18] sm:$0xff] (%p78_p3), %v242_v3  ;;  %v248_v6 = vld [vmem:[%s802_s26 + $0x450] sm:$0xff] (%p78_p3) }
  0x14   : > { %245 = vst [vmem:[%s173_s27 + $0x20] sm:$0xff] (%p78_p3), %v244_v4  ;;  %247 = vst [vmem:[%s173_s27 + $0x28] sm:$0xff] (%p78_p3), %v246_v5  ;;  %v250_v7 = vld [vmem:[%s802_s26 + $0x508] sm:$0xff] (%p78_p3)  ;;  %v252_v8 = vld [vmem:[%s802_s26 + $0x5c0] sm:$0xff] (%p78_p3) }
  0x15   : > { %249 = vst [vmem:[%s173_s27 + $0x30] sm:$0xff] %v248_v6  ;;  %251 = vst [vmem:[%s173_s27 + $0x38] sm:$0xff] %v250_v7  ;;  %v254_v9 = vld [vmem:[%s802_s26 + $0x678] sm:$0xff]  ;;  %v256_v10 = vld [vmem:[%s802_s26 + $0x730] sm:$0xff] }
  0x16   : > { %253 = vst [vmem:[%s173_s27 + $0x40] sm:$0xff] %v252_v8  ;;  %v258_v11 = vld [vmem:[%s802_s26 + $0x7e8] sm:$0xff]  ;;  %255 = vst [vmem:[%s173_s27 + $0x48] sm:$0xff] %v254_v9  ;;  %v260_v12 = vld [vmem:[%s802_s26 + $0x8a0] sm:$0xff] }
  0x17   : > { %257 = vst [vmem:[%s173_s27 + $0x50] sm:$0xff] %v256_v10  ;;  %259 = vst [vmem:[%s173_s27 + $0x58] sm:$0xff] %v258_v11  ;;  %v262_v13 = vld [vmem:[%s802_s26 + $0x958] sm:$0xff]  ;;  %v264_v14 = vld [vmem:[%s802_s26 + $0xa10] sm:$0xff] }
  0x18   : > { %261 = vst [vmem:[%s173_s27 + $0x60] sm:$0xff] %v260_v12  ;;  %263 = vst [vmem:[%s173_s27 + $0x68] sm:$0xff] %v262_v13  ;;  %v266_v15 = vld [vmem:[%s802_s26 + $0xac8] sm:$0xff] }
  0x19   : > { %265 = vst [vmem:[%s173_s27 + $0x70] sm:$0xff] %v264_v14  ;;  %267 = vst [vmem:[%s173_s27 + $0x78] sm:$0xff] %v266_v15 }
  0x1a PF: > { %p571_p6 = scmp.ge.s32.totalorder %s734_s16, 1  ;;  %p278_p7 = scmp.lt.s32.totalorder %s734_s16, 24 }
  0x1c   : > { %p279_p8 = pnand %p571_p6, %p278_p7 }
  0x1d   : > { %s285_s28 = sand.u32 (!%p279_p8), 1, %s718_s12   ;;  %v736_v16 = vmov (!%p279_p8), 0.0|0.0   ;;  %vm737_vm0 = vmmov (!%p279_p8), 0   ;;  %v738_v17 = vmov (!%p279_p8), 0.0   ;;  %v346_v42 = vld [vmem:[%s867_s0] sm:$0xff] (!%p279_p8)  ;;  %p329_p9 = scmp.lt.s32.totalorder (!%p279_p8), %s726_s14, 22 }
  0x1e   : > { %282 = sbr.rel (%p279_p8) target bundleno = 281 (0x119), region = 66  ;;  %629 = vmatprep.subr.bf16.mxu0 (!%p279_p8), %v736_v16  ;;  %s572_s29 = sshll.u32 (!%p279_p8), %s285_s28, 7  ;;  %626 = vmatprep.mubr.msk.f32.mxu0 (!%p279_p8), %vm737_vm0, %v738_v17 }
  0x1f   : > { %s823_s30 = scalar_lea.vmem (!%p279_p8), [#allocation3], %s572_s29 }
  0x20   : > { %v347_v18 = vld [vmem:[%s823_s30] sm:$0xff] (!%p279_p8)  ;;  %v348_v19 = vld [vmem:[%s823_s30 + $0x8] sm:$0xff] (!%p279_p8)  ;;  %v349_v20 = vld [vmem:[%s823_s30 + $0x10] sm:$0xff] (!%p279_p8) }
  0x21   : > { %v630_v21 = vpack.c.bf16 (!%p279_p8), %v348_v19, %v347_v18  ;;  %v350_v22 = vld [vmem:[%s823_s30 + $0x18] sm:$0xff] (!%p279_p8)  ;;  %v351_v24 = vld [vmem:[%s823_s30 + $0x20] sm:$0xff] (!%p279_p8)  ;;  %v352_v25 = vld [vmem:[%s823_s30 + $0x28] sm:$0xff] (!%p279_p8) }
  0x22   : > { %v633_v23 = vpack.c.bf16 (!%p279_p8), %v350_v22, %v349_v20  ;;  %v636_v26 = vpack.c.bf16 (!%p279_p8), %v352_v25, %v351_v24  ;;  %v353_v27 = vld [vmem:[%s823_s30 + $0x30] sm:$0xff] (!%p279_p8)  ;;  %v354_v28 = vld [vmem:[%s823_s30 + $0x38] sm:$0xff] (!%p279_p8)  ;;  %v355_v30 = vld [vmem:[%s823_s30 + $0x40] sm:$0xff] (!%p279_p8) }
  0x23   : > { %631 = vmatpush3.bf16.msra.mxu0 (!%p279_p8), %v630_v21  ;;  %v639_v29 = vpack.c.bf16 (!%p279_p8), %v354_v28, %v353_v27  ;;  %v356_v31 = vld [vmem:[%s823_s30 + $0x48] sm:$0xff] (!%p279_p8)  ;;  %v357_v33 = vld [vmem:[%s823_s30 + $0x50] sm:$0xff] (!%p279_p8)  ;;  %v358_v34 = vld [vmem:[%s823_s30 + $0x58] sm:$0xff] (!%p279_p8) }
  0x24   : > { %632 = vmatprep.subr.bf16.mxu0 (!%p279_p8), %v736_v16  ;;  %v642_v32 = vpack.c.bf16 (!%p279_p8), %v356_v31, %v355_v30  ;;  %v645_v35 = vpack.c.bf16 (!%p279_p8), %v358_v34, %v357_v33  ;;  %v359_v36 = vld [vmem:[%s823_s30 + $0x60] sm:$0xff] (!%p279_p8)  ;;  %v360_v37 = vld [vmem:[%s823_s30 + $0x68] sm:$0xff] (!%p279_p8)  ;;  %v361_v39 = vld [vmem:[%s823_s30 + $0x70] sm:$0xff] (!%p279_p8) }
  0x25   : > { %v648_v38 = vpack.c.bf16 %v360_v37, %v359_v36  ;;  %v362_v40 = vld [vmem:[%s823_s30 + $0x78] sm:$0xff]  ;;  %s878_s14 = smov (!%p329_p9, %s726_s14), 22 }
  0x26   : > { %v651_v41 = vpack.c.bf16 %v362_v40, %v361_v39  ;;  %s331_s8 = scalar_lea.vmem %s869_s2, %s878_s14  ;;  %s573_s9 = sshll.u32 %s878_s14, 3 }
  0x27   : > { %634 = vmatpush3.bf16.msra.mxu0 %v633_v23  ;;  %v574_v43 = vld [vmem:[%s331_s8] ss:$0 sm:$0xff]  ;;  %s339_s12 = scalar_lea.vmem %s870_s3, %s573_s9 }
  0x28   : > { %635 = vmatprep.subr.bf16.mxu0 %v736_v16 }
  0x2b   : > { %637 = vmatpush3.bf16.msra.mxu0 %v636_v26 }
  0x2c   : > { %638 = vmatprep.subr.bf16.mxu0 %v736_v16 }
  0x2f   : > { %640 = vmatpush3.bf16.msra.mxu0 %v639_v29 }
  0x30   : > { %641 = vmatprep.subr.bf16.mxu0 %v736_v16 }
  0x33   : > { %643 = vmatpush3.bf16.msra.mxu0 %v642_v32 }
  0x34   : > { %644 = vmatprep.subr.bf16.mxu0 %v736_v16 }
  0x37   : > { %646 = vmatpush3.bf16.msra.mxu0 %v645_v35 }
  0x38   : > { %647 = vmatprep.subr.bf16.mxu0 %v736_v16 }
  0x3b   : > { %649 = vmatpush3.bf16.msra.mxu0 %v648_v38 }
  0x3c   : > { %650 = vmatprep.subr.bf16.mxu0 %v736_v16 }
  0x3f   : > { %652 = vmatpush3.bf16.msra.mxu0 %v651_v41 }
  0x42   : > { %627 = vmatmul.mubr.f32.vlgmr.msra.gmra.mrb[0].mxu0 %v346_v42 }
 0x115   : > { %v429_v44 = vpop.f32.mrb[0].mxu0 }
 0x116   : > { %v446_v45 = vadd.f32 %v574_v43, %v429_v44  ;;  %v628_v46 = vpop.f32.mrb[1].mxu0 }
 0x118   : > { %447 = vst [vmem:[%s339_s12] sm:$0xff] %v446_v45 }
 0x119 PF: > { %s13_s16 = sadd.s32 1, %s734_s16   ;;  %s871_s12 = smov %s722_s13 }
 0x11a   : > { %p10_p10 = scmp.ge.s32.totalorder %s13_s16, 25   ;;  %s872_s13 = smov %s794_s20 }
 0x11b   : > { %s873_s14 = smov %s730_s15  ;;  %s874_s15 = smov %s876_s17 }
 0x11c   :  { %12 = sbr.rel (!%p10_p10) target bundleno = 3 (0x3), region = 119 }

// kernel: network_forward.9
= control target key start
LH: loop header
LB: loop body
LE: loop exit
PB: predicated region body
PF: predicated region fallthrough
CT: control target
= control target key end

     0   :  { %8 = vsyncpa [#allocation4], 0  ;;  %s5680_s0 = inlined_call_operand.hbm [shape: bf16[3072,3072], index: 0, kind: input, shape index: {}]   ;;  %s5681_s1 = inlined_call_operand.vmem [shape: bf16[3072,128], index: 1, kind: input, shape index: {}]   ;;  %s5682_s2 = inlined_call_operand.vmem [shape: f32[1,128], index: 2, kind: input, shape index: {}]   ;;  %s5683_s3 = inlined_call_operand.vmem [shape: f32[3072,128], index: 3, kind: output, shape index: {}]  }
   0x1   :  { %10 = vsyncpa [#allocation4 + $0x1], 0  ;;  %s4733_s12 = smov 0   ;;  %s4735_s13 = smov 0  }
   0x2   :  { %s4737_s14 = smov 0   ;;  %s4739_s15 = smov 0  }
   0x3   :  { %s4741_s16 = smov 0   ;;  %s4743_s17 = smov 0  }
   0x4   :  { %s4745_s18 = smov 0   ;;  %s4747_s19 = smov 0  }
   0x5 LB: > { %s4127_s20 = sadd.s32 4294967295, %s4705_s19   ;;  %s28_s21 = sadd.s32 1, %s4697_s17  ;;  %s4705_s19 = sphi %s4747_s19, %s16_s19   ;;  %s4701_s18 = sphi %s4745_s18, %s5741_s18   ;;  %s4697_s17 = sphi %s4743_s17, %s5740_s17   ;;  %s4693_s16 = sphi %s4741_s16, %s5739_s16   ;;  %s4689_s15 = sphi %s4739_s15, %s5738_s15   ;;  %s4685_s14 = sphi %s4737_s14, %s5737_s14   ;;  %s4681_s13 = sphi %s4735_s13, %s5736_s13   ;;  %s4677_s12 = sphi %s4733_s12, %s5735_s12  }
   0x6   : > { %p29_p0 = scmp.ge.s32.totalorder %s28_s21, 3  ;;  %s35_s22 = sadd.s32 1, %s4701_s18 }
   0x7   : > { %s44_s23 = sadd.s32 1, %s4685_s14  ;;  %p51_p1 = scmp.ne.s32.totalorder %s4685_s14, %s4681_s13 }
   0x8   : > { %s5743_s21 = smov (%p29_p0, %s28_s21), 0  ;;  %s5745_s22 = smov (!%p29_p0, %s35_s22), %s4701_s18 }
   0x9   : > { %s40_s24 = ssub.s32 %s4697_s17, %s5743_s21  ;;  %p52_p2 = scmp.eq.s32.totalorder %s4705_s19, 0 }
   0xa   : > { %p37_p3 = scmp.ge.s32.totalorder %s5745_s22, 6  ;;  %p57_p4 = scmp.ne.s32.totalorder %s4681_s13, %s4677_s12 }
   0xb   : > { %p4784_p5 = por %p52_p2, %p51_p1  ;;  %p58_p6 = scmp.eq.s32.totalorder %s4127_s20, 0 }
   0xc   : > { %s5747_s22 = smov (%p37_p3, %s5745_s22), 0  ;;  %p4475_p8 = scmp.lt.s32.totalorder %s4705_s19, 18 }
   0xd   : > { %p4790_p7 = por %p58_p6, %p57_p4  ;;  %s39_s27 = ssub.s32 %s4701_s18, %s5747_s22 }
   0xe   : > { %s41_s28 = sor.u32 %s40_s24, %s39_s27  ;;  %s169_s29 = sand.u32 1, %s4685_s14  }
   0xf   : > { %p42_p9 = scmp.eq.s32.totalorder %s41_s28, 0  ;;  %s4132_s30 = sshll.u32 %s169_s29, 11 }
  0x10   : > { %s4134_s4 = sshll.u32 %s4697_s17, 3  ;;  %s4468_s6 = smul.u32 1536, %s4701_s18 }
  0x11   : > { %s4800_s5 = scalar_select %p42_p9, %s4685_s14, %s44_s23  }
  0x12   : > { %s173_s7 = scalar_lea.vmem [#allocation3], %s4132_s30  ;;  %p4805_p10 = pnand %p4475_p8, %p4784_p5 }
  0x13   : > { %s183_s8 = sshll.u32 %s173_s7, 4  ;;  %s180_s10 = sadd.s32 %s4468_s6, %s4134_s4  ;;  %s4809_s8 = int_to_ptr.vmem [resolvable:$true] %s183_s8 }
  0x14   : > { %s4136_s11 = sshll.u32 %s180_s10, 6  ;;  %s4816_s23 = scalar_lea.sflag [#allocation4], %s169_s29 }
  0x15   : > { %s4814_s24 = scalar_lea.hbm %s5680_s0, %s4136_s11  ;;  %p4611_p12 = pneg %p4805_p10 }
  0x16   : > { %s4609_s25 = scalar_lea.hbm %s4814_s24, 32768  ;;  %s4614_s30 = scalar_lea.hbm %s5680_s0, 589824 }
  0x17   : > { %p4610_p11 = scmp.ne.s32.totalorder %s4814_s24, %s4609_s25  ;;  %p4615_p1 = scmp.lt.u32.totalorder %s4814_s24, %s5680_s0 }
  0x18   : > { %p4616_p2 = scmp.lt.u32.totalorder %s4614_s30, %s4609_s25  ;;  %p4618_p4 = scmp.lt.u32.totalorder %s4609_s25, %s4814_s24 }
  0x19   : > { %p4612_p13 = pnand %p4611_p12, %p4610_p11 }
  0x1a   : > { %p4617_p3 = por %p4616_p2, %p4615_p1 }
  0x1b   : > { %p4613_p0 = pneg %p4612_p13 }
  0x1c   : > { %p4619_p5 = por %p4618_p4, %p4617_p3 }
  0x1e   : > { %p4620_p6 = pnand %p4619_p5, %p4613_p0 }
  0x20   : > { %4623 = shalt.err (!%p4620_p6)
}
  0x21   : > { %s4624_s29 = scalar_lea.vmem %s4809_s8, 32768  ;;  %s4707_s7 = smov [#allocation3]  }
  0x22   : > { %p4625_p8 = scmp.ne.s32.totalorder %s4809_s8, %s4624_s29  ;;  %s4629_s10 = sshll.u32 %s4707_s7, 4  ;;  %s4630_s10 = int_to_ptr.vmem [resolvable:$false] %s4629_s10 }
  0x23   : > { %s4631_s11 = scalar_lea.vmem %s4630_s10, 65536  ;;  %p4632_p13 = scmp.lt.s32.totalorder %s4809_s8, %s4630_s10 }
  0x24   : > { %p4627_p9 = pnand %p4625_p8, %p4611_p12  ;;  %p4633_p1 = scmp.lt.s32.totalorder %s4631_s11, %s4624_s29 }
  0x26   : > { %p4628_p11 = pneg %p4627_p9  ;;  %p4634_p2 = por %p4633_p1, %p4632_p13 }
  0x28   : > { %p4635_p3 = pnand %p4634_p2, %p4628_p11 }
  0x2a   : > { %4638 = shalt.err (!%p4635_p3)
}
  0x2b   : > { %s4708_s12 = smov 1536   ;;  %s4709_s20 = smov 512  }
  0x2c   : > { %s4710_s25 = smov 32   ;;  %p4137_p12 = scmp.ge.s32.totalorder %s4705_s19, 1 }
  0x2d   : > { %4474 = dma.hbm_to_vmem [thread:$0]  (!%p4805_p10), %s4814_s24, 32768, %s4809_s8, %s4816_s23, %s4708_s12, %s4709_s20, %s4710_s25  }
  0x2e   : > { %p203_p0 = scmp.lt.s32.totalorder %s4705_s19, 19 }
  0x30   : > { %p204_p4 = pnand %p4137_p12, %p203_p0 }
  0x32   : > { %207 = sbr.rel (%p204_p4) target bundleno = 909 (0x38d), region = 32 }
  0x39   : > { %s209_s27 = sand.u32 1, %s4681_s13  }
  0x3a   : > { %s4138_s28 = sshll.u32 %s209_s27, 11  ;;  %s210_s30 = scalar_lea.sflag [#allocation4], %s209_s27 }
  0x3b   : > { %s4847_s4 = scalar_lea.vmem [#allocation3], %s4138_s28 }
  0x3c   : > { %4672 = dma.done.wait (%p4790_p7), %s210_s30, 32768  }
  0x3d   : > { %4674 = vsyncadd (%p4790_p7), %s210_s30, 4294934528  ;;  %s4139_s9 = sshll.u32 %s4689_s15, 7  ;;  %s4141_s8 = sshll.u32 %s4693_s16, 6 }
  0x3e   : > { %p253_p10 = scmp.lt.s32.totalorder %s4139_s9, 383  ;;  %p265_p5 = scmp.lt.s32.totalorder %s4141_s8, 383 }
  0x3f   : > { %p4143_p7 = scmp.ne.s32.totalorder %s4689_s15, 0 }
  0x40   : > { %s5749_s9 = smov (!%p253_p10, %s4139_s9), 383  ;;  %s5751_s8 = smov (!%p265_p5, %s4141_s8), 383 }
  0x41   : > { %s4140_s24 = sshll.u32 %s5749_s9, 2  ;;  %s4142_s7 = sshll.u32 %s5751_s8, 3  ;;  %v4711_v0 = vmov (!%p4143_p7), 0.0  }
  0x42   : > { %s4858_s29 = scalar_lea.vmem %s5681_s1, %s4140_s24  ;;  %s4863_s26 = scalar_lea.vmem %s5683_s3, %s4142_s7  ;;  %278 = vst [vmem:[#allocation2] sm:$0xff] (!%p4143_p7), %v4711_v0  ;;  %279 = vst [vmem:[#allocation2 + $0x8] sm:$0xff] (!%p4143_p7), %v4711_v0 }
  0x43   : > { %277 = sbr.rel (%p4143_p7) target bundleno = 98 (0x62), region = 40  ;;  %280 = vst [vmem:[#allocation2 + $0x10] sm:$0xff] (!%p4143_p7), %v4711_v0  ;;  %281 = vst [vmem:[#allocation2 + $0x18] sm:$0xff] (!%p4143_p7), %v4711_v0 }
  0x44   : > { %282 = vst [vmem:[#allocation2 + $0x20] sm:$0xff] (!%p4143_p7), %v4711_v0  ;;  %283 = vst [vmem:[#allocation2 + $0x28] sm:$0xff] (!%p4143_p7), %v4711_v0 }
  0x45   : > { %284 = vst [vmem:[#allocation2 + $0x30] sm:$0xff] (!%p4143_p7), %v4711_v0  ;;  %285 = vst [vmem:[#allocation2 + $0x38] sm:$0xff] (!%p4143_p7), %v4711_v0 }
  0x46   : > { %286 = vst [vmem:[#allocation2 + $0x40] sm:$0xff] (!%p4143_p7), %v4711_v0  ;;  %287 = vst [vmem:[#allocation2 + $0x48] sm:$0xff] (!%p4143_p7), %v4711_v0 }
  0x47   : > { %288 = vst [vmem:[#allocation2 + $0x50] sm:$0xff] (!%p4143_p7), %v4711_v0  ;;  %289 = vst [vmem:[#allocation2 + $0x58] sm:$0xff] (!%p4143_p7), %v4711_v0 }
  0x48   : > { %290 = vst [vmem:[#allocation2 + $0x60] sm:$0xff] (!%p4143_p7), %v4711_v0  ;;  %291 = vst [vmem:[#allocation2 + $0x68] sm:$0xff] (!%p4143_p7), %v4711_v0 }
  0x49   : > { %292 = vst [vmem:[#allocation2 + $0x70] sm:$0xff] (!%p4143_p7), %v4711_v0  ;;  %293 = vst [vmem:[#allocation2 + $0x78] sm:$0xff] (!%p4143_p7), %v4711_v0 }
  0x4a   : > { %294 = vst [vmem:[#allocation2 + $0x80] sm:$0xff] %v4711_v0  ;;  %295 = vst [vmem:[#allocation2 + $0x88] sm:$0xff] %v4711_v0 }
  0x4b   : > { %296 = vst [vmem:[#allocation2 + $0x90] sm:$0xff] %v4711_v0  ;;  %297 = vst [vmem:[#allocation2 + $0x98] sm:$0xff] %v4711_v0 }
  0x4c   : > { %298 = vst [vmem:[#allocation2 + $0xa0] sm:$0xff] %v4711_v0  ;;  %299 = vst [vmem:[#allocation2 + $0xa8] sm:$0xff] %v4711_v0 }
  0x4d   : > { %300 = vst [vmem:[#allocation2 + $0xb0] sm:$0xff] %v4711_v0  ;;  %301 = vst [vmem:[#allocation2 + $0xb8] sm:$0xff] %v4711_v0 }
  0x4e   : > { %302 = vst [vmem:[#allocation2 + $0xc0] sm:$0xff] %v4711_v0  ;;  %303 = vst [vmem:[#allocation2 + $0xc8] sm:$0xff] %v4711_v0 }
  0x4f   : > { %304 = vst [vmem:[#allocation2 + $0xd0] sm:$0xff] %v4711_v0  ;;  %305 = vst [vmem:[#allocation2 + $0xd8] sm:$0xff] %v4711_v0 }
  0x50   : > { %306 = vst [vmem:[#allocation2 + $0xe0] sm:$0xff] %v4711_v0  ;;  %307 = vst [vmem:[#allocation2 + $0xe8] sm:$0xff] %v4711_v0 }
  0x51   : > { %308 = vst [vmem:[#allocation2 + $0xf0] sm:$0xff] %v4711_v0  ;;  %309 = vst [vmem:[#allocation2 + $0xf8] sm:$0xff] %v4711_v0 }
  0x52   : > { %310 = vst [vmem:[#allocation2 + $0x100] sm:$0xff] %v4711_v0  ;;  %311 = vst [vmem:[#allocation2 + $0x108] sm:$0xff] %v4711_v0 }
  0x53   : > { %312 = vst [vmem:[#allocation2 + $0x110] sm:$0xff] %v4711_v0  ;;  %313 = vst [vmem:[#allocation2 + $0x118] sm:$0xff] %v4711_v0 }
  0x54   : > { %314 = vst [vmem:[#allocation2 + $0x120] sm:$0xff] %v4711_v0  ;;  %315 = vst [vmem:[#allocation2 + $0x128] sm:$0xff] %v4711_v0 }
  0x55   : > { %316 = vst [vmem:[#allocation2 + $0x130] sm:$0xff] %v4711_v0  ;;  %317 = vst [vmem:[#allocation2 + $0x138] sm:$0xff] %v4711_v0 }
  0x56   : > { %318 = vst [vmem:[#allocation2 + $0x140] sm:$0xff] %v4711_v0  ;;  %319 = vst [vmem:[#allocation2 + $0x148] sm:$0xff] %v4711_v0 }
  0x57   : > { %320 = vst [vmem:[#allocation2 + $0x150] sm:$0xff] %v4711_v0  ;;  %321 = vst [vmem:[#allocation2 + $0x158] sm:$0xff] %v4711_v0 }
  0x58   : > { %322 = vst [vmem:[#allocation2 + $0x160] sm:$0xff] %v4711_v0  ;;  %323 = vst [vmem:[#allocation2 + $0x168] sm:$0xff] %v4711_v0 }
  0x59   : > { %324 = vst [vmem:[#allocation2 + $0x170] sm:$0xff] %v4711_v0  ;;  %325 = vst [vmem:[#allocation2 + $0x178] sm:$0xff] %v4711_v0 }
  0x5a   : > { %326 = vst [vmem:[#allocation2 + $0x180] sm:$0xff] %v4711_v0  ;;  %327 = vst [vmem:[#allocation2 + $0x188] sm:$0xff] %v4711_v0 }
  0x5b   : > { %328 = vst [vmem:[#allocation2 + $0x190] sm:$0xff] %v4711_v0  ;;  %329 = vst [vmem:[#allocation2 + $0x198] sm:$0xff] %v4711_v0 }
  0x5c   : > { %330 = vst [vmem:[#allocation2 + $0x1a0] sm:$0xff] %v4711_v0  ;;  %331 = vst [vmem:[#allocation2 + $0x1a8] sm:$0xff] %v4711_v0 }
  0x5d   : > { %332 = vst [vmem:[#allocation2 + $0x1b0] sm:$0xff] %v4711_v0  ;;  %333 = vst [vmem:[#allocation2 + $0x1b8] sm:$0xff] %v4711_v0 }
  0x5e   : > { %334 = vst [vmem:[#allocation2 + $0x1c0] sm:$0xff] %v4711_v0  ;;  %335 = vst [vmem:[#allocation2 + $0x1c8] sm:$0xff] %v4711_v0 }
  0x5f   : > { %336 = vst [vmem:[#allocation2 + $0x1d0] sm:$0xff] %v4711_v0  ;;  %337 = vst [vmem:[#allocation2 + $0x1d8] sm:$0xff] %v4711_v0 }
  0x60   : > { %338 = vst [vmem:[#allocation2 + $0x1e0] sm:$0xff] %v4711_v0  ;;  %339 = vst [vmem:[#allocation2 + $0x1e8] sm:$0xff] %v4711_v0 }
  0x61   : > { %340 = vst [vmem:[#allocation2 + $0x1f0] sm:$0xff] %v4711_v0  ;;  %341 = vst [vmem:[#allocation2 + $0x1f8] sm:$0xff] %v4711_v0 }
  0x62 PF: > { %v4545_v1 = vld [vmem:[%s4858_s29] sm:$0xff]   ;;  %v4712_v2 = vmov 0   ;;  %v4547_v4 = vld [vmem:[%s4858_s29 + $0x8] sm:$0xff]   ;;  %v4549_v6 = vld [vmem:[%s4858_s29 + $0x10] sm:$0xff]   ;;  %p4464_p6 = scmp.ne.s32.totalorder %s4689_s15, 2 }
  0x63   : > { %2454 = vmatprep.subr.bf16.mxu0 %v4712_v2  ;;  %2743 = vmatprep.subr.bf16.mxu1 %v4712_v2  ;;  %v4546_v3 = vld [vmem:[%s4858_s29 + $0x80] sm:$0xff]   ;;  %v4548_v5 = vld [vmem:[%s4858_s29 + $0x88] sm:$0xff]   ;;  %v4550_v7 = vld [vmem:[%s4858_s29 + $0x90] sm:$0xff]  }
  0x64   : > { %2455 = vmatpush1.bf16.msra.mxu0 %v4545_v1  ;;  %2744 = vmatpush1.bf16.msra.mxu1 %v4546_v3  ;;  %v4551_v8 = vld [vmem:[%s4858_s29 + $0x18] sm:$0xff]   ;;  %v4553_v10 = vld [vmem:[%s4858_s29 + $0x20] sm:$0xff]   ;;  %v4555_v12 = vld [vmem:[%s4858_s29 + $0x28] sm:$0xff]  }
  0x65   : > { %2456 = vmatprep.subr.bf16.mxu0 %v4712_v2  ;;  %2745 = vmatprep.subr.bf16.mxu1 %v4712_v2  ;;  %v4552_v9 = vld [vmem:[%s4858_s29 + $0x98] sm:$0xff]   ;;  %v4554_v11 = vld [vmem:[%s4858_s29 + $0xa0] sm:$0xff]   ;;  %v4556_v13 = vld [vmem:[%s4858_s29 + $0xa8] sm:$0xff]  }
  0x66   : > { %v4557_v14 = vld [vmem:[%s4858_s29 + $0x30] sm:$0xff]   ;;  %v4559_v16 = vld [vmem:[%s4858_s29 + $0x38] sm:$0xff]   ;;  %v4561_v18 = vld [vmem:[%s4858_s29 + $0x40] sm:$0xff]  }
  0x67   : > { %v4558_v15 = vld [vmem:[%s4858_s29 + $0xb0] sm:$0xff]   ;;  %v4560_v17 = vld [vmem:[%s4858_s29 + $0xb8] sm:$0xff]   ;;  %v4562_v19 = vld [vmem:[%s4858_s29 + $0xc0] sm:$0xff]  }
  0x68   : > { %2457 = vmatpush1.bf16.msra.mxu0 %v4547_v4  ;;  %2746 = vmatpush1.bf16.msra.mxu1 %v4548_v5  ;;  %v4967_v20 = vld [vmem:[%s4847_s4] sm:$0xff]  ;;  %v4973_v22 = vld [vmem:[%s4847_s4 + $0x8] sm:$0xff]  ;;  %v4565_v28 = vld [vmem:[%s4858_s29 + $0x50] sm:$0xff]  }
  0x69   : > { %2458 = vmatprep.subr.bf16.mxu0 %v4712_v2  ;;  %2747 = vmatprep.subr.bf16.mxu1 %v4712_v2  ;;  %v4970_v21 = vld [vmem:[%s4847_s4 + $0x20] sm:$0xff]  ;;  %v4978_v24 = vld [vmem:[%s4847_s4 + $0x28] sm:$0xff]  ;;  %v4566_v29 = vld [vmem:[%s4858_s29 + $0xd0] sm:$0xff]  }
  0x6a   : > { %v4145_v23 = vcombine.high %v4967_v20, %v4970_v21  ;;  %v4563_v25 = vld [vmem:[%s4858_s29 + $0x48] sm:$0xff]   ;;  %v4147_v26 = vcombine.high %v4973_v22, %v4978_v24  ;;  %v4567_v30 = vld [vmem:[%s4858_s29 + $0x58] sm:$0xff]   ;;  %v4569_v32 = vld [vmem:[%s4858_s29 + $0x60] sm:$0xff]   ;;  %v4144_v43 = vcombine.low %v4967_v20, %v4970_v21  ;;  %v4146_v45 = vcombine.low %v4973_v22, %v4978_v24 }
  0x6b   : > { %v4564_v27 = vld [vmem:[%s4858_s29 + $0xc8] sm:$0xff]   ;;  %v4568_v31 = vld [vmem:[%s4858_s29 + $0xd8] sm:$0xff]   ;;  %v4570_v33 = vld [vmem:[%s4858_s29 + $0xe0] sm:$0xff]  }
  0x6c   : > { %2459 = vmatpush1.bf16.msra.mxu0 %v4549_v6  ;;  %2748 = vmatpush1.bf16.msra.mxu1 %v4550_v7  ;;  %v4571_v34 = vld [vmem:[%s4858_s29 + $0x68] sm:$0xff]   ;;  %v4573_v36 = vld [vmem:[%s4858_s29 + $0x70] sm:$0xff]   ;;  %v4575_v38 = vld [vmem:[%s4858_s29 + $0x78] sm:$0xff]  }
  0x6d   : > { %2460 = vmatprep.subr.bf16.mxu0 %v4712_v2  ;;  %2749 = vmatprep.subr.bf16.mxu1 %v4712_v2  ;;  %v4572_v35 = vld [vmem:[%s4858_s29 + $0xe8] sm:$0xff]   ;;  %v4574_v37 = vld [vmem:[%s4858_s29 + $0xf0] sm:$0xff]   ;;  %v4576_v39 = vld [vmem:[%s4858_s29 + $0xf8] sm:$0xff]  }
  0x6e   : > { %2486 = vmatprep.mubr.bf16.mxu0 %v4145_v23  ;;  %2775 = vmatprep.mubr.bf16.mxu1 %v4147_v26  ;;  %v414_v40 = vld [vmem:[%s4847_s4 + $0x40] sm:$0xff]  ;;  %v415_v42 = vld [vmem:[%s4847_s4 + $0x48] sm:$0xff]  ;;  %v4581_v60 = vld [vmem:[%s4858_s29 + $0x110] sm:$0xff]  }
  0x6f   : > { %v418_v41 = vld [vmem:[%s4847_s4 + $0x60] sm:$0xff]  ;;  %v419_v44 = vld [vmem:[%s4847_s4 + $0x68] sm:$0xff]  ;;  %v4582_v61 = vld [vmem:[%s4858_s29 + $0x190] sm:$0xff]  }
  0x70   : > { %2461 = vmatpush1.bf16.msra.mxu0 %v4551_v8  ;;  %2750 = vmatpush1.bf16.msra.mxu1 %v4552_v9  ;;  %v4577_v46 = vld [vmem:[%s4858_s29 + $0x100] sm:$0xff]   ;;  %v4153_v48 = vcombine.high %v414_v40, %v418_v41  ;;  %v4155_v49 = vcombine.high %v415_v42, %v419_v44  ;;  %v4579_v52 = vld [vmem:[%s4858_s29 + $0x108] sm:$0xff]   ;;  %v4152_v56 = vcombine.low %v414_v40, %v418_v41  ;;  %v4583_v3 = vld [vmem:[%s4858_s29 + $0x118] sm:$0xff]  }
  0x71   : > { %2462 = vmatprep.subr.bf16.mxu0 %v4712_v2  ;;  %2751 = vmatprep.subr.bf16.mxu1 %v4712_v2  ;;  %v4578_v47 = vld [vmem:[%s4858_s29 + $0x180] sm:$0xff]   ;;  %v4580_v53 = vld [vmem:[%s4858_s29 + $0x188] sm:$0xff]   ;;  %v4154_v57 = vcombine.low %v415_v42, %v419_v44  ;;  %v4584_v4 = vld [vmem:[%s4858_s29 + $0x198] sm:$0xff]  }
  0x72   : > { %v422_v50 = vld [vmem:[%s4847_s4 + $0x80] sm:$0xff]  ;;  %v423_v54 = vld [vmem:[%s4847_s4 + $0x88] sm:$0xff]  ;;  %v4589_v21 = vld [vmem:[%s4858_s29 + $0x130] sm:$0xff]  }
  0x73   : > { %v426_v51 = vld [vmem:[%s4847_s4 + $0xa0] sm:$0xff]  ;;  %v427_v55 = vld [vmem:[%s4847_s4 + $0xa8] sm:$0xff]  ;;  %v4590_v22 = vld [vmem:[%s4858_s29 + $0x1b0] sm:$0xff]  }
  0x74   : > { %2463 = vmatpush1.bf16.msra.mxu0 %v4553_v10  ;;  %2752 = vmatpush1.bf16.msra.mxu1 %v4554_v11  ;;  %v4161_v58 = vcombine.high %v422_v50, %v426_v51  ;;  %v4163_v59 = vcombine.high %v423_v54, %v427_v55  ;;  %v430_v62 = vld [vmem:[%s4847_s4 + $0xc0] sm:$0xff]  ;;  %v431_v0 = vld [vmem:[%s4847_s4 + $0xc8] sm:$0xff]  ;;  %v4160_v5 = vcombine.low %v422_v50, %v426_v51 }
  0x75   : > { %2464 = vmatprep.subr.bf16.mxu0 %v4712_v2  ;;  %2753 = vmatprep.subr.bf16.mxu1 %v4712_v2  ;;  %v434_v63 = vld [vmem:[%s4847_s4 + $0xe0] sm:$0xff]  ;;  %v435_v1 = vld [vmem:[%s4847_s4 + $0xe8] sm:$0xff]  ;;  %v4162_v7 = vcombine.low %v423_v54, %v427_v55  ;;  %v4599_v55 = vld [vmem:[%s4858_s29 + $0x158] sm:$0xff]  }
  0x76   : > { %v4585_v6 = vld [vmem:[%s4858_s29 + $0x120] sm:$0xff]   ;;  %v4169_v8 = vcombine.high %v430_v62, %v434_v63  ;;  %v4171_v10 = vcombine.high %v431_v0, %v435_v1  ;;  %v447_v26 = vld [vmem:[%s4847_s4 + $0x148] sm:$0xff] }
  0x77   : > { %v4586_v9 = vld [vmem:[%s4858_s29 + $0x1a0] sm:$0xff]   ;;  %v4596_v40 = vld [vmem:[%s4858_s29 + $0x1c8] sm:$0xff]  }
  0x78   : > { %2465 = vmatpush1.bf16.msra.mxu0 %v4555_v12  ;;  %2754 = vmatpush1.bf16.msra.mxu1 %v4556_v13  ;;  %v438_v11 = vld [vmem:[%s4847_s4 + $0x100] sm:$0xff]  ;;  %v439_v13 = vld [vmem:[%s4847_s4 + $0x108] sm:$0xff] }
  0x79   : > { %2466 = vmatprep.subr.bf16.mxu0 %v4712_v2  ;;  %2755 = vmatprep.subr.bf16.mxu1 %v4712_v2  ;;  %v442_v12 = vld [vmem:[%s4847_s4 + $0x120] sm:$0xff]  ;;  %v467_v50 = vld [vmem:[%s4847_s4 + $0x1e8] sm:$0xff] }
  0x7a   : > { %v446_v23 = vld [vmem:[%s4847_s4 + $0x140] sm:$0xff] }
  0x7b   : > { %v450_v24 = vld [vmem:[%s4847_s4 + $0x160] sm:$0xff] }
  0x7c   : > { %2467 = vmatpush1.bf16.msra.mxu0 %v4557_v14  ;;  %2756 = vmatpush1.bf16.msra.mxu1 %v4558_v15  ;;  %v443_v14 = vld [vmem:[%s4847_s4 + $0x128] sm:$0xff]  ;;  %v4184_v41 = vcombine.low %v446_v23, %v450_v24 }
  0x7d   : > { %2468 = vmatprep.subr.bf16.mxu0 %v4712_v2  ;;  %2757 = vmatprep.subr.bf16.mxu1 %v4712_v2  ;;  %v4587_v15 = vld [vmem:[%s4858_s29 + $0x128] sm:$0xff]   ;;  %v4179_v20 = vcombine.high %v439_v13, %v443_v14 }
  0x80   : > { %2469 = vmatpush1.bf16.msra.mxu0 %v4559_v16  ;;  %2758 = vmatpush1.bf16.msra.mxu1 %v4560_v17  ;;  %v4588_v16 = vld [vmem:[%s4858_s29 + $0x1a8] sm:$0xff]   ;;  %v4168_v17 = vcombine.low %v430_v62, %v434_v63 }
  0x81   : > { %2470 = vmatprep.subr.bf16.mxu0 %v4712_v2  ;;  %2759 = vmatprep.subr.bf16.mxu1 %v4712_v2 }
  0x84   : > { %2471 = vmatpush1.bf16.msra.mxu0 %v4561_v18  ;;  %2760 = vmatpush1.bf16.msra.mxu1 %v4562_v19  ;;  %v4170_v18 = vcombine.low %v431_v0, %v435_v1  ;;  %v4177_v19 = vcombine.high %v438_v11, %v442_v12  ;;  %v478_v1 = vld [vmem:[%s4847_s4 + $0x240] sm:$0xff] }
  0x85   : > { %2472 = vmatprep.subr.bf16.mxu0 %v4712_v2  ;;  %2761 = vmatprep.subr.bf16.mxu1 %v4712_v2 }
  0x88   : > { %2473 = vmatpush1.bf16.msra.mxu0 %v4563_v25  ;;  %2762 = vmatpush1.bf16.msra.mxu1 %v4564_v27  ;;  %v4591_v25 = vld [vmem:[%s4858_s29 + $0x138] sm:$0xff]   ;;  %v451_v27 = vld [vmem:[%s4847_s4 + $0x168] sm:$0xff] }
  0x89   : > { %2474 = vmatprep.subr.bf16.mxu0 %v4712_v2  ;;  %2763 = vmatprep.subr.bf16.mxu1 %v4712_v2  ;;  %v4186_v42 = vcombine.low %v447_v26, %v451_v27 }
  0x8c   : > { %2475 = vmatpush1.bf16.msra.mxu0 %v4565_v28  ;;  %2764 = vmatpush1.bf16.msra.mxu1 %v4566_v29  ;;  %v4592_v28 = vld [vmem:[%s4858_s29 + $0x1b8] sm:$0xff]   ;;  %v4176_v29 = vcombine.low %v438_v11, %v442_v12  ;;  %v4602_v11 = vld [vmem:[%s4858_s29 + $0x1e0] sm:$0xff]  }
  0x8d   : > { %2476 = vmatprep.subr.bf16.mxu0 %v4712_v2  ;;  %2765 = vmatprep.subr.bf16.mxu1 %v4712_v2  ;;  %v486_v12 = vld [vmem:[%s4847_s4 + $0x280] sm:$0xff] }
  0x90   : > { %2477 = vmatpush1.bf16.msra.mxu0 %v4567_v30  ;;  %2766 = vmatpush1.bf16.msra.mxu1 %v4568_v31  ;;  %v4178_v30 = vcombine.low %v439_v13, %v443_v14  ;;  %v4185_v31 = vcombine.high %v446_v23, %v450_v24  ;;  %v490_v13 = vld [vmem:[%s4847_s4 + $0x2a0] sm:$0xff]  ;;  %v487_v14 = vld [vmem:[%s4847_s4 + $0x288] sm:$0xff] }
  0x91   : > { %2478 = vmatprep.subr.bf16.mxu0 %v4712_v2  ;;  %2767 = vmatprep.subr.bf16.mxu1 %v4712_v2  ;;  %v499_v23 = vld [vmem:[%s4847_s4 + $0x2e8] sm:$0xff]  ;;  %v4224_v24 = vcombine.low %v486_v12, %v490_v13 }
  0x94   : > { %2479 = vmatpush1.bf16.msra.mxu0 %v4569_v32  ;;  %2768 = vmatpush1.bf16.msra.mxu1 %v4570_v33  ;;  %v4187_v32 = vcombine.high %v447_v26, %v451_v27  ;;  %v4593_v33 = vld [vmem:[%s4858_s29 + $0x140] sm:$0xff]  }
  0x95   : > { %2480 = vmatprep.subr.bf16.mxu0 %v4712_v2  ;;  %2769 = vmatprep.subr.bf16.mxu1 %v4712_v2 }
  0x98   : > { %2481 = vmatpush1.bf16.msra.mxu0 %v4571_v34  ;;  %2770 = vmatpush1.bf16.msra.mxu1 %v4572_v35  ;;  %v4594_v34 = vld [vmem:[%s4858_s29 + $0x1c0] sm:$0xff]  }
  0x99   : > { %2482 = vmatprep.subr.bf16.mxu0 %v4712_v2  ;;  %2771 = vmatprep.subr.bf16.mxu1 %v4712_v2  ;;  %v454_v35 = vld [vmem:[%s4847_s4 + $0x180] sm:$0xff] }
  0x9c   : > { %2483 = vmatpush1.bf16.msra.mxu0 %v4573_v36  ;;  %2772 = vmatpush1.bf16.msra.mxu1 %v4574_v37  ;;  %v458_v36 = vld [vmem:[%s4847_s4 + $0x1a0] sm:$0xff]  ;;  %v4595_v37 = vld [vmem:[%s4858_s29 + $0x148] sm:$0xff]  }
  0x9d   : > { %2484 = vmatprep.subr.bf16.mxu0 %v4712_v2  ;;  %2773 = vmatprep.subr.bf16.mxu1 %v4712_v2  ;;  %v4192_v51 = vcombine.low %v454_v35, %v458_v36 }
  0xa0   : > { %2485 = vmatpush1.bf16.msra.mxu0 %v4575_v38  ;;  %2774 = vmatpush1.bf16.msra.mxu1 %v4576_v39  ;;  %v455_v38 = vld [vmem:[%s4847_s4 + $0x188] sm:$0xff] }
  0xa1   : > { %3032 = vmatprep.subr.bf16.mxu0 %v4712_v2  ;;  %3321 = vmatprep.subr.bf16.mxu1 %v4712_v2  ;;  %v459_v39 = vld [vmem:[%s4847_s4 + $0x1a8] sm:$0xff] }
  0xa2   : > { %v4195_v44 = vcombine.high %v455_v38, %v459_v39 }
  0xa3   : > { %2487 = vmatmul.mubr.bf16.vlgmr.msra.gmra.mrb[0].mxu0 %v4144_v43  ;;  %2776 = vmatmul.mubr.bf16.vlgmr.msra.gmra.mrb[0].mxu1 %v4146_v45  ;;  %v4193_v43 = vcombine.high %v454_v35, %v458_v36  ;;  %v4597_v45 = vld [vmem:[%s4858_s29 + $0x150] sm:$0xff]   ;;  %v4604_v36 = vld [vmem:[%s4858_s29 + $0x1e8] sm:$0xff]  }
  0xa4   : > { %3033 = vmatpush1.bf16.msra.mxu0 %v4577_v46  ;;  %3322 = vmatpush1.bf16.msra.mxu1 %v4578_v47  ;;  %v4598_v46 = vld [vmem:[%s4858_s29 + $0x1d0] sm:$0xff]   ;;  %v462_v47 = vld [vmem:[%s4847_s4 + $0x1c0] sm:$0xff] }
  0xa5   : > { %2494 = vmatprep.mubr.bf16.mxu0 %v4153_v48  ;;  %2783 = vmatprep.mubr.bf16.mxu1 %v4155_v49  ;;  %v466_v48 = vld [vmem:[%s4847_s4 + $0x1e0] sm:$0xff]  ;;  %v463_v49 = vld [vmem:[%s4847_s4 + $0x1c8] sm:$0xff] }
  0xa6   : > { %3034 = vmatprep.subr.bf16.mxu0 %v4712_v2  ;;  %3323 = vmatprep.subr.bf16.mxu1 %v4712_v2  ;;  %v4203_v54 = vcombine.high %v463_v49, %v467_v50  ;;  %v4202_v62 = vcombine.low %v463_v49, %v467_v50  ;;  %v519_v49 = vld [vmem:[%s4847_s4 + $0x388] sm:$0xff] }
  0xa7   : > { %v523_v50 = vld [vmem:[%s4847_s4 + $0x3a8] sm:$0xff] }
  0xa8   : > { %3035 = vmatpush1.bf16.msra.mxu0 %v4579_v52  ;;  %3324 = vmatpush1.bf16.msra.mxu1 %v4580_v53  ;;  %v4194_v52 = vcombine.low %v455_v38, %v459_v39  ;;  %v4201_v53 = vcombine.high %v462_v47, %v466_v48  ;;  %v510_v38 = vld [vmem:[%s4847_s4 + $0x340] sm:$0xff] }
  0xa9   : > { %3036 = vmatprep.subr.bf16.mxu0 %v4712_v2  ;;  %3325 = vmatprep.subr.bf16.mxu1 %v4712_v2  ;;  %v514_v39 = vld [vmem:[%s4847_s4 + $0x360] sm:$0xff] }
  0xab   : > { %2495 = vmatmul.mubr.bf16.gmra.mrb[4].mxu0 %v4152_v56  ;;  %2784 = vmatmul.mubr.bf16.gmra.mrb[4].mxu1 %v4154_v57  ;;  %v4600_v56 = vld [vmem:[%s4858_s29 + $0x1d8] sm:$0xff]   ;;  %v470_v57 = vld [vmem:[%s4847_s4 + $0x200] sm:$0xff] }
  0xac   : > { %2502 = vmatprep.mubr.bf16.mxu0 %v4161_v58  ;;  %2791 = vmatprep.mubr.bf16.mxu1 %v4163_v59  ;;  %v474_v58 = vld [vmem:[%s4847_s4 + $0x220] sm:$0xff]  ;;  %v471_v59 = vld [vmem:[%s4847_s4 + $0x208] sm:$0xff] }
  0xad   : > { %3037 = vmatpush1.bf16.msra.mxu0 %v4581_v60  ;;  %3326 = vmatpush1.bf16.msra.mxu1 %v4582_v61  ;;  %v475_v60 = vld [vmem:[%s4847_s4 + $0x228] sm:$0xff]  ;;  %v4200_v61 = vcombine.low %v462_v47, %v466_v48  ;;  %v4209_v63 = vcombine.high %v470_v57, %v474_v58  ;;  %v518_v47 = vld [vmem:[%s4847_s4 + $0x380] sm:$0xff] }
  0xae   : > { %3038 = vmatprep.subr.bf16.mxu0 %v4712_v2  ;;  %3327 = vmatprep.subr.bf16.mxu1 %v4712_v2  ;;  %v4211_v0 = vcombine.high %v471_v59, %v475_v60  ;;  %v522_v48 = vld [vmem:[%s4847_s4 + $0x3a0] sm:$0xff] }
  0xb1   : > { %3039 = vmatpush1.bf16.msra.mxu0 %v4583_v3  ;;  %3328 = vmatpush1.bf16.msra.mxu1 %v4584_v4  ;;  %v482_v3 = vld [vmem:[%s4847_s4 + $0x260] sm:$0xff]  ;;  %v479_v4 = vld [vmem:[%s4847_s4 + $0x248] sm:$0xff] }
  0xb2   : > { %3040 = vmatprep.subr.bf16.mxu0 %v4712_v2  ;;  %3329 = vmatprep.subr.bf16.mxu1 %v4712_v2 }
  0xb3   : > { %2503 = vmatmul.mubr.bf16.gmra.mrb[8].mxu0 %v4160_v5  ;;  %2792 = vmatmul.mubr.bf16.gmra.mrb[8].mxu1 %v4162_v7  ;;  %v483_v5 = vld [vmem:[%s4847_s4 + $0x268] sm:$0xff]  ;;  %v4210_v7 = vcombine.low %v471_v59, %v475_v60  ;;  %v4256_v60 = vcombine.low %v518_v47, %v522_v48 }
  0xb4   : > { %2510 = vmatprep.mubr.bf16.mxu0 %v4169_v8  ;;  %2799 = vmatprep.mubr.bf16.mxu1 %v4171_v10  ;;  %v4217_v8 = vcombine.high %v478_v1, %v482_v3  ;;  %v4601_v10 = vld [vmem:[%s4858_s29 + $0x160] sm:$0xff]   ;;  %v531_v59 = vld [vmem:[%s4847_s4 + $0x3e8] sm:$0xff] }
  0xb5   : > { %3041 = vmatpush1.bf16.msra.mxu0 %v4585_v6  ;;  %3330 = vmatpush1.bf16.msra.mxu1 %v4586_v9  ;;  %v4208_v6 = vcombine.low %v470_v57, %v474_v58  ;;  %v4219_v9 = vcombine.high %v479_v4, %v483_v5  ;;  %v530_v57 = vld [vmem:[%s4847_s4 + $0x3e0] sm:$0xff]  ;;  %v527_v58 = vld [vmem:[%s4847_s4 + $0x3c8] sm:$0xff] }
  0xb6   : > { %3042 = vmatprep.subr.bf16.mxu0 %v4712_v2  ;;  %3331 = vmatprep.subr.bf16.mxu1 %v4712_v2 }
  0xb9   : > { %3043 = vmatpush1.bf16.msra.mxu0 %v4587_v15  ;;  %3332 = vmatpush1.bf16.msra.mxu1 %v4588_v16  ;;  %v491_v15 = vld [vmem:[%s4847_s4 + $0x2a8] sm:$0xff]  ;;  %v4216_v16 = vcombine.low %v478_v1, %v482_v3  ;;  %v538_v1 = vld [vmem:[%s4847_s4 + $0x420] sm:$0xff] }
  0xba   : > { %3044 = vmatprep.subr.bf16.mxu0 %v4712_v2  ;;  %3333 = vmatprep.subr.bf16.mxu1 %v4712_v2  ;;  %v535_v3 = vld [vmem:[%s4847_s4 + $0x408] sm:$0xff] }
  0xbb   : > { %2511 = vmatmul.mubr.bf16.gmra.mrb[12].mxu0 %v4168_v17  ;;  %2800 = vmatmul.mubr.bf16.gmra.mrb[12].mxu1 %v4170_v18  ;;  %v4218_v17 = vcombine.low %v479_v4, %v483_v5  ;;  %v4225_v18 = vcombine.high %v486_v12, %v490_v13  ;;  %v539_v4 = vld [vmem:[%s4847_s4 + $0x428] sm:$0xff] }
  0xbc   : > { %2518 = vmatprep.mubr.bf16.mxu0 %v4177_v19  ;;  %2807 = vmatprep.mubr.bf16.mxu1 %v4179_v20  ;;  %v4227_v19 = vcombine.high %v487_v14, %v491_v15  ;;  %v494_v20 = vld [vmem:[%s4847_s4 + $0x2c0] sm:$0xff]  ;;  %v543_v12 = vld [vmem:[%s4847_s4 + $0x448] sm:$0xff] }
  0xbd   : > { %3045 = vmatpush1.bf16.msra.mxu0 %v4589_v21  ;;  %3334 = vmatpush1.bf16.msra.mxu1 %v4590_v22  ;;  %v498_v21 = vld [vmem:[%s4847_s4 + $0x2e0] sm:$0xff]  ;;  %v495_v22 = vld [vmem:[%s4847_s4 + $0x2c8] sm:$0xff] }
  0xbe   : > { %3046 = vmatprep.subr.bf16.mxu0 %v4712_v2  ;;  %3335 = vmatprep.subr.bf16.mxu1 %v4712_v2  ;;  %v4233_v26 = vcombine.high %v494_v20, %v498_v21  ;;  %v4235_v27 = vcombine.high %v495_v22, %v499_v23  ;;  %v547_v13 = vld [vmem:[%s4847_s4 + $0x468] sm:$0xff] }
  0xc1   : > { %3047 = vmatpush1.bf16.msra.mxu0 %v4591_v25  ;;  %3336 = vmatpush1.bf16.msra.mxu1 %v4592_v28  ;;  %v4226_v25 = vcombine.low %v487_v14, %v491_v15  ;;  %v4603_v28 = vld [vmem:[%s4858_s29 + $0x168] sm:$0xff]   ;;  %v4274_v15 = vcombine.low %v535_v3, %v539_v4 }
  0xc2   : > { %3048 = vmatprep.subr.bf16.mxu0 %v4712_v2  ;;  %3337 = vmatprep.subr.bf16.mxu1 %v4712_v2 }
  0xc3   : > { %2519 = vmatmul.mubr.bf16.gmra.mrb[16].mxu0 %v4176_v29  ;;  %2808 = vmatmul.mubr.bf16.gmra.mrb[16].mxu1 %v4178_v30  ;;  %v502_v29 = vld [vmem:[%s4847_s4 + $0x300] sm:$0xff] }
  0xc4   : > { %2526 = vmatprep.mubr.bf16.mxu0 %v4185_v31  ;;  %2815 = vmatprep.mubr.bf16.mxu1 %v4187_v32  ;;  %v506_v30 = vld [vmem:[%s4847_s4 + $0x320] sm:$0xff]  ;;  %v503_v31 = vld [vmem:[%s4847_s4 + $0x308] sm:$0xff] }
  0xc5   : > { %3049 = vmatpush1.bf16.msra.mxu0 %v4593_v33  ;;  %3338 = vmatpush1.bf16.msra.mxu1 %v4594_v34  ;;  %v507_v32 = vld [vmem:[%s4847_s4 + $0x328] sm:$0xff]  ;;  %v4232_v33 = vcombine.low %v494_v20, %v498_v21  ;;  %v4234_v34 = vcombine.low %v495_v22, %v499_v23  ;;  %v4241_v35 = vcombine.high %v502_v29, %v506_v30 }
  0xc6   : > { %3050 = vmatprep.subr.bf16.mxu0 %v4712_v2  ;;  %3339 = vmatprep.subr.bf16.mxu1 %v4712_v2  ;;  %v551_v20 = vld [vmem:[%s4847_s4 + $0x488] sm:$0xff]  ;;  %v4282_v23 = vcombine.low %v543_v12, %v547_v13 }
  0xc7   : > { %v555_v21 = vld [vmem:[%s4847_s4 + $0x4a8] sm:$0xff] }
  0xc9   : > { %3051 = vmatpush1.bf16.msra.mxu0 %v4595_v37  ;;  %3340 = vmatpush1.bf16.msra.mxu1 %v4596_v40  ;;  %v4243_v37 = vcombine.high %v503_v31, %v507_v32  ;;  %v511_v40 = vld [vmem:[%s4847_s4 + $0x348] sm:$0xff] }
  0xca   : > { %3052 = vmatprep.subr.bf16.mxu0 %v4712_v2  ;;  %3341 = vmatprep.subr.bf16.mxu1 %v4712_v2 }
  0xcb   : > { %2527 = vmatmul.mubr.bf16.gmra.mrb[20].mxu0 %v4184_v41  ;;  %2816 = vmatmul.mubr.bf16.gmra.mrb[20].mxu1 %v4186_v42  ;;  %v515_v41 = vld [vmem:[%s4847_s4 + $0x368] sm:$0xff]  ;;  %v4240_v42 = vcombine.low %v502_v29, %v506_v30 }
  0xcc   : > { %2534 = vmatprep.mubr.bf16.mxu0 %v4193_v43  ;;  %2823 = vmatprep.mubr.bf16.mxu1 %v4195_v44  ;;  %v4242_v43 = vcombine.low %v503_v31, %v507_v32  ;;  %v4249_v44 = vcombine.high %v510_v38, %v514_v39  ;;  %v563_v29 = vld [vmem:[%s4847_s4 + $0x4e8] sm:$0xff]  ;;  %v4290_v31 = vcombine.low %v551_v20, %v555_v21 }
  0xcd   : > { %3053 = vmatpush1.bf16.msra.mxu0 %v4597_v45  ;;  %3342 = vmatpush1.bf16.msra.mxu1 %v4598_v46  ;;  %v4251_v45 = vcombine.high %v511_v40, %v515_v41  ;;  %v4605_v46 = vld [vmem:[%s4858_s29 + $0x170] sm:$0xff]  }
  0xce   : > { %3054 = vmatprep.subr.bf16.mxu0 %v4712_v2  ;;  %3343 = vmatprep.subr.bf16.mxu1 %v4712_v2 }
  0xd1   : > { %3055 = vmatpush1.bf16.msra.mxu0 %v4599_v55  ;;  %3344 = vmatpush1.bf16.msra.mxu1 %v4600_v56  ;;  %v4259_v55 = vcombine.high %v519_v49, %v523_v50  ;;  %v526_v56 = vld [vmem:[%s4847_s4 + $0x3c0] sm:$0xff] }
  0xd2   : > { %3056 = vmatprep.subr.bf16.mxu0 %v4712_v2  ;;  %3345 = vmatprep.subr.bf16.mxu1 %v4712_v2  ;;  %v4264_v5 = vcombine.low %v526_v56, %v530_v57 }
  0xd3   : > { %2535 = vmatmul.mubr.bf16.gmra.mrb[24].mxu0 %v4192_v51  ;;  %2824 = vmatmul.mubr.bf16.gmra.mrb[24].mxu1 %v4194_v52  ;;  %v4248_v51 = vcombine.low %v510_v38, %v514_v39  ;;  %v4250_v52 = vcombine.low %v511_v40, %v515_v41 }
  0xd4   : > { %2542 = vmatprep.mubr.bf16.mxu0 %v4201_v53  ;;  %2831 = vmatprep.mubr.bf16.mxu1 %v4203_v54  ;;  %v4257_v53 = vcombine.high %v518_v47, %v522_v48  ;;  %v4606_v54 = vld [vmem:[%s4858_s29 + $0x1f0] sm:$0xff]  }
  0xd5   : > { %3057 = vmatpush1.bf16.msra.mxu0 %v4601_v10  ;;  %3346 = vmatpush1.bf16.msra.mxu1 %v4602_v11  ;;  %v542_v10 = vld [vmem:[%s4847_s4 + $0x440] sm:$0xff] }
  0xd6   : > { %3058 = vmatprep.subr.bf16.mxu0 %v4712_v2  ;;  %3347 = vmatprep.subr.bf16.mxu1 %v4712_v2  ;;  %v546_v11 = vld [vmem:[%s4847_s4 + $0x460] sm:$0xff] }
  0xd7   : > { %v4280_v22 = vcombine.low %v542_v10, %v546_v11 }
  0xd9   : > { %3059 = vmatpush1.bf16.msra.mxu0 %v4603_v28  ;;  %3348 = vmatpush1.bf16.msra.mxu1 %v4604_v36  ;;  %v559_v28 = vld [vmem:[%s4847_s4 + $0x4c8] sm:$0xff] }
  0xda   : > { %3060 = vmatprep.subr.bf16.mxu0 %v4712_v2  ;;  %3349 = vmatprep.subr.bf16.mxu1 %v4712_v2  ;;  %v567_v36 = vld [vmem:[%s4847_s4 + $0x508] sm:$0xff]  ;;  %v4298_v39 = vcombine.low %v559_v28, %v563_v29 }
  0xdb   : > { %2543 = vmatmul.mubr.bf16.gmra.mrb[28].mxu0 %v4200_v61  ;;  %2832 = vmatmul.mubr.bf16.gmra.mrb[28].mxu1 %v4202_v62  ;;  %v4258_v61 = vcombine.low %v519_v49, %v523_v50  ;;  %v4265_v62 = vcombine.high %v526_v56, %v530_v57  ;;  %v582_v50 = vld [vmem:[%s4847_s4 + $0x580] sm:$0xff] }
  0xdc   : > { %2550 = vmatprep.mubr.bf16.mxu0 %v4209_v63  ;;  %2839 = vmatprep.mubr.bf16.mxu1 %v4211_v0  ;;  %v4267_v63 = vcombine.high %v527_v58, %v531_v59  ;;  %v534_v0 = vld [vmem:[%s4847_s4 + $0x400] sm:$0xff] }
  0xdd   : > { %3061 = vmatpush1.bf16.msra.mxu0 %v4605_v46  ;;  %3350 = vmatpush1.bf16.msra.mxu1 %v4606_v54  ;;  %v4272_v14 = vcombine.low %v534_v0, %v538_v1 }
  0xde   : > { %3062 = vmatprep.subr.bf16.mxu0 %v4712_v2  ;;  %3351 = vmatprep.subr.bf16.mxu1 %v4712_v2  ;;  %v4607_v2 = vld [vmem:[%s4858_s29 + $0x178] sm:$0xff]  }
  0xe1   : > { %3063 = vmatpush1.bf16.msra.mxu0 %v4607_v2 }
  0xe3   : > { %2551 = vmatmul.mubr.bf16.gmra.mrb[32].mxu0 %v4208_v6  ;;  %2840 = vmatmul.mubr.bf16.gmra.mrb[32].mxu1 %v4210_v7  ;;  %v4266_v6 = vcombine.low %v527_v58, %v531_v59  ;;  %v4273_v7 = vcombine.high %v534_v0, %v538_v1  ;;  %v590_v58 = vld [vmem:[%s4847_s4 + $0x5c0] sm:$0xff] }
  0xe4   : > { %2558 = vmatprep.mubr.bf16.mxu0 %v4217_v8  ;;  %2847 = vmatprep.mubr.bf16.mxu1 %v4219_v9  ;;  %v4608_v8 = vld [vmem:[%s4858_s29 + $0x1f8] sm:$0xff]   ;;  %v4275_v9 = vcombine.high %v535_v3, %v539_v4  ;;  %v594_v59 = vld [vmem:[%s4847_s4 + $0x5e0] sm:$0xff]  ;;  %v599_v4 = vld [vmem:[%s4847_s4 + $0x608] sm:$0xff] }
  0xe5   : > { %3352 = vmatpush1.bf16.msra.mxu1 %v4608_v8  ;;  %v4329_v2 = vcombine.high %v590_v58, %v594_v59  ;;  %v598_v1 = vld [vmem:[%s4847_s4 + $0x600] sm:$0xff] }
  0xe6   : > { %v602_v3 = vld [vmem:[%s4847_s4 + $0x620] sm:$0xff] }
  0xe7   : > { %v4337_v8 = vcombine.high %v598_v1, %v602_v3 }
  0xeb   : > { %2559 = vmatmul.mubr.bf16.gmra.mrb[36].mxu0 %v4216_v16  ;;  %2848 = vmatmul.mubr.bf16.gmra.mrb[36].mxu1 %v4218_v17  ;;  %v4281_v16 = vcombine.high %v542_v10, %v546_v11  ;;  %v4283_v17 = vcombine.high %v543_v12, %v547_v13  ;;  %v606_v10 = vld [vmem:[%s4847_s4 + $0x640] sm:$0xff]  ;;  %v607_v12 = vld [vmem:[%s4847_s4 + $0x648] sm:$0xff] }
  0xec   : > { %2566 = vmatprep.mubr.bf16.mxu0 %v4225_v18  ;;  %2855 = vmatprep.mubr.bf16.mxu1 %v4227_v19  ;;  %v550_v18 = vld [vmem:[%s4847_s4 + $0x480] sm:$0xff]  ;;  %v611_v13 = vld [vmem:[%s4847_s4 + $0x668] sm:$0xff] }
  0xed   : > { %v554_v19 = vld [vmem:[%s4847_s4 + $0x4a0] sm:$0xff] }
  0xee   : > { %v4288_v30 = vcombine.low %v550_v18, %v554_v19  ;;  %v610_v11 = vld [vmem:[%s4847_s4 + $0x660] sm:$0xff] }
  0xf3   : > { %2567 = vmatmul.mubr.bf16.gmra.mrb[40].mxu0 %v4224_v24  ;;  %2856 = vmatmul.mubr.bf16.gmra.mrb[40].mxu1 %v4226_v25  ;;  %v4289_v24 = vcombine.high %v550_v18, %v554_v19  ;;  %v4291_v25 = vcombine.high %v551_v20, %v555_v21  ;;  %v614_v18 = vld [vmem:[%s4847_s4 + $0x680] sm:$0xff]  ;;  %v615_v20 = vld [vmem:[%s4847_s4 + $0x688] sm:$0xff] }
  0xf4   : > { %2574 = vmatprep.mubr.bf16.mxu0 %v4233_v26  ;;  %2863 = vmatprep.mubr.bf16.mxu1 %v4235_v27  ;;  %v558_v26 = vld [vmem:[%s4847_s4 + $0x4c0] sm:$0xff]  ;;  %v619_v21 = vld [vmem:[%s4847_s4 + $0x6a8] sm:$0xff] }
  0xf5   : > { %v562_v27 = vld [vmem:[%s4847_s4 + $0x4e0] sm:$0xff] }
  0xf6   : > { %v4297_v32 = vcombine.high %v558_v26, %v562_v27  ;;  %v4296_v38 = vcombine.low %v558_v26, %v562_v27  ;;  %v618_v19 = vld [vmem:[%s4847_s4 + $0x6a0] sm:$0xff] }
  0xf7   : > { %v622_v26 = vld [vmem:[%s4847_s4 + $0x6c0] sm:$0xff] }
  0xf8   : > { %v626_v27 = vld [vmem:[%s4847_s4 + $0x6e0] sm:$0xff] }
  0xfb   : > { %2575 = vmatmul.mubr.bf16.gmra.mrb[44].mxu0 %v4232_v33  ;;  %2864 = vmatmul.mubr.bf16.gmra.mrb[44].mxu1 %v4234_v34  ;;  %v4299_v33 = vcombine.high %v559_v28, %v563_v29  ;;  %v566_v34 = vld [vmem:[%s4847_s4 + $0x500] sm:$0xff]  ;;  %v623_v28 = vld [vmem:[%s4847_s4 + $0x6c8] sm:$0xff] }
  0xfc   : > { %2582 = vmatprep.mubr.bf16.mxu0 %v4241_v35  ;;  %2871 = vmatprep.mubr.bf16.mxu1 %v4243_v37  ;;  %v570_v35 = vld [vmem:[%s4847_s4 + $0x520] sm:$0xff]  ;;  %v571_v37 = vld [vmem:[%s4847_s4 + $0x528] sm:$0xff] }
  0xfd   : > { %v4305_v40 = vcombine.high %v566_v34, %v570_v35  ;;  %v4307_v41 = vcombine.high %v567_v36, %v571_v37  ;;  %v4304_v46 = vcombine.low %v566_v34, %v570_v35  ;;  %v4306_v47 = vcombine.low %v567_v36, %v571_v37  ;;  %v627_v29 = vld [vmem:[%s4847_s4 + $0x6e8] sm:$0xff]  ;;  %v630_v34 = vld [vmem:[%s4847_s4 + $0x700] sm:$0xff] }
  0xfe   : > { %v634_v35 = vld [vmem:[%s4847_s4 + $0x720] sm:$0xff]  ;;  %v631_v37 = vld [vmem:[%s4847_s4 + $0x708] sm:$0xff] }
 0x103   : > { %2583 = vmatmul.mubr.bf16.gmra.mrb[48].mxu0 %v4240_v42  ;;  %2872 = vmatmul.mubr.bf16.gmra.mrb[48].mxu1 %v4242_v43  ;;  %v574_v42 = vld [vmem:[%s4847_s4 + $0x540] sm:$0xff] }
 0x104   : > { %2590 = vmatprep.mubr.bf16.mxu0 %v4249_v44  ;;  %2879 = vmatprep.mubr.bf16.mxu1 %v4251_v45  ;;  %v578_v43 = vld [vmem:[%s4847_s4 + $0x560] sm:$0xff]  ;;  %v575_v44 = vld [vmem:[%s4847_s4 + $0x548] sm:$0xff] }
 0x105   : > { %v579_v45 = vld [vmem:[%s4847_s4 + $0x568] sm:$0xff]  ;;  %v4313_v48 = vcombine.high %v574_v42, %v578_v43  ;;  %v4312_v54 = vcombine.low %v574_v42, %v578_v43 }
 0x106   : > { %v4315_v49 = vcombine.high %v575_v44, %v579_v45 }
 0x10b   : > { %2591 = vmatmul.mubr.bf16.gmra.mrb[52].mxu0 %v4248_v51  ;;  %2880 = vmatmul.mubr.bf16.gmra.mrb[52].mxu1 %v4250_v52  ;;  %v586_v51 = vld [vmem:[%s4847_s4 + $0x5a0] sm:$0xff]  ;;  %v583_v52 = vld [vmem:[%s4847_s4 + $0x588] sm:$0xff] }
 0x10c   : > { %2598 = vmatprep.mubr.bf16.mxu0 %v4257_v53  ;;  %2887 = vmatprep.mubr.bf16.mxu1 %v4259_v55  ;;  %v587_v53 = vld [vmem:[%s4847_s4 + $0x5a8] sm:$0xff]  ;;  %v4314_v55 = vcombine.low %v575_v44, %v579_v45  ;;  %v4321_v56 = vcombine.high %v582_v50, %v586_v51  ;;  %v4362_v45 = vcombine.low %v623_v28, %v627_v29 }
 0x10d   : > { %v4323_v57 = vcombine.high %v583_v52, %v587_v53 }
 0x113   : > { %2599 = vmatmul.mubr.bf16.gmra.mrb[56].mxu0 %v4256_v60  ;;  %2888 = vmatmul.mubr.bf16.gmra.mrb[56].mxu1 %v4258_v61  ;;  %v591_v60 = vld [vmem:[%s4847_s4 + $0x5c8] sm:$0xff] }
 0x114   : > { %2606 = vmatprep.mubr.bf16.mxu0 %v4265_v62  ;;  %2895 = vmatprep.mubr.bf16.mxu1 %v4267_v63  ;;  %v595_v61 = vld [vmem:[%s4847_s4 + $0x5e8] sm:$0xff]  ;;  %v4320_v62 = vcombine.low %v582_v50, %v586_v51  ;;  %v4322_v63 = vcombine.low %v583_v52, %v587_v53  ;;  %v638_v52 = vld [vmem:[%s4847_s4 + $0x740] sm:$0xff] }
 0x115   : > { %v4331_v0 = vcombine.high %v591_v60, %v595_v61  ;;  %v642_v53 = vld [vmem:[%s4847_s4 + $0x760] sm:$0xff] }
 0x11b   : > { %2607 = vmatmul.mubr.bf16.gmra.mrb[60].mxu0 %v4264_v5  ;;  %2896 = vmatmul.mubr.bf16.gmra.mrb[60].mxu1 %v4266_v6  ;;  %v603_v5 = vld [vmem:[%s4847_s4 + $0x628] sm:$0xff]  ;;  %v4328_v6 = vcombine.low %v590_v58, %v594_v59  ;;  %v4368_v59 = vcombine.low %v630_v34, %v634_v35 }
 0x11c   : > { %2614 = vmatprep.mubr.bf16.mxu0 %v4273_v7  ;;  %2903 = vmatprep.mubr.bf16.mxu1 %v4275_v9  ;;  %v4330_v7 = vcombine.low %v591_v60, %v595_v61  ;;  %v4339_v9 = vcombine.high %v599_v4, %v603_v5 }
 0x123   : > { %2615 = vmatmul.mubr.bf16.gmra.mrb[64].mxu0 %v4272_v14  ;;  %2904 = vmatmul.mubr.bf16.gmra.mrb[64].mxu1 %v4274_v15  ;;  %v4336_v14 = vcombine.low %v598_v1, %v602_v3  ;;  %v4338_v15 = vcombine.low %v599_v4, %v603_v5 }
 0x124   : > { %2622 = vmatprep.mubr.bf16.mxu0 %v4281_v16  ;;  %2911 = vmatprep.mubr.bf16.mxu1 %v4283_v17  ;;  %v4345_v16 = vcombine.high %v606_v10, %v610_v11  ;;  %v4347_v17 = vcombine.high %v607_v12, %v611_v13 }
 0x12b   : > { %2623 = vmatmul.mubr.bf16.gmra.mrb[68].mxu0 %v4280_v22  ;;  %2912 = vmatmul.mubr.bf16.gmra.mrb[68].mxu1 %v4282_v23  ;;  %v4344_v22 = vcombine.low %v606_v10, %v610_v11  ;;  %v4346_v23 = vcombine.low %v607_v12, %v611_v13  ;;  %v651_v10 = vld [vmem:[%s4847_s4 + $0x7a8] sm:$0xff]  ;;  %v4376_v13 = vcombine.low %v638_v52, %v642_v53 }
 0x12c   : > { %2630 = vmatprep.mubr.bf16.mxu0 %v4289_v24  ;;  %2919 = vmatprep.mubr.bf16.mxu1 %v4291_v25  ;;  %v4353_v24 = vcombine.high %v614_v18, %v618_v19  ;;  %v4355_v25 = vcombine.high %v615_v20, %v619_v21 }
 0x133   : > { %2631 = vmatmul.mubr.bf16.gmra.mrb[72].mxu0 %v4288_v30  ;;  %2920 = vmatmul.mubr.bf16.gmra.mrb[72].mxu1 %v4290_v31  ;;  %v4352_v30 = vcombine.low %v614_v18, %v618_v19  ;;  %v4354_v31 = vcombine.low %v615_v20, %v619_v21 }
 0x134   : > { %2638 = vmatprep.mubr.bf16.mxu0 %v4297_v32  ;;  %2927 = vmatprep.mubr.bf16.mxu1 %v4299_v33  ;;  %v4361_v32 = vcombine.high %v622_v26, %v626_v27  ;;  %v4363_v33 = vcombine.high %v623_v28, %v627_v29  ;;  %v659_v28 = vld [vmem:[%s4847_s4 + $0x7e8] sm:$0xff] }
 0x13b   : > { %2639 = vmatmul.mubr.bf16.gmra.mrb[76].mxu0 %v4296_v38  ;;  %2928 = vmatmul.mubr.bf16.gmra.mrb[76].mxu1 %v4298_v39  ;;  %v635_v38 = vld [vmem:[%s4847_s4 + $0x728] sm:$0xff] }
 0x13c   : > { %2646 = vmatprep.mubr.bf16.mxu0 %v4305_v40  ;;  %2935 = vmatprep.mubr.bf16.mxu1 %v4307_v41  ;;  %v4360_v41 = vcombine.low %v622_v26, %v626_v27  ;;  %v655_v27 = vld [vmem:[%s4847_s4 + $0x7c8] sm:$0xff] }
 0x143   : > { %2647 = vmatmul.mubr.bf16.gmra.mrb[80].mxu0 %v4304_v46  ;;  %2936 = vmatmul.mubr.bf16.gmra.mrb[80].mxu1 %v4306_v47  ;;  %v4369_v46 = vcombine.high %v630_v34, %v634_v35 }
 0x144   : > { %2654 = vmatprep.mubr.bf16.mxu0 %v4313_v48  ;;  %2943 = vmatprep.mubr.bf16.mxu1 %v4315_v49  ;;  %v4371_v49 = vcombine.high %v631_v37, %v635_v38 }
 0x14b   : > { %2655 = vmatmul.mubr.bf16.gmra.mrb[84].mxu0 %v4312_v54  ;;  %2944 = vmatmul.mubr.bf16.gmra.mrb[84].mxu1 %v4314_v55  ;;  %v639_v55 = vld [vmem:[%s4847_s4 + $0x748] sm:$0xff] }
 0x14c   : > { %2662 = vmatprep.mubr.bf16.mxu0 %v4321_v56  ;;  %2951 = vmatprep.mubr.bf16.mxu1 %v4323_v57  ;;  %v643_v56 = vld [vmem:[%s4847_s4 + $0x768] sm:$0xff] }
 0x14d   : > { %v4379_v3 = vcombine.high %v639_v55, %v643_v56 }
 0x153   : > { %2663 = vmatmul.mubr.bf16.gmra.mrb[88].mxu0 %v4320_v62  ;;  %2952 = vmatmul.mubr.bf16.gmra.mrb[88].mxu1 %v4322_v63  ;;  %v4370_v63 = vcombine.low %v631_v37, %v635_v38 }
 0x154   : > { %2670 = vmatprep.mubr.bf16.mxu0 %v4329_v2  ;;  %2959 = vmatprep.mubr.bf16.mxu1 %v4331_v0  ;;  %v4377_v2 = vcombine.high %v638_v52, %v642_v53 }
 0x15b   : > { %2671 = vmatmul.mubr.bf16.gmra.mrb[92].mxu0 %v4328_v6  ;;  %2960 = vmatmul.mubr.bf16.gmra.mrb[92].mxu1 %v4330_v7  ;;  %v646_v6 = vld [vmem:[%s4847_s4 + $0x780] sm:$0xff] }
 0x15c   : > { %2678 = vmatprep.mubr.bf16.mxu0 %v4337_v8  ;;  %2967 = vmatprep.mubr.bf16.mxu1 %v4339_v9  ;;  %v650_v7 = vld [vmem:[%s4847_s4 + $0x7a0] sm:$0xff]  ;;  %v647_v9 = vld [vmem:[%s4847_s4 + $0x788] sm:$0xff] }
 0x15d   : > { %v4385_v18 = vcombine.high %v646_v6, %v650_v7  ;;  %v4387_v21 = vcombine.high %v647_v9, %v651_v10  ;;  %v4386_v35 = vcombine.low %v647_v9, %v651_v10 }
 0x163   : > { %2679 = vmatmul.mubr.bf16.gmra.mrb[96].mxu0 %v4336_v14  ;;  %2968 = vmatmul.mubr.bf16.gmra.mrb[96].mxu1 %v4338_v15 }
 0x164   : > { %2686 = vmatprep.mubr.bf16.mxu0 %v4345_v16  ;;  %2975 = vmatprep.mubr.bf16.mxu1 %v4347_v17  ;;  %v4378_v17 = vcombine.low %v639_v55, %v643_v56  ;;  %v4394_v55 = vcombine.low %v655_v27, %v659_v28 }
 0x16b   : > { %2687 = vmatmul.mubr.bf16.gmra.mrb[100].mxu0 %v4344_v22  ;;  %2976 = vmatmul.mubr.bf16.gmra.mrb[100].mxu1 %v4346_v23 }
 0x16c   : > { %2694 = vmatprep.mubr.bf16.mxu0 %v4353_v24  ;;  %2983 = vmatprep.mubr.bf16.mxu1 %v4355_v25  ;;  %v654_v24 = vld [vmem:[%s4847_s4 + $0x7c0] sm:$0xff] }
 0x16d   : > { %v658_v25 = vld [vmem:[%s4847_s4 + $0x7e0] sm:$0xff] }
 0x173   : > { %2695 = vmatmul.mubr.bf16.gmra.mrb[104].mxu0 %v4352_v30  ;;  %2984 = vmatmul.mubr.bf16.gmra.mrb[104].mxu1 %v4354_v31  ;;  %v4384_v31 = vcombine.low %v646_v6, %v650_v7 }
 0x174   : > { %2702 = vmatprep.mubr.bf16.mxu0 %v4361_v32  ;;  %2991 = vmatprep.mubr.bf16.mxu1 %v4363_v33 }
 0x176   : > { %v2488_v36 = vpop.f32.mrb[0].mxu0  ;;  %v2777_v39 = vpop.f32.mrb[0].mxu1 }
 0x177   : > { %v2490_v40 = vpop.f32.mrb[1].mxu0  ;;  %v5190_v42 = vadd.f32 %v2777_v39, %v2488_v36  ;;  %v2779_v43 = vpop.f32.mrb[1].mxu1  ;;  %v4393_v36 = vcombine.high %v654_v24, %v658_v25  ;;  %v4395_v39 = vcombine.high %v655_v27, %v659_v28 }
 0x178   : > { %v2491_v44 = vpop.f32.mrb[2].mxu0  ;;  %v2780_v47 = vpop.f32.mrb[2].mxu1  ;;  %v408_v43 = vld [vmem:[%s4847_s4 + $0x10] sm:$0xff] }
 0x179   : > { %v2493_v48 = vpop.f32.mrb[3].mxu0  ;;  %v5192_v50 = vadd.f32 %v2780_v47, %v2491_v44  ;;  %v2782_v51 = vpop.f32.mrb[3].mxu1  ;;  %v412_v44 = vld [vmem:[%s4847_s4 + $0x30] sm:$0xff]  ;;  %v413_v47 = vld [vmem:[%s4847_s4 + $0x38] sm:$0xff] }
 0x17a   : > { %v4392_v51 = vcombine.low %v654_v24, %v658_v25  ;;  %v4149_v56 = vcombine.high %v408_v43, %v412_v44  ;;  %v4148_v7 = vcombine.low %v408_v43, %v412_v44  ;;  %v429_v24 = vld [vmem:[%s4847_s4 + $0xb8] sm:$0xff] }
 0x17b   : > { %2703 = vmatmul.mubr.bf16.gmra.mrb[108].mxu0 %v4360_v41  ;;  %2992 = vmatmul.mubr.bf16.gmra.mrb[108].mxu1 %v4362_v45  ;;  %v433_v44 = vld [vmem:[%s4847_s4 + $0xd8] sm:$0xff] }
 0x17c   : > { %2710 = vmatprep.mubr.bf16.mxu0 %v4369_v46  ;;  %2999 = vmatprep.mubr.bf16.mxu1 %v4371_v49  ;;  %v409_v46 = vld [vmem:[%s4847_s4 + $0x18] sm:$0xff] }
 0x17e   : > { %v2496_v54 = vpop.f32.mrb[4].mxu0  ;;  %v2785_v57 = vpop.f32.mrb[4].mxu1 }
 0x17f   : > { %v2498_v58 = vpop.f32.mrb[5].mxu0  ;;  %v5198_v60 = vadd.f32 %v2785_v57, %v2496_v54  ;;  %v2787_v61 = vpop.f32.mrb[5].mxu1 }
 0x180   : > { %v2499_v62 = vpop.f32.mrb[6].mxu0  ;;  %v2788_v0 = vpop.f32.mrb[6].mxu1 }
 0x181   : > { %v2501_v1 = vpop.f32.mrb[7].mxu0  ;;  %v5200_v4 = vadd.f32 %v2788_v0, %v2499_v62  ;;  %v2790_v5 = vpop.f32.mrb[7].mxu1 }
 0x182   : > { %v417_v1 = vld [vmem:[%s4847_s4 + $0x58] sm:$0xff] }
 0x183   : > { %2711 = vmatmul.mubr.bf16.gmra.mrb[112].mxu0 %v4368_v59  ;;  %3000 = vmatmul.mubr.bf16.gmra.mrb[112].mxu1 %v4370_v63  ;;  %v4151_v59 = vcombine.high %v409_v46, %v413_v47  ;;  %v416_v63 = vld [vmem:[%s4847_s4 + $0x50] sm:$0xff] }
 0x184   : > { %2718 = vmatprep.mubr.bf16.mxu0 %v4377_v2  ;;  %3007 = vmatprep.mubr.bf16.mxu1 %v4379_v3  ;;  %v420_v2 = vld [vmem:[%s4847_s4 + $0x70] sm:$0xff]  ;;  %v421_v3 = vld [vmem:[%s4847_s4 + $0x78] sm:$0xff] }
 0x185   : > { %v4156_v27 = vcombine.low %v416_v63, %v420_v2 }
 0x186   : > { %v2504_v8 = vpop.f32.mrb[8].mxu0  ;;  %v2793_v11 = vpop.f32.mrb[8].mxu1 }
 0x187   : > { %v2506_v12 = vpop.f32.mrb[9].mxu0  ;;  %v5206_v14 = vadd.f32 %v2793_v11, %v2504_v8  ;;  %v2795_v15 = vpop.f32.mrb[9].mxu1  ;;  %v4150_v11 = vcombine.low %v409_v46, %v413_v47 }
 0x188   : > { %v2507_v16 = vpop.f32.mrb[10].mxu0  ;;  %v2796_v19 = vpop.f32.mrb[10].mxu1  ;;  %v4157_v12 = vcombine.high %v416_v63, %v420_v2  ;;  %v440_v63 = vld [vmem:[%s4847_s4 + $0x110] sm:$0xff] }
 0x189   : > { %v2509_v20 = vpop.f32.mrb[11].mxu0  ;;  %v5208_v22 = vadd.f32 %v2796_v19, %v2507_v16  ;;  %v2798_v23 = vpop.f32.mrb[11].mxu1  ;;  %v4159_v16 = vcombine.high %v417_v1, %v421_v3  ;;  %v424_v19 = vld [vmem:[%s4847_s4 + $0x90] sm:$0xff] }
 0x18a   : > { %v428_v20 = vld [vmem:[%s4847_s4 + $0xb0] sm:$0xff]  ;;  %v425_v23 = vld [vmem:[%s4847_s4 + $0x98] sm:$0xff] }
 0x18b   : > { %2719 = vmatmul.mubr.bf16.gmra.mrb[116].mxu0 %v4376_v13  ;;  %3008 = vmatmul.mubr.bf16.gmra.mrb[116].mxu1 %v4378_v17  ;;  %v444_v2 = vld [vmem:[%s4847_s4 + $0x130] sm:$0xff] }
 0x18c   : > { %2726 = vmatprep.mubr.bf16.mxu0 %v4385_v18  ;;  %3015 = vmatprep.mubr.bf16.mxu1 %v4387_v21 }
 0x18e   : > { %v2512_v26 = vpop.f32.mrb[12].mxu0  ;;  %v2801_v29 = vpop.f32.mrb[12].mxu1 }
 0x18f   : > { %v2514_v30 = vpop.f32.mrb[13].mxu0  ;;  %v5214_v32 = vadd.f32 %v2801_v29, %v2512_v26  ;;  %v2803_v33 = vpop.f32.mrb[13].mxu1 }
 0x190   : > { %v2515_v34 = vpop.f32.mrb[14].mxu0  ;;  %v2804_v37 = vpop.f32.mrb[14].mxu1  ;;  %v4165_v33 = vcombine.high %v424_v19, %v428_v20 }
 0x191   : > { %v2517_v38 = vpop.f32.mrb[15].mxu0  ;;  %v5216_v40 = vadd.f32 %v2804_v37, %v2515_v34  ;;  %v2806_v41 = vpop.f32.mrb[15].mxu1 }
 0x192   : > { %v436_v41 = vld [vmem:[%s4847_s4 + $0xf0] sm:$0xff] }
 0x193   : > { %2727 = vmatmul.mubr.bf16.gmra.mrb[120].mxu0 %v4384_v31  ;;  %3016 = vmatmul.mubr.bf16.gmra.mrb[120].mxu1 %v4386_v35  ;;  %v4158_v31 = vcombine.low %v417_v1, %v421_v3  ;;  %v441_v1 = vld [vmem:[%s4847_s4 + $0x118] sm:$0xff] }
 0x194   : > { %2734 = vmatprep.mubr.bf16.mxu0 %v4393_v36  ;;  %3023 = vmatprep.mubr.bf16.mxu1 %v4395_v39  ;;  %v4167_v36 = vcombine.high %v425_v23, %v429_v24  ;;  %v432_v39 = vld [vmem:[%s4847_s4 + $0xd0] sm:$0xff]  ;;  %v445_v3 = vld [vmem:[%s4847_s4 + $0x138] sm:$0xff] }
 0x196   : > { %v2520_v45 = vpop.f32.mrb[16].mxu0  ;;  %v2809_v48 = vpop.f32.mrb[16].mxu1 }
 0x197   : > { %v2522_v49 = vpop.f32.mrb[17].mxu0  ;;  %v5222_v52 = vadd.f32 %v2809_v48, %v2520_v45  ;;  %v2811_v53 = vpop.f32.mrb[17].mxu1  ;;  %v437_v45 = vld [vmem:[%s4847_s4 + $0xf8] sm:$0xff]  ;;  %v4164_v48 = vcombine.low %v424_v19, %v428_v20 }
 0x198   : > { %v2523_v54 = vpop.f32.mrb[18].mxu0  ;;  %v2812_v57 = vpop.f32.mrb[18].mxu1 }
 0x199   : > { %v2525_v58 = vpop.f32.mrb[19].mxu0  ;;  %v5224_v61 = vadd.f32 %v2812_v57, %v2523_v54  ;;  %v2814_v62 = vpop.f32.mrb[19].mxu1  ;;  %v4166_v54 = vcombine.low %v425_v23, %v429_v24  ;;  %v452_v23 = vld [vmem:[%s4847_s4 + $0x170] sm:$0xff] }
 0x19a   : > { %v4175_v58 = vcombine.high %v433_v44, %v437_v45 }
 0x19b   : > { %2735 = vmatmul.mubr.bf16.gmra.mrb[124].mxu0 %v4392_v51  ;;  %3024 = vmatmul.mubr.bf16.gmra.mrb[124].mxu1 %v4394_v55  ;;  %v4173_v55 = vcombine.high %v432_v39, %v436_v41 }
 0x19c   : > { %3064 = vmatprep.mubr.bf16.mxu0 %v4149_v56  ;;  %3353 = vmatprep.mubr.bf16.mxu1 %v4151_v59 }
 0x19e   : > { %v2528_v0 = vpop.f32.mrb[20].mxu0  ;;  %v2817_v5 = vpop.f32.mrb[20].mxu1 }
 0x19f   : > { %v2530_v6 = vpop.f32.mrb[21].mxu0  ;;  %v5230_v8 = vadd.f32 %v2817_v5, %v2528_v0  ;;  %v2819_v9 = vpop.f32.mrb[21].mxu1 }
 0x1a0   : > { %v2531_v10 = vpop.f32.mrb[22].mxu0  ;;  %v2820_v13 = vpop.f32.mrb[22].mxu1 }
 0x1a1   : > { %v2533_v15 = vpop.f32.mrb[23].mxu0  ;;  %v5232_v17 = vadd.f32 %v2820_v13, %v2531_v10  ;;  %v2822_v18 = vpop.f32.mrb[23].mxu1  ;;  %v4181_v13 = vcombine.high %v440_v63, %v444_v2 }
 0x1a2   : > { %v4183_v18 = vcombine.high %v441_v1, %v445_v3 }
 0x1a3   : > { %3065 = vmatmul.mubr.bf16.vlgmr.msra.gmra.mrb[128].mxu0 %v4148_v7  ;;  %3354 = vmatmul.mubr.bf16.vlgmr.msra.gmra.mrb[128].mxu1 %v4150_v11  ;;  %v4172_v7 = vcombine.low %v432_v39, %v436_v41 }
 0x1a4   : > { %3072 = vmatprep.mubr.bf16.mxu0 %v4157_v12  ;;  %3361 = vmatprep.mubr.bf16.mxu1 %v4159_v16  ;;  %v4174_v12 = vcombine.low %v433_v44, %v437_v45  ;;  %v456_v45 = vld [vmem:[%s4847_s4 + $0x190] sm:$0xff] }
 0x1a6   : > { %v2536_v21 = vpop.f32.mrb[24].mxu0  ;;  %v2825_v25 = vpop.f32.mrb[24].mxu1 }
 0x1a7   : > { %v2538_v26 = vpop.f32.mrb[25].mxu0  ;;  %v5238_v28 = vadd.f32 %v2825_v25, %v2536_v21  ;;  %v2827_v29 = vpop.f32.mrb[25].mxu1  ;;  %v448_v21 = vld [vmem:[%s4847_s4 + $0x150] sm:$0xff]  ;;  %v449_v25 = vld [vmem:[%s4847_s4 + $0x158] sm:$0xff] }
 0x1a8   : > { %v2539_v30 = vpop.f32.mrb[26].mxu0  ;;  %v2828_v34 = vpop.f32.mrb[26].mxu1  ;;  %v453_v26 = vld [vmem:[%s4847_s4 + $0x178] sm:$0xff] }
 0x1a9   : > { %v2541_v35 = vpop.f32.mrb[27].mxu0  ;;  %v5240_v37 = vadd.f32 %v2828_v34, %v2539_v30  ;;  %v2830_v38 = vpop.f32.mrb[27].mxu1  ;;  %v4180_v30 = vcombine.low %v440_v63, %v444_v2  ;;  %v4191_v41 = vcombine.high %v449_v25, %v453_v26 }
 0x1aa   : > { %v4182_v35 = vcombine.low %v441_v1, %v445_v3 }
 0x1ab   : > { %3073 = vmatmul.mubr.bf16.gmra.mrb[132].mxu0 %v4156_v27  ;;  %3362 = vmatmul.mubr.bf16.gmra.mrb[132].mxu1 %v4158_v31 }
 0x1ac   : > { %3080 = vmatprep.mubr.bf16.mxu0 %v4165_v33  ;;  %3369 = vmatprep.mubr.bf16.mxu1 %v4167_v36  ;;  %v4189_v36 = vcombine.high %v448_v21, %v452_v23 }
 0x1ae   : > { %v2544_v43 = vpop.f32.mrb[28].mxu0  ;;  %v2833_v46 = vpop.f32.mrb[28].mxu1 }
 0x1af   : > { %v2546_v47 = vpop.f32.mrb[29].mxu0  ;;  %v5246_v49 = vadd.f32 %v2833_v46, %v2544_v43  ;;  %v2835_v51 = vpop.f32.mrb[29].mxu1  ;;  %v460_v46 = vld [vmem:[%s4847_s4 + $0x1b0] sm:$0xff] }
 0x1b0   : > { %v2547_v53 = vpop.f32.mrb[30].mxu0  ;;  %v2836_v56 = vpop.f32.mrb[30].mxu1  ;;  %v461_v51 = vld [vmem:[%s4847_s4 + $0x1b8] sm:$0xff]  ;;  %v4197_v63 = vcombine.high %v456_v45, %v460_v46 }
 0x1b1   : > { %v2549_v57 = vpop.f32.mrb[31].mxu0  ;;  %v5248_v59 = vadd.f32 %v2836_v56, %v2547_v53  ;;  %v2838_v62 = vpop.f32.mrb[31].mxu1 }
 0x1b2   : > { %v4190_v62 = vcombine.low %v449_v25, %v453_v26 }
 0x1b3   : > { %3081 = vmatmul.mubr.bf16.gmra.mrb[136].mxu0 %v4164_v48  ;;  %3370 = vmatmul.mubr.bf16.gmra.mrb[136].mxu1 %v4166_v54  ;;  %v457_v48 = vld [vmem:[%s4847_s4 + $0x198] sm:$0xff] }
 0x1b4   : > { %3088 = vmatprep.mubr.bf16.mxu0 %v4173_v55  ;;  %3377 = vmatprep.mubr.bf16.mxu1 %v4175_v58  ;;  %v4188_v55 = vcombine.low %v448_v21, %v452_v23  ;;  %v4199_v1 = vcombine.high %v457_v48, %v461_v51  ;;  %v4198_v23 = vcombine.low %v457_v48, %v461_v51 }
 0x1b6   : > { %v2552_v0 = vpop.f32.mrb[32].mxu0  ;;  %v2841_v5 = vpop.f32.mrb[32].mxu1 }
 0x1b7   : > { %v2554_v6 = vpop.f32.mrb[33].mxu0  ;;  %v5254_v9 = vadd.f32 %v2841_v5, %v2552_v0  ;;  %v2843_v10 = vpop.f32.mrb[33].mxu1 }
 0x1b8   : > { %v2555_v11 = vpop.f32.mrb[34].mxu0  ;;  %v2844_v15 = vpop.f32.mrb[34].mxu1  ;;  %v464_v6 = vld [vmem:[%s4847_s4 + $0x1d0] sm:$0xff] }
 0x1b9   : > { %v2557_v16 = vpop.f32.mrb[35].mxu0  ;;  %v5256_v19 = vadd.f32 %v2844_v15, %v2555_v11  ;;  %v2846_v20 = vpop.f32.mrb[35].mxu1  ;;  %v465_v11 = vld [vmem:[%s4847_s4 + $0x1d8] sm:$0xff] }
 0x1ba   : > { %v4196_v16 = vcombine.low %v456_v45, %v460_v46 }
 0x1bb   : > { %3089 = vmatmul.mubr.bf16.gmra.mrb[140].mxu0 %v4172_v7  ;;  %3378 = vmatmul.mubr.bf16.gmra.mrb[140].mxu1 %v4174_v12  ;;  %v468_v7 = vld [vmem:[%s4847_s4 + $0x1f0] sm:$0xff]  ;;  %v469_v12 = vld [vmem:[%s4847_s4 + $0x1f8] sm:$0xff] }
 0x1bc   : > { %3096 = vmatprep.mubr.bf16.mxu0 %v4181_v13  ;;  %3385 = vmatprep.mubr.bf16.mxu1 %v4183_v18  ;;  %v4206_v48 = vcombine.low %v465_v11, %v469_v12 }
 0x1be   : > { %v2560_v24 = vpop.f32.mrb[36].mxu0  ;;  %v2849_v27 = vpop.f32.mrb[36].mxu1 }
 0x1bf   : > { %v2562_v29 = vpop.f32.mrb[37].mxu0  ;;  %v5262_v31 = vadd.f32 %v2849_v27, %v2560_v24  ;;  %v2851_v33 = vpop.f32.mrb[37].mxu1  ;;  %v4205_v24 = vcombine.high %v464_v6, %v468_v7  ;;  %v4207_v27 = vcombine.high %v465_v11, %v469_v12 }
 0x1c0   : > { %v2563_v34 = vpop.f32.mrb[38].mxu0  ;;  %v2852_v38 = vpop.f32.mrb[38].mxu1  ;;  %v472_v33 = vld [vmem:[%s4847_s4 + $0x210] sm:$0xff] }
 0x1c1   : > { %v2565_v39 = vpop.f32.mrb[39].mxu0  ;;  %v5264_v43 = vadd.f32 %v2852_v38, %v2563_v34  ;;  %v2854_v44 = vpop.f32.mrb[39].mxu1  ;;  %v476_v34 = vld [vmem:[%s4847_s4 + $0x230] sm:$0xff]  ;;  %v477_v38 = vld [vmem:[%s4847_s4 + $0x238] sm:$0xff] }
 0x1c2   : > { %v4204_v44 = vcombine.low %v464_v6, %v468_v7  ;;  %v4213_v51 = vcombine.high %v472_v33, %v476_v34  ;;  %v4212_v7 = vcombine.low %v472_v33, %v476_v34  ;;  %v493_v33 = vld [vmem:[%s4847_s4 + $0x2b8] sm:$0xff] }
 0x1c3   : > { %3097 = vmatmul.mubr.bf16.gmra.mrb[144].mxu0 %v4180_v30  ;;  %3386 = vmatmul.mubr.bf16.gmra.mrb[144].mxu1 %v4182_v35 }
 0x1c4   : > { %3104 = vmatprep.mubr.bf16.mxu0 %v4189_v36  ;;  %3393 = vmatprep.mubr.bf16.mxu1 %v4191_v41  ;;  %v473_v36 = vld [vmem:[%s4847_s4 + $0x218] sm:$0xff] }
 0x1c6   : > { %v2568_v47 = vpop.f32.mrb[40].mxu0  ;;  %v2857_v53 = vpop.f32.mrb[40].mxu1 }
 0x1c7   : > { %v2570_v54 = vpop.f32.mrb[41].mxu0  ;;  %v5270_v56 = vadd.f32 %v2857_v53, %v2568_v47  ;;  %v2859_v57 = vpop.f32.mrb[41].mxu1 }
 0x1c8   : > { %v2571_v58 = vpop.f32.mrb[42].mxu0  ;;  %v2860_v2 = vpop.f32.mrb[42].mxu1 }
 0x1c9   : > { %v2573_v0 = vpop.f32.mrb[43].mxu0  ;;  %v5272_v3 = vadd.f32 %v2860_v2, %v2571_v58  ;;  %v2862_v5 = vpop.f32.mrb[43].mxu1 }
 0x1ca   : > { %v481_v0 = vld [vmem:[%s4847_s4 + $0x258] sm:$0xff] }
 0x1cb   : > { %3105 = vmatmul.mubr.bf16.gmra.mrb[148].mxu0 %v4188_v55  ;;  %3394 = vmatmul.mubr.bf16.gmra.mrb[148].mxu1 %v4190_v62  ;;  %v4215_v55 = vcombine.high %v473_v36, %v477_v38  ;;  %v480_v62 = vld [vmem:[%s4847_s4 + $0x250] sm:$0xff] }
 0x1cc   : > { %3112 = vmatprep.mubr.bf16.mxu0 %v4197_v63  ;;  %3401 = vmatprep.mubr.bf16.mxu1 %v4199_v1  ;;  %v484_v63 = vld [vmem:[%s4847_s4 + $0x270] sm:$0xff]  ;;  %v485_v1 = vld [vmem:[%s4847_s4 + $0x278] sm:$0xff] }
 0x1ce   : > { %v2576_v10 = vpop.f32.mrb[44].mxu0  ;;  %v2865_v13 = vpop.f32.mrb[44].mxu1 }
 0x1cf   : > { %v2578_v15 = vpop.f32.mrb[45].mxu0  ;;  %v5278_v18 = vadd.f32 %v2865_v13, %v2576_v10  ;;  %v2867_v20 = vpop.f32.mrb[45].mxu1  ;;  %v4214_v13 = vcombine.low %v473_v36, %v477_v38  ;;  %v4220_v36 = vcombine.low %v480_v62, %v484_v63 }
 0x1d0   : > { %v2579_v21 = vpop.f32.mrb[46].mxu0  ;;  %v2868_v25 = vpop.f32.mrb[46].mxu1  ;;  %v4221_v15 = vcombine.high %v480_v62, %v484_v63  ;;  %v497_v63 = vld [vmem:[%s4847_s4 + $0x2d8] sm:$0xff] }
 0x1d1   : > { %v2581_v26 = vpop.f32.mrb[47].mxu0  ;;  %v5280_v29 = vadd.f32 %v2868_v25, %v2579_v21  ;;  %v2870_v30 = vpop.f32.mrb[47].mxu1  ;;  %v4223_v21 = vcombine.high %v481_v0, %v485_v1  ;;  %v488_v25 = vld [vmem:[%s4847_s4 + $0x290] sm:$0xff] }
 0x1d2   : > { %v492_v26 = vld [vmem:[%s4847_s4 + $0x2b0] sm:$0xff]  ;;  %v489_v30 = vld [vmem:[%s4847_s4 + $0x298] sm:$0xff] }
 0x1d3   : > { %3113 = vmatmul.mubr.bf16.gmra.mrb[152].mxu0 %v4196_v16  ;;  %3402 = vmatmul.mubr.bf16.gmra.mrb[152].mxu1 %v4198_v23 }
 0x1d4   : > { %3120 = vmatprep.mubr.bf16.mxu0 %v4205_v24  ;;  %3409 = vmatprep.mubr.bf16.mxu1 %v4207_v27 }
 0x1d6   : > { %v2584_v35 = vpop.f32.mrb[48].mxu0  ;;  %v2873_v39 = vpop.f32.mrb[48].mxu1 }
 0x1d7   : > { %v2586_v41 = vpop.f32.mrb[49].mxu0  ;;  %v5286_v45 = vadd.f32 %v2873_v39, %v2584_v35  ;;  %v2875_v46 = vpop.f32.mrb[49].mxu1 }
 0x1d8   : > { %v2587_v47 = vpop.f32.mrb[50].mxu0  ;;  %v2876_v53 = vpop.f32.mrb[50].mxu1  ;;  %v4229_v46 = vcombine.high %v488_v25, %v492_v26 }
 0x1d9   : > { %v2589_v54 = vpop.f32.mrb[51].mxu0  ;;  %v5288_v57 = vadd.f32 %v2876_v53, %v2587_v47  ;;  %v2878_v58 = vpop.f32.mrb[51].mxu1 }
 0x1da   : > { %v500_v58 = vld [vmem:[%s4847_s4 + $0x2f0] sm:$0xff] }
 0x1db   : > { %3121 = vmatmul.mubr.bf16.gmra.mrb[156].mxu0 %v4204_v44  ;;  %3410 = vmatmul.mubr.bf16.gmra.mrb[156].mxu1 %v4206_v48  ;;  %v4222_v44 = vcombine.low %v481_v0, %v485_v1  ;;  %v4228_v0 = vcombine.low %v488_v25, %v492_v26  ;;  %v504_v25 = vld [vmem:[%s4847_s4 + $0x310] sm:$0xff] }
 0x1dc   : > { %3128 = vmatprep.mubr.bf16.mxu0 %v4213_v51  ;;  %3417 = vmatprep.mubr.bf16.mxu1 %v4215_v55  ;;  %v4231_v51 = vcombine.high %v489_v30, %v493_v33  ;;  %v496_v55 = vld [vmem:[%s4847_s4 + $0x2d0] sm:$0xff] }
 0x1dd   : > { %v508_v26 = vld [vmem:[%s4847_s4 + $0x330] sm:$0xff] }
 0x1de   : > { %v2592_v2 = vpop.f32.mrb[52].mxu0  ;;  %v2881_v5 = vpop.f32.mrb[52].mxu1 }
 0x1df   : > { %v2594_v6 = vpop.f32.mrb[53].mxu0  ;;  %v5294_v10 = vadd.f32 %v2881_v5, %v2592_v2  ;;  %v2883_v11 = vpop.f32.mrb[53].mxu1  ;;  %v501_v2 = vld [vmem:[%s4847_s4 + $0x2f8] sm:$0xff] }
 0x1e0   : > { %v2595_v12 = vpop.f32.mrb[54].mxu0  ;;  %v2884_v16 = vpop.f32.mrb[54].mxu1 }
 0x1e1   : > { %v2597_v20 = vpop.f32.mrb[55].mxu0  ;;  %v5296_v23 = vadd.f32 %v2884_v16, %v2595_v12  ;;  %v2886_v24 = vpop.f32.mrb[55].mxu1  ;;  %v4230_v12 = vcombine.low %v489_v30, %v493_v33  ;;  %v4236_v30 = vcombine.low %v496_v55, %v500_v58 }
 0x1e2   : > { %v4239_v20 = vcombine.high %v497_v63, %v501_v2 }
 0x1e3   : > { %3129 = vmatmul.mubr.bf16.gmra.mrb[160].mxu0 %v4212_v7  ;;  %3418 = vmatmul.mubr.bf16.gmra.mrb[160].mxu1 %v4214_v13  ;;  %v4237_v13 = vcombine.high %v496_v55, %v500_v58  ;;  %v512_v55 = vld [vmem:[%s4847_s4 + $0x350] sm:$0xff] }
 0x1e4   : > { %3136 = vmatprep.mubr.bf16.mxu0 %v4221_v15  ;;  %3425 = vmatprep.mubr.bf16.mxu1 %v4223_v21  ;;  %v516_v58 = vld [vmem:[%s4847_s4 + $0x370] sm:$0xff] }
 0x1e6   : > { %v2600_v27 = vpop.f32.mrb[56].mxu0  ;;  %v2889_v34 = vpop.f32.mrb[56].mxu1 }
 0x1e7   : > { %v2602_v35 = vpop.f32.mrb[57].mxu0  ;;  %v5302_v38 = vadd.f32 %v2889_v34, %v2600_v27  ;;  %v2891_v39 = vpop.f32.mrb[57].mxu1  ;;  %v505_v34 = vld [vmem:[%s4847_s4 + $0x318] sm:$0xff] }
 0x1e8   : > { %v2603_v41 = vpop.f32.mrb[58].mxu0  ;;  %v2892_v47 = vpop.f32.mrb[58].mxu1  ;;  %v509_v35 = vld [vmem:[%s4847_s4 + $0x338] sm:$0xff] }
 0x1e9   : > { %v2605_v48 = vpop.f32.mrb[59].mxu0  ;;  %v5304_v53 = vadd.f32 %v2892_v47, %v2603_v41  ;;  %v2894_v54 = vpop.f32.mrb[59].mxu1  ;;  %v4245_v47 = vcombine.high %v504_v25, %v508_v26 }
 0x1ea   : > { %v4247_v54 = vcombine.high %v505_v34, %v509_v35 }
 0x1eb   : > { %3137 = vmatmul.mubr.bf16.gmra.mrb[164].mxu0 %v4220_v36  ;;  %3426 = vmatmul.mubr.bf16.gmra.mrb[164].mxu1 %v4222_v44 }
 0x1ec   : > { %3144 = vmatprep.mubr.bf16.mxu0 %v4229_v46  ;;  %3433 = vmatprep.mubr.bf16.mxu1 %v4231_v51  ;;  %v4238_v46 = vcombine.low %v497_v63, %v501_v2  ;;  %v4244_v63 = vcombine.low %v504_v25, %v508_v26  ;;  %v520_v25 = vld [vmem:[%s4847_s4 + $0x390] sm:$0xff] }
 0x1ed   : > { %v524_v26 = vld [vmem:[%s4847_s4 + $0x3b0] sm:$0xff] }
 0x1ee   : > { %v2608_v62 = vpop.f32.mrb[60].mxu0  ;;  %v2897_v5 = vpop.f32.mrb[60].mxu1 }
 0x1ef   : > { %v2610_v6 = vpop.f32.mrb[61].mxu0  ;;  %v5310_v1 = vadd.f32 %v2897_v5, %v2608_v62  ;;  %v2899_v7 = vpop.f32.mrb[61].mxu1 }
 0x1f0   : > { %v2611_v11 = vpop.f32.mrb[62].mxu0  ;;  %v2900_v15 = vpop.f32.mrb[62].mxu1  ;;  %v517_v7 = vld [vmem:[%s4847_s4 + $0x378] sm:$0xff] }
 0x1f1   : > { %v2613_v16 = vpop.f32.mrb[63].mxu0  ;;  %v5312_v21 = vadd.f32 %v2900_v15, %v2611_v11  ;;  %v2902_v24 = vpop.f32.mrb[63].mxu1 }
 0x1f2   : > { %v4246_v16 = vcombine.low %v505_v34, %v509_v35  ;;  %v4252_v34 = vcombine.low %v512_v55, %v516_v58 }
 0x1f3   : > { %3145 = vmatmul.mubr.bf16.gmra.mrb[168].mxu0 %v4228_v0  ;;  %3434 = vmatmul.mubr.bf16.gmra.mrb[168].mxu1 %v4230_v12  ;;  %v513_v0 = vld [vmem:[%s4847_s4 + $0x358] sm:$0xff] }
 0x1f4   : > { %3152 = vmatprep.mubr.bf16.mxu0 %v4237_v13  ;;  %3441 = vmatprep.mubr.bf16.mxu1 %v4239_v20  ;;  %v4253_v20 = vcombine.high %v512_v55, %v516_v58  ;;  %v528_v55 = vld [vmem:[%s4847_s4 + $0x3d0] sm:$0xff] }
 0x1f5   : > { %v532_v58 = vld [vmem:[%s4847_s4 + $0x3f0] sm:$0xff] }
 0x1f6   : > { %v2616_v27 = vpop.f32.mrb[64].mxu0  ;;  %v2905_v36 = vpop.f32.mrb[64].mxu1 }
 0x1f7   : > { %v2618_v39 = vpop.f32.mrb[65].mxu0  ;;  %v5318_v33 = vadd.f32 %v2905_v36, %v2616_v27  ;;  %v2907_v41 = vpop.f32.mrb[65].mxu1  ;;  %v4255_v36 = vcombine.high %v513_v0, %v517_v7 }
 0x1f8   : > { %v2619_v44 = vpop.f32.mrb[66].mxu0  ;;  %v2908_v48 = vpop.f32.mrb[66].mxu1 }
 0x1f9   : > { %v2621_v51 = vpop.f32.mrb[67].mxu0  ;;  %v5320_v62 = vadd.f32 %v2908_v48, %v2619_v44  ;;  %v2910_v5 = vpop.f32.mrb[67].mxu1  ;;  %v521_v44 = vld [vmem:[%s4847_s4 + $0x398] sm:$0xff] }
 0x1fa   : > { %v4254_v5 = vcombine.low %v513_v0, %v517_v7  ;;  %v4260_v0 = vcombine.low %v520_v25, %v524_v26 }
 0x1fb   : > { %3153 = vmatmul.mubr.bf16.gmra.mrb[172].mxu0 %v4236_v30  ;;  %3442 = vmatmul.mubr.bf16.gmra.mrb[172].mxu1 %v4238_v46  ;;  %v525_v46 = vld [vmem:[%s4847_s4 + $0x3b8] sm:$0xff] }
 0x1fc   : > { %3160 = vmatprep.mubr.bf16.mxu0 %v4245_v47  ;;  %3449 = vmatprep.mubr.bf16.mxu1 %v4247_v54 }
 0x1fe   : > { %v2624_v6 = vpop.f32.mrb[68].mxu0  ;;  %v2913_v11 = vpop.f32.mrb[68].mxu1 }
 0x1ff   : > { %v2626_v12 = vpop.f32.mrb[69].mxu0  ;;  %v5326_v2 = vadd.f32 %v2913_v11, %v2624_v6  ;;  %v2915_v13 = vpop.f32.mrb[69].mxu1  ;;  %v4261_v6 = vcombine.high %v520_v25, %v524_v26  ;;  %v536_v25 = vld [vmem:[%s4847_s4 + $0x410] sm:$0xff] }
 0x200   : > { %v2627_v15 = vpop.f32.mrb[70].mxu0  ;;  %v2916_v24 = vpop.f32.mrb[70].mxu1  ;;  %v540_v26 = vld [vmem:[%s4847_s4 + $0x430] sm:$0xff] }
 0x201   : > { %v2629_v27 = vpop.f32.mrb[71].mxu0  ;;  %v5328_v39 = vadd.f32 %v2916_v24, %v2627_v15  ;;  %v2918_v30 = vpop.f32.mrb[71].mxu1  ;;  %v533_v24 = vld [vmem:[%s4847_s4 + $0x3f8] sm:$0xff] }
 0x203   : > { %3161 = vmatmul.mubr.bf16.gmra.mrb[176].mxu0 %v4244_v63  ;;  %3450 = vmatmul.mubr.bf16.gmra.mrb[176].mxu1 %v4246_v16  ;;  %v4263_v63 = vcombine.high %v521_v44, %v525_v46 }
 0x204   : > { %3168 = vmatprep.mubr.bf16.mxu0 %v4253_v20  ;;  %3457 = vmatprep.mubr.bf16.mxu1 %v4255_v36  ;;  %v529_v20 = vld [vmem:[%s4847_s4 + $0x3d8] sm:$0xff] }
 0x206   : > { %v2632_v41 = vpop.f32.mrb[72].mxu0  ;;  %v2921_v47 = vpop.f32.mrb[72].mxu1 }
 0x207   : > { %v2634_v48 = vpop.f32.mrb[73].mxu0  ;;  %v5334_v35 = vadd.f32 %v2921_v47, %v2632_v41  ;;  %v2923_v51 = vpop.f32.mrb[73].mxu1  ;;  %v4262_v47 = vcombine.low %v521_v44, %v525_v46  ;;  %v4268_v44 = vcombine.low %v528_v55, %v532_v58 }
 0x208   : > { %v2635_v54 = vpop.f32.mrb[74].mxu0  ;;  %v2924_v11 = vpop.f32.mrb[74].mxu1  ;;  %v4269_v48 = vcombine.high %v528_v55, %v532_v58  ;;  %v544_v55 = vld [vmem:[%s4847_s4 + $0x450] sm:$0xff] }
 0x209   : > { %v2637_v12 = vpop.f32.mrb[75].mxu0  ;;  %v5336_v13 = vadd.f32 %v2924_v11, %v2635_v54  ;;  %v2926_v15 = vpop.f32.mrb[75].mxu1  ;;  %v4271_v54 = vcombine.high %v529_v20, %v533_v24  ;;  %v548_v58 = vld [vmem:[%s4847_s4 + $0x470] sm:$0xff] }
 0x20a   : > { %v537_v12 = vld [vmem:[%s4847_s4 + $0x418] sm:$0xff] }
 0x20b   : > { %3169 = vmatmul.mubr.bf16.gmra.mrb[180].mxu0 %v4252_v34  ;;  %3458 = vmatmul.mubr.bf16.gmra.mrb[180].mxu1 %v4254_v5 }
 0x20c   : > { %3176 = vmatprep.mubr.bf16.mxu0 %v4261_v6  ;;  %3465 = vmatprep.mubr.bf16.mxu1 %v4263_v63  ;;  %v541_v63 = vld [vmem:[%s4847_s4 + $0x438] sm:$0xff] }
 0x20e   : > { %v2640_v16 = vpop.f32.mrb[76].mxu0  ;;  %v2929_v27 = vpop.f32.mrb[76].mxu1 }
 0x20f   : > { %v2642_v36 = vpop.f32.mrb[77].mxu0  ;;  %v5342_v7 = vadd.f32 %v2929_v27, %v2640_v16  ;;  %v2931_v30 = vpop.f32.mrb[77].mxu1 }
 0x210   : > { %v2643_v41 = vpop.f32.mrb[78].mxu0  ;;  %v2932_v34 = vpop.f32.mrb[78].mxu1  ;;  %v4277_v30 = vcombine.high %v536_v25, %v540_v26 }
 0x211   : > { %v2645_v51 = vpop.f32.mrb[79].mxu0  ;;  %v5344_v5 = vadd.f32 %v2932_v34, %v2643_v41  ;;  %v2934_v6 = vpop.f32.mrb[79].mxu1 }
 0x212   : > { %v545_v6 = vld [vmem:[%s4847_s4 + $0x458] sm:$0xff] }
 0x213   : > { %3177 = vmatmul.mubr.bf16.gmra.mrb[184].mxu0 %v4260_v0  ;;  %3466 = vmatmul.mubr.bf16.gmra.mrb[184].mxu1 %v4262_v47  ;;  %v4270_v0 = vcombine.low %v529_v20, %v533_v24  ;;  %v4276_v20 = vcombine.low %v536_v25, %v540_v26  ;;  %v552_v25 = vld [vmem:[%s4847_s4 + $0x490] sm:$0xff] }
 0x214   : > { %3184 = vmatprep.mubr.bf16.mxu0 %v4269_v48  ;;  %3473 = vmatprep.mubr.bf16.mxu1 %v4271_v54  ;;  %v4279_v48 = vcombine.high %v537_v12, %v541_v63  ;;  %v556_v26 = vld [vmem:[%s4847_s4 + $0x4b0] sm:$0xff] }
 0x216   : > { %v2648_v11 = vpop.f32.mrb[80].mxu0  ;;  %v2937_v15 = vpop.f32.mrb[80].mxu1 }
 0x217   : > { %v2650_v16 = vpop.f32.mrb[81].mxu0  ;;  %v5350_v46 = vadd.f32 %v2937_v15, %v2648_v11  ;;  %v2939_v27 = vpop.f32.mrb[81].mxu1  ;;  %v549_v11 = vld [vmem:[%s4847_s4 + $0x478] sm:$0xff] }
 0x218   : > { %v2651_v36 = vpop.f32.mrb[82].mxu0  ;;  %v2940_v41 = vpop.f32.mrb[82].mxu1 }
 0x219   : > { %5687 = vst [vmem:[#allocation6_spill] sm:$0xff] %v5350_v46  ;;  %v2653_v47 = vpop.f32.mrb[83].mxu0  ;;  %v5352_v34 = vadd.f32 %v2940_v41, %v2651_v36  ;;  %v2942_v51 = vpop.f32.mrb[83].mxu1 }
 0x21a   : > { %v4287_v47 = vcombine.high %v545_v6, %v549_v11 }
 0x21b   : > { %5688 = vst [vmem:[#allocation7_spill] sm:$0xff] %v5352_v34  ;;  %3185 = vmatmul.mubr.bf16.gmra.mrb[188].mxu0 %v4268_v44  ;;  %3474 = vmatmul.mubr.bf16.gmra.mrb[188].mxu1 %v4270_v0  ;;  %v4278_v44 = vcombine.low %v537_v12, %v541_v63  ;;  %v4285_v0 = vcombine.high %v544_v55, %v548_v58  ;;  %v342_v34 = vld [vmem:[#allocation2] sm:$0xff] }
 0x21c   : > { %3192 = vmatprep.mubr.bf16.mxu0 %v4277_v30  ;;  %3481 = vmatprep.mubr.bf16.mxu1 %v4279_v48  ;;  %v4284_v12 = vcombine.low %v544_v55, %v548_v58  ;;  %v560_v55 = vld [vmem:[%s4847_s4 + $0x4d0] sm:$0xff] }
 0x21d   : > { %v564_v58 = vld [vmem:[%s4847_s4 + $0x4f0] sm:$0xff] }
 0x21e   : > { %v2656_v54 = vpop.f32.mrb[84].mxu0  ;;  %v2945_v15 = vpop.f32.mrb[84].mxu1 }
 0x21f   : > { %v2658_v16 = vpop.f32.mrb[85].mxu0  ;;  %v5358_v24 = vadd.f32 %v2945_v15, %v2656_v54  ;;  %v2947_v27 = vpop.f32.mrb[85].mxu1  ;;  %v553_v15 = vld [vmem:[%s4847_s4 + $0x498] sm:$0xff] }
 0x220   : > { %v2659_v36 = vpop.f32.mrb[86].mxu0  ;;  %v2948_v30 = vpop.f32.mrb[86].mxu1  ;;  %v557_v16 = vld [vmem:[%s4847_s4 + $0x4b8] sm:$0xff] }
 0x221   : > { %5689 = vst [vmem:[#allocation8_spill] sm:$0xff] %v5358_v24  ;;  %v2661_v41 = vpop.f32.mrb[87].mxu0  ;;  %v5360_v48 = vadd.f32 %v2948_v30, %v2659_v36  ;;  %v2950_v51 = vpop.f32.mrb[87].mxu1 }
 0x223   : > { %5690 = vst [vmem:[#allocation9_spill] sm:$0xff] %v5360_v48  ;;  %3193 = vmatmul.mubr.bf16.gmra.mrb[192].mxu0 %v4276_v20  ;;  %3482 = vmatmul.mubr.bf16.gmra.mrb[192].mxu1 %v4278_v44  ;;  %v4286_v20 = vcombine.low %v545_v6, %v549_v11  ;;  %v4293_v44 = vcombine.high %v552_v25, %v556_v26 }
 0x224   : > { %3200 = vmatprep.mubr.bf16.mxu0 %v4285_v0  ;;  %3489 = vmatprep.mubr.bf16.mxu1 %v4287_v47  ;;  %v4295_v47 = vcombine.high %v553_v15, %v557_v16  ;;  %v4292_v6 = vcombine.low %v552_v25, %v556_v26  ;;  %v568_v25 = vld [vmem:[%s4847_s4 + $0x510] sm:$0xff] }
 0x225   : > { %v572_v26 = vld [vmem:[%s4847_s4 + $0x530] sm:$0xff] }
 0x226   : > { %v2664_v54 = vpop.f32.mrb[88].mxu0  ;;  %v2953_v27 = vpop.f32.mrb[88].mxu1 }
 0x227   : > { %v2666_v24 = vpop.f32.mrb[89].mxu0  ;;  %v5366_v63 = vadd.f32 %v2953_v27, %v2664_v54  ;;  %v2955_v41 = vpop.f32.mrb[89].mxu1  ;;  %v561_v54 = vld [vmem:[%s4847_s4 + $0x4d8] sm:$0xff] }
 0x228   : > { %v2667_v36 = vpop.f32.mrb[90].mxu0  ;;  %v2956_v0 = vpop.f32.mrb[90].mxu1  ;;  %v565_v27 = vld [vmem:[%s4847_s4 + $0x4f8] sm:$0xff] }
 0x229   : > { %5691 = vst [vmem:[#allocation10_spill] sm:$0xff] %v5366_v63  ;;  %v2669_v30 = vpop.f32.mrb[91].mxu0  ;;  %v5368_v51 = vadd.f32 %v2956_v0, %v2667_v36  ;;  %v2958_v48 = vpop.f32.mrb[91].mxu1  ;;  %v4303_v0 = vcombine.high %v561_v54, %v565_v27 }
 0x22a   : > { %v4294_v48 = vcombine.low %v553_v15, %v557_v16  ;;  %v4300_v15 = vcombine.low %v560_v55, %v564_v58 }
 0x22b   : > { %5692 = vst [vmem:[#allocation11_spill] sm:$0xff] %v5368_v51  ;;  %3201 = vmatmul.mubr.bf16.gmra.mrb[196].mxu0 %v4284_v12  ;;  %3490 = vmatmul.mubr.bf16.gmra.mrb[196].mxu1 %v4286_v20  ;;  %v4301_v12 = vcombine.high %v560_v55, %v564_v58  ;;  %v576_v55 = vld [vmem:[%s4847_s4 + $0x550] sm:$0xff] }
 0x22c   : > { %3208 = vmatprep.mubr.bf16.mxu0 %v4293_v44  ;;  %3497 = vmatprep.mubr.bf16.mxu1 %v4295_v47  ;;  %v580_v58 = vld [vmem:[%s4847_s4 + $0x570] sm:$0xff] }
 0x22e   : > { %v2672_v24 = vpop.f32.mrb[92].mxu0  ;;  %v2961_v41 = vpop.f32.mrb[92].mxu1 }
 0x22f   : > { %v2674_v63 = vpop.f32.mrb[93].mxu0  ;;  %v5374_v11 = vadd.f32 %v2961_v41, %v2672_v24  ;;  %v2963_v30 = vpop.f32.mrb[93].mxu1  ;;  %v569_v24 = vld [vmem:[%s4847_s4 + $0x518] sm:$0xff] }
 0x230   : > { %v2675_v36 = vpop.f32.mrb[94].mxu0  ;;  %v2964_v20 = vpop.f32.mrb[94].mxu1  ;;  %v573_v41 = vld [vmem:[%s4847_s4 + $0x538] sm:$0xff] }
 0x231   : > { %5693 = vst [vmem:[#allocation12_spill] sm:$0xff] %v5374_v11  ;;  %v2677_v44 = vpop.f32.mrb[95].mxu0  ;;  %v5376_v47 = vadd.f32 %v2964_v20, %v2675_v36  ;;  %v2966_v51 = vpop.f32.mrb[95].mxu1  ;;  %v4311_v20 = vcombine.high %v569_v24, %v573_v41 }
 0x232   : > { %v4302_v51 = vcombine.low %v561_v54, %v565_v27  ;;  %v4308_v54 = vcombine.low %v568_v25, %v572_v26 }
 0x233   : > { %5694 = vst [vmem:[#allocation13_spill] sm:$0xff] %v5376_v47  ;;  %3209 = vmatmul.mubr.bf16.gmra.mrb[200].mxu0 %v4292_v6  ;;  %3498 = vmatmul.mubr.bf16.gmra.mrb[200].mxu1 %v4294_v48  ;;  %v4309_v6 = vcombine.high %v568_v25, %v572_v26  ;;  %v584_v25 = vld [vmem:[%s4847_s4 + $0x590] sm:$0xff] }
 0x234   : > { %3216 = vmatprep.mubr.bf16.mxu0 %v4301_v12  ;;  %3505 = vmatprep.mubr.bf16.mxu1 %v4303_v0  ;;  %v588_v26 = vld [vmem:[%s4847_s4 + $0x5b0] sm:$0xff] }
 0x236   : > { %v2680_v63 = vpop.f32.mrb[96].mxu0  ;;  %v2969_v30 = vpop.f32.mrb[96].mxu1 }
 0x237   : > { %v2682_v11 = vpop.f32.mrb[97].mxu0  ;;  %v5382_v16 = vadd.f32 %v2969_v30, %v2680_v63  ;;  %v2971_v44 = vpop.f32.mrb[97].mxu1  ;;  %v577_v63 = vld [vmem:[%s4847_s4 + $0x558] sm:$0xff] }
 0x238   : > { %v2683_v36 = vpop.f32.mrb[98].mxu0  ;;  %v2972_v48 = vpop.f32.mrb[98].mxu1  ;;  %v581_v30 = vld [vmem:[%s4847_s4 + $0x578] sm:$0xff] }
 0x239   : > { %5695 = vst [vmem:[#allocation14_spill] sm:$0xff] %v5382_v16  ;;  %v2685_v12 = vpop.f32.mrb[99].mxu0  ;;  %v5384_v0 = vadd.f32 %v2972_v48, %v2683_v36  ;;  %v2974_v47 = vpop.f32.mrb[99].mxu1  ;;  %v4319_v48 = vcombine.high %v577_v63, %v581_v30 }
 0x23a   : > { %v4310_v47 = vcombine.low %v569_v24, %v573_v41  ;;  %v4316_v24 = vcombine.low %v576_v55, %v580_v58 }
 0x23b   : > { %5696 = vst [vmem:[#allocation15_spill] sm:$0xff] %v5384_v0  ;;  %3217 = vmatmul.mubr.bf16.gmra.mrb[204].mxu0 %v4300_v15  ;;  %3506 = vmatmul.mubr.bf16.gmra.mrb[204].mxu1 %v4302_v51  ;;  %v4317_v15 = vcombine.high %v576_v55, %v580_v58  ;;  %v592_v55 = vld [vmem:[%s4847_s4 + $0x5d0] sm:$0xff] }
 0x23c   : > { %3224 = vmatprep.mubr.bf16.mxu0 %v4309_v6  ;;  %3513 = vmatprep.mubr.bf16.mxu1 %v4311_v20  ;;  %v596_v58 = vld [vmem:[%s4847_s4 + $0x5f0] sm:$0xff] }
 0x23e   : > { %v2688_v11 = vpop.f32.mrb[100].mxu0  ;;  %v2977_v44 = vpop.f32.mrb[100].mxu1 }
 0x23f   : > { %v2690_v16 = vpop.f32.mrb[101].mxu0  ;;  %v5390_v27 = vadd.f32 %v2977_v44, %v2688_v11  ;;  %v2979_v12 = vpop.f32.mrb[101].mxu1  ;;  %v585_v11 = vld [vmem:[%s4847_s4 + $0x598] sm:$0xff] }
 0x240   : > { %v2691_v36 = vpop.f32.mrb[102].mxu0  ;;  %v2980_v51 = vpop.f32.mrb[102].mxu1  ;;  %v589_v44 = vld [vmem:[%s4847_s4 + $0x5b8] sm:$0xff] }
 0x241   : > { %5697 = vst [vmem:[#allocation16_spill] sm:$0xff] %v5390_v27  ;;  %v2693_v6 = vpop.f32.mrb[103].mxu0  ;;  %v5392_v20 = vadd.f32 %v2980_v51, %v2691_v36  ;;  %v2982_v0 = vpop.f32.mrb[103].mxu1  ;;  %v4327_v51 = vcombine.high %v585_v11, %v589_v44 }
 0x242   : > { %v4318_v0 = vcombine.low %v577_v63, %v581_v30  ;;  %v4324_v63 = vcombine.low %v584_v25, %v588_v26 }
 0x243   : > { %5698 = vst [vmem:[#allocation17_spill] sm:$0xff] %v5392_v20  ;;  %3225 = vmatmul.mubr.bf16.gmra.mrb[208].mxu0 %v4308_v54  ;;  %3514 = vmatmul.mubr.bf16.gmra.mrb[208].mxu1 %v4310_v47  ;;  %v4325_v54 = vcombine.high %v584_v25, %v588_v26  ;;  %v600_v25 = vld [vmem:[%s4847_s4 + $0x610] sm:$0xff] }
 0x244   : > { %3232 = vmatprep.mubr.bf16.mxu0 %v4317_v15  ;;  %3521 = vmatprep.mubr.bf16.mxu1 %v4319_v48  ;;  %v604_v26 = vld [vmem:[%s4847_s4 + $0x630] sm:$0xff] }
 0x246   : > { %v2696_v16 = vpop.f32.mrb[104].mxu0  ;;  %v2985_v12 = vpop.f32.mrb[104].mxu1 }
 0x247   : > { %v2698_v27 = vpop.f32.mrb[105].mxu0  ;;  %v5398_v41 = vadd.f32 %v2985_v12, %v2696_v16  ;;  %v2987_v6 = vpop.f32.mrb[105].mxu1  ;;  %v593_v16 = vld [vmem:[%s4847_s4 + $0x5d8] sm:$0xff] }
 0x248   : > { %v2699_v36 = vpop.f32.mrb[106].mxu0  ;;  %v2988_v47 = vpop.f32.mrb[106].mxu1  ;;  %v597_v12 = vld [vmem:[%s4847_s4 + $0x5f8] sm:$0xff] }
 0x249   : > { %5699 = vst [vmem:[#allocation18_spill] sm:$0xff] %v5398_v41  ;;  %v2701_v15 = vpop.f32.mrb[107].mxu0  ;;  %v5400_v48 = vadd.f32 %v2988_v47, %v2699_v36  ;;  %v2990_v20 = vpop.f32.mrb[107].mxu1  ;;  %v4335_v47 = vcombine.high %v593_v16, %v597_v12 }
 0x24a   : > { %v4326_v20 = vcombine.low %v585_v11, %v589_v44  ;;  %v4332_v11 = vcombine.low %v592_v55, %v596_v58 }
 0x24b   : > { %5700 = vst [vmem:[#allocation19_spill] sm:$0xff] %v5400_v48  ;;  %3233 = vmatmul.mubr.bf16.gmra.mrb[212].mxu0 %v4316_v24  ;;  %3522 = vmatmul.mubr.bf16.gmra.mrb[212].mxu1 %v4318_v0  ;;  %v4333_v24 = vcombine.high %v592_v55, %v596_v58  ;;  %v608_v55 = vld [vmem:[%s4847_s4 + $0x650] sm:$0xff] }
 0x24c   : > { %3240 = vmatprep.mubr.bf16.mxu0 %v4325_v54  ;;  %3529 = vmatprep.mubr.bf16.mxu1 %v4327_v51  ;;  %v612_v58 = vld [vmem:[%s4847_s4 + $0x670] sm:$0xff] }
 0x24e   : > { %v2704_v27 = vpop.f32.mrb[108].mxu0  ;;  %v2993_v6 = vpop.f32.mrb[108].mxu1 }
 0x24f   : > { %v2706_v41 = vpop.f32.mrb[109].mxu0  ;;  %v5406_v30 = vadd.f32 %v2993_v6, %v2704_v27  ;;  %v2995_v15 = vpop.f32.mrb[109].mxu1  ;;  %v601_v27 = vld [vmem:[%s4847_s4 + $0x618] sm:$0xff] }
 0x250   : > { %v2707_v36 = vpop.f32.mrb[110].mxu0  ;;  %v2996_v0 = vpop.f32.mrb[110].mxu1  ;;  %v605_v6 = vld [vmem:[%s4847_s4 + $0x638] sm:$0xff] }
 0x251   : > { %5701 = vst [vmem:[#allocation20_spill] sm:$0xff] %v5406_v30  ;;  %v2709_v54 = vpop.f32.mrb[111].mxu0  ;;  %v5408_v51 = vadd.f32 %v2996_v0, %v2707_v36  ;;  %v2998_v48 = vpop.f32.mrb[111].mxu1  ;;  %v4343_v0 = vcombine.high %v601_v27, %v605_v6 }
 0x252   : > { %v4334_v48 = vcombine.low %v593_v16, %v597_v12  ;;  %v4340_v16 = vcombine.low %v600_v25, %v604_v26 }
 0x253   : > { %5702 = vst [vmem:[#allocation21_spill] sm:$0xff] %v5408_v51  ;;  %3241 = vmatmul.mubr.bf16.gmra.mrb[216].mxu0 %v4324_v63  ;;  %3530 = vmatmul.mubr.bf16.gmra.mrb[216].mxu1 %v4326_v20  ;;  %v4341_v63 = vcombine.high %v600_v25, %v604_v26  ;;  %v616_v25 = vld [vmem:[%s4847_s4 + $0x690] sm:$0xff] }
 0x254   : > { %3248 = vmatprep.mubr.bf16.mxu0 %v4333_v24  ;;  %3537 = vmatprep.mubr.bf16.mxu1 %v4335_v47  ;;  %v620_v26 = vld [vmem:[%s4847_s4 + $0x6b0] sm:$0xff] }
 0x256   : > { %v2712_v41 = vpop.f32.mrb[112].mxu0  ;;  %v3001_v15 = vpop.f32.mrb[112].mxu1 }
 0x257   : > { %v2714_v30 = vpop.f32.mrb[113].mxu0  ;;  %v5414_v44 = vadd.f32 %v3001_v15, %v2712_v41  ;;  %v3003_v54 = vpop.f32.mrb[113].mxu1  ;;  %v609_v41 = vld [vmem:[%s4847_s4 + $0x658] sm:$0xff] }
 0x258   : > { %v2715_v36 = vpop.f32.mrb[114].mxu0  ;;  %v3004_v20 = vpop.f32.mrb[114].mxu1  ;;  %v613_v15 = vld [vmem:[%s4847_s4 + $0x678] sm:$0xff] }
 0x259   : > { %5703 = vst [vmem:[#allocation22_spill] sm:$0xff] %v5414_v44  ;;  %v2717_v24 = vpop.f32.mrb[115].mxu0  ;;  %v5416_v47 = vadd.f32 %v3004_v20, %v2715_v36  ;;  %v3006_v51 = vpop.f32.mrb[115].mxu1  ;;  %v4351_v20 = vcombine.high %v609_v41, %v613_v15 }
 0x25a   : > { %v4342_v51 = vcombine.low %v601_v27, %v605_v6  ;;  %v4348_v27 = vcombine.low %v608_v55, %v612_v58 }
 0x25b   : > { %5704 = vst [vmem:[#allocation23_spill] sm:$0xff] %v5416_v47  ;;  %3249 = vmatmul.mubr.bf16.gmra.mrb[220].mxu0 %v4332_v11  ;;  %3538 = vmatmul.mubr.bf16.gmra.mrb[220].mxu1 %v4334_v48  ;;  %v4349_v11 = vcombine.high %v608_v55, %v612_v58  ;;  %v624_v55 = vld [vmem:[%s4847_s4 + $0x6d0] sm:$0xff] }
 0x25c   : > { %3256 = vmatprep.mubr.bf16.mxu0 %v4341_v63  ;;  %3545 = vmatprep.mubr.bf16.mxu1 %v4343_v0  ;;  %v628_v58 = vld [vmem:[%s4847_s4 + $0x6f0] sm:$0xff] }
 0x25e   : > { %v2720_v30 = vpop.f32.mrb[116].mxu0  ;;  %v3009_v54 = vpop.f32.mrb[116].mxu1 }
 0x25f   : > { %v2722_v44 = vpop.f32.mrb[117].mxu0  ;;  %v5422_v12 = vadd.f32 %v3009_v54, %v2720_v30  ;;  %v3011_v24 = vpop.f32.mrb[117].mxu1  ;;  %v617_v30 = vld [vmem:[%s4847_s4 + $0x698] sm:$0xff] }
 0x260   : > { %v2723_v36 = vpop.f32.mrb[118].mxu0  ;;  %v3012_v48 = vpop.f32.mrb[118].mxu1  ;;  %v621_v54 = vld [vmem:[%s4847_s4 + $0x6b8] sm:$0xff] }
 0x261   : > { %5705 = vst [vmem:[#allocation24_spill] sm:$0xff] %v5422_v12  ;;  %v2725_v63 = vpop.f32.mrb[119].mxu0  ;;  %v5424_v0 = vadd.f32 %v3012_v48, %v2723_v36  ;;  %v3014_v47 = vpop.f32.mrb[119].mxu1  ;;  %v4359_v48 = vcombine.high %v617_v30, %v621_v54 }
 0x262   : > { %v4350_v47 = vcombine.low %v609_v41, %v613_v15  ;;  %v4356_v41 = vcombine.low %v616_v25, %v620_v26 }
 0x263   : > { %5706 = vst [vmem:[#allocation25_spill] sm:$0xff] %v5424_v0  ;;  %3257 = vmatmul.mubr.bf16.gmra.mrb[224].mxu0 %v4340_v16  ;;  %3546 = vmatmul.mubr.bf16.gmra.mrb[224].mxu1 %v4342_v51  ;;  %v4357_v16 = vcombine.high %v616_v25, %v620_v26  ;;  %v632_v25 = vld [vmem:[%s4847_s4 + $0x710] sm:$0xff] }
 0x264   : > { %3264 = vmatprep.mubr.bf16.mxu0 %v4349_v11  ;;  %3553 = vmatprep.mubr.bf16.mxu1 %v4351_v20  ;;  %v636_v26 = vld [vmem:[%s4847_s4 + $0x730] sm:$0xff] }
 0x266   : > { %v2728_v44 = vpop.f32.mrb[120].mxu0  ;;  %v3017_v24 = vpop.f32.mrb[120].mxu1 }
 0x267   : > { %v2730_v12 = vpop.f32.mrb[121].mxu0  ;;  %v5430_v6 = vadd.f32 %v3017_v24, %v2728_v44  ;;  %v3019_v63 = vpop.f32.mrb[121].mxu1  ;;  %v625_v44 = vld [vmem:[%s4847_s4 + $0x6d8] sm:$0xff] }
 0x268   : > { %v2731_v36 = vpop.f32.mrb[122].mxu0  ;;  %v3020_v51 = vpop.f32.mrb[122].mxu1  ;;  %v629_v24 = vld [vmem:[%s4847_s4 + $0x6f8] sm:$0xff] }
 0x269   : > { %5707 = vst [vmem:[#allocation26_spill] sm:$0xff] %v5430_v6  ;;  %v2733_v11 = vpop.f32.mrb[123].mxu0  ;;  %v5432_v20 = vadd.f32 %v3020_v51, %v2731_v36  ;;  %v3022_v0 = vpop.f32.mrb[123].mxu1  ;;  %v4367_v51 = vcombine.high %v625_v44, %v629_v24 }
 0x26a   : > { %v4358_v0 = vcombine.low %v617_v30, %v621_v54  ;;  %v4364_v54 = vcombine.low %v624_v55, %v628_v58 }
 0x26b   : > { %5708 = vst [vmem:[#allocation27_spill] sm:$0xff] %v5432_v20  ;;  %3265 = vmatmul.mubr.bf16.gmra.mrb[228].mxu0 %v4348_v27  ;;  %3554 = vmatmul.mubr.bf16.gmra.mrb[228].mxu1 %v4350_v47  ;;  %v4365_v27 = vcombine.high %v624_v55, %v628_v58  ;;  %v640_v58 = vld [vmem:[%s4847_s4 + $0x750] sm:$0xff] }
 0x26c   : > { %3272 = vmatprep.mubr.bf16.mxu0 %v4357_v16  ;;  %3561 = vmatprep.mubr.bf16.mxu1 %v4359_v48 }
 0x26e   : > { %v2736_v12 = vpop.f32.mrb[124].mxu0  ;;  %v3025_v63 = vpop.f32.mrb[124].mxu1 }
 0x26f   : > { %v2738_v6 = vpop.f32.mrb[125].mxu0  ;;  %v5438_v15 = vadd.f32 %v3025_v63, %v2736_v12  ;;  %v3027_v11 = vpop.f32.mrb[125].mxu1  ;;  %v633_v12 = vld [vmem:[%s4847_s4 + $0x718] sm:$0xff] }
 0x270   : > { %v2739_v36 = vpop.f32.mrb[126].mxu0  ;;  %v3028_v47 = vpop.f32.mrb[126].mxu1  ;;  %v637_v63 = vld [vmem:[%s4847_s4 + $0x738] sm:$0xff] }
 0x271   : > { %5709 = vst [vmem:[#allocation28_spill] sm:$0xff] %v5438_v15  ;;  %v2741_v16 = vpop.f32.mrb[127].mxu0  ;;  %v5440_v48 = vadd.f32 %v3028_v47, %v2739_v36  ;;  %v3030_v20 = vpop.f32.mrb[127].mxu1  ;;  %v4366_v36 = vcombine.low %v625_v44, %v629_v24  ;;  %v4373_v47 = vcombine.high %v632_v25, %v636_v26  ;;  %v644_v44 = vld [vmem:[%s4847_s4 + $0x770] sm:$0xff] }
 0x273   : > { %5710 = vst [vmem:[#allocation29_spill] sm:$0xff] %v5440_v48  ;;  %3273 = vmatmul.mubr.bf16.gmra.mrb[232].mxu0 %v4356_v41  ;;  %3562 = vmatmul.mubr.bf16.gmra.mrb[232].mxu1 %v4358_v0  ;;  %v343_v48 = vld [vmem:[#allocation2 + $0x8] sm:$0xff] }
 0x274   : > { %3280 = vmatprep.mubr.bf16.mxu0 %v4365_v27  ;;  %3569 = vmatprep.mubr.bf16.mxu1 %v4367_v51  ;;  %v4375_v51 = vcombine.high %v633_v12, %v637_v63 }
 0x276   : > { %v3066_v6 = vpop.f32.mrb[128].mxu0  ;;  %v3355_v15 = vpop.f32.mrb[128].mxu1 }
 0x277   : > { %v3067_v11 = vadd.f32 %v3066_v6, %v5190_v42  ;;  %v3068_v30 = vpop.f32.mrb[129].mxu0  ;;  %v3357_v16 = vpop.f32.mrb[129].mxu1 }
 0x278   : > { %v3069_v46 = vpop.f32.mrb[130].mxu0  ;;  %v3358_v0 = vpop.f32.mrb[130].mxu1 }
 0x279   : > { %v3356_v20 = vadd.f32 %v3355_v15, %v3067_v11  ;;  %v3070_v41 = vadd.f32 %v3069_v46, %v5192_v50  ;;  %v3071_v27 = vpop.f32.mrb[131].mxu0  ;;  %v3360_v42 = vpop.f32.mrb[131].mxu1  ;;  %v641_v15 = vld [vmem:[%s4847_s4 + $0x758] sm:$0xff] }
 0x27a   : > { %v645_v50 = vld [vmem:[%s4847_s4 + $0x778] sm:$0xff]  ;;  %v4372_v27 = vcombine.low %v632_v25, %v636_v26  ;;  %v344_v42 = vld [vmem:[#allocation2 + $0x10] sm:$0xff] }
 0x27b   : > { %v3610_v6 = vadd.f32 %v3356_v20, %v342_v34  ;;  %v3359_v30 = vadd.f32 %v3358_v0, %v3070_v41  ;;  %3281 = vmatmul.mubr.bf16.gmra.mrb[236].mxu0 %v4364_v54  ;;  %3570 = vmatmul.mubr.bf16.gmra.mrb[236].mxu1 %v4366_v36  ;;  %v4374_v54 = vcombine.low %v633_v12, %v637_v63  ;;  %v648_v26 = vld [vmem:[%s4847_s4 + $0x790] sm:$0xff] }
 0x27c   : > { %3288 = vmatprep.mubr.bf16.mxu0 %v4373_v47  ;;  %3577 = vmatprep.mubr.bf16.mxu1 %v4375_v51  ;;  %v4381_v36 = vcombine.high %v640_v58, %v644_v44  ;;  %v4383_v51 = vcombine.high %v641_v15, %v645_v50  ;;  %v652_v12 = vld [vmem:[%s4847_s4 + $0x7b0] sm:$0xff] }
 0x27d   : > { %3674 = vst [vmem:[#allocation2] sm:$0xff] %v3610_v6  ;;  %v3611_v55 = vadd.f32 %v3359_v30, %v343_v48  ;;  %v345_v6 = vld [vmem:[#allocation2 + $0x18] sm:$0xff] }
 0x27e   : > { %v3074_v24 = vpop.f32.mrb[132].mxu0  ;;  %v3363_v11 = vpop.f32.mrb[132].mxu1 }
 0x27f   : > { %3675 = vst [vmem:[#allocation2 + $0x8] sm:$0xff] %v3611_v55  ;;  %v3075_v46 = vadd.f32 %v3074_v24, %v5198_v60  ;;  %v3076_v16 = vpop.f32.mrb[133].mxu0  ;;  %v3365_v34 = vpop.f32.mrb[133].mxu1  ;;  %v649_v24 = vld [vmem:[%s4847_s4 + $0x798] sm:$0xff] }
 0x280   : > { %v3077_v20 = vpop.f32.mrb[134].mxu0  ;;  %v3366_v41 = vpop.f32.mrb[134].mxu1  ;;  %v4380_v34 = vcombine.low %v640_v58, %v644_v44  ;;  %v656_v44 = vld [vmem:[%s4847_s4 + $0x7d0] sm:$0xff] }
 0x281   : > { %v3364_v47 = vadd.f32 %v3363_v11, %v3075_v46  ;;  %v3078_v48 = vadd.f32 %v3077_v20, %v5200_v4  ;;  %v3079_v0 = vpop.f32.mrb[135].mxu0  ;;  %v3368_v60 = vpop.f32.mrb[135].mxu1  ;;  %v653_v4 = vld [vmem:[%s4847_s4 + $0x7b8] sm:$0xff]  ;;  %v346_v20 = vld [vmem:[#allocation2 + $0x20] sm:$0xff] }
 0x283   : > { %v3612_v30 = vadd.f32 %v3364_v47, %v344_v42  ;;  %v3367_v55 = vadd.f32 %v3366_v41, %v3078_v48  ;;  %3289 = vmatmul.mubr.bf16.gmra.mrb[240].mxu0 %v4372_v27  ;;  %3578 = vmatmul.mubr.bf16.gmra.mrb[240].mxu1 %v4374_v54  ;;  %v4382_v27 = vcombine.low %v641_v15, %v645_v50  ;;  %v660_v15 = vld [vmem:[%s4847_s4 + $0x7f0] sm:$0xff] }
 0x284   : > { %3296 = vmatprep.mubr.bf16.mxu0 %v4381_v36  ;;  %3585 = vmatprep.mubr.bf16.mxu1 %v4383_v51  ;;  %v4389_v54 = vcombine.high %v648_v26, %v652_v12  ;;  %v4391_v51 = vcombine.high %v649_v24, %v653_v4 }
 0x285   : > { %3676 = vst [vmem:[#allocation2 + $0x10] sm:$0xff] %v3612_v30  ;;  %v3613_v25 = vadd.f32 %v3367_v55, %v345_v6  ;;  %v347_v6 = vld [vmem:[#allocation2 + $0x28] sm:$0xff]  ;;  %v657_v55 = vld [vmem:[%s4847_s4 + $0x7d8] sm:$0xff] }
 0x286   : > { %v3082_v63 = vpop.f32.mrb[136].mxu0  ;;  %v3371_v11 = vpop.f32.mrb[136].mxu1 }
 0x287   : > { %3677 = vst [vmem:[#allocation2 + $0x18] sm:$0xff] %v3613_v25  ;;  %v3083_v46 = vadd.f32 %v3082_v63, %v5206_v14  ;;  %v3084_v16 = vpop.f32.mrb[137].mxu0  ;;  %v3373_v42 = vpop.f32.mrb[137].mxu1 }
 0x288   : > { %v3085_v47 = vpop.f32.mrb[138].mxu0  ;;  %v3374_v41 = vpop.f32.mrb[138].mxu1  ;;  %v348_v16 = vld [vmem:[#allocation2 + $0x30] sm:$0xff] }
 0x289   : > { %v3372_v36 = vadd.f32 %v3371_v11, %v3083_v46  ;;  %v3086_v48 = vadd.f32 %v3085_v47, %v5208_v22  ;;  %v3087_v0 = vpop.f32.mrb[139].mxu0  ;;  %v3376_v14 = vpop.f32.mrb[139].mxu1  ;;  %v661_v22 = vld [vmem:[%s4847_s4 + $0x7f8] sm:$0xff]  ;;  %v4388_v11 = vcombine.low %v648_v26, %v652_v12  ;;  %v4397_v47 = vcombine.high %v656_v44, %v660_v15 }
 0x28a   : > { %v349_v0 = vld [vmem:[#allocation2 + $0x38] sm:$0xff] }
 0x28b   : > { %v3614_v60 = vadd.f32 %v3372_v36, %v346_v20  ;;  %v3375_v30 = vadd.f32 %v3374_v41, %v3086_v48  ;;  %3297 = vmatmul.mubr.bf16.gmra.mrb[244].mxu0 %v4380_v34  ;;  %3586 = vmatmul.mubr.bf16.gmra.mrb[244].mxu1 %v4382_v27  ;;  %v4390_v34 = vcombine.low %v649_v24, %v653_v4 }
 0x28c   : > { %3304 = vmatprep.mubr.bf16.mxu0 %v4389_v54  ;;  %3593 = vmatprep.mubr.bf16.mxu1 %v4391_v51  ;;  %v4399_v41 = vcombine.high %v657_v55, %v661_v22 }
 0x28d   : > { %3678 = vst [vmem:[#allocation2 + $0x20] sm:$0xff] %v3614_v60  ;;  %v3615_v58 = vadd.f32 %v3375_v30, %v347_v6  ;;  %v350_v60 = vld [vmem:[#allocation2 + $0x40] sm:$0xff] }
 0x28e   : > { %v3090_v50 = vpop.f32.mrb[140].mxu0  ;;  %v3379_v63 = vpop.f32.mrb[140].mxu1 }
 0x28f   : > { %3679 = vst [vmem:[#allocation2 + $0x28] sm:$0xff] %v3615_v58  ;;  %v3091_v25 = vadd.f32 %v3090_v50, %v5214_v32  ;;  %v3092_v46 = vpop.f32.mrb[141].mxu0  ;;  %v3381_v20 = vpop.f32.mrb[141].mxu1  ;;  %v4398_v50 = vcombine.low %v657_v55, %v661_v22  ;;  %v352_v55 = vld [vmem:[#allocation2 + $0x50] sm:$0xff] }
 0x290   : > { %v3093_v42 = vpop.f32.mrb[142].mxu0  ;;  %v3382_v36 = vpop.f32.mrb[142].mxu1 }
 0x291   : > { %v3380_v27 = vadd.f32 %v3379_v63, %v3091_v25  ;;  %v3094_v54 = vadd.f32 %v3093_v42, %v5216_v40  ;;  %v3095_v48 = vpop.f32.mrb[143].mxu0  ;;  %v3384_v51 = vpop.f32.mrb[143].mxu1  ;;  %v4396_v40 = vcombine.low %v656_v44, %v660_v15 }
 0x293   : > { %v3616_v6 = vadd.f32 %v3380_v27, %v348_v16  ;;  %v3383_v14 = vadd.f32 %v3382_v36, %v3094_v54  ;;  %3305 = vmatmul.mubr.bf16.gmra.mrb[248].mxu0 %v4388_v11  ;;  %3594 = vmatmul.mubr.bf16.gmra.mrb[248].mxu1 %v4390_v34  ;;  %v351_v16 = vld [vmem:[#allocation2 + $0x48] sm:$0xff] }
 0x294   : > { %3312 = vmatprep.mubr.bf16.mxu0 %v4397_v47  ;;  %3601 = vmatprep.mubr.bf16.mxu1 %v4399_v41 }
 0x295   : > { %3680 = vst [vmem:[#allocation2 + $0x30] sm:$0xff] %v3616_v6  ;;  %v3617_v32 = vadd.f32 %v3383_v14, %v349_v0  ;;  %v353_v0 = vld [vmem:[#allocation2 + $0x58] sm:$0xff] }
 0x296   : > { %v3098_v26 = vpop.f32.mrb[144].mxu0  ;;  %v3387_v24 = vpop.f32.mrb[144].mxu1 }
 0x297   : > { %3681 = vst [vmem:[#allocation2 + $0x38] sm:$0xff] %v3617_v32  ;;  %v3099_v12 = vadd.f32 %v3098_v26, %v5222_v52  ;;  %v3100_v4 = vpop.f32.mrb[145].mxu0  ;;  %v3389_v30 = vpop.f32.mrb[145].mxu1 }
 0x298   : > { %v3101_v58 = vpop.f32.mrb[146].mxu0  ;;  %v3390_v46 = vpop.f32.mrb[146].mxu1  ;;  %v354_v4 = vld [vmem:[#allocation2 + $0x60] sm:$0xff] }
 0x299   : > { %v3388_v25 = vadd.f32 %v3387_v24, %v3099_v12  ;;  %v3102_v63 = vadd.f32 %v3101_v58, %v5224_v61  ;;  %v3103_v11 = vpop.f32.mrb[147].mxu0  ;;  %v3392_v20 = vpop.f32.mrb[147].mxu1 }
 0x29b   : > { %v3618_v42 = vadd.f32 %v3388_v25, %v350_v60  ;;  %v3391_v34 = vadd.f32 %v3390_v46, %v3102_v63  ;;  %3313 = vmatmul.mubr.bf16.gmra.mrb[252].mxu0 %v4396_v40  ;;  %3602 = vmatmul.mubr.bf16.gmra.mrb[252].mxu1 %v4398_v50  ;;  %v355_v25 = vld [vmem:[#allocation2 + $0x68] sm:$0xff] }
 0x29d   : > { %3682 = vst [vmem:[#allocation2 + $0x40] sm:$0xff] %v3618_v42  ;;  %v3619_v52 = vadd.f32 %v3391_v34, %v351_v16 }
 0x29e   : > { %v3106_v47 = vpop.f32.mrb[148].mxu0  ;;  %v3395_v15 = vpop.f32.mrb[148].mxu1 }
 0x29f   : > { %3683 = vst [vmem:[#allocation2 + $0x48] sm:$0xff] %v3619_v52  ;;  %v3107_v44 = vadd.f32 %v3106_v47, %v5230_v8  ;;  %v3108_v27 = vpop.f32.mrb[149].mxu0  ;;  %v3397_v22 = vpop.f32.mrb[149].mxu1  ;;  %v356_v52 = vld [vmem:[#allocation2 + $0x70] sm:$0xff] }
 0x2a0   : > { %v3109_v54 = vpop.f32.mrb[150].mxu0  ;;  %v3398_v48 = vpop.f32.mrb[150].mxu1  ;;  %v357_v22 = vld [vmem:[#allocation2 + $0x78] sm:$0xff] }
 0x2a1   : > { %v3396_v61 = vadd.f32 %v3395_v15, %v3107_v44  ;;  %v3110_v36 = vadd.f32 %v3109_v54, %v5232_v17  ;;  %v3111_v41 = vpop.f32.mrb[151].mxu0  ;;  %v3400_v51 = vpop.f32.mrb[151].mxu1 }
 0x2a3   : > { %v3620_v6 = vadd.f32 %v3396_v61, %v352_v55  ;;  %v3399_v14 = vadd.f32 %v3398_v48, %v3110_v36 }
 0x2a5   : > { %3684 = vst [vmem:[#allocation2 + $0x50] sm:$0xff] %v3620_v6  ;;  %v3621_v32 = vadd.f32 %v3399_v14, %v353_v0  ;;  %v358_v6 = vld [vmem:[#allocation2 + $0x80] sm:$0xff] }
 0x2a6   : > { %v3114_v26 = vpop.f32.mrb[152].mxu0  ;;  %v3403_v12 = vpop.f32.mrb[152].mxu1 }
 0x2a7   : > { %3685 = vst [vmem:[#allocation2 + $0x58] sm:$0xff] %v3621_v32  ;;  %v3115_v8 = vadd.f32 %v3114_v26, %v5238_v28  ;;  %v3116_v24 = vpop.f32.mrb[153].mxu0  ;;  %v3405_v40 = vpop.f32.mrb[153].mxu1 }
 0x2a8   : > { %v3117_v60 = vpop.f32.mrb[154].mxu0  ;;  %v3406_v58 = vpop.f32.mrb[154].mxu1  ;;  %v359_v24 = vld [vmem:[#allocation2 + $0x88] sm:$0xff] }
 0x2a9   : > { %v3404_v30 = vadd.f32 %v3403_v12, %v3115_v8  ;;  %v3118_v17 = vadd.f32 %v3117_v60, %v5240_v37  ;;  %v3119_v50 = vpop.f32.mrb[155].mxu0  ;;  %v3408_v63 = vpop.f32.mrb[155].mxu1 }
 0x2ab   : > { %v3622_v46 = vadd.f32 %v3404_v30, %v354_v4  ;;  %v3407_v11 = vadd.f32 %v3406_v58, %v3118_v17 }
 0x2ad   : > { %3686 = vst [vmem:[#allocation2 + $0x60] sm:$0xff] %v3622_v46  ;;  %v3623_v16 = vadd.f32 %v3407_v11, %v355_v25  ;;  %v360_v25 = vld [vmem:[#allocation2 + $0x90] sm:$0xff] }
 0x2ae   : > { %v3122_v20 = vpop.f32.mrb[156].mxu0  ;;  %v3411_v42 = vpop.f32.mrb[156].mxu1 }
 0x2af   : > { %3687 = vst [vmem:[#allocation2 + $0x68] sm:$0xff] %v3623_v16  ;;  %v3123_v28 = vadd.f32 %v3122_v20, %v5246_v49  ;;  %v3124_v34 = vpop.f32.mrb[157].mxu0  ;;  %v3413_v47 = vpop.f32.mrb[157].mxu1 }
 0x2b0   : > { %v3125_v44 = vpop.f32.mrb[158].mxu0  ;;  %v3414_v27 = vpop.f32.mrb[158].mxu1 }
 0x2b1   : > { %v3412_v15 = vadd.f32 %v3411_v42, %v3123_v28  ;;  %v3126_v37 = vadd.f32 %v3125_v44, %v5248_v59  ;;  %v3127_v55 = vpop.f32.mrb[159].mxu0  ;;  %v3416_v54 = vpop.f32.mrb[159].mxu1  ;;  %v361_v28 = vld [vmem:[#allocation2 + $0x98] sm:$0xff] }
 0x2b3   : > { %v3624_v61 = vadd.f32 %v3412_v15, %v356_v52  ;;  %v3415_v36 = vadd.f32 %v3414_v27, %v3126_v37  ;;  %v362_v27 = vld [vmem:[#allocation2 + $0xa0] sm:$0xff] }
 0x2b5   : > { %3688 = vst [vmem:[#allocation2 + $0x70] sm:$0xff] %v3624_v61  ;;  %v3625_v48 = vadd.f32 %v3415_v36, %v357_v22 }
 0x2b6   : > { %v3130_v41 = vpop.f32.mrb[160].mxu0  ;;  %v3419_v0 = vpop.f32.mrb[160].mxu1 }
 0x2b7   : > { %3689 = vst [vmem:[#allocation2 + $0x78] sm:$0xff] %v3625_v48  ;;  %v3131_v49 = vadd.f32 %v3130_v41, %v5254_v9  ;;  %v3132_v51 = vpop.f32.mrb[161].mxu0  ;;  %v3421_v14 = vpop.f32.mrb[161].mxu1  ;;  %v363_v48 = vld [vmem:[#allocation2 + $0xa8] sm:$0xff] }
 0x2b8   : > { %v3133_v32 = vpop.f32.mrb[162].mxu0  ;;  %v3422_v8 = vpop.f32.mrb[162].mxu1 }
 0x2b9   : > { %v3420_v26 = vadd.f32 %v3419_v0, %v3131_v49  ;;  %v3134_v59 = vadd.f32 %v3133_v32, %v5256_v19  ;;  %v3135_v12 = vpop.f32.mrb[163].mxu0  ;;  %v3424_v4 = vpop.f32.mrb[163].mxu1 }
 0x2bb   : > { %v3626_v40 = vadd.f32 %v3420_v26, %v358_v6  ;;  %v3423_v60 = vadd.f32 %v3422_v8, %v3134_v59  ;;  %v364_v26 = vld [vmem:[#allocation2 + $0xb0] sm:$0xff] }
 0x2bd   : > { %3690 = vst [vmem:[#allocation2 + $0x80] sm:$0xff] %v3626_v40  ;;  %v3627_v30 = vadd.f32 %v3423_v60, %v359_v24  ;;  %v365_v40 = vld [vmem:[#allocation2 + $0xb8] sm:$0xff] }
 0x2be   : > { %v3138_v17 = vpop.f32.mrb[164].mxu0  ;;  %v3427_v58 = vpop.f32.mrb[164].mxu1 }
 0x2bf   : > { %3691 = vst [vmem:[#allocation2 + $0x88] sm:$0xff] %v3627_v30  ;;  %v3139_v9 = vadd.f32 %v3138_v17, %v5262_v31  ;;  %v3140_v50 = vpop.f32.mrb[165].mxu0  ;;  %v3429_v63 = vpop.f32.mrb[165].mxu1 }
 0x2c0   : > { %v3141_v46 = vpop.f32.mrb[166].mxu0  ;;  %v3430_v16 = vpop.f32.mrb[166].mxu1  ;;  %v366_v63 = vld [vmem:[#allocation2 + $0xc0] sm:$0xff] }
 0x2c1   : > { %v3428_v11 = vadd.f32 %v3427_v58, %v3139_v9  ;;  %v3142_v19 = vadd.f32 %v3141_v46, %v5264_v43  ;;  %v3143_v20 = vpop.f32.mrb[167].mxu0  ;;  %v3432_v42 = vpop.f32.mrb[167].mxu1 }
 0x2c3   : > { %v3628_v34 = vadd.f32 %v3428_v11, %v360_v25  ;;  %v3431_v52 = vadd.f32 %v3430_v16, %v3142_v19 }
 0x2c5   : > { %3692 = vst [vmem:[#allocation2 + $0x90] sm:$0xff] %v3628_v34  ;;  %v3629_v47 = vadd.f32 %v3431_v52, %v361_v28  ;;  %v367_v28 = vld [vmem:[#allocation2 + $0xc8] sm:$0xff] }
 0x2c6   : > { %v3146_v44 = vpop.f32.mrb[168].mxu0  ;;  %v3435_v15 = vpop.f32.mrb[168].mxu1 }
 0x2c7   : > { %3693 = vst [vmem:[#allocation2 + $0x98] sm:$0xff] %v3629_v47  ;;  %v3147_v31 = vadd.f32 %v3146_v44, %v5270_v56  ;;  %v3148_v37 = vpop.f32.mrb[169].mxu0  ;;  %v3437_v55 = vpop.f32.mrb[169].mxu1 }
 0x2c8   : > { %v3149_v22 = vpop.f32.mrb[170].mxu0  ;;  %v3438_v61 = vpop.f32.mrb[170].mxu1  ;;  %v368_v37 = vld [vmem:[#allocation2 + $0xd0] sm:$0xff] }
 0x2c9   : > { %v3436_v54 = vadd.f32 %v3435_v15, %v3147_v31  ;;  %v3150_v43 = vadd.f32 %v3149_v22, %v5272_v3  ;;  %v3151_v36 = vpop.f32.mrb[171].mxu0  ;;  %v3440_v41 = vpop.f32.mrb[171].mxu1 }
 0x2cb   : > { %v3630_v49 = vadd.f32 %v3436_v54, %v362_v27  ;;  %v3439_v0 = vadd.f32 %v3438_v61, %v3150_v43  ;;  %v369_v61 = vld [vmem:[#allocation2 + $0xd8] sm:$0xff] }
 0x2cd   : > { %3694 = vst [vmem:[#allocation2 + $0xa0] sm:$0xff] %v3630_v49  ;;  %v3631_v51 = vadd.f32 %v3439_v0, %v363_v48 }
 0x2ce   : > { %v3154_v6 = vpop.f32.mrb[172].mxu0  ;;  %v3443_v14 = vpop.f32.mrb[172].mxu1 }
 0x2cf   : > { %3695 = vst [vmem:[#allocation2 + $0xa8] sm:$0xff] %v3631_v51  ;;  %v3155_v56 = vadd.f32 %v3154_v6, %v5278_v18  ;;  %v3156_v32 = vpop.f32.mrb[173].mxu0  ;;  %v3445_v59 = vpop.f32.mrb[173].mxu1 }
 0x2d0   : > { %v3157_v8 = vpop.f32.mrb[174].mxu0  ;;  %v3446_v24 = vpop.f32.mrb[174].mxu1 }
 0x2d1   : > { %v3444_v12 = vadd.f32 %v3443_v14, %v3155_v56  ;;  %v3158_v3 = vadd.f32 %v3157_v8, %v5280_v29  ;;  %v3159_v4 = vpop.f32.mrb[175].mxu0  ;;  %v3448_v60 = vpop.f32.mrb[175].mxu1  ;;  %v370_v56 = vld [vmem:[#allocation2 + $0xe0] sm:$0xff] }
 0x2d3   : > { %v3632_v30 = vadd.f32 %v3444_v12, %v364_v26  ;;  %v3447_v17 = vadd.f32 %v3446_v24, %v3158_v3  ;;  %v371_v12 = vld [vmem:[#allocation2 + $0xe8] sm:$0xff] }
 0x2d5   : > { %3696 = vst [vmem:[#allocation2 + $0xb0] sm:$0xff] %v3632_v30  ;;  %v3633_v9 = vadd.f32 %v3447_v17, %v365_v40 }
 0x2d6   : > { %v3162_v58 = vpop.f32.mrb[176].mxu0  ;;  %v3451_v50 = vpop.f32.mrb[176].mxu1 }
 0x2d7   : > { %3697 = vst [vmem:[#allocation2 + $0xb8] sm:$0xff] %v3633_v9  ;;  %v3163_v18 = vadd.f32 %v3162_v58, %v5286_v45  ;;  %v3164_v25 = vpop.f32.mrb[177].mxu0  ;;  %v3453_v46 = vpop.f32.mrb[177].mxu1  ;;  %v372_v9 = vld [vmem:[#allocation2 + $0xf0] sm:$0xff] }
 0x2d8   : > { %v3165_v11 = vpop.f32.mrb[178].mxu0  ;;  %v3454_v16 = vpop.f32.mrb[178].mxu1  ;;  %v373_v46 = vld [vmem:[#allocation2 + $0xf8] sm:$0xff] }
 0x2d9   : > { %v3452_v19 = vadd.f32 %v3451_v50, %v3163_v18  ;;  %v3166_v29 = vadd.f32 %v3165_v11, %v5288_v57  ;;  %v3167_v20 = vpop.f32.mrb[179].mxu0  ;;  %v3456_v42 = vpop.f32.mrb[179].mxu1 }
 0x2db   : > { %v3634_v34 = vadd.f32 %v3452_v19, %v366_v63  ;;  %v3455_v52 = vadd.f32 %v3454_v16, %v3166_v29 }
 0x2dd   : > { %3698 = vst [vmem:[#allocation2 + $0xc0] sm:$0xff] %v3634_v34  ;;  %v3635_v47 = vadd.f32 %v3455_v52, %v367_v28  ;;  %v374_v34 = vld [vmem:[#allocation2 + $0x100] sm:$0xff] }
 0x2de   : > { %v3170_v44 = vpop.f32.mrb[180].mxu0  ;;  %v3459_v31 = vpop.f32.mrb[180].mxu1 }
 0x2df   : > { %3699 = vst [vmem:[#allocation2 + $0xc8] sm:$0xff] %v3635_v47  ;;  %v3171_v45 = vadd.f32 %v3170_v44, %v5294_v10  ;;  %v3172_v15 = vpop.f32.mrb[181].mxu0  ;;  %v3461_v27 = vpop.f32.mrb[181].mxu1 }
 0x2e0   : > { %v3173_v55 = vpop.f32.mrb[182].mxu0  ;;  %v3462_v54 = vpop.f32.mrb[182].mxu1  ;;  %v375_v15 = vld [vmem:[#allocation2 + $0x108] sm:$0xff] }
 0x2e1   : > { %v3460_v22 = vadd.f32 %v3459_v31, %v3171_v45  ;;  %v3174_v57 = vadd.f32 %v3173_v55, %v5296_v23  ;;  %v3175_v43 = vpop.f32.mrb[183].mxu0  ;;  %v3464_v36 = vpop.f32.mrb[183].mxu1 }
 0x2e3   : > { %v3636_v48 = vadd.f32 %v3460_v22, %v368_v37  ;;  %v3463_v41 = vadd.f32 %v3462_v54, %v3174_v57 }
 0x2e5   : > { %3700 = vst [vmem:[#allocation2 + $0xd0] sm:$0xff] %v3636_v48  ;;  %v3637_v49 = vadd.f32 %v3463_v41, %v369_v61  ;;  %v376_v61 = vld [vmem:[#allocation2 + $0x110] sm:$0xff] }
 0x2e6   : > { %v3178_v0 = vpop.f32.mrb[184].mxu0  ;;  %v3467_v51 = vpop.f32.mrb[184].mxu1 }
 0x2e7   : > { %3701 = vst [vmem:[#allocation2 + $0xd8] sm:$0xff] %v3637_v49  ;;  %v3179_v10 = vadd.f32 %v3178_v0, %v5302_v38  ;;  %v3180_v6 = vpop.f32.mrb[185].mxu0  ;;  %v3469_v14 = vpop.f32.mrb[185].mxu1 }
 0x2e8   : > { %v3181_v32 = vpop.f32.mrb[186].mxu0  ;;  %v3470_v59 = vpop.f32.mrb[186].mxu1 }
 0x2e9   : > { %v3468_v26 = vadd.f32 %v3467_v51, %v3179_v10  ;;  %v3182_v23 = vadd.f32 %v3181_v32, %v5304_v53  ;;  %v3183_v8 = vpop.f32.mrb[187].mxu0  ;;  %v3472_v3 = vpop.f32.mrb[187].mxu1  ;;  %v377_v10 = vld [vmem:[#allocation2 + $0x118] sm:$0xff] }
 0x2eb   : > { %v3638_v24 = vadd.f32 %v3468_v26, %v370_v56  ;;  %v3471_v4 = vadd.f32 %v3470_v59, %v3182_v23  ;;  %v378_v59 = vld [vmem:[#allocation2 + $0x120] sm:$0xff] }
 0x2ed   : > { %3702 = vst [vmem:[#allocation2 + $0xe0] sm:$0xff] %v3638_v24  ;;  %v3639_v40 = vadd.f32 %v3471_v4, %v371_v12 }
 0x2ee   : > { %v3186_v60 = vpop.f32.mrb[188].mxu0  ;;  %v3475_v30 = vpop.f32.mrb[188].mxu1 }
 0x2ef   : > { %3703 = vst [vmem:[#allocation2 + $0xe8] sm:$0xff] %v3639_v40  ;;  %v3187_v38 = vadd.f32 %v3186_v60, %v5310_v1  ;;  %v3188_v17 = vpop.f32.mrb[189].mxu0  ;;  %v3477_v58 = vpop.f32.mrb[189].mxu1  ;;  %v379_v40 = vld [vmem:[#allocation2 + $0x128] sm:$0xff] }
 0x2f0   : > { %v3189_v18 = vpop.f32.mrb[190].mxu0  ;;  %v3478_v25 = vpop.f32.mrb[190].mxu1 }
 0x2f1   : > { %v3476_v50 = vadd.f32 %v3475_v30, %v3187_v38  ;;  %v3190_v53 = vadd.f32 %v3189_v18, %v5312_v21  ;;  %v3191_v63 = vpop.f32.mrb[191].mxu0  ;;  %v3480_v11 = vpop.f32.mrb[191].mxu1 }
 0x2f3   : > { %v3640_v19 = vadd.f32 %v3476_v50, %v372_v9  ;;  %v3479_v29 = vadd.f32 %v3478_v25, %v3190_v53  ;;  %v380_v50 = vld [vmem:[#allocation2 + $0x130] sm:$0xff] }
 0x2f5   : > { %3704 = vst [vmem:[#allocation2 + $0xf0] sm:$0xff] %v3640_v19  ;;  %v3641_v16 = vadd.f32 %v3479_v29, %v373_v46  ;;  %v381_v19 = vld [vmem:[#allocation2 + $0x138] sm:$0xff] }
 0x2f6   : > { %v3194_v20 = vpop.f32.mrb[192].mxu0  ;;  %v3483_v28 = vpop.f32.mrb[192].mxu1 }
 0x2f7   : > { %3705 = vst [vmem:[#allocation2 + $0xf8] sm:$0xff] %v3641_v16  ;;  %v3195_v1 = vadd.f32 %v3194_v20, %v5318_v33  ;;  %v3196_v42 = vpop.f32.mrb[193].mxu0  ;;  %v3485_v52 = vpop.f32.mrb[193].mxu1 }
 0x2f8   : > { %v3197_v47 = vpop.f32.mrb[194].mxu0  ;;  %v3486_v45 = vpop.f32.mrb[194].mxu1  ;;  %v5711_v42 = vld [vmem:[#allocation6_spill] sm:$0xff] }
 0x2f9   : > { %v3484_v44 = vadd.f32 %v3483_v28, %v3195_v1  ;;  %v3198_v21 = vadd.f32 %v3197_v47, %v5320_v62  ;;  %v3199_v31 = vpop.f32.mrb[195].mxu0  ;;  %v3488_v37 = vpop.f32.mrb[195].mxu1  ;;  %v382_v47 = vld [vmem:[#allocation2 + $0x140] sm:$0xff] }
 0x2fa   : > { %v5712_v31 = vld [vmem:[#allocation7_spill] sm:$0xff] }
 0x2fb   : > { %v3642_v27 = vadd.f32 %v3484_v44, %v374_v34  ;;  %v3487_v55 = vadd.f32 %v3486_v45, %v3198_v21 }
 0x2fd   : > { %3706 = vst [vmem:[#allocation2 + $0x100] sm:$0xff] %v3642_v27  ;;  %v3643_v22 = vadd.f32 %v3487_v55, %v375_v15  ;;  %v383_v27 = vld [vmem:[#allocation2 + $0x148] sm:$0xff] }
 0x2fe   : > { %v3202_v57 = vpop.f32.mrb[196].mxu0  ;;  %v3491_v54 = vpop.f32.mrb[196].mxu1 }
 0x2ff   : > { %3707 = vst [vmem:[#allocation2 + $0x108] sm:$0xff] %v3643_v22  ;;  %v3203_v33 = vadd.f32 %v3202_v57, %v5326_v2  ;;  %v3204_v43 = vpop.f32.mrb[197].mxu0  ;;  %v3493_v36 = vpop.f32.mrb[197].mxu1 }
 0x300   : > { %v3205_v48 = vpop.f32.mrb[198].mxu0  ;;  %v3494_v49 = vpop.f32.mrb[198].mxu1  ;;  %v5713_v43 = vld [vmem:[#allocation8_spill] sm:$0xff] }
 0x301   : > { %v3492_v41 = vadd.f32 %v3491_v54, %v3203_v33  ;;  %v3206_v62 = vadd.f32 %v3205_v48, %v5328_v39  ;;  %v3207_v0 = vpop.f32.mrb[199].mxu0  ;;  %v3496_v51 = vpop.f32.mrb[199].mxu1 }
 0x303   : > { %v3644_v6 = vadd.f32 %v3492_v41, %v376_v61  ;;  %v3495_v56 = vadd.f32 %v3494_v49, %v3206_v62  ;;  %v384_v41 = vld [vmem:[#allocation2 + $0x150] sm:$0xff] }
 0x305   : > { %3708 = vst [vmem:[#allocation2 + $0x110] sm:$0xff] %v3644_v6  ;;  %v3645_v14 = vadd.f32 %v3495_v56, %v377_v10  ;;  %v5714_v10 = vld [vmem:[#allocation9_spill] sm:$0xff] }
 0x306   : > { %v3210_v32 = vpop.f32.mrb[200].mxu0  ;;  %v3499_v26 = vpop.f32.mrb[200].mxu1 }
 0x307   : > { %3709 = vst [vmem:[#allocation2 + $0x118] sm:$0xff] %v3645_v14  ;;  %v3211_v2 = vadd.f32 %v3210_v32, %v5334_v35  ;;  %v3212_v23 = vpop.f32.mrb[201].mxu0  ;;  %v3501_v8 = vpop.f32.mrb[201].mxu1  ;;  %v385_v14 = vld [vmem:[#allocation2 + $0x158] sm:$0xff] }
 0x308   : > { %v3213_v12 = vpop.f32.mrb[202].mxu0  ;;  %v3502_v24 = vpop.f32.mrb[202].mxu1  ;;  %v5715_v8 = vld [vmem:[#allocation10_spill] sm:$0xff] }
 0x309   : > { %v3500_v3 = vadd.f32 %v3499_v26, %v3211_v2  ;;  %v3214_v39 = vadd.f32 %v3213_v12, %v5336_v13  ;;  %v3215_v4 = vpop.f32.mrb[203].mxu0  ;;  %v3504_v60 = vpop.f32.mrb[203].mxu1 }
 0x30b   : > { %v3646_v38 = vadd.f32 %v3500_v3, %v378_v59  ;;  %v3503_v30 = vadd.f32 %v3502_v24, %v3214_v39  ;;  %v386_v24 = vld [vmem:[#allocation2 + $0x160] sm:$0xff] }
 0x30d   : > { %3710 = vst [vmem:[#allocation2 + $0x120] sm:$0xff] %v3646_v38  ;;  %v3647_v17 = vadd.f32 %v3503_v30, %v379_v40  ;;  %v5716_v38 = vld [vmem:[#allocation11_spill] sm:$0xff] }
 0x30e   : > { %v3218_v9 = vpop.f32.mrb[204].mxu0  ;;  %v3507_v58 = vpop.f32.mrb[204].mxu1 }
 0x30f   : > { %3711 = vst [vmem:[#allocation2 + $0x128] sm:$0xff] %v3647_v17  ;;  %v3219_v35 = vadd.f32 %v3218_v9, %v5342_v7  ;;  %v3220_v18 = vpop.f32.mrb[205].mxu0  ;;  %v3509_v53 = vpop.f32.mrb[205].mxu1 }
 0x310   : > { %v3221_v25 = vpop.f32.mrb[206].mxu0  ;;  %v3510_v46 = vpop.f32.mrb[206].mxu1 }
 0x311   : > { %v3508_v63 = vadd.f32 %v3507_v58, %v3219_v35  ;;  %v3222_v13 = vadd.f32 %v3221_v25, %v5344_v5  ;;  %v3223_v11 = vpop.f32.mrb[207].mxu0  ;;  %v3512_v29 = vpop.f32.mrb[207].mxu1  ;;  %v387_v35 = vld [vmem:[#allocation2 + $0x168] sm:$0xff] }
 0x313   : > { %v3648_v16 = vadd.f32 %v3508_v63, %v380_v50  ;;  %v3511_v20 = vadd.f32 %v3510_v46, %v3222_v13  ;;  %v5717_v63 = vld [vmem:[#allocation12_spill] sm:$0xff] }
 0x315   : > { %3712 = vst [vmem:[#allocation2 + $0x130] sm:$0xff] %v3648_v16  ;;  %v3649_v1 = vadd.f32 %v3511_v20, %v381_v19  ;;  %v388_v19 = vld [vmem:[#allocation2 + $0x170] sm:$0xff] }
 0x316   : > { %v3226_v28 = vpop.f32.mrb[208].mxu0  ;;  %v3515_v34 = vpop.f32.mrb[208].mxu1 }
 0x317   : > { %3713 = vst [vmem:[#allocation2 + $0x138] sm:$0xff] %v3649_v1  ;;  %v3227_v7 = vadd.f32 %v3226_v28, %v5711_v42  ;;  %v3228_v52 = vpop.f32.mrb[209].mxu0  ;;  %v3517_v44 = vpop.f32.mrb[209].mxu1  ;;  %v5718_v1 = vld [vmem:[#allocation13_spill] sm:$0xff] }
 0x318   : > { %v3229_v21 = vpop.f32.mrb[210].mxu0  ;;  %v3518_v15 = vpop.f32.mrb[210].mxu1 }
 0x319   : > { %v3516_v45 = vadd.f32 %v3515_v34, %v3227_v7  ;;  %v3230_v5 = vadd.f32 %v3229_v21, %v5712_v31  ;;  %v3231_v37 = vpop.f32.mrb[211].mxu0  ;;  %v3520_v55 = vpop.f32.mrb[211].mxu1  ;;  %v389_v34 = vld [vmem:[#allocation2 + $0x178] sm:$0xff]  ;;  %v5719_v31 = vld [vmem:[#allocation14_spill] sm:$0xff] }
 0x31b   : > { %v3650_v22 = vadd.f32 %v3516_v45, %v382_v47  ;;  %v3519_v57 = vadd.f32 %v3518_v15, %v3230_v5 }
 0x31d   : > { %3714 = vst [vmem:[#allocation2 + $0x140] sm:$0xff] %v3650_v22  ;;  %v3651_v33 = vadd.f32 %v3519_v57, %v383_v27  ;;  %v390_v27 = vld [vmem:[#allocation2 + $0x180] sm:$0xff] }
 0x31e   : > { %v3234_v54 = vpop.f32.mrb[212].mxu0  ;;  %v3523_v36 = vpop.f32.mrb[212].mxu1 }
 0x31f   : > { %3715 = vst [vmem:[#allocation2 + $0x148] sm:$0xff] %v3651_v33  ;;  %v3235_v61 = vadd.f32 %v3234_v54, %v5713_v43  ;;  %v3236_v48 = vpop.f32.mrb[213].mxu0  ;;  %v3525_v62 = vpop.f32.mrb[213].mxu1  ;;  %v5720_v33 = vld [vmem:[#allocation15_spill] sm:$0xff] }
 0x320   : > { %v3237_v49 = vpop.f32.mrb[214].mxu0  ;;  %v3526_v6 = vpop.f32.mrb[214].mxu1 }
 0x321   : > { %v3524_v0 = vadd.f32 %v3523_v36, %v3235_v61  ;;  %v3238_v51 = vadd.f32 %v3237_v49, %v5714_v10  ;;  %v3239_v56 = vpop.f32.mrb[215].mxu0  ;;  %v3528_v32 = vpop.f32.mrb[215].mxu1  ;;  %v391_v36 = vld [vmem:[#allocation2 + $0x188] sm:$0xff]  ;;  %v5721_v10 = vld [vmem:[#allocation16_spill] sm:$0xff] }
 0x323   : > { %v3652_v2 = vadd.f32 %v3524_v0, %v384_v41  ;;  %v3527_v26 = vadd.f32 %v3526_v6, %v3238_v51 }
 0x325   : > { %3716 = vst [vmem:[#allocation2 + $0x150] sm:$0xff] %v3652_v2  ;;  %v3653_v23 = vadd.f32 %v3527_v26, %v385_v14  ;;  %v392_v14 = vld [vmem:[#allocation2 + $0x190] sm:$0xff] }
 0x326   : > { %v3242_v59 = vpop.f32.mrb[216].mxu0  ;;  %v3531_v3 = vpop.f32.mrb[216].mxu1 }
 0x327   : > { %3717 = vst [vmem:[#allocation2 + $0x158] sm:$0xff] %v3653_v23  ;;  %v3243_v12 = vadd.f32 %v3242_v59, %v5715_v8  ;;  %v3244_v39 = vpop.f32.mrb[217].mxu0  ;;  %v3533_v4 = vpop.f32.mrb[217].mxu1  ;;  %v5722_v23 = vld [vmem:[#allocation17_spill] sm:$0xff] }
 0x328   : > { %v3245_v40 = vpop.f32.mrb[218].mxu0  ;;  %v3534_v17 = vpop.f32.mrb[218].mxu1 }
 0x329   : > { %v3532_v60 = vadd.f32 %v3531_v3, %v3243_v12  ;;  %v3246_v30 = vadd.f32 %v3245_v40, %v5716_v38  ;;  %v3247_v9 = vpop.f32.mrb[219].mxu0  ;;  %v3536_v58 = vpop.f32.mrb[219].mxu1  ;;  %v393_v3 = vld [vmem:[#allocation2 + $0x198] sm:$0xff]  ;;  %v5723_v38 = vld [vmem:[#allocation18_spill] sm:$0xff] }
 0x32b   : > { %v3654_v18 = vadd.f32 %v3532_v60, %v386_v24  ;;  %v3535_v50 = vadd.f32 %v3534_v17, %v3246_v30 }
 0x32d   : > { %3718 = vst [vmem:[#allocation2 + $0x160] sm:$0xff] %v3654_v18  ;;  %v3655_v53 = vadd.f32 %v3535_v50, %v387_v35  ;;  %v394_v35 = vld [vmem:[#allocation2 + $0x1a0] sm:$0xff] }
 0x32e   : > { %v3250_v25 = vpop.f32.mrb[220].mxu0  ;;  %v3539_v46 = vpop.f32.mrb[220].mxu1 }
 0x32f   : > { %3719 = vst [vmem:[#allocation2 + $0x168] sm:$0xff] %v3655_v53  ;;  %v3251_v13 = vadd.f32 %v3250_v25, %v5717_v63  ;;  %v3252_v11 = vpop.f32.mrb[221].mxu0  ;;  %v3541_v29 = vpop.f32.mrb[221].mxu1  ;;  %v5724_v53 = vld [vmem:[#allocation19_spill] sm:$0xff] }
 0x330   : > { %v3253_v16 = vpop.f32.mrb[222].mxu0  ;;  %v3542_v42 = vpop.f32.mrb[222].mxu1 }
 0x331   : > { %v3540_v20 = vadd.f32 %v3539_v46, %v3251_v13  ;;  %v3254_v28 = vadd.f32 %v3253_v16, %v5718_v1  ;;  %v3255_v7 = vpop.f32.mrb[223].mxu0  ;;  %v3544_v52 = vpop.f32.mrb[223].mxu1  ;;  %v395_v46 = vld [vmem:[#allocation2 + $0x1a8] sm:$0xff]  ;;  %v5725_v1 = vld [vmem:[#allocation20_spill] sm:$0xff] }
 0x333   : > { %v3656_v47 = vadd.f32 %v3540_v20, %v388_v19  ;;  %v3543_v44 = vadd.f32 %v3542_v42, %v3254_v28 }
 0x335   : > { %3720 = vst [vmem:[#allocation2 + $0x170] sm:$0xff] %v3656_v47  ;;  %v3657_v21 = vadd.f32 %v3543_v44, %v389_v34  ;;  %v396_v34 = vld [vmem:[#allocation2 + $0x1b0] sm:$0xff] }
 0x336   : > { %v3258_v45 = vpop.f32.mrb[224].mxu0  ;;  %v3547_v15 = vpop.f32.mrb[224].mxu1 }
 0x337   : > { %3721 = vst [vmem:[#allocation2 + $0x178] sm:$0xff] %v3657_v21  ;;  %v3259_v5 = vadd.f32 %v3258_v45, %v5719_v31  ;;  %v3260_v37 = vpop.f32.mrb[225].mxu0  ;;  %v3549_v55 = vpop.f32.mrb[225].mxu1  ;;  %v5726_v21 = vld [vmem:[#allocation21_spill] sm:$0xff] }
 0x338   : > { %v3261_v22 = vpop.f32.mrb[226].mxu0  ;;  %v3550_v43 = vpop.f32.mrb[226].mxu1 }
 0x339   : > { %v3548_v57 = vadd.f32 %v3547_v15, %v3259_v5  ;;  %v3262_v54 = vadd.f32 %v3261_v22, %v5720_v33  ;;  %v3263_v61 = vpop.f32.mrb[227].mxu0  ;;  %v3552_v48 = vpop.f32.mrb[227].mxu1  ;;  %v397_v15 = vld [vmem:[#allocation2 + $0x1b8] sm:$0xff]  ;;  %v5727_v33 = vld [vmem:[#allocation22_spill] sm:$0xff] }
 0x33b   : > { %v3658_v41 = vadd.f32 %v3548_v57, %v390_v27  ;;  %v3551_v62 = vadd.f32 %v3550_v43, %v3262_v54 }
 0x33d   : > { %3722 = vst [vmem:[#allocation2 + $0x180] sm:$0xff] %v3658_v41  ;;  %v3659_v49 = vadd.f32 %v3551_v62, %v391_v36  ;;  %v398_v36 = vld [vmem:[#allocation2 + $0x1c0] sm:$0xff] }
 0x33e   : > { %v3266_v0 = vpop.f32.mrb[228].mxu0  ;;  %v3555_v6 = vpop.f32.mrb[228].mxu1 }
 0x33f   : > { %3723 = vst [vmem:[#allocation2 + $0x188] sm:$0xff] %v3659_v49  ;;  %v3267_v51 = vadd.f32 %v3266_v0, %v5721_v10  ;;  %v3268_v56 = vpop.f32.mrb[229].mxu0  ;;  %v3557_v32 = vpop.f32.mrb[229].mxu1  ;;  %v5728_v49 = vld [vmem:[#allocation23_spill] sm:$0xff] }
 0x340   : > { %v3269_v2 = vpop.f32.mrb[230].mxu0  ;;  %v3558_v8 = vpop.f32.mrb[230].mxu1 }
 0x341   : > { %v3556_v26 = vadd.f32 %v3555_v6, %v3267_v51  ;;  %v3270_v59 = vadd.f32 %v3269_v2, %v5722_v23  ;;  %v3271_v12 = vpop.f32.mrb[231].mxu0  ;;  %v3560_v39 = vpop.f32.mrb[231].mxu1  ;;  %v399_v6 = vld [vmem:[#allocation2 + $0x1c8] sm:$0xff]  ;;  %v5729_v23 = vld [vmem:[#allocation24_spill] sm:$0xff] }
 0x343   : > { %v3660_v24 = vadd.f32 %v3556_v26, %v392_v14  ;;  %v3559_v4 = vadd.f32 %v3558_v8, %v3270_v59 }
 0x345   : > { %3724 = vst [vmem:[#allocation2 + $0x190] sm:$0xff] %v3660_v24  ;;  %v3661_v40 = vadd.f32 %v3559_v4, %v393_v3  ;;  %v400_v3 = vld [vmem:[#allocation2 + $0x1d0] sm:$0xff] }
 0x346   : > { %v3274_v60 = vpop.f32.mrb[232].mxu0  ;;  %v3563_v17 = vpop.f32.mrb[232].mxu1 }
 0x347   : > { %3725 = vst [vmem:[#allocation2 + $0x198] sm:$0xff] %v3661_v40  ;;  %v3275_v30 = vadd.f32 %v3274_v60, %v5723_v38  ;;  %v3276_v9 = vpop.f32.mrb[233].mxu0  ;;  %v3565_v58 = vpop.f32.mrb[233].mxu1  ;;  %v5730_v40 = vld [vmem:[#allocation25_spill] sm:$0xff] }
 0x348   : > { %v3277_v18 = vpop.f32.mrb[234].mxu0  ;;  %v3566_v63 = vpop.f32.mrb[234].mxu1 }
 0x349   : > { %v3564_v50 = vadd.f32 %v3563_v17, %v3275_v30  ;;  %v3278_v25 = vadd.f32 %v3277_v18, %v5724_v53  ;;  %v3279_v13 = vpop.f32.mrb[235].mxu0  ;;  %v3568_v11 = vpop.f32.mrb[235].mxu1  ;;  %v401_v17 = vld [vmem:[#allocation2 + $0x1d8] sm:$0xff]  ;;  %v5731_v53 = vld [vmem:[#allocation26_spill] sm:$0xff] }
 0x34b   : > { %v3662_v19 = vadd.f32 %v3564_v50, %v394_v35  ;;  %v3567_v29 = vadd.f32 %v3566_v63, %v3278_v25 }
 0x34d   : > { %3726 = vst [vmem:[#allocation2 + $0x1a0] sm:$0xff] %v3662_v19  ;;  %v3663_v16 = vadd.f32 %v3567_v29, %v395_v46  ;;  %v402_v46 = vld [vmem:[#allocation2 + $0x1e0] sm:$0xff] }
 0x34e   : > { %v3282_v20 = vpop.f32.mrb[236].mxu0  ;;  %v3571_v42 = vpop.f32.mrb[236].mxu1 }
 0x34f   : > { %3727 = vst [vmem:[#allocation2 + $0x1a8] sm:$0xff] %v3663_v16  ;;  %v3283_v28 = vadd.f32 %v3282_v20, %v5725_v1  ;;  %v3284_v7 = vpop.f32.mrb[237].mxu0  ;;  %v3573_v52 = vpop.f32.mrb[237].mxu1  ;;  %v5732_v16 = vld [vmem:[#allocation27_spill] sm:$0xff] }
 0x350   : > { %v3285_v47 = vpop.f32.mrb[238].mxu0  ;;  %v3574_v31 = vpop.f32.mrb[238].mxu1 }
 0x351   : > { %v3572_v44 = vadd.f32 %v3571_v42, %v3283_v28  ;;  %v3286_v45 = vadd.f32 %v3285_v47, %v5726_v21  ;;  %v3287_v5 = vpop.f32.mrb[239].mxu0  ;;  %v3576_v37 = vpop.f32.mrb[239].mxu1  ;;  %v403_v42 = vld [vmem:[#allocation2 + $0x1e8] sm:$0xff]  ;;  %v5733_v21 = vld [vmem:[#allocation28_spill] sm:$0xff] }
 0x353   : > { %v3664_v27 = vadd.f32 %v3572_v44, %v396_v34  ;;  %v3575_v55 = vadd.f32 %v3574_v31, %v3286_v45 }
 0x355   : > { %3728 = vst [vmem:[#allocation2 + $0x1b0] sm:$0xff] %v3664_v27  ;;  %v3665_v22 = vadd.f32 %v3575_v55, %v397_v15  ;;  %v404_v15 = vld [vmem:[#allocation2 + $0x1f0] sm:$0xff] }
 0x356   : > { %v3290_v57 = vpop.f32.mrb[240].mxu0  ;;  %v3579_v43 = vpop.f32.mrb[240].mxu1 }
 0x357   : > { %3729 = vst [vmem:[#allocation2 + $0x1b8] sm:$0xff] %v3665_v22  ;;  %v3291_v54 = vadd.f32 %v3290_v57, %v5727_v33  ;;  %v3292_v61 = vpop.f32.mrb[241].mxu0  ;;  %v3581_v48 = vpop.f32.mrb[241].mxu1  ;;  %v5734_v22 = vld [vmem:[#allocation29_spill] sm:$0xff] }
 0x358   : > { %v3293_v41 = vpop.f32.mrb[242].mxu0  ;;  %v3582_v10 = vpop.f32.mrb[242].mxu1 }
 0x359   : > { %v3580_v62 = vadd.f32 %v3579_v43, %v3291_v54  ;;  %v3294_v0 = vadd.f32 %v3293_v41, %v5728_v49  ;;  %v3295_v51 = vpop.f32.mrb[243].mxu0  ;;  %v3584_v56 = vpop.f32.mrb[243].mxu1  ;;  %v405_v43 = vld [vmem:[#allocation2 + $0x1f8] sm:$0xff]  ;;  %v5526_v49 = vld [vmem:[%s5682_s2] ss:$0 sm:$0xff] (!%p4464_p6) }
 0x35a   : > { %v3745_v56 = vld [vmem:[#allocation2 + $0x18] sm:$0xff] (!%p4464_p6) }
 0x35b   : > { %v3666_v14 = vadd.f32 %v3580_v62, %v398_v36  ;;  %v3583_v32 = vadd.f32 %v3582_v10, %v3294_v0  ;;  %v3742_v62 = vld [vmem:[#allocation2] sm:$0xff] (!%p4464_p6)  ;;  %v3743_v0 = vld [vmem:[#allocation2 + $0x8] sm:$0xff] (!%p4464_p6) }
 0x35c   : > { %v3813_v10 = vadd.f32 (!%p4464_p6), %v5526_v49, %v3742_v62  ;;  %v3814_v51 = vadd.f32 (!%p4464_p6), %v5526_v49, %v3743_v0 }
 0x35d   : > { %3730 = vst [vmem:[#allocation2 + $0x1c0] sm:$0xff] %v3666_v14  ;;  %v3667_v2 = vadd.f32 %v3583_v32, %v399_v6  ;;  %v3744_v6 = vld [vmem:[#allocation2 + $0x10] sm:$0xff] (!%p4464_p6)  ;;  %v3746_v14 = vld [vmem:[#allocation2 + $0x20] sm:$0xff] (!%p4464_p6) }
 0x35e   : > { %v3298_v26 = vpop.f32.mrb[244].mxu0  ;;  %v3587_v8 = vpop.f32.mrb[244].mxu1  ;;  %v3815_v32 = vadd.f32 (!%p4464_p6), %v5526_v49, %v3744_v6  ;;  %v3768_v6 = vld [vmem:[#allocation2 + $0xd0] sm:$0xff] (!%p4464_p6) }
 0x35f   : > { %3731 = vst [vmem:[#allocation2 + $0x1c8] sm:$0xff] %v3667_v2  ;;  %v3299_v59 = vadd.f32 %v3298_v26, %v5729_v23  ;;  %v3300_v12 = vpop.f32.mrb[245].mxu0  ;;  %v3589_v39 = vpop.f32.mrb[245].mxu1  ;;  %v3816_v2 = vadd.f32 (!%p4464_p6), %v5526_v49, %v3745_v56  ;;  %v3817_v26 = vadd.f32 (!%p4464_p6), %v5526_v49, %v3746_v14  ;;  %v3747_v23 = vld [vmem:[#allocation2 + $0x28] sm:$0xff] (!%p4464_p6)  ;;  %v3769_v56 = vld [vmem:[#allocation2 + $0xd8] sm:$0xff] (!%p4464_p6)  ;;  %v3770_v14 = vld [vmem:[#allocation2 + $0xe0] sm:$0xff] (!%p4464_p6) }
 0x360   : > { %v3301_v24 = vpop.f32.mrb[246].mxu0  ;;  %v3590_v38 = vpop.f32.mrb[246].mxu1  ;;  %v3877_v12 = vmax.f32 (!%p4464_p6), %v3813_v10, 0.0  ;;  %v3818_v39 = vadd.f32 (!%p4464_p6), %v5526_v49, %v3747_v23 }
 0x361   : > { %v3588_v4 = vadd.f32 %v3587_v8, %v3299_v59  ;;  %v3302_v60 = vadd.f32 %v3301_v24, %v5730_v40  ;;  %v3303_v30 = vpop.f32.mrb[247].mxu0  ;;  %v3592_v9 = vpop.f32.mrb[247].mxu1  ;;  %v3748_v59 = vld [vmem:[#allocation2 + $0x30] sm:$0xff] (!%p4464_p6)  ;;  %v3749_v8 = vld [vmem:[#allocation2 + $0x38] sm:$0xff] (!%p4464_p6)  ;;  %v3751_v40 = vld [vmem:[#allocation2 + $0x48] sm:$0xff] (!%p4464_p6) }
 0x362   : > { %v3819_v24 = vadd.f32 (!%p4464_p6), %v5526_v49, %v3748_v59  ;;  %v3880_v30 = vmax.f32 (!%p4464_p6), %v3816_v2, 0.0  ;;  %v3820_v9 = vadd.f32 (!%p4464_p6), %v5526_v49, %v3749_v8  ;;  %3941 = vst [vmem:[%s4863_s26] sm:$0xff] (!%p4464_p6), %v3877_v12  ;;  %v3771_v59 = vld [vmem:[#allocation2 + $0xe8] sm:$0xff] (!%p4464_p6)  ;;  %v3772_v8 = vld [vmem:[#allocation2 + $0xf0] sm:$0xff] (!%p4464_p6) }
 0x363   : > { %v3668_v35 = vadd.f32 %v3588_v4, %v400_v3  ;;  %v3591_v58 = vadd.f32 %v3590_v38, %v3302_v60  ;;  %v3878_v3 = vmax.f32 (!%p4464_p6), %v3814_v51, 0.0  ;;  %v3750_v4 = vld [vmem:[#allocation2 + $0x40] sm:$0xff] (!%p4464_p6)  ;;  %v3752_v60 = vld [vmem:[#allocation2 + $0x50] sm:$0xff] (!%p4464_p6)  ;;  %v3879_v38 = vmax.f32 (!%p4464_p6), %v3815_v32, 0.0 }
 0x364   : > { %3944 = vst [vmem:[%s4863_s26 + $0x18] sm:$0xff] (!%p4464_p6), %v3880_v30  ;;  %v3841_v30 = vadd.f32 (!%p4464_p6), %v5526_v49, %v3770_v14 }
 0x365   : > { %3732 = vst [vmem:[#allocation2 + $0x1d0] sm:$0xff] %v3668_v35  ;;  %v3669_v18 = vadd.f32 %v3591_v58, %v401_v17  ;;  %v3881_v17 = vmax.f32 (!%p4464_p6), %v3817_v26, 0.0  ;;  %v3753_v35 = vld [vmem:[#allocation2 + $0x58] sm:$0xff] (!%p4464_p6)  ;;  %v3754_v58 = vld [vmem:[#allocation2 + $0x60] sm:$0xff] (!%p4464_p6)  ;;  %3942 = vst [vmem:[%s4863_s26 + $0x8] sm:$0xff] (!%p4464_p6), %v3878_v3 }
 0x366   : > { %v3306_v50 = vpop.f32.mrb[248].mxu0  ;;  %v3595_v63 = vpop.f32.mrb[248].mxu1  ;;  %3943 = vst [vmem:[%s4863_s26 + $0x10] sm:$0xff] (!%p4464_p6), %v3879_v38  ;;  %v3840_v38 = vadd.f32 (!%p4464_p6), %v5526_v49, %v3769_v56 }
 0x367   : > { %3733 = vst [vmem:[#allocation2 + $0x1d8] sm:$0xff] %v3669_v18  ;;  %v3307_v25 = vadd.f32 %v3306_v50, %v5731_v53  ;;  %v3308_v13 = vpop.f32.mrb[249].mxu0  ;;  %v3597_v11 = vpop.f32.mrb[249].mxu1  ;;  %v3755_v18 = vld [vmem:[#allocation2 + $0x68] sm:$0xff] (!%p4464_p6)  ;;  %v3882_v50 = vmax.f32 (!%p4464_p6), %v3818_v39, 0.0  ;;  %v3883_v53 = vmax.f32 (!%p4464_p6), %v3819_v24, 0.0 }
 0x368   : > { %v3309_v19 = vpop.f32.mrb[250].mxu0  ;;  %v3598_v1 = vpop.f32.mrb[250].mxu1  ;;  %v3756_v13 = vld [vmem:[#allocation2 + $0x70] sm:$0xff] (!%p4464_p6)  ;;  %3945 = vst [vmem:[%s4863_s26 + $0x20] sm:$0xff] (!%p4464_p6), %v3881_v17  ;;  %v3884_v11 = vmax.f32 (!%p4464_p6), %v3820_v9, 0.0  ;;  %v3774_v17 = vld [vmem:[#allocation2 + $0x100] sm:$0xff] (!%p4464_p6) }
 0x369   : > { %v3596_v29 = vadd.f32 %v3595_v63, %v3307_v25  ;;  %v3310_v20 = vadd.f32 %v3309_v19, %v5732_v16  ;;  %v3311_v28 = vpop.f32.mrb[251].mxu0  ;;  %v3600_v7 = vpop.f32.mrb[251].mxu1  ;;  %v3821_v25 = vadd.f32 (!%p4464_p6), %v5526_v49, %v3750_v4  ;;  %v3822_v63 = vadd.f32 (!%p4464_p6), %v5526_v49, %v3751_v40  ;;  %3946 = vst [vmem:[%s4863_s26 + $0x28] sm:$0xff] (!%p4464_p6), %v3882_v50  ;;  %v3773_v4 = vld [vmem:[#allocation2 + $0xf8] sm:$0xff] (!%p4464_p6)  ;;  %v3775_v9 = vld [vmem:[#allocation2 + $0x108] sm:$0xff] (!%p4464_p6) }
 0x36a   : > { %v3823_v19 = vadd.f32 (!%p4464_p6), %v5526_v49, %v3752_v60  ;;  %v3825_v16 = vadd.f32 (!%p4464_p6), %v5526_v49, %v3754_v58  ;;  %3947 = vst [vmem:[%s4863_s26 + $0x30] sm:$0xff] (!%p4464_p6), %v3883_v53  ;;  %v3826_v7 = vadd.f32 (!%p4464_p6), %v5526_v49, %v3755_v18  ;;  %3948 = vst [vmem:[%s4863_s26 + $0x38] sm:$0xff] (!%p4464_p6), %v3884_v11  ;;  %v3776_v53 = vld [vmem:[#allocation2 + $0x110] sm:$0xff] (!%p4464_p6)  ;;  %v3905_v11 = vmax.f32 (!%p4464_p6), %v3841_v30, 0.0 }
 0x36b   : > { %v3670_v34 = vadd.f32 %v3596_v29, %v402_v46  ;;  %v3599_v52 = vadd.f32 %v3598_v1, %v3310_v20  ;;  %v3757_v46 = vld [vmem:[#allocation2 + $0x78] sm:$0xff] (!%p4464_p6)  ;;  %v3824_v29 = vadd.f32 (!%p4464_p6), %v5526_v49, %v3753_v35  ;;  %v3758_v20 = vld [vmem:[#allocation2 + $0x80] sm:$0xff] (!%p4464_p6)  ;;  %v3759_v1 = vld [vmem:[#allocation2 + $0x88] sm:$0xff] (!%p4464_p6)  ;;  %v3885_v28 = vmax.f32 (!%p4464_p6), %v3821_v25, 0.0 }
 0x36c   : > { %v3839_v60 = vadd.f32 (!%p4464_p6), %v5526_v49, %v3768_v6  ;;  %v3842_v18 = vadd.f32 (!%p4464_p6), %v5526_v49, %v3771_v59  ;;  %v3843_v50 = vadd.f32 (!%p4464_p6), %v5526_v49, %v3772_v8  ;;  %v3777_v25 = vld [vmem:[#allocation2 + $0x118] sm:$0xff] (!%p4464_p6)  ;;  %3969 = vst [vmem:[%s4863_s26 + $0xe0] sm:$0xff] (!%p4464_p6), %v3905_v11  ;;  %v3796_v30 = vld [vmem:[#allocation2 + $0x1b0] sm:$0xff] (!%p4464_p6) }
 0x36d   : > { %3734 = vst [vmem:[#allocation2 + $0x1e0] sm:$0xff] %v3670_v34  ;;  %v3671_v47 = vadd.f32 %v3599_v52, %v403_v42  ;;  %v3886_v42 = vmax.f32 (!%p4464_p6), %v3822_v63, 0.0  ;;  %v3827_v34 = vadd.f32 (!%p4464_p6), %v5526_v49, %v3756_v13  ;;  %v3760_v52 = vld [vmem:[#allocation2 + $0x90] sm:$0xff] (!%p4464_p6)  ;;  %3949 = vst [vmem:[%s4863_s26 + $0x40] sm:$0xff] (!%p4464_p6), %v3885_v28  ;;  %v3778_v63 = vld [vmem:[#allocation2 + $0x120] sm:$0xff] (!%p4464_p6)  ;;  %v3845_v28 = vadd.f32 (!%p4464_p6), %v5526_v49, %v3774_v17 }
 0x36e   : > { %v3314_v44 = vpop.f32.mrb[252].mxu0  ;;  %v3603_v31 = vpop.f32.mrb[252].mxu1  ;;  %v3903_v13 = vmax.f32 (!%p4464_p6), %v3839_v60, 0.0 }
 0x36f   : > { %3735 = vst [vmem:[#allocation2 + $0x1e8] sm:$0xff] %v3671_v47  ;;  %v3315_v45 = vadd.f32 %v3314_v44, %v5733_v21  ;;  %v3316_v5 = vpop.f32.mrb[253].mxu0  ;;  %v3605_v37 = vpop.f32.mrb[253].mxu1  ;;  %v3761_v47 = vld [vmem:[#allocation2 + $0x98] sm:$0xff] (!%p4464_p6)  ;;  %v3762_v44 = vld [vmem:[#allocation2 + $0xa0] sm:$0xff] (!%p4464_p6)  ;;  %v3887_v21 = vmax.f32 (!%p4464_p6), %v3823_v19, 0.0  ;;  %v3844_v19 = vadd.f32 (!%p4464_p6), %v5526_v49, %v3773_v4 }
 0x370   : > { %v3317_v27 = vpop.f32.mrb[254].mxu0  ;;  %v3606_v33 = vpop.f32.mrb[254].mxu1  ;;  %v3828_v5 = vadd.f32 (!%p4464_p6), %v5526_v49, %v3757_v46  ;;  %v3764_v37 = vld [vmem:[#allocation2 + $0xb0] sm:$0xff] (!%p4464_p6)  ;;  %3950 = vst [vmem:[%s4863_s26 + $0x48] sm:$0xff] (!%p4464_p6), %v3886_v42  ;;  %v3904_v46 = vmax.f32 (!%p4464_p6), %v3840_v38, 0.0  ;;  %v3846_v42 = vadd.f32 (!%p4464_p6), %v5526_v49, %v3775_v9  ;;  %3967 = vst [vmem:[%s4863_s26 + $0xd0] sm:$0xff] (!%p4464_p6), %v3903_v13 }
 0x371   : > { %v3604_v55 = vadd.f32 %v3603_v31, %v3315_v45  ;;  %v3318_v57 = vadd.f32 %v3317_v27, %v5734_v22  ;;  %v3319_v54 = vpop.f32.mrb[255].mxu0  ;;  %v3608_v61 = vpop.f32.mrb[255].mxu1  ;;  %3741 = sbr.rel (%p4464_p6) target bundleno = 909 (0x38d), region = 44  ;;  %v3888_v45 = vmax.f32 (!%p4464_p6), %v3824_v29, 0.0  ;;  %v3889_v31 = vmax.f32 (!%p4464_p6), %v3825_v16, 0.0  ;;  %3951 = vst [vmem:[%s4863_s26 + $0x50] sm:$0xff] (!%p4464_p6), %v3887_v21 }
 0x372   : > { %v3890_v27 = vmax.f32 (!%p4464_p6), %v3826_v7, 0.0  ;;  %v3829_v22 = vadd.f32 (!%p4464_p6), %v5526_v49, %v3758_v20  ;;  %v3892_v54 = vmax.f32 (!%p4464_p6), %v3828_v5, 0.0  ;;  %v3832_v61 = vadd.f32 (!%p4464_p6), %v5526_v49, %v3761_v47  ;;  %v3779_v29 = vld [vmem:[#allocation2 + $0x128] sm:$0xff] (!%p4464_p6)  ;;  %v3780_v16 = vld [vmem:[#allocation2 + $0x130] sm:$0xff] (!%p4464_p6)  ;;  %v3781_v7 = vld [vmem:[#allocation2 + $0x138] sm:$0xff] (!%p4464_p6)  ;;  %3968 = vst [vmem:[%s4863_s26 + $0xd8] sm:$0xff] (!%p4464_p6), %v3904_v46 }
 0x373   : > { %v3672_v36 = vadd.f32 %v3604_v55, %v404_v15  ;;  %v3607_v48 = vadd.f32 %v3606_v33, %v3318_v57  ;;  %v3763_v15 = vld [vmem:[#allocation2 + $0xa8] sm:$0xff] (!%p4464_p6)  ;;  %v3891_v55 = vmax.f32 (!%p4464_p6), %v3827_v34, 0.0  ;;  %v3830_v57 = vadd.f32 (!%p4464_p6), %v5526_v49, %v3759_v1  ;;  %v3765_v33 = vld [vmem:[#allocation2 + $0xb8] sm:$0xff] (!%p4464_p6)  ;;  %3952 = vst [vmem:[%s4863_s26 + $0x58] sm:$0xff] (!%p4464_p6), %v3888_v45  ;;  %3953 = vst [vmem:[%s4863_s26 + $0x60] sm:$0xff] (!%p4464_p6), %v3889_v31 }
 0x374   : > { %3954 = vst [vmem:[%s4863_s26 + $0x68] sm:$0xff] (!%p4464_p6), %v3890_v27  ;;  %v3893_v62 = vmax.f32 (!%p4464_p6), %v3829_v22, 0.0  ;;  %v3834_v10 = vadd.f32 (!%p4464_p6), %v5526_v49, %v3763_v15  ;;  %v3835_v51 = vadd.f32 (!%p4464_p6), %v5526_v49, %v3764_v37  ;;  %3956 = vst [vmem:[%s4863_s26 + $0x78] sm:$0xff] (!%p4464_p6), %v3892_v54  ;;  %v3896_v2 = vmax.f32 (!%p4464_p6), %v3832_v61, 0.0  ;;  %v3782_v21 = vld [vmem:[#allocation2 + $0x140] sm:$0xff] (!%p4464_p6)  ;;  %v3783_v45 = vld [vmem:[#allocation2 + $0x148] sm:$0xff] (!%p4464_p6) }
 0x375   : > { %3736 = vst [vmem:[#allocation2 + $0x1f0] sm:$0xff] %v3672_v36  ;;  %v3673_v41 = vadd.f32 %v3607_v48, %v405_v43  ;;  %v3831_v43 = vadd.f32 (!%p4464_p6), %v5526_v49, %v3760_v52  ;;  %v3833_v36 = vadd.f32 (!%p4464_p6), %v5526_v49, %v3762_v44  ;;  %v3766_v48 = vld [vmem:[#allocation2 + $0xc0] sm:$0xff] (!%p4464_p6)  ;;  %3955 = vst [vmem:[%s4863_s26 + $0x70] sm:$0xff] (!%p4464_p6), %v3891_v55  ;;  %v3894_v0 = vmax.f32 (!%p4464_p6), %v3830_v57, 0.0  ;;  %v3784_v27 = vld [vmem:[#allocation2 + $0x150] sm:$0xff] (!%p4464_p6) }
 0x376   : > { %v3836_v23 = vadd.f32 (!%p4464_p6), %v5526_v49, %v3765_v33  ;;  %3957 = vst [vmem:[%s4863_s26 + $0x80] sm:$0xff] (!%p4464_p6), %v3893_v62  ;;  %v3898_v12 = vmax.f32 (!%p4464_p6), %v3834_v10, 0.0  ;;  %v3899_v3 = vmax.f32 (!%p4464_p6), %v3835_v51, 0.0  ;;  %v3837_v39 = vadd.f32 (!%p4464_p6), %v5526_v49, %v3766_v48  ;;  %3960 = vst [vmem:[%s4863_s26 + $0x98] sm:$0xff] (!%p4464_p6), %v3896_v2  ;;  %v3785_v55 = vld [vmem:[#allocation2 + $0x158] sm:$0xff] (!%p4464_p6)  ;;  %v3786_v22 = vld [vmem:[#allocation2 + $0x160] sm:$0xff] (!%p4464_p6) }
 0x377   : > { %3737 = vst [vmem:[#allocation2 + $0x1f8] sm:$0xff] %v3673_v41  ;;  %v3767_v41 = vld [vmem:[#allocation2 + $0xc8] sm:$0xff] (!%p4464_p6)  ;;  %v3895_v32 = vmax.f32 (!%p4464_p6), %v3831_v43, 0.0  ;;  %v3897_v26 = vmax.f32 (!%p4464_p6), %v3833_v36, 0.0  ;;  %3958 = vst [vmem:[%s4863_s26 + $0x88] sm:$0xff] (!%p4464_p6), %v3894_v0  ;;  %v3906_v20 = vmax.f32 (!%p4464_p6), %v3842_v18, 0.0  ;;  %v3847_v52 = vadd.f32 (!%p4464_p6), %v5526_v49, %v3776_v53 }
 0x378   : > { %v3838_v24 = vadd.f32 %v5526_v49, %v3767_v41  ;;  %v3900_v40 = vmax.f32 %v3836_v23, 0.0  ;;  %3962 = vst [vmem:[%s4863_s26 + $0xa8] sm:$0xff] %v3898_v12  ;;  %3963 = vst [vmem:[%s4863_s26 + $0xb0] sm:$0xff] %v3899_v3  ;;  %v3901_v35 = vmax.f32 %v3837_v39, 0.0  ;;  %v3907_v1 = vmax.f32 %v3843_v50, 0.0  ;;  %v3787_v61 = vld [vmem:[#allocation2 + $0x168] sm:$0xff] }
 0x379   : > { %3959 = vst [vmem:[%s4863_s26 + $0x90] sm:$0xff] %v3895_v32  ;;  %3961 = vst [vmem:[%s4863_s26 + $0xa0] sm:$0xff] %v3897_v26  ;;  %v3908_v34 = vmax.f32 %v3844_v19, 0.0  ;;  %v3848_v47 = vadd.f32 %v5526_v49, %v3777_v25  ;;  %v3849_v44 = vadd.f32 %v5526_v49, %v3778_v63  ;;  %v3909_v31 = vmax.f32 %v3845_v28, 0.0  ;;  %v3788_v36 = vld [vmem:[#allocation2 + $0x170] sm:$0xff]  ;;  %v3789_v10 = vld [vmem:[#allocation2 + $0x178] sm:$0xff] }
 0x37a   : > { %v3902_v58 = vmax.f32 %v3838_v24, 0.0  ;;  %3964 = vst [vmem:[%s4863_s26 + $0xb8] sm:$0xff] %v3900_v40  ;;  %3965 = vst [vmem:[%s4863_s26 + $0xc0] sm:$0xff] %v3901_v35  ;;  %v3910_v5 = vmax.f32 %v3846_v42, 0.0  ;;  %v3850_v15 = vadd.f32 %v5526_v49, %v3779_v29  ;;  %v3851_v37 = vadd.f32 %v5526_v49, %v3780_v16  ;;  %v3790_v32 = vld [vmem:[#allocation2 + $0x180] sm:$0xff]  ;;  %v3791_v2 = vld [vmem:[#allocation2 + $0x188] sm:$0xff] }
 0x37b   : > { %3970 = vst [vmem:[%s4863_s26 + $0xe8] sm:$0xff] %v3906_v20  ;;  %3971 = vst [vmem:[%s4863_s26 + $0xf0] sm:$0xff] %v3907_v1  ;;  %v3911_v57 = vmax.f32 %v3847_v52, 0.0  ;;  %v3912_v33 = vmax.f32 %v3848_v47, 0.0  ;;  %v3913_v54 = vmax.f32 %v3849_v44, 0.0  ;;  %v3852_v43 = vadd.f32 %v5526_v49, %v3781_v7  ;;  %v3792_v12 = vld [vmem:[#allocation2 + $0x190] sm:$0xff] }
 0x37c   : > { %3966 = vst [vmem:[%s4863_s26 + $0xc8] sm:$0xff] %v3902_v58  ;;  %3972 = vst [vmem:[%s4863_s26 + $0xf8] sm:$0xff] %v3908_v34  ;;  %v3914_v48 = vmax.f32 %v3850_v15, 0.0  ;;  %v3915_v41 = vmax.f32 %v3851_v37, 0.0  ;;  %v3853_v62 = vadd.f32 %v5526_v49, %v3782_v21  ;;  %v3854_v0 = vadd.f32 %v5526_v49, %v3783_v45  ;;  %v3793_v3 = vld [vmem:[#allocation2 + $0x198] sm:$0xff]  ;;  %v3794_v39 = vld [vmem:[#allocation2 + $0x1a0] sm:$0xff] }
 0x37d   : > { %3973 = vst [vmem:[%s4863_s26 + $0x100] sm:$0xff] %v3909_v31  ;;  %3974 = vst [vmem:[%s4863_s26 + $0x108] sm:$0xff] %v3910_v5  ;;  %v3916_v51 = vmax.f32 %v3852_v43, 0.0  ;;  %v3855_v6 = vadd.f32 %v5526_v49, %v3784_v27  ;;  %v3856_v56 = vadd.f32 %v5526_v49, %v3785_v55  ;;  %v3857_v14 = vadd.f32 %v5526_v49, %v3786_v22  ;;  %v3795_v38 = vld [vmem:[#allocation2 + $0x1a8] sm:$0xff]  ;;  %v3797_v18 = vld [vmem:[#allocation2 + $0x1b8] sm:$0xff] }
 0x37e   : > { %3975 = vst [vmem:[%s4863_s26 + $0x110] sm:$0xff] %v3911_v57  ;;  %3976 = vst [vmem:[%s4863_s26 + $0x118] sm:$0xff] %v3912_v33  ;;  %v3917_v26 = vmax.f32 %v3853_v62, 0.0  ;;  %v3918_v23 = vmax.f32 %v3854_v0, 0.0  ;;  %v3858_v59 = vadd.f32 %v5526_v49, %v3787_v61  ;;  %v3859_v8 = vadd.f32 %v5526_v49, %v3788_v36  ;;  %v3798_v13 = vld [vmem:[#allocation2 + $0x1c0] sm:$0xff]  ;;  %v3799_v46 = vld [vmem:[#allocation2 + $0x1c8] sm:$0xff] }
 0x37f   : > { %3977 = vst [vmem:[%s4863_s26 + $0x120] sm:$0xff] %v3913_v54  ;;  %3978 = vst [vmem:[%s4863_s26 + $0x128] sm:$0xff] %v3914_v48  ;;  %v3919_v24 = vmax.f32 %v3855_v6, 0.0  ;;  %v3920_v4 = vmax.f32 %v3856_v56, 0.0  ;;  %v3921_v40 = vmax.f32 %v3857_v14, 0.0  ;;  %v3860_v60 = vadd.f32 %v5526_v49, %v3789_v10  ;;  %v3800_v20 = vld [vmem:[#allocation2 + $0x1d0] sm:$0xff] }
 0x380   : > { %3979 = vst [vmem:[%s4863_s26 + $0x130] sm:$0xff] %v3915_v41  ;;  %3980 = vst [vmem:[%s4863_s26 + $0x138] sm:$0xff] %v3916_v51  ;;  %v3922_v17 = vmax.f32 %v3858_v59, 0.0  ;;  %v3923_v9 = vmax.f32 %v3859_v8, 0.0  ;;  %v3861_v35 = vadd.f32 %v5526_v49, %v3790_v32  ;;  %v3862_v58 = vadd.f32 %v5526_v49, %v3791_v2  ;;  %v3801_v1 = vld [vmem:[#allocation2 + $0x1d8] sm:$0xff]  ;;  %v3802_v28 = vld [vmem:[#allocation2 + $0x1e0] sm:$0xff] }
 0x381   : > { %3981 = vst [vmem:[%s4863_s26 + $0x140] sm:$0xff] %v3917_v26  ;;  %3982 = vst [vmem:[%s4863_s26 + $0x148] sm:$0xff] %v3918_v23  ;;  %v3924_v50 = vmax.f32 %v3860_v60, 0.0  ;;  %v3863_v53 = vadd.f32 %v5526_v49, %v3792_v12  ;;  %v3864_v25 = vadd.f32 %v5526_v49, %v3793_v3  ;;  %v3865_v63 = vadd.f32 %v5526_v49, %v3794_v39  ;;  %v3803_v47 = vld [vmem:[#allocation2 + $0x1e8] sm:$0xff]  ;;  %v3804_v44 = vld [vmem:[#allocation2 + $0x1f0] sm:$0xff] }
 0x382   : > { %3983 = vst [vmem:[%s4863_s26 + $0x150] sm:$0xff] %v3919_v24  ;;  %3984 = vst [vmem:[%s4863_s26 + $0x158] sm:$0xff] %v3920_v4  ;;  %v3925_v11 = vmax.f32 %v3861_v35, 0.0  ;;  %v3926_v19 = vmax.f32 %v3862_v58, 0.0  ;;  %v3866_v29 = vadd.f32 %v5526_v49, %v3795_v38  ;;  %v3867_v16 = vadd.f32 %v5526_v49, %v3796_v30  ;;  %v3805_v15 = vld [vmem:[#allocation2 + $0x1f8] sm:$0xff] }
 0x383   : > { %3985 = vst [vmem:[%s4863_s26 + $0x160] sm:$0xff] %v3921_v40  ;;  %3986 = vst [vmem:[%s4863_s26 + $0x168] sm:$0xff] %v3922_v17  ;;  %v3927_v42 = vmax.f32 %v3863_v53, 0.0  ;;  %v3928_v7 = vmax.f32 %v3864_v25, 0.0  ;;  %v3929_v34 = vmax.f32 %v3865_v63, 0.0  ;;  %v3868_v52 = vadd.f32 %v5526_v49, %v3797_v18 }
 0x384   : > { %3987 = vst [vmem:[%s4863_s26 + $0x170] sm:$0xff] %v3923_v9  ;;  %3988 = vst [vmem:[%s4863_s26 + $0x178] sm:$0xff] %v3924_v50  ;;  %v3930_v21 = vmax.f32 %v3866_v29, 0.0  ;;  %v3931_v45 = vmax.f32 %v3867_v16, 0.0  ;;  %v3869_v31 = vadd.f32 %v5526_v49, %v3798_v13  ;;  %v3870_v5 = vadd.f32 %v5526_v49, %v3799_v46 }
 0x385   : > { %3989 = vst [vmem:[%s4863_s26 + $0x180] sm:$0xff] %v3925_v11  ;;  %3990 = vst [vmem:[%s4863_s26 + $0x188] sm:$0xff] %v3926_v19  ;;  %v3932_v37 = vmax.f32 %v3868_v52, 0.0  ;;  %v3871_v27 = vadd.f32 %v5526_v49, %v3800_v20  ;;  %v3872_v55 = vadd.f32 %v5526_v49, %v3801_v1  ;;  %v3873_v22 = vadd.f32 %v5526_v49, %v3802_v28 }
 0x386   : > { %3991 = vst [vmem:[%s4863_s26 + $0x190] sm:$0xff] %v3927_v42  ;;  %3992 = vst [vmem:[%s4863_s26 + $0x198] sm:$0xff] %v3928_v7  ;;  %v3933_v57 = vmax.f32 %v3869_v31, 0.0  ;;  %v3934_v33 = vmax.f32 %v3870_v5, 0.0  ;;  %v3874_v54 = vadd.f32 %v5526_v49, %v3803_v47  ;;  %v3875_v43 = vadd.f32 %v5526_v49, %v3804_v44 }
 0x387   : > { %3993 = vst [vmem:[%s4863_s26 + $0x1a0] sm:$0xff] %v3929_v34  ;;  %3994 = vst [vmem:[%s4863_s26 + $0x1a8] sm:$0xff] %v3930_v21  ;;  %v3935_v61 = vmax.f32 %v3871_v27, 0.0  ;;  %v3936_v36 = vmax.f32 %v3872_v55, 0.0  ;;  %v3937_v48 = vmax.f32 %v3873_v22, 0.0  ;;  %v3876_v41 = vadd.f32 %v5526_v49, %v3805_v15 }
 0x388   : > { %3995 = vst [vmem:[%s4863_s26 + $0x1b0] sm:$0xff] %v3931_v45  ;;  %3996 = vst [vmem:[%s4863_s26 + $0x1b8] sm:$0xff] %v3932_v37  ;;  %v3938_v62 = vmax.f32 %v3874_v54, 0.0  ;;  %v3939_v0 = vmax.f32 %v3875_v43, 0.0 }
 0x389   : > { %3997 = vst [vmem:[%s4863_s26 + $0x1c0] sm:$0xff] %v3933_v57  ;;  %3998 = vst [vmem:[%s4863_s26 + $0x1c8] sm:$0xff] %v3934_v33  ;;  %v3940_v10 = vmax.f32 %v3876_v41, 0.0 }
 0x38a   : > { %3999 = vst [vmem:[%s4863_s26 + $0x1d0] sm:$0xff] %v3935_v61  ;;  %4000 = vst [vmem:[%s4863_s26 + $0x1d8] sm:$0xff] %v3936_v36 }
 0x38b   : > { %4001 = vst [vmem:[%s4863_s26 + $0x1e0] sm:$0xff] %v3937_v48  ;;  %4002 = vst [vmem:[%s4863_s26 + $0x1e8] sm:$0xff] %v3938_v62 }
 0x38c   : > { %4003 = vst [vmem:[%s4863_s26 + $0x1f0] sm:$0xff] %v3939_v0  ;;  %4004 = vst [vmem:[%s4863_s26 + $0x1f8] sm:$0xff] %v3940_v10 }
 0x38d PF: > { %s16_s19 = sadd.s32 1, %s4705_s19   ;;  %s5735_s12 = smov %s4681_s13 }
 0x38e   : > { %p13_p8 = scmp.ge.s32.totalorder %s16_s19, 20   ;;  %s5736_s13 = smov %s4685_s14 }
 0x38f   : > { %s5737_s14 = smov %s4800_s5  ;;  %s5738_s15 = smov %s4697_s17 }
 0x390   : > { %s5739_s16 = smov %s4701_s18  ;;  %s5740_s17 = smov %s5743_s21 }
 0x391   : > { %s5741_s18 = smov %s5747_s22  ;;  %15 = sbr.rel (!%p13_p8) target bundleno = 5 (0x5), region = 86 }
 0x398   :  { %4033 = vsyncpa [#allocation4], 1 }
 0x399   :  { %4035 = vsyncpa [#allocation4 + $0x1], 1 }

// kernel: network_forward.15
= control target key start
LH: loop header
LB: loop body
LE: loop exit
PB: predicated region body
PF: predicated region fallthrough
CT: control target
= control target key end

     0   :  { %v29_v0 = vlaneseq  ;;  %v473_v1 = vmov 1983009808   ;;  %vm462_vm0 = vcmask 1041408   ;;  %vm463_vm1 = vcmask 1043458   ;;  %s659_s2 = inlined_call_operand.vmem [shape: f32[1,2901], index: 2, kind: input, shape index: {}]   ;;  %s660_s3 = inlined_call_operand.vmem [shape: f32[1,2901], index: 3, kind: input, shape index: {}]   ;;  %s661_s0 = inlined_call_operand.vmem [shape: f32[2,2901], index: 0, kind: input, shape index: {}]   ;;  %s662_s1 = inlined_call_operand.vmem [shape: f32[2,2901], index: 1, kind: input, shape index: {}]   ;;  %s663_s4 = inlined_call_operand.vmem [shape: f32[2,2901], index: 4, kind: output, shape index: {}]  }
   0x1   :  { %v124_v2 = vunpack.c.l.s4 %v473_v1  ;;  %v23_v4 = vld [vmem:[%s659_s2] sm:$0xff]  ;;  %v24_v35 = vld [vmem:[%s659_s2 + $0x8] sm:$0xff]  ;;  %vm464_vm2 = vmor %vm463_vm1, %vm462_vm0  ;;  %vm465_vm3 = vcmask 693252  }
   0x2   :  { %v30_v3 = vshrl.u32 %v29_v0, 7  ;;  %v240_v10 = vld [vmem:[%s660_s3] sm:$0xff]  ;;  %v241_v50 = vld [vmem:[%s660_s3 + $0x8] sm:$0xff]  ;;  %vm466_vm4 = vmor %vm465_vm3, %vm464_vm2 }
   0x3   :  { %v125_v5 = vunpack.c.0.s8 %v124_v2  ;;  %v17_v36 = vld [vmem:[%s661_s0] sm:$0xff]  ;;  %v18_v59 = vld [vmem:[%s661_s0 + $0x8] sm:$0xff] }
   0x4   :  { %v502_v6 = vsub.s32 0, %v30_v3  ;;  %v504_v7 = vsub.s32 1, %v30_v3  ;;  %v506_v8 = vsub.s32 2, %v30_v3  ;;  %v508_v9 = vsub.s32 3, %v30_v3  ;;  %v234_v42 = vld [vmem:[%s662_s1] sm:$0xff]  ;;  %v235_v2 = vld [vmem:[%s662_s1 + $0x8] sm:$0xff] }
   0x5   :  { %v513_v11 = vsub.s32 %v125_v5, %v30_v3  ;;  %v515_v12 = vsub.s32 4, %v30_v3  ;;  %v517_v13 = vsub.s32 5, %v30_v3  ;;  %v519_v14 = vsub.s32 6, %v30_v3 }
   0x6   :  { %v32_v15 = vrot.slane %v23_v4, %v502_v6  ;;  %v36_v16 = vrot.slane %v23_v4, %v504_v7  ;;  %v40_v17 = vrot.slane %v23_v4, %v506_v8  ;;  %v44_v18 = vrot.slane %v23_v4, %v508_v9 }
   0x7   :  { %v249_v19 = vrot.slane %v240_v10, %v502_v6  ;;  %v253_v20 = vrot.slane %v240_v10, %v504_v7  ;;  %v257_v21 = vrot.slane %v240_v10, %v506_v8  ;;  %v261_v22 = vrot.slane %v240_v10, %v508_v9 }
   0x8   :  { %v121_v23 = vcombine.low %v32_v15, %v36_v16  ;;  %v122_v24 = vcombine.low %v40_v17, %v44_v18  ;;  %v48_v25 = vrot.slane %v23_v4, %v515_v12  ;;  %v52_v26 = vrot.slane %v23_v4, %v517_v13 }
   0x9   :  { %v338_v27 = vcombine.low %v249_v19, %v253_v20  ;;  %v339_v28 = vcombine.low %v257_v21, %v261_v22  ;;  %v56_v29 = vrot.slane %v23_v4, %v519_v14  ;;  %v532_v30 = vsub.s32 7, %v30_v3  ;;  %v19_v22 = vld [vmem:[%s661_s0 + $0x10] sm:$0xff] }
   0xa   :  { %v129_v31 = vrot.slane %v121_v23, %v513_v11  ;;  %v136_v32 = vrot.slane %v122_v24, %v513_v11  ;;  %v138_v33 = vcombine.low %v48_v25, %v52_v26  ;;  %v265_v34 = vrot.slane %v240_v10, %v515_v12 }
   0xb   :  { %v346_v37 = vrot.slane %v338_v27, %v513_v11  ;;  %v353_v38 = vrot.slane %v339_v28, %v513_v11  ;;  %v60_v39 = vrot.slane %v23_v4, %v532_v30  ;;  %v269_v40 = vrot.slane %v240_v10, %v517_v13 }
   0xc   :  { %v137_v41 = vcombine.low %v129_v31, %v136_v32  ;;  %v146_v43 = vrot.slane %v138_v33, %v513_v11  ;;  %v273_v44 = vrot.slane %v240_v10, %v519_v14  ;;  %v277_v45 = vrot.slane %v240_v10, %v532_v30  ;;  %v25_v31 = vld [vmem:[%s659_s2 + $0x10] sm:$0x7f] }
   0xd   :  { %v354_v46 = vcombine.low %v346_v37, %v353_v38  ;;  %v139_v47 = vcombine.low %v56_v29, %v60_v39  ;;  %v355_v48 = vcombine.low %v265_v34, %v269_v40  ;;  %v64_v49 = vrot.slane %v24_v35, %v502_v6  ;;  %v236_v38 = vld [vmem:[%s662_s1 + $0x10] sm:$0xff] }
   0xe   :  { %v228_v51 = vmul.f32 %v137_v41, %v17_v36  ;;  %v356_v52 = vcombine.low %v273_v44, %v277_v45  ;;  %v68_v53 = vrot.slane %v24_v35, %v504_v7  ;;  %v72_v54 = vrot.slane %v24_v35, %v506_v8  ;;  %v242_v41 = vld [vmem:[%s660_s3 + $0x10] sm:$0x7f] }
   0xf   :  { %v445_v55 = vmul.f32 %v354_v46, %v234_v42  ;;  %v153_v56 = vrot.slane %v139_v47, %v513_v11  ;;  %v363_v57 = vrot.slane %v355_v48, %v513_v11  ;;  %v76_v58 = vrot.slane %v24_v35, %v508_v9 }
  0x10   :  { %v370_v60 = vrot.slane %v356_v52, %v513_v11  ;;  %v155_v61 = vcombine.low %v64_v49, %v68_v53  ;;  %v281_v62 = vrot.slane %v241_v50, %v502_v6  ;;  %v285_v63 = vrot.slane %v241_v50, %v504_v7 }
  0x11   :  { %v451_v0 = vadd.f32 %v445_v55, %v228_v51  ;;  %v154_v1 = vcombine.low %v146_v43, %v153_v56  ;;  %v156_v3 = vcombine.low %v72_v54, %v76_v58  ;;  %v289_v4 = vrot.slane %v241_v50, %v506_v8 }
  0x12   :  { %v371_v5 = vcombine.low %v363_v57, %v370_v60  ;;  %v163_v10 = vrot.slane %v155_v61, %v513_v11  ;;  %v293_v15 = vrot.slane %v241_v50, %v508_v9  ;;  %v372_v16 = vcombine.low %v281_v62, %v285_v63 }
  0x13   :  { %457 = vst [vmem:[%s663_s4] sm:$0xff] %v451_v0  ;;  %v229_v17 = vmul.f32 %v154_v1, %v18_v59  ;;  %v170_v18 = vrot.slane %v156_v3, %v513_v11  ;;  %v80_v19 = vrot.slane %v24_v35, %v515_v12  ;;  %v84_v20 = vrot.slane %v24_v35, %v517_v13  ;;  %v237_v59 = vld [vmem:[%s662_s1 + $0x18] sm:$0xff] }
  0x14   :  { %v446_v21 = vmul.f32 %v371_v5, %v235_v2  ;;  %v373_v23 = vcombine.low %v289_v4, %v293_v15  ;;  %v380_v24 = vrot.slane %v372_v16, %v513_v11  ;;  %v88_v25 = vrot.slane %v24_v35, %v519_v14 }
  0x15   :  { %v171_v26 = vcombine.low %v163_v10, %v170_v18  ;;  %v92_v27 = vrot.slane %v24_v35, %v532_v30  ;;  %v172_v28 = vcombine.low %v80_v19, %v84_v20  ;;  %v297_v29 = vrot.slane %v241_v50, %v515_v12 }
  0x16   :  { %v452_v32 = vadd.f32 %v446_v21, %v229_v17  ;;  %v387_v33 = vrot.slane %v373_v23, %v513_v11  ;;  %v301_v34 = vrot.slane %v241_v50, %v517_v13  ;;  %v305_v36 = vrot.slane %v241_v50, %v519_v14  ;;  %v238_v21 = vld [vmem:[%s662_s1 + $0x20] sm:$0xff] }
  0x17   :  { %v230_v37 = vmul.f32 %v171_v26, %v19_v22  ;;  %v173_v35 = vcombine.low %v88_v25, %v92_v27  ;;  %v180_v39 = vrot.slane %v172_v28, %v513_v11  ;;  %v309_v40 = vrot.slane %v241_v50, %v532_v30  ;;  %v20_v50 = vld [vmem:[%s661_s0 + $0x18] sm:$0xff] }
  0x18   :  { %458 = vst [vmem:[%s663_s4 + $0x8] sm:$0xff] %v452_v32  ;;  %v388_v42 = vcombine.low %v380_v24, %v387_v33  ;;  %v389_v43 = vcombine.low %v297_v29, %v301_v34  ;;  %v96_v44 = vrot.slane %v25_v31, %v502_v6  ;;  %v100_v45 = vrot.slane %v25_v31, %v504_v7  ;;  %v239_v29 = vld [vmem:[%s662_s1 + $0x28] sm:$0x3f] }
  0x19   :  { %v187_v46 = vrot.slane %v173_v35, %v513_v11  ;;  %v390_v47 = vcombine.low %v305_v36, %v309_v40  ;;  %v104_v48 = vrot.slane %v25_v31, %v506_v8  ;;  %v108_v30 = vrot.slane %v25_v31, %v508_v9 }
  0x1a   :  { %v447_v49 = vmul.f32 %v388_v42, %v236_v38  ;;  %v397_v51 = vrot.slane %v389_v43, %v513_v11  ;;  %v189_v52 = vcombine.low %v96_v44, %v100_v45  ;;  %v313_v53 = vrot.slane %v242_v41, %v502_v6 }
  0x1b   :  { %v188_v54 = vcombine.low %v180_v39, %v187_v46  ;;  %v404_v55 = vrot.slane %v390_v47, %v513_v11  ;;  %v190_v56 = vcombine.low %v104_v48, %v108_v30  ;;  %v317_v57 = vrot.slane %v242_v41, %v504_v7 }
  0x1c   :  { %v453_v58 = vadd.f32 %v447_v49, %v230_v37  ;;  %v197_v60 = vrot.slane %v189_v52, %v513_v11  ;;  %v321_v61 = vrot.slane %v242_v41, %v506_v8  ;;  %v325_v62 = vrot.slane %v242_v41, %v508_v9  ;;  %v21_v8 = vld [vmem:[%s661_s0 + $0x20] sm:$0xff] }
  0x1d   :  { %v231_v63 = vmul.f32 %v188_v54, %v20_v50  ;;  %v405_v0 = vcombine.low %v397_v51, %v404_v55  ;;  %v204_v6 = vrot.slane %v190_v56, %v513_v11  ;;  %v406_v1 = vcombine.low %v313_v53, %v317_v57 }
  0x1e   :  { %459 = vst [vmem:[%s663_s4 + $0x10] sm:$0xff] %v453_v58  ;;  %v407_v7 = vcombine.low %v321_v61, %v325_v62  ;;  %v112_v2 = vrot.slane %v25_v31, %v515_v12  ;;  %v116_v3 = vrot.slane %v25_v31, %v517_v13  ;;  %v120_v4 = vrot.slane %v25_v31, %v519_v14 }
  0x1f   :  { %v448_v5 = vmul.f32 %v405_v0, %v237_v59  ;;  %v205_v9 = vcombine.low %v197_v60, %v204_v6  ;;  %v414_v10 = vrot.slane %v406_v1, %v513_v11  ;;  %v329_v15 = vrot.slane %v242_v41, %v515_v12  ;;  %v22_v12 = vld [vmem:[%s661_s0 + $0x28] sm:$0x3f] }
  0x20   :  { %v421_v16 = vrot.slane %v407_v7, %v513_v11  ;;  %v206_v17 = vcombine.low %v112_v2, %v116_v3  ;;  %v220_v18 = vrot.slane %v120_v4, %v513_v11  ;;  %v333_v19 = vrot.slane %v242_v41, %v517_v13 }
  0x21   :  { %v454_v20 = vadd.f32 %v448_v5, %v231_v63  ;;  %v337_v22 = vrot.slane %v242_v41, %v519_v14  ;;  %v232_v23 = vmul.f32 %v205_v9, %v21_v8 }
  0x22   :  { %v422_v24 = vcombine.low %v414_v10, %v421_v16  ;;  %v213_v25 = vrot.slane %v206_v17, %v513_v11  ;;  %v423_v26 = vcombine.low %v329_v15, %v333_v19 }
  0x23   :  { %460 = vst [vmem:[%s663_s4 + $0x18] sm:$0xff] %v454_v20  ;;  %v437_v13 = vrot.slane %v337_v22, %v513_v11 }
  0x24   :  { %v449_v27 = vmul.f32 %v422_v24, %v238_v21  ;;  %v221_v28 = vcombine.low %v213_v25, %v220_v18  ;;  %v430_v14 = vrot.slane %v423_v26, %v513_v11 }
  0x26   :  { %v455_v31 = vadd.f32 %v449_v27, %v232_v23  ;;  %v233_v32 = vmul.f32 %v221_v28, %v22_v12  ;;  %v438_v33 = vcombine.low %v430_v14, %v437_v13 }
  0x28   :  { %461 = vst [vmem:[%s663_s4 + $0x20] sm:$0xff] %v455_v31  ;;  %v450_v34 = vmul.f32 %v438_v33, %v239_v29 }
  0x2a   :  { %v456_v36 = vadd.f32 %v450_v34, %v233_v32 }
  0x2c   :  { %467 = vst.msk [vmem:[%s663_s4 + $0x28] sm:$0x3f] %vm466_vm4, %v456_v36 }

</bundles_post_ra>
